<compile_context>
chip_gen: v5e
topology: v5e:2x2
jax: 0.10.0
libtpu: 0.0.40
codegen_flags: <defaults>
</compile_context>

<pallas_src>
import jax
import jax.numpy as jnp
from jax import lax
from jax.experimental import pallas as pl
from jax.experimental.pallas import tpu as pltpu  # noqa: F401  (TPU backend)

# ----- model sizes (small, consistent with the NTM forward) -----
B  = 2     # batch
NI = 8     # num_inputs
NO = 8     # num_outputs
H  = 32    # controller (single-layer LSTM) hidden size
N  = 16    # memory rows
M  = 8     # memory width
T  = 8     # timesteps fused into one kernel launch (T=1 == module.forward)

HEAD_R = M + 6          # read-head fc width  [k(M), beta, g, s(3), gamma]      = 14
HEAD_W = 3 * M + 6      # write-head fc width [k, beta, g, s, gamma, e(M), a(M)] = 30
HEAD_DIM = HEAD_R + HEAD_W

# packed final-state slab lane layout (lane-dense (B, 128)):
SLAB = 128
L_X, L_R, L_H, L_C = 0, NI, NI + M, NI + M + H             # x | prev_read | h | c
L_WR, L_WW = NI + M + 2 * H, NI + M + 2 * H + N            # w_read | w_write (80, 96)


# --------------------------- in-kernel math helpers ---------------------------
def _sigmoid(x):
    # EUP tanh form (avoids an exp + full-precision divide on the VPU)
    return 0.5 * (jnp.tanh(0.5 * x) + 1.0)


def _softplus(x):
    # matches torch.nn.functional.softplus(beta=1, threshold=20)
    return jnp.where(x > 20.0, x, jnp.log(1.0 + jnp.exp(jnp.minimum(x, 20.0))))


def _softmax(x):
    z = x - jnp.max(x, axis=1, keepdims=True)
    e = jnp.exp(z)
    return e / jnp.sum(e, axis=1, keepdims=True)


# --------------------------------- the kernel ---------------------------------
def _make_kernel(Tn):
    def kernel(xs_ref, state0_ref, mem0_ref,
               w_lstm_ref, b_lstm_ref, w_heads_ref, b_heads_ref,
               w_fc_ref, b_fc_ref,
               shift_ref, tile_m_ref, blk_sum_ref, expand_n_ref, gather_m_ref,
               stack_r_ref, stack_w_ref, unstk_r_ref, unstk_w_ref,
               o_ref, state_ref, mem_ref):
        f32 = jnp.float32
        mm = lambda a, b: jnp.dot(a, b, preferred_element_type=f32)

        # ---- everything loaded into registers ONCE (constant across steps) ----
        xs  = xs_ref[...]                     # (B, Tn*NI) lane-dense inputs
        st0 = state0_ref[...]                 # (B, 128) packed initial state
        mem = mem0_ref[...]                   # (B, N*M) lane-dense memory

        w_lstm = w_lstm_ref[...]              # (NI+M+H, 4H)
        w_gx = w_lstm[0:NI, :]
        w_gr = w_lstm[NI:NI + M, :]
        w_gh = w_lstm[NI + M:NI + M + H, :]
        b_g = b_lstm_ref[...]                 # (1, 4H)
        w_heads = w_heads_ref[...]            # (H, 44)
        b_heads = b_heads_ref[...]            # (1, 44)
        w_fc = w_fc_ref[...]                  # (H+M, NO) rows = [ctrl | read]
        w_fc_h = w_fc[0:H, :]
        w_fc_r = w_fc[H:H + M, :]
        b_fc = b_fc_ref[...]                  # (1, NO)

        shift = shift_ref[...]                # (N, 3N): [w(i-1) | w(i) | w(i+1)]
        tile_m = tile_m_ref[...]              # (M, N*M): v[m] tiled across all N rows
        blk_sum = blk_sum_ref[...]            # (N*M, N): per-row sum over M lanes
        expand_n = expand_n_ref[...]          # (N, N*M): w[n] broadcast to row n lanes
        gather_m = gather_m_ref[...]          # (N*M, M): sum over rows per column m
        s_r = stack_r_ref[...]                # (2B, B): place a (B,.) block in rows 0:B
        s_w = stack_w_ref[...]                # (2B, B): place a (B,.) block in rows B:2B
        dup2 = s_r + s_w                      # (2B, B): duplicate a (B,.) block twice
        u_r = unstk_r_ref[...]                # (B, 2B): take rows 0:B
        u_w = unstk_w_ref[...]                # (B, 2B): take rows B:2B

        # recurrent state carried as values (vregs) across the unrolled time loop
        read = st0[:, L_R:L_R + M]
        h = st0[:, L_H:L_H + H]
        c = st0[:, L_C:L_C + H]
        # previous addressing weights, stacked [read-head rows | write-head rows]
        w2 = mm(s_r, st0[:, L_WR:L_WR + N]) + mm(s_w, st0[:, L_WW:L_WW + N])   # (2B, N)
        w_read = u_r @ w2 * 0.0 + st0[:, L_WR:L_WR + N]      # defined even if Tn == 0
        w_write = st0[:, L_WW:L_WW + N]

        for t in range(Tn):
            x_t = xs[:, t * NI:(t + 1) * NI]                          # (B, NI)

            # ---- LSTM controller (PyTorch gate order i,f,g,o); 3 small MXU dots
            #      (splitting the fused matmul avoids any in-kernel concat) ----
            gates = mm(x_t, w_gx) + mm(read, w_gr) + mm(h, w_gh) + b_g
            i_g = _sigmoid(gates[:, 0 * H:1 * H])
            f_g = _sigmoid(gates[:, 1 * H:2 * H])
            g_g = jnp.tanh(gates[:, 2 * H:3 * H])
            o_g = _sigmoid(gates[:, 3 * H:4 * H])
            c = f_g * c + i_g * g_g
            h = o_g * jnp.tanh(c)

            # ---- both heads' fc projections in ONE matmul ----
            heads = mm(h, w_heads) + b_heads                          # (B, 44)
            # stack both heads' (k,beta,g,s,gamma) along sublanes -> (2B, 14)
            hp2 = mm(s_r, heads[:, 0:HEAD_R]) + mm(s_w, heads[:, HEAD_R:2 * HEAD_R])
            k2 = hp2[:, 0:M] + 1e-16
            beta2 = _softplus(hp2[:, M:M + 1])
            g2 = _sigmoid(hp2[:, M + 1:M + 2])
            s2 = _softmax(hp2[:, M + 2:M + 5])
            gamma2 = 1.0 + _softplus(hp2[:, M + 5:M + 6])

            # ---- batched NTM addressing for BOTH heads (2B sublanes) ----
            memp = mem + 1e-16                                        # (B, N*M)
            memp2 = mm(dup2, memp)                                    # (2B, N*M)
            k_til = mm(k2, tile_m)                                    # (2B, N*M)
            dots = mm(memp2 * k_til, blk_sum)                         # (2B, N) row dots
            mem_sq = mm(memp2 * memp2, blk_sum)                       # (2B, N) row sq-norms
            k_sq = jnp.sum(k2 * k2, axis=1, keepdims=True)            # (2B, 1)
            # cos = dot / (max(||m||,1e-8) * max(||k||,1e-8))  via one rsqrt
            cos = dots * lax.rsqrt(jnp.maximum(mem_sq, 1e-16) *
                                   jnp.maximum(k_sq, 1e-16))
            wc = _softmax(beta2 * cos)                                # content weights
            wg = g2 * wc + (1.0 - g2) * w2                            # interpolation
            y = mm(wg, shift)                                         # (2B, 3N)
            sh = (s2[:, 0:1] * y[:, 0:N] + s2[:, 1:2] * y[:, N:2 * N]
                  + s2[:, 2:3] * y[:, 2 * N:3 * N])                   # circular shift
            sh = jnp.maximum(sh, 1e-30)                               # avoid log(0)
            wpow = jnp.exp(gamma2 * jnp.log(sh))                      # sharpen
            w2 = wpow / (jnp.sum(wpow, axis=1, keepdims=True) + 1e-16)

            w_read = mm(u_r, w2)                                      # (B, N)
            w_write = mm(u_w, w2)                                     # (B, N)

            # ---- read (pre-write memory), then erase/add write ----
            read = mm(mm(w_read, expand_n) * mem, gather_m)           # (B, M)
            e_w = _sigmoid(heads[:, HEAD_R + M + 6:HEAD_R + 2 * M + 6])
            a_w = heads[:, HEAD_R + 2 * M + 6:HEAD_R + 3 * M + 6]
            ww_til = mm(w_write, expand_n)                            # (B, N*M)
            mem = (mem * (1.0 - ww_til * mm(e_w, tile_m))
                   + ww_til * mm(a_w, tile_m))

            # ---- external output o_t = fc(cat([controller, read])) ----
            o_t = mm(h, w_fc_h) + mm(read, w_fc_r) + b_fc             # (B, NO)
            o_ref[:, t * NO:(t + 1) * NO] = o_t          # store only; never re-read

        # ---- final recurrent state / memory written back once ----
        state_ref[...] = jnp.zeros((B, SLAB), f32)
        state_ref[:, L_R:L_R + M] = read
        state_ref[:, L_H:L_H + H] = h
        state_ref[:, L_C:L_C + H] = c
        state_ref[:, L_WR:L_WR + N] = w_read
        state_ref[:, L_WW:L_WW + N] = w_write
        mem_ref[...] = mem

    return kernel


# ------------------------------ params & wrapper ------------------------------
def init_params(key):
    ks = jax.random.split(key, 12)

    def uni(k, shape, a):
        return jax.random.uniform(k, shape, jnp.float32, minval=-a, maxval=a)

    def xavier(k, shape, gain=1.0):
        fan_out, fan_in = shape
        a = gain * (6.0 / (fan_in + fan_out)) ** 0.5
        return jax.random.uniform(k, shape, jnp.float32, minval=-a, maxval=a)

    sc = 1.0 / (H ** 0.5)
    p = {}
    p["W_ih"] = uni(ks[0], (4 * H, NI + M), sc)        # LSTM input weights
    p["W_hh"] = uni(ks[1], (4 * H, H), sc)
    p["b_ih"] = uni(ks[2], (4 * H,), sc)
    p["b_hh"] = uni(ks[3], (4 * H,), sc)
    p["W_rh"] = xavier(ks[4], (HEAD_R, H), 1.4)        # read-head fc
    p["b_rh"] = 0.01 * jax.random.normal(ks[5], (HEAD_R,), jnp.float32)
    p["W_wh"] = xavier(ks[6], (HEAD_W, H), 1.4)        # write-head fc
    p["b_wh"] = 0.01 * jax.random.normal(ks[7], (HEAD_W,), jnp.float32)
    p["W_fc"] = xavier(ks[8], (NO, H + M), 1.0)        # output fc
    p["b_fc"] = 0.01 * jax.random.normal(ks[9], (NO,), jnp.float32)
    p["mem_bias"] = uni(ks[10], (N, M), 1.0 / ((N + M) ** 0.5))
    p["init_r"]   = 0.01 * jax.random.normal(ks[11], (1, M), jnp.float32)
    p["h_bias"] = 0.05 * jax.random.normal(jax.random.fold_in(key, 100), (1, H), jnp.float32)
    p["c_bias"] = 0.05 * jax.random.normal(jax.random.fold_in(key, 101), (1, H), jnp.float32)
    return p


def ntm_forward_seq(params, xs, prev_read, h, c, w_read_prev, w_write_prev, mem):
    """Run T NTM steps (xs: (T,B,NI)) in ONE grid-less pallas_call; returns
    per-step outputs and the final state (== iterating the module's forward)."""
    p = params
    Tn = xs.shape[0]
    f32 = jnp.float32

    # ---- wrapper-side weight merging & constant selector matrices ----
    w_lstm = jnp.concatenate([p["W_ih"].T, p["W_hh"].T], axis=0)          # (48, 128)
    b_lstm = (p["b_ih"] + p["b_hh"]).reshape(1, 4 * H)
    w_heads = jnp.concatenate([p["W_rh"].T, p["W_wh"].T], axis=1)         # (32, 44)
    b_heads = jnp.concatenate([p["b_rh"], p["b_wh"]]).reshape(1, HEAD_DIM)
    w_fc = p["W_fc"].T                                                    # (40, 8)
    b_fc = p["b_fc"].reshape(1, NO)

    eye_n = jnp.eye(N, dtype=f32)
    eye_m = jnp.eye(M, dtype=f32)
    eye_b = jnp.eye(B, dtype=f32)
    zer_b = jnp.zeros((B, B), f32)
    shift_mat = jnp.concatenate([jnp.roll(eye_n, 1, axis=1), eye_n,
                                 jnp.roll(eye_n, -1, axis=1)], axis=1)    # (N, 3N)
    tile_m = jnp.tile(eye_m, (1, N))                                      # (M, N*M)
    gather_m = jnp.tile(eye_m, (N, 1))                                    # (N*M, M)
    expand_n = jnp.repeat(eye_n, M, axis=1)                               # (N, N*M)
    blk_sum = jnp.repeat(eye_n, M, axis=0)                                # (N*M, N)
    stack_r = jnp.concatenate([eye_b, zer_b], axis=0)                     # (2B, B)
    stack_w = jnp.concatenate([zer_b, eye_b], axis=0)                     # (2B, B)
    unstk_r = stack_r.T                                                   # (B, 2B)
    unstk_w = stack_w.T

    # ---- lane-dense packings ----
    xs_packed = jnp.transpose(xs, (1, 0, 2)).reshape(B, Tn * NI)          # (B, Tn*NI)
    mem_packed = mem.reshape(B, N * M)                                    # (B, 128)

    state0 = jnp.zeros((B, SLAB), f32)
    state0 = state0.at[:, L_R:L_R + M].set(prev_read)
    state0 = state0.at[:, L_H:L_H + H].set(h)
    state0 = state0.at[:, L_C:L_C + H].set(c)
    state0 = state0.at[:, L_WR:L_WR + N].set(w_read_prev)
    state0 = state0.at[:, L_WW:L_WW + N].set(w_write_prev)

    out_shape = (
        jax.ShapeDtypeStruct((B, Tn * NO), f32),    # all T outputs (lane-dense)
        jax.ShapeDtypeStruct((B, SLAB), f32),       # final packed state slab
        jax.ShapeDtypeStruct((B, N * M), f32),      # final memory (lane-dense)
    )

    # Grid-less call: every operand is a whole-array VMEM block, DMA'd once;
    # the T-step recurrence is fully unrolled inside the kernel body.
    o_packed, state_f, mem_f = pl.pallas_call(
        _make_kernel(Tn),
        out_shape=out_shape,
    )(xs_packed, state0, mem_packed, w_lstm, b_lstm, w_heads, b_heads,
      w_fc, b_fc, shift_mat, tile_m, blk_sum, expand_n, gather_m,
      stack_r, stack_w, unstk_r, unstk_w)

    o_seq = jnp.transpose(o_packed.reshape(B, Tn, NO), (1, 0, 2))
    read_f = state_f[:, L_R:L_R + M]
    h_f    = state_f[:, L_H:L_H + H]
    c_f    = state_f[:, L_C:L_C + H]
    wr_f   = state_f[:, L_WR:L_WR + N]
    ww_f   = state_f[:, L_WW:L_WW + N]
    state = ([read_f], (h_f, c_f), [wr_f, ww_f], mem_f.reshape(B, N, M))
    return o_seq, state


def ntm_forward(params, x, prev_read, h, c, w_read_prev, w_write_prev, mem):
    """Single NTM step == the PyTorch module's forward (T=1 instance)."""
    o_seq, state = ntm_forward_seq(params, x[None], prev_read, h, c,
                                   w_read_prev, w_write_prev, mem)
    return o_seq[0], state


# ------------------- pure-JAX reference (PyTorch semantics) -------------------
def ntm_reference_seq(p, xs, prev_read, h, c, wr, ww, mem):
    def address(k, beta, g, s, gamma, w_prev, mem):
        k = k + 1e-16
        memp = mem + 1e-16
        dots = jnp.sum(memp * k[:, None, :], axis=-1)
        mem_norm = jnp.sqrt(jnp.sum(memp * memp, axis=-1))
        k_norm = jnp.sqrt(jnp.sum(k * k, axis=-1, keepdims=True))
        cos = dots / (jnp.maximum(mem_norm, 1e-8) * jnp.maximum(k_norm, 1e-8))
        wc = _softmax(_softplus(beta) * cos)
        g = _sigmoid(g)
        wg = g * wc + (1.0 - g) * w_prev
        s = _softmax(s)
        wt = (s[:, 0:1] * jnp.roll(wg, 1, axis=1) + s[:, 1:2] * wg
              + s[:, 2:3] * jnp.roll(wg, -1, axis=1))
        gamma = 1.0 + _softplus(gamma)
        wpow = jnp.maximum(wt, 1e-30) ** gamma
        return wpow / (jnp.sum(wpow, axis=1, keepdims=True) + 1e-16)

    read = prev_read
    outs = []
    for t in range(xs.shape[0]):
        inp = jnp.concatenate([xs[t], read], axis=1)
        gates = inp @ p["W_ih"].T + h @ p["W_hh"].T + p["b_ih"] + p["b_hh"]
        i_g = _sigmoid(gates[:, 0 * H:1 * H]); f_g = _sigmoid(gates[:, 1 * H:2 * H])
        g_g = jnp.tanh(gates[:, 2 * H:3 * H]); o_g = _sigmoid(gates[:, 3 * H:4 * H])
        c = f_g * c + i_g * g_g
        h = o_g * jnp.tanh(c)
        rh = h @ p["W_rh"].T + p["b_rh"]
        wh = h @ p["W_wh"].T + p["b_wh"]
        wr = address(rh[:, 0:M], rh[:, M:M + 1], rh[:, M + 1:M + 2],
                     rh[:, M + 2:M + 5], rh[:, M + 5:M + 6], wr, mem)
        read = jnp.einsum('bn,bnm->bm', wr, mem)
        ww = address(wh[:, 0:M], wh[:, M:M + 1], wh[:, M + 1:M + 2],
                     wh[:, M + 2:M + 5], wh[:, M + 5:M + 6], ww, mem)
        e = _sigmoid(wh[:, M + 6:2 * M + 6]); a = wh[:, 2 * M + 6:3 * M + 6]
        mem = (mem * (1.0 - ww[:, :, None] * e[:, None, :])
               + ww[:, :, None] * a[:, None, :])
        outs.append(jnp.concatenate([h, read], axis=1) @ p["W_fc"].T + p["b_fc"])
    return jnp.stack(outs), read, h, c, wr, ww, mem


if __name__ == "__main__":
    key = jax.random.PRNGKey(0)
    pkey, xkey = jax.random.split(key)
    params = init_params(pkey)

    xs = jax.random.normal(xkey, (T, B, NI), jnp.float32)
    prev_read = jnp.tile(params["init_r"], (B, 1))          # create_new_state: init_r
    h0 = jnp.tile(params["h_bias"], (B, 1))
    c0 = jnp.tile(params["c_bias"], (B, 1))
    w_read0  = jnp.zeros((B, N), jnp.float32)               # heads create_new_state
    w_write0 = jnp.zeros((B, N), jnp.float32)
    mem0 = jnp.tile(params["mem_bias"][None], (B, 1, 1))    # memory create_new_state

    o_seq, state = ntm_forward_seq(params, xs, prev_read, h0, c0,
                                   w_read0, w_write0, mem0)
    jax.block_until_ready(o_seq)
    jax.block_until_ready(state)

    reads, (h_f, c_f), (wr_f, ww_f), mem_f = state
    assert o_seq.shape == (T, B, NO)
    assert reads[0].shape == (B, M)
    assert h_f.shape == (B, H) and c_f.shape == (B, H)
    assert wr_f.shape == (B, N) and ww_f.shape == (B, N)
    assert mem_f.shape == (B, N, M)
    assert bool(jnp.all(jnp.isfinite(o_seq)))
    assert bool(jnp.all(jnp.isfinite(mem_f)))

    # parity check vs a straightforward pure-JAX port of the PyTorch math
    o_ref, read_r, h_r, c_r, wr_r, ww_r, mem_r = ntm_reference_seq(
        params, xs, prev_read, h0, c0, w_read0, w_write0, mem0)
    assert float(jnp.max(jnp.abs(o_seq - o_ref))) < 3e-2
    assert float(jnp.max(jnp.abs(mem_f - mem_r))) < 3e-2

    print("KERNEL_OK")
</pallas_src>

<mosaic_0001>
module attributes {stable_mosaic.version = 11 : i64} {
  func.func @kernel(%arg0: memref<2x64xf32, #tpu.memory_space<vmem>>, %arg1: memref<2x128xf32, #tpu.memory_space<vmem>>, %arg2: memref<2x128xf32, #tpu.memory_space<vmem>>, %arg3: memref<48x128xf32, #tpu.memory_space<vmem>>, %arg4: memref<1x128xf32, #tpu.memory_space<vmem>>, %arg5: memref<32x44xf32, #tpu.memory_space<vmem>>, %arg6: memref<1x44xf32, #tpu.memory_space<vmem>>, %arg7: memref<40x8xf32, #tpu.memory_space<vmem>>, %arg8: memref<1x8xf32, #tpu.memory_space<vmem>>, %arg9: memref<16x48xf32, #tpu.memory_space<vmem>>, %arg10: memref<8x128xf32, #tpu.memory_space<vmem>>, %arg11: memref<128x16xf32, #tpu.memory_space<vmem>>, %arg12: memref<16x128xf32, #tpu.memory_space<vmem>>, %arg13: memref<128x8xf32, #tpu.memory_space<vmem>>, %arg14: memref<4x2xf32, #tpu.memory_space<vmem>>, %arg15: memref<4x2xf32, #tpu.memory_space<vmem>>, %arg16: memref<2x4xf32, #tpu.memory_space<vmem>>, %arg17: memref<2x4xf32, #tpu.memory_space<vmem>>, %arg18: memref<2x64xf32, #tpu.memory_space<vmem>>, %arg19: memref<2x128xf32, #tpu.memory_space<vmem>>, %arg20: memref<2x128xf32, #tpu.memory_space<vmem>>) attributes {dimension_semantics = [], scalar_prefetch = 0 : i64, scratch_operands = 0 : i64, tpu.core_type = #tpu.core_type<tc>} {
    %c0 = arith.constant 0 : index
    %c0_0 = arith.constant 0 : index
    %0 = vector.load %arg0[%c0, %c0_0] : memref<2x64xf32, #tpu.memory_space<vmem>>, vector<2x64xf32>
    %c0_1 = arith.constant 0 : index
    %c0_2 = arith.constant 0 : index
    %1 = vector.load %arg1[%c0_1, %c0_2] : memref<2x128xf32, #tpu.memory_space<vmem>>, vector<2x128xf32>
    %c0_3 = arith.constant 0 : index
    %c0_4 = arith.constant 0 : index
    %2 = vector.load %arg2[%c0_3, %c0_4] : memref<2x128xf32, #tpu.memory_space<vmem>>, vector<2x128xf32>
    %c0_5 = arith.constant 0 : index
    %c0_6 = arith.constant 0 : index
    %3 = vector.load %arg3[%c0_5, %c0_6] : memref<48x128xf32, #tpu.memory_space<vmem>>, vector<48x128xf32>
    %4 = vector.extract_strided_slice %3 {offsets = [0, 0], sizes = [8, 128], strides = [1, 1]} : vector<48x128xf32> to vector<8x128xf32>
    %5 = vector.extract_strided_slice %3 {offsets = [8, 0], sizes = [8, 128], strides = [1, 1]} : vector<48x128xf32> to vector<8x128xf32>
    %6 = vector.extract_strided_slice %3 {offsets = [16, 0], sizes = [32, 128], strides = [1, 1]} : vector<48x128xf32> to vector<32x128xf32>
    %c0_7 = arith.constant 0 : index
    %c0_8 = arith.constant 0 : index
    %7 = vector.load %arg4[%c0_7, %c0_8] : memref<1x128xf32, #tpu.memory_space<vmem>>, vector<1x128xf32>
    %c0_9 = arith.constant 0 : index
    %c0_10 = arith.constant 0 : index
    %8 = vector.load %arg5[%c0_9, %c0_10] : memref<32x44xf32, #tpu.memory_space<vmem>>, vector<32x44xf32>
    %c0_11 = arith.constant 0 : index
    %c0_12 = arith.constant 0 : index
    %9 = vector.load %arg6[%c0_11, %c0_12] : memref<1x44xf32, #tpu.memory_space<vmem>>, vector<1x44xf32>
    %c0_13 = arith.constant 0 : index
    %c0_14 = arith.constant 0 : index
    %10 = vector.load %arg7[%c0_13, %c0_14] : memref<40x8xf32, #tpu.memory_space<vmem>>, vector<40x8xf32>
    %11 = vector.extract_strided_slice %10 {offsets = [0, 0], sizes = [32, 8], strides = [1, 1]} : vector<40x8xf32> to vector<32x8xf32>
    %12 = vector.extract_strided_slice %10 {offsets = [32, 0], sizes = [8, 8], strides = [1, 1]} : vector<40x8xf32> to vector<8x8xf32>
    %c0_15 = arith.constant 0 : index
    %c0_16 = arith.constant 0 : index
    %13 = vector.load %arg8[%c0_15, %c0_16] : memref<1x8xf32, #tpu.memory_space<vmem>>, vector<1x8xf32>
    %c0_17 = arith.constant 0 : index
    %c0_18 = arith.constant 0 : index
    %14 = vector.load %arg9[%c0_17, %c0_18] : memref<16x48xf32, #tpu.memory_space<vmem>>, vector<16x48xf32>
    %c0_19 = arith.constant 0 : index
    %c0_20 = arith.constant 0 : index
    %15 = vector.load %arg10[%c0_19, %c0_20] : memref<8x128xf32, #tpu.memory_space<vmem>>, vector<8x128xf32>
    %c0_21 = arith.constant 0 : index
    %c0_22 = arith.constant 0 : index
    %16 = vector.load %arg11[%c0_21, %c0_22] : memref<128x16xf32, #tpu.memory_space<vmem>>, vector<128x16xf32>
    %c0_23 = arith.constant 0 : index
    %c0_24 = arith.constant 0 : index
    %17 = vector.load %arg12[%c0_23, %c0_24] : memref<16x128xf32, #tpu.memory_space<vmem>>, vector<16x128xf32>
    %c0_25 = arith.constant 0 : index
    %c0_26 = arith.constant 0 : index
    %18 = vector.load %arg13[%c0_25, %c0_26] : memref<128x8xf32, #tpu.memory_space<vmem>>, vector<128x8xf32>
    %c0_27 = arith.constant 0 : index
    %c0_28 = arith.constant 0 : index
    %19 = vector.load %arg14[%c0_27, %c0_28] : memref<4x2xf32, #tpu.memory_space<vmem>>, vector<4x2xf32>
    %c0_29 = arith.constant 0 : index
    %c0_30 = arith.constant 0 : index
    %20 = vector.load %arg15[%c0_29, %c0_30] : memref<4x2xf32, #tpu.memory_space<vmem>>, vector<4x2xf32>
    %21 = arith.addf %19, %20 : vector<4x2xf32>
    %c0_31 = arith.constant 0 : index
    %c0_32 = arith.constant 0 : index
    %22 = vector.load %arg16[%c0_31, %c0_32] : memref<2x4xf32, #tpu.memory_space<vmem>>, vector<2x4xf32>
    %c0_33 = arith.constant 0 : index
    %c0_34 = arith.constant 0 : index
    %23 = vector.load %arg17[%c0_33, %c0_34] : memref<2x4xf32, #tpu.memory_space<vmem>>, vector<2x4xf32>
    %24 = vector.extract_strided_slice %1 {offsets = [0, 8], sizes = [2, 8], strides = [1, 1]} : vector<2x128xf32> to vector<2x8xf32>
    %25 = vector.extract_strided_slice %1 {offsets = [0, 16], sizes = [2, 32], strides = [1, 1]} : vector<2x128xf32> to vector<2x32xf32>
    %26 = vector.extract_strided_slice %1 {offsets = [0, 48], sizes = [2, 32], strides = [1, 1]} : vector<2x128xf32> to vector<2x32xf32>
    %27 = vector.extract_strided_slice %1 {offsets = [0, 80], sizes = [2, 16], strides = [1, 1]} : vector<2x128xf32> to vector<2x16xf32>
    %cst = arith.constant dense<0.000000e+00> : vector<4x16xf32>
    %28 = tpu.matmul %19, %27, %cst {dimension_numbers = #tpu.dot_dimension_numbers<[1], [0], [0], [1], [0, 0, 1, 1], [], []>} : vector<4x2xf32>, vector<2x16xf32>, vector<4x16xf32> -> vector<4x16xf32>
    %29 = vector.extract_strided_slice %1 {offsets = [0, 96], sizes = [2, 16], strides = [1, 1]} : vector<2x128xf32> to vector<2x16xf32>
    %cst_35 = arith.constant dense<0.000000e+00> : vector<4x16xf32>
    %30 = tpu.matmul %20, %29, %cst_35 {dimension_numbers = #tpu.dot_dimension_numbers<[1], [0], [0], [1], [0, 0, 1, 1], [], []>} : vector<4x2xf32>, vector<2x16xf32>, vector<4x16xf32> -> vector<4x16xf32>
    %31 = arith.addf %28, %30 : vector<4x16xf32>
    %32 = vector.extract_strided_slice %0 {offsets = [0, 0], sizes = [2, 8], strides = [1, 1]} : vector<2x64xf32> to vector<2x8xf32>
    %cst_36 = arith.constant dense<0.000000e+00> : vector<2x128xf32>
    %33 = tpu.matmul %32, %4, %cst_36 {dimension_numbers = #tpu.dot_dimension_numbers<[1], [0], [0], [1], [0, 0, 1, 1], [], []>} : vector<2x8xf32>, vector<8x128xf32>, vector<2x128xf32> -> vector<2x128xf32>
    %cst_37 = arith.constant dense<0.000000e+00> : vector<2x128xf32>
    %34 = tpu.matmul %24, %5, %cst_37 {dimension_numbers = #tpu.dot_dimension_numbers<[1], [0], [0], [1], [0, 0, 1, 1], [], []>} : vector<2x8xf32>, vector<8x128xf32>, vector<2x128xf32> -> vector<2x128xf32>
    %35 = arith.addf %33, %34 : vector<2x128xf32>
    %cst_38 = arith.constant dense<0.000000e+00> : vector<2x128xf32>
    %36 = tpu.matmul %25, %6, %cst_38 {dimension_numbers = #tpu.dot_dimension_numbers<[1], [0], [0], [1], [0, 0, 1, 1], [], []>} : vector<2x32xf32>, vector<32x128xf32>, vector<2x128xf32> -> vector<2x128xf32>
    %37 = arith.addf %35, %36 : vector<2x128xf32>
    %38 = vector.broadcast %7 : vector<1x128xf32> to vector<2x128xf32>
    %39 = arith.addf %37, %38 : vector<2x128xf32>
    %40 = vector.extract_strided_slice %39 {offsets = [0, 0], sizes = [2, 32], strides = [1, 1]} : vector<2x128xf32> to vector<2x32xf32>
    %cst_39 = arith.constant 5.000000e-01 : f32
    %41 = vector.broadcast %cst_39 : f32 to vector<2x32xf32>
    %42 = arith.mulf %41, %40 : vector<2x32xf32>
    %43 = math.tanh %42 : vector<2x32xf32>
    %cst_40 = arith.constant 1.000000e+00 : f32
    %44 = vector.broadcast %cst_40 : f32 to vector<2x32xf32>
    %45 = arith.addf %43, %44 : vector<2x32xf32>
    %cst_41 = arith.constant 5.000000e-01 : f32
    %46 = vector.broadcast %cst_41 : f32 to vector<2x32xf32>
    %47 = arith.mulf %46, %45 : vector<2x32xf32>
    %48 = vector.extract_strided_slice %39 {offsets = [0, 32], sizes = [2, 32], strides = [1, 1]} : vector<2x128xf32> to vector<2x32xf32>
    %cst_42 = arith.constant 5.000000e-01 : f32
    %49 = vector.broadcast %cst_42 : f32 to vector<2x32xf32>
    %50 = arith.mulf %49, %48 : vector<2x32xf32>
    %51 = math.tanh %50 : vector<2x32xf32>
    %cst_43 = arith.constant 1.000000e+00 : f32
    %52 = vector.broadcast %cst_43 : f32 to vector<2x32xf32>
    %53 = arith.addf %51, %52 : vector<2x32xf32>
    %cst_44 = arith.constant 5.000000e-01 : f32
    %54 = vector.broadcast %cst_44 : f32 to vector<2x32xf32>
    %55 = arith.mulf %54, %53 : vector<2x32xf32>
    %56 = vector.extract_strided_slice %39 {offsets = [0, 64], sizes = [2, 32], strides = [1, 1]} : vector<2x128xf32> to vector<2x32xf32>
    %57 = math.tanh %56 : vector<2x32xf32>
    %58 = vector.extract_strided_slice %39 {offsets = [0, 96], sizes = [2, 32], strides = [1, 1]} : vector<2x128xf32> to vector<2x32xf32>
    %cst_45 = arith.constant 5.000000e-01 : f32
    %59 = vector.broadcast %cst_45 : f32 to vector<2x32xf32>
    %60 = arith.mulf %59, %58 : vector<2x32xf32>
    %61 = math.tanh %60 : vector<2x32xf32>
    %cst_46 = arith.constant 1.000000e+00 : f32
    %62 = vector.broadcast %cst_46 : f32 to vector<2x32xf32>
    %63 = arith.addf %61, %62 : vector<2x32xf32>
    %cst_47 = arith.constant 5.000000e-01 : f32
    %64 = vector.broadcast %cst_47 : f32 to vector<2x32xf32>
    %65 = arith.mulf %64, %63 : vector<2x32xf32>
    %66 = arith.mulf %55, %26 : vector<2x32xf32>
    %67 = arith.mulf %47, %57 : vector<2x32xf32>
    %68 = arith.addf %66, %67 : vector<2x32xf32>
    %69 = math.tanh %68 : vector<2x32xf32>
    %70 = arith.mulf %65, %69 : vector<2x32xf32>
    %cst_48 = arith.constant dense<0.000000e+00> : vector<2x44xf32>
    %71 = tpu.matmul %70, %8, %cst_48 {dimension_numbers = #tpu.dot_dimension_numbers<[1], [0], [0], [1], [0, 0, 1, 1], [], []>} : vector<2x32xf32>, vector<32x44xf32>, vector<2x44xf32> -> vector<2x44xf32>
    %72 = vector.broadcast %9 : vector<1x44xf32> to vector<2x44xf32>
    %73 = arith.addf %71, %72 : vector<2x44xf32>
    %74 = vector.extract_strided_slice %73 {offsets = [0, 0], sizes = [2, 14], strides = [1, 1]} : vector<2x44xf32> to vector<2x14xf32>
    %cst_49 = arith.constant dense<0.000000e+00> : vector<4x14xf32>
    %75 = tpu.matmul %19, %74, %cst_49 {dimension_numbers = #tpu.dot_dimension_numbers<[1], [0], [0], [1], [0, 0, 1, 1], [], []>} : vector<4x2xf32>, vector<2x14xf32>, vector<4x14xf32> -> vector<4x14xf32>
    %76 = vector.extract_strided_slice %73 {offsets = [0, 14], sizes = [2, 14], strides = [1, 1]} : vector<2x44xf32> to vector<2x14xf32>
    %cst_50 = arith.constant dense<0.000000e+00> : vector<4x14xf32>
    %77 = tpu.matmul %20, %76, %cst_50 {dimension_numbers = #tpu.dot_dimension_numbers<[1], [0], [0], [1], [0, 0, 1, 1], [], []>} : vector<4x2xf32>, vector<2x14xf32>, vector<4x14xf32> -> vector<4x14xf32>
    %78 = arith.addf %75, %77 : vector<4x14xf32>
    %79 = vector.extract_strided_slice %78 {offsets = [0, 0], sizes = [4, 8], strides = [1, 1]} : vector<4x14xf32> to vector<4x8xf32>
    %cst_51 = arith.constant 1.000000e-16 : f32
    %80 = vector.broadcast %cst_51 : f32 to vector<4x8xf32>
    %81 = arith.addf %79, %80 : vector<4x8xf32>
    %82 = vector.extract_strided_slice %78 {offsets = [0, 8], sizes = [4, 1], strides = [1, 1]} : vector<4x14xf32> to vector<4x1xf32>
    %cst_52 = arith.constant 2.000000e+01 : f32
    %83 = vector.broadcast %cst_52 : f32 to vector<4x1xf32>
    %84 = arith.cmpf ogt, %82, %83 : vector<4x1xf32>
    %cst_53 = arith.constant 2.000000e+01 : f32
    %85 = vector.broadcast %cst_53 : f32 to vector<4x1xf32>
    %86 = arith.minimumf %82, %85 : vector<4x1xf32>
    %87 = math.exp %86 : vector<4x1xf32>
    %cst_54 = arith.constant 1.000000e+00 : f32
    %88 = vector.broadcast %cst_54 : f32 to vector<4x1xf32>
    %89 = arith.addf %88, %87 : vector<4x1xf32>
    %90 = math.log %89 : vector<4x1xf32>
    %91 = arith.select %84, %82, %90 : vector<4x1xi1>, vector<4x1xf32>
    %92 = vector.extract_strided_slice %78 {offsets = [0, 9], sizes = [4, 1], strides = [1, 1]} : vector<4x14xf32> to vector<4x1xf32>
    %cst_55 = arith.constant 5.000000e-01 : f32
    %93 = vector.broadcast %cst_55 : f32 to vector<4x1xf32>
    %94 = arith.mulf %93, %92 : vector<4x1xf32>
    %95 = math.tanh %94 : vector<4x1xf32>
    %cst_56 = arith.constant 1.000000e+00 : f32
    %96 = vector.broadcast %cst_56 : f32 to vector<4x1xf32>
    %97 = arith.addf %95, %96 : vector<4x1xf32>
    %cst_57 = arith.constant 5.000000e-01 : f32
    %98 = vector.broadcast %cst_57 : f32 to vector<4x1xf32>
    %99 = arith.mulf %98, %97 : vector<4x1xf32>
    %100 = vector.extract_strided_slice %78 {offsets = [0, 10], sizes = [4, 3], strides = [1, 1]} : vector<4x14xf32> to vector<4x3xf32>
    %cst_58 = arith.constant dense<0xFF800000> : vector<4xf32>
    %101 = vector.multi_reduction <maximumf>, %100, %cst_58 [1] : vector<4x3xf32> to vector<4xf32>
    %102 = vector.shape_cast %101 : vector<4xf32> to vector<4x1xf32>
    %103 = vector.broadcast %102 : vector<4x1xf32> to vector<4x3xf32>
    %104 = arith.subf %100, %103 : vector<4x3xf32>
    %105 = math.exp %104 : vector<4x3xf32>
    %cst_59 = arith.constant dense<0.000000e+00> : vector<4xf32>
    %106 = vector.multi_reduction <add>, %105, %cst_59 [1] : vector<4x3xf32> to vector<4xf32>
    %107 = vector.shape_cast %106 : vector<4xf32> to vector<4x1xf32>
    %108 = vector.broadcast %107 : vector<4x1xf32> to vector<4x3xf32>
    %109 = arith.divf %105, %108 : vector<4x3xf32>
    %110 = vector.extract_strided_slice %78 {offsets = [0, 13], sizes = [4, 1], strides = [1, 1]} : vector<4x14xf32> to vector<4x1xf32>
    %cst_60 = arith.constant 2.000000e+01 : f32
    %111 = vector.broadcast %cst_60 : f32 to vector<4x1xf32>
    %112 = arith.cmpf ogt, %110, %111 : vector<4x1xf32>
    %cst_61 = arith.constant 2.000000e+01 : f32
    %113 = vector.broadcast %cst_61 : f32 to vector<4x1xf32>
    %114 = arith.minimumf %110, %113 : vector<4x1xf32>
    %115 = math.exp %114 : vector<4x1xf32>
    %cst_62 = arith.constant 1.000000e+00 : f32
    %116 = vector.broadcast %cst_62 : f32 to vector<4x1xf32>
    %117 = arith.addf %116, %115 : vector<4x1xf32>
    %118 = math.log %117 : vector<4x1xf32>
    %119 = arith.select %112, %110, %118 : vector<4x1xi1>, vector<4x1xf32>
    %cst_63 = arith.constant 1.000000e+00 : f32
    %120 = vector.broadcast %cst_63 : f32 to vector<4x1xf32>
    %121 = arith.addf %120, %119 : vector<4x1xf32>
    %cst_64 = arith.constant 1.000000e-16 : f32
    %122 = vector.broadcast %cst_64 : f32 to vector<2x128xf32>
    %123 = arith.addf %2, %122 : vector<2x128xf32>
    %cst_65 = arith.constant dense<0.000000e+00> : vector<4x128xf32>
    %124 = tpu.matmul %21, %123, %cst_65 {dimension_numbers = #tpu.dot_dimension_numbers<[1], [0], [0], [1], [0, 0, 1, 1], [], []>} : vector<4x2xf32>, vector<2x128xf32>, vector<4x128xf32> -> vector<4x128xf32>
    %cst_66 = arith.constant dense<0.000000e+00> : vector<4x128xf32>
    %125 = tpu.matmul %81, %15, %cst_66 {dimension_numbers = #tpu.dot_dimension_numbers<[1], [0], [0], [1], [0, 0, 1, 1], [], []>} : vector<4x8xf32>, vector<8x128xf32>, vector<4x128xf32> -> vector<4x128xf32>
    %126 = arith.mulf %124, %125 : vector<4x128xf32>
    %cst_67 = arith.constant dense<0.000000e+00> : vector<4x16xf32>
    %127 = tpu.matmul %126, %16, %cst_67 {dimension_numbers = #tpu.dot_dimension_numbers<[1], [0], [0], [1], [0, 0, 1, 1], [], []>} : vector<4x128xf32>, vector<128x16xf32>, vector<4x16xf32> -> vector<4x16xf32>
    %128 = arith.mulf %124, %124 : vector<4x128xf32>
    %cst_68 = arith.constant dense<0.000000e+00> : vector<4x16xf32>
    %129 = tpu.matmul %128, %16, %cst_68 {dimension_numbers = #tpu.dot_dimension_numbers<[1], [0], [0], [1], [0, 0, 1, 1], [], []>} : vector<4x128xf32>, vector<128x16xf32>, vector<4x16xf32> -> vector<4x16xf32>
    %130 = arith.mulf %81, %81 : vector<4x8xf32>
    %cst_69 = arith.constant dense<0.000000e+00> : vector<4xf32>
    %131 = vector.multi_reduction <add>, %130, %cst_69 [1] : vector<4x8xf32> to vector<4xf32>
    %132 = vector.shape_cast %131 : vector<4xf32> to vector<4x1xf32>
    %cst_70 = arith.constant 1.000000e-16 : f32
    %133 = vector.broadcast %cst_70 : f32 to vector<4x16xf32>
    %134 = arith.maximumf %129, %133 : vector<4x16xf32>
    %cst_71 = arith.constant 1.000000e-16 : f32
    %135 = vector.broadcast %cst_71 : f32 to vector<4x1xf32>
    %136 = arith.maximumf %132, %135 : vector<4x1xf32>
    %137 = vector.broadcast %136 : vector<4x1xf32> to vector<4x16xf32>
    %138 = arith.mulf %134, %137 : vector<4x16xf32>
    %139 = math.rsqrt %138 : vector<4x16xf32>
    %140 = arith.mulf %127, %139 : vector<4x16xf32>
    %141 = vector.broadcast %91 : vector<4x1xf32> to vector<4x16xf32>
    %142 = arith.mulf %141, %140 : vector<4x16xf32>
    %cst_72 = arith.constant dense<0xFF800000> : vector<4xf32>
    %143 = vector.multi_reduction <maximumf>, %142, %cst_72 [1] : vector<4x16xf32> to vector<4xf32>
    %144 = vector.shape_cast %143 : vector<4xf32> to vector<4x1xf32>
    %145 = vector.broadcast %144 : vector<4x1xf32> to vector<4x16xf32>
    %146 = arith.subf %142, %145 : vector<4x16xf32>
    %147 = math.exp %146 : vector<4x16xf32>
    %cst_73 = arith.constant dense<0.000000e+00> : vector<4xf32>
    %148 = vector.multi_reduction <add>, %147, %cst_73 [1] : vector<4x16xf32> to vector<4xf32>
    %149 = vector.shape_cast %148 : vector<4xf32> to vector<4x1xf32>
    %150 = vector.broadcast %149 : vector<4x1xf32> to vector<4x16xf32>
    %151 = arith.divf %147, %150 : vector<4x16xf32>
    %152 = vector.broadcast %99 : vector<4x1xf32> to vector<4x16xf32>
    %153 = arith.mulf %152, %151 : vector<4x16xf32>
    %cst_74 = arith.constant 1.000000e+00 : f32
    %154 = vector.broadcast %cst_74 : f32 to vector<4x1xf32>
    %155 = arith.subf %154, %99 : vector<4x1xf32>
    %156 = vector.broadcast %155 : vector<4x1xf32> to vector<4x16xf32>
    %157 = arith.mulf %156, %31 : vector<4x16xf32>
    %158 = arith.addf %153, %157 : vector<4x16xf32>
    %cst_75 = arith.constant dense<0.000000e+00> : vector<4x48xf32>
    %159 = tpu.matmul %158, %14, %cst_75 {dimension_numbers = #tpu.dot_dimension_numbers<[1], [0], [0], [1], [0, 0, 1, 1], [], []>} : vector<4x16xf32>, vector<16x48xf32>, vector<4x48xf32> -> vector<4x48xf32>
    %160 = vector.extract_strided_slice %109 {offsets = [0, 0], sizes = [4, 1], strides = [1, 1]} : vector<4x3xf32> to vector<4x1xf32>
    %161 = vector.extract_strided_slice %159 {offsets = [0, 0], sizes = [4, 16], strides = [1, 1]} : vector<4x48xf32> to vector<4x16xf32>
    %162 = vector.broadcast %160 : vector<4x1xf32> to vector<4x16xf32>
    %163 = arith.mulf %162, %161 : vector<4x16xf32>
    %164 = vector.extract_strided_slice %109 {offsets = [0, 1], sizes = [4, 1], strides = [1, 1]} : vector<4x3xf32> to vector<4x1xf32>
    %165 = vector.extract_strided_slice %159 {offsets = [0, 16], sizes = [4, 16], strides = [1, 1]} : vector<4x48xf32> to vector<4x16xf32>
    %166 = vector.broadcast %164 : vector<4x1xf32> to vector<4x16xf32>
    %167 = arith.mulf %166, %165 : vector<4x16xf32>
    %168 = arith.addf %163, %167 : vector<4x16xf32>
    %169 = vector.extract_strided_slice %109 {offsets = [0, 2], sizes = [4, 1], strides = [1, 1]} : vector<4x3xf32> to vector<4x1xf32>
    %170 = vector.extract_strided_slice %159 {offsets = [0, 32], sizes = [4, 16], strides = [1, 1]} : vector<4x48xf32> to vector<4x16xf32>
    %171 = vector.broadcast %169 : vector<4x1xf32> to vector<4x16xf32>
    %172 = arith.mulf %171, %170 : vector<4x16xf32>
    %173 = arith.addf %168, %172 : vector<4x16xf32>
    %cst_76 = arith.constant 1.000000e-30 : f32
    %174 = vector.broadcast %cst_76 : f32 to vector<4x16xf32>
    %175 = arith.maximumf %173, %174 : vector<4x16xf32>
    %176 = math.log %175 : vector<4x16xf32>
    %177 = vector.broadcast %121 : vector<4x1xf32> to vector<4x16xf32>
    %178 = arith.mulf %177, %176 : vector<4x16xf32>
    %179 = math.exp %178 : vector<4x16xf32>
    %cst_77 = arith.constant dense<0.000000e+00> : vector<4xf32>
    %180 = vector.multi_reduction <add>, %179, %cst_77 [1] : vector<4x16xf32> to vector<4xf32>
    %181 = vector.shape_cast %180 : vector<4xf32> to vector<4x1xf32>
    %cst_78 = arith.constant 1.000000e-16 : f32
    %182 = vector.broadcast %cst_78 : f32 to vector<4x1xf32>
    %183 = arith.addf %181, %182 : vector<4x1xf32>
    %184 = vector.broadcast %183 : vector<4x1xf32> to vector<4x16xf32>
    %185 = arith.divf %179, %184 : vector<4x16xf32>
    %cst_79 = arith.constant dense<0.000000e+00> : vector<2x16xf32>
    %186 = tpu.matmul %22, %185, %cst_79 {dimension_numbers = #tpu.dot_dimension_numbers<[1], [0], [0], [1], [0, 0, 1, 1], [], []>} : vector<2x4xf32>, vector<4x16xf32>, vector<2x16xf32> -> vector<2x16xf32>
    %cst_80 = arith.constant dense<0.000000e+00> : vector<2x16xf32>
    %187 = tpu.matmul %23, %185, %cst_80 {dimension_numbers = #tpu.dot_dimension_numbers<[1], [0], [0], [1], [0, 0, 1, 1], [], []>} : vector<2x4xf32>, vector<4x16xf32>, vector<2x16xf32> -> vector<2x16xf32>
    %cst_81 = arith.constant dense<0.000000e+00> : vector<2x128xf32>
    %188 = tpu.matmul %186, %17, %cst_81 {dimension_numbers = #tpu.dot_dimension_numbers<[1], [0], [0], [1], [0, 0, 1, 1], [], []>} : vector<2x16xf32>, vector<16x128xf32>, vector<2x128xf32> -> vector<2x128xf32>
    %189 = arith.mulf %188, %2 : vector<2x128xf32>
    %cst_82 = arith.constant dense<0.000000e+00> : vector<2x8xf32>
    %190 = tpu.matmul %189, %18, %cst_82 {dimension_numbers = #tpu.dot_dimension_numbers<[1], [0], [0], [1], [0, 0, 1, 1], [], []>} : vector<2x128xf32>, vector<128x8xf32>, vector<2x8xf32> -> vector<2x8xf32>
    %191 = vector.extract_strided_slice %73 {offsets = [0, 28], sizes = [2, 8], strides = [1, 1]} : vector<2x44xf32> to vector<2x8xf32>
    %cst_83 = arith.constant 5.000000e-01 : f32
    %192 = vector.broadcast %cst_83 : f32 to vector<2x8xf32>
    %193 = arith.mulf %192, %191 : vector<2x8xf32>
    %194 = math.tanh %193 : vector<2x8xf32>
    %cst_84 = arith.constant 1.000000e+00 : f32
    %195 = vector.broadcast %cst_84 : f32 to vector<2x8xf32>
    %196 = arith.addf %194, %195 : vector<2x8xf32>
    %cst_85 = arith.constant 5.000000e-01 : f32
    %197 = vector.broadcast %cst_85 : f32 to vector<2x8xf32>
    %198 = arith.mulf %197, %196 : vector<2x8xf32>
    %199 = vector.extract_strided_slice %73 {offsets = [0, 36], sizes = [2, 8], strides = [1, 1]} : vector<2x44xf32> to vector<2x8xf32>
    %cst_86 = arith.constant dense<0.000000e+00> : vector<2x128xf32>
    %200 = tpu.matmul %187, %17, %cst_86 {dimension_numbers = #tpu.dot_dimension_numbers<[1], [0], [0], [1], [0, 0, 1, 1], [], []>} : vector<2x16xf32>, vector<16x128xf32>, vector<2x128xf32> -> vector<2x128xf32>
    %cst_87 = arith.constant dense<0.000000e+00> : vector<2x128xf32>
    %201 = tpu.matmul %198, %15, %cst_87 {dimension_numbers = #tpu.dot_dimension_numbers<[1], [0], [0], [1], [0, 0, 1, 1], [], []>} : vector<2x8xf32>, vector<8x128xf32>, vector<2x128xf32> -> vector<2x128xf32>
    %202 = arith.mulf %200, %201 : vector<2x128xf32>
    %cst_88 = arith.constant 1.000000e+00 : f32
    %203 = vector.broadcast %cst_88 : f32 to vector<2x128xf32>
    %204 = arith.subf %203, %202 : vector<2x128xf32>
    %205 = arith.mulf %2, %204 : vector<2x128xf32>
    %cst_89 = arith.constant dense<0.000000e+00> : vector<2x128xf32>
    %206 = tpu.matmul %199, %15, %cst_89 {dimension_numbers = #tpu.dot_dimension_numbers<[1], [0], [0], [1], [0, 0, 1, 1], [], []>} : vector<2x8xf32>, vector<8x128xf32>, vector<2x128xf32> -> vector<2x128xf32>
    %207 = arith.mulf %200, %206 : vector<2x128xf32>
    %208 = arith.addf %205, %207 : vector<2x128xf32>
    %cst_90 = arith.constant dense<0.000000e+00> : vector<2x8xf32>
    %209 = tpu.matmul %70, %11, %cst_90 {dimension_numbers = #tpu.dot_dimension_numbers<[1], [0], [0], [1], [0, 0, 1, 1], [], []>} : vector<2x32xf32>, vector<32x8xf32>, vector<2x8xf32> -> vector<2x8xf32>
    %cst_91 = arith.constant dense<0.000000e+00> : vector<2x8xf32>
    %210 = tpu.matmul %190, %12, %cst_91 {dimension_numbers = #tpu.dot_dimension_numbers<[1], [0], [0], [1], [0, 0, 1, 1], [], []>} : vector<2x8xf32>, vector<8x8xf32>, vector<2x8xf32> -> vector<2x8xf32>
    %211 = arith.addf %209, %210 : vector<2x8xf32>
    %212 = vector.broadcast %13 : vector<1x8xf32> to vector<2x8xf32>
    %213 = arith.addf %211, %212 : vector<2x8xf32>
    %c0_92 = arith.constant 0 : index
    %c0_93 = arith.constant 0 : index
    %214 = vector.load %arg18[%c0_92, %c0_93] : memref<2x64xf32, #tpu.memory_space<vmem>>, vector<2x8xf32>
    tpu.vector_store %arg18[%c0_92, %c0_93], %213 {strides = array<i32>} : memref<2x64xf32, #tpu.memory_space<vmem>>, vector<2x8xf32>,
    %215 = vector.extract_strided_slice %0 {offsets = [0, 8], sizes = [2, 8], strides = [1, 1]} : vector<2x64xf32> to vector<2x8xf32>
    %cst_94 = arith.constant dense<0.000000e+00> : vector<2x128xf32>
    %216 = tpu.matmul %215, %4, %cst_94 {dimension_numbers = #tpu.dot_dimension_numbers<[1], [0], [0], [1], [0, 0, 1, 1], [], []>} : vector<2x8xf32>, vector<8x128xf32>, vector<2x128xf32> -> vector<2x128xf32>
    %cst_95 = arith.constant dense<0.000000e+00> : vector<2x128xf32>
    %217 = tpu.matmul %190, %5, %cst_95 {dimension_numbers = #tpu.dot_dimension_numbers<[1], [0], [0], [1], [0, 0, 1, 1], [], []>} : vector<2x8xf32>, vector<8x128xf32>, vector<2x128xf32> -> vector<2x128xf32>
    %218 = arith.addf %216, %217 : vector<2x128xf32>
    %cst_96 = arith.constant dense<0.000000e+00> : vector<2x128xf32>
    %219 = tpu.matmul %70, %6, %cst_96 {dimension_numbers = #tpu.dot_dimension_numbers<[1], [0], [0], [1], [0, 0, 1, 1], [], []>} : vector<2x32xf32>, vector<32x128xf32>, vector<2x128xf32> -> vector<2x128xf32>
    %220 = arith.addf %218, %219 : vector<2x128xf32>
    %221 = vector.broadcast %7 : vector<1x128xf32> to vector<2x128xf32>
    %222 = arith.addf %220, %221 : vector<2x128xf32>
    %223 = vector.extract_strided_slice %222 {offsets = [0, 0], sizes = [2, 32], strides = [1, 1]} : vector<2x128xf32> to vector<2x32xf32>
    %cst_97 = arith.constant 5.000000e-01 : f32
    %224 = vector.broadcast %cst_97 : f32 to vector<2x32xf32>
    %225 = arith.mulf %224, %223 : vector<2x32xf32>
    %226 = math.tanh %225 : vector<2x32xf32>
    %cst_98 = arith.constant 1.000000e+00 : f32
    %227 = vector.broadcast %cst_98 : f32 to vector<2x32xf32>
    %228 = arith.addf %226, %227 : vector<2x32xf32>
    %cst_99 = arith.constant 5.000000e-01 : f32
    %229 = vector.broadcast %cst_99 : f32 to vector<2x32xf32>
    %230 = arith.mulf %229, %228 : vector<2x32xf32>
    %231 = vector.extract_strided_slice %222 {offsets = [0, 32], sizes = [2, 32], strides = [1, 1]} : vector<2x128xf32> to vector<2x32xf32>
    %cst_100 = arith.constant 5.000000e-01 : f32
    %232 = vector.broadcast %cst_100 : f32 to vector<2x32xf32>
    %233 = arith.mulf %232, %231 : vector<2x32xf32>
    %234 = math.tanh %233 : vector<2x32xf32>
    %cst_101 = arith.constant 1.000000e+00 : f32
    %235 = vector.broadcast %cst_101 : f32 to vector<2x32xf32>
    %236 = arith.addf %234, %235 : vector<2x32xf32>
    %cst_102 = arith.constant 5.000000e-01 : f32
    %237 = vector.broadcast %cst_102 : f32 to vector<2x32xf32>
    %238 = arith.mulf %237, %236 : vector<2x32xf32>
    %239 = vector.extract_strided_slice %222 {offsets = [0, 64], sizes = [2, 32], strides = [1, 1]} : vector<2x128xf32> to vector<2x32xf32>
    %240 = math.tanh %239 : vector<2x32xf32>
    %241 = vector.extract_strided_slice %222 {offsets = [0, 96], sizes = [2, 32], strides = [1, 1]} : vector<2x128xf32> to vector<2x32xf32>
    %cst_103 = arith.constant 5.000000e-01 : f32
    %242 = vector.broadcast %cst_103 : f32 to vector<2x32xf32>
    %243 = arith.mulf %242, %241 : vector<2x32xf32>
    %244 = math.tanh %243 : vector<2x32xf32>
    %cst_104 = arith.constant 1.000000e+00 : f32
    %245 = vector.broadcast %cst_104 : f32 to vector<2x32xf32>
    %246 = arith.addf %244, %245 : vector<2x32xf32>
    %cst_105 = arith.constant 5.000000e-01 : f32
    %247 = vector.broadcast %cst_105 : f32 to vector<2x32xf32>
    %248 = arith.mulf %247, %246 : vector<2x32xf32>
    %249 = arith.mulf %238, %68 : vector<2x32xf32>
    %250 = arith.mulf %230, %240 : vector<2x32xf32>
    %251 = arith.addf %249, %250 : vector<2x32xf32>
    %252 = math.tanh %251 : vector<2x32xf32>
    %253 = arith.mulf %248, %252 : vector<2x32xf32>
    %cst_106 = arith.constant dense<0.000000e+00> : vector<2x44xf32>
    %254 = tpu.matmul %253, %8, %cst_106 {dimension_numbers = #tpu.dot_dimension_numbers<[1], [0], [0], [1], [0, 0, 1, 1], [], []>} : vector<2x32xf32>, vector<32x44xf32>, vector<2x44xf32> -> vector<2x44xf32>
    %255 = vector.broadcast %9 : vector<1x44xf32> to vector<2x44xf32>
    %256 = arith.addf %254, %255 : vector<2x44xf32>
    %257 = vector.extract_strided_slice %256 {offsets = [0, 0], sizes = [2, 14], strides = [1, 1]} : vector<2x44xf32> to vector<2x14xf32>
    %cst_107 = arith.constant dense<0.000000e+00> : vector<4x14xf32>
    %258 = tpu.matmul %19, %257, %cst_107 {dimension_numbers = #tpu.dot_dimension_numbers<[1], [0], [0], [1], [0, 0, 1, 1], [], []>} : vector<4x2xf32>, vector<2x14xf32>, vector<4x14xf32> -> vector<4x14xf32>
    %259 = vector.extract_strided_slice %256 {offsets = [0, 14], sizes = [2, 14], strides = [1, 1]} : vector<2x44xf32> to vector<2x14xf32>
    %cst_108 = arith.constant dense<0.000000e+00> : vector<4x14xf32>
    %260 = tpu.matmul %20, %259, %cst_108 {dimension_numbers = #tpu.dot_dimension_numbers<[1], [0], [0], [1], [0, 0, 1, 1], [], []>} : vector<4x2xf32>, vector<2x14xf32>, vector<4x14xf32> -> vector<4x14xf32>
    %261 = arith.addf %258, %260 : vector<4x14xf32>
    %262 = vector.extract_strided_slice %261 {offsets = [0, 0], sizes = [4, 8], strides = [1, 1]} : vector<4x14xf32> to vector<4x8xf32>
    %cst_109 = arith.constant 1.000000e-16 : f32
    %263 = vector.broadcast %cst_109 : f32 to vector<4x8xf32>
    %264 = arith.addf %262, %263 : vector<4x8xf32>
    %265 = vector.extract_strided_slice %261 {offsets = [0, 8], sizes = [4, 1], strides = [1, 1]} : vector<4x14xf32> to vector<4x1xf32>
    %cst_110 = arith.constant 2.000000e+01 : f32
    %266 = vector.broadcast %cst_110 : f32 to vector<4x1xf32>
    %267 = arith.cmpf ogt, %265, %266 : vector<4x1xf32>
    %cst_111 = arith.constant 2.000000e+01 : f32
    %268 = vector.broadcast %cst_111 : f32 to vector<4x1xf32>
    %269 = arith.minimumf %265, %268 : vector<4x1xf32>
    %270 = math.exp %269 : vector<4x1xf32>
    %cst_112 = arith.constant 1.000000e+00 : f32
    %271 = vector.broadcast %cst_112 : f32 to vector<4x1xf32>
    %272 = arith.addf %271, %270 : vector<4x1xf32>
    %273 = math.log %272 : vector<4x1xf32>
    %274 = arith.select %267, %265, %273 : vector<4x1xi1>, vector<4x1xf32>
    %275 = vector.extract_strided_slice %261 {offsets = [0, 9], sizes = [4, 1], strides = [1, 1]} : vector<4x14xf32> to vector<4x1xf32>
    %cst_113 = arith.constant 5.000000e-01 : f32
    %276 = vector.broadcast %cst_113 : f32 to vector<4x1xf32>
    %277 = arith.mulf %276, %275 : vector<4x1xf32>
    %278 = math.tanh %277 : vector<4x1xf32>
    %cst_114 = arith.constant 1.000000e+00 : f32
    %279 = vector.broadcast %cst_114 : f32 to vector<4x1xf32>
    %280 = arith.addf %278, %279 : vector<4x1xf32>
    %cst_115 = arith.constant 5.000000e-01 : f32
    %281 = vector.broadcast %cst_115 : f32 to vector<4x1xf32>
    %282 = arith.mulf %281, %280 : vector<4x1xf32>
    %283 = vector.extract_strided_slice %261 {offsets = [0, 10], sizes = [4, 3], strides = [1, 1]} : vector<4x14xf32> to vector<4x3xf32>
    %cst_116 = arith.constant dense<0xFF800000> : vector<4xf32>
    %284 = vector.multi_reduction <maximumf>, %283, %cst_116 [1] : vector<4x3xf32> to vector<4xf32>
    %285 = vector.shape_cast %284 : vector<4xf32> to vector<4x1xf32>
    %286 = vector.broadcast %285 : vector<4x1xf32> to vector<4x3xf32>
    %287 = arith.subf %283, %286 : vector<4x3xf32>
    %288 = math.exp %287 : vector<4x3xf32>
    %cst_117 = arith.constant dense<0.000000e+00> : vector<4xf32>
    %289 = vector.multi_reduction <add>, %288, %cst_117 [1] : vector<4x3xf32> to vector<4xf32>
    %290 = vector.shape_cast %289 : vector<4xf32> to vector<4x1xf32>
    %291 = vector.broadcast %290 : vector<4x1xf32> to vector<4x3xf32>
    %292 = arith.divf %288, %291 : vector<4x3xf32>
    %293 = vector.extract_strided_slice %261 {offsets = [0, 13], sizes = [4, 1], strides = [1, 1]} : vector<4x14xf32> to vector<4x1xf32>
    %cst_118 = arith.constant 2.000000e+01 : f32
    %294 = vector.broadcast %cst_118 : f32 to vector<4x1xf32>
    %295 = arith.cmpf ogt, %293, %294 : vector<4x1xf32>
    %cst_119 = arith.constant 2.000000e+01 : f32
    %296 = vector.broadcast %cst_119 : f32 to vector<4x1xf32>
    %297 = arith.minimumf %293, %296 : vector<4x1xf32>
    %298 = math.exp %297 : vector<4x1xf32>
    %cst_120 = arith.constant 1.000000e+00 : f32
    %299 = vector.broadcast %cst_120 : f32 to vector<4x1xf32>
    %300 = arith.addf %299, %298 : vector<4x1xf32>
    %301 = math.log %300 : vector<4x1xf32>
    %302 = arith.select %295, %293, %301 : vector<4x1xi1>, vector<4x1xf32>
    %cst_121 = arith.constant 1.000000e+00 : f32
    %303 = vector.broadcast %cst_121 : f32 to vector<4x1xf32>
    %304 = arith.addf %303, %302 : vector<4x1xf32>
    %cst_122 = arith.constant 1.000000e-16 : f32
    %305 = vector.broadcast %cst_122 : f32 to vector<2x128xf32>
    %306 = arith.addf %208, %305 : vector<2x128xf32>
    %cst_123 = arith.constant dense<0.000000e+00> : vector<4x128xf32>
    %307 = tpu.matmul %21, %306, %cst_123 {dimension_numbers = #tpu.dot_dimension_numbers<[1], [0], [0], [1], [0, 0, 1, 1], [], []>} : vector<4x2xf32>, vector<2x128xf32>, vector<4x128xf32> -> vector<4x128xf32>
    %cst_124 = arith.constant dense<0.000000e+00> : vector<4x128xf32>
    %308 = tpu.matmul %264, %15, %cst_124 {dimension_numbers = #tpu.dot_dimension_numbers<[1], [0], [0], [1], [0, 0, 1, 1], [], []>} : vector<4x8xf32>, vector<8x128xf32>, vector<4x128xf32> -> vector<4x128xf32>
    %309 = arith.mulf %307, %308 : vector<4x128xf32>
    %cst_125 = arith.constant dense<0.000000e+00> : vector<4x16xf32>
    %310 = tpu.matmul %309, %16, %cst_125 {dimension_numbers = #tpu.dot_dimension_numbers<[1], [0], [0], [1], [0, 0, 1, 1], [], []>} : vector<4x128xf32>, vector<128x16xf32>, vector<4x16xf32> -> vector<4x16xf32>
    %311 = arith.mulf %307, %307 : vector<4x128xf32>
    %cst_126 = arith.constant dense<0.000000e+00> : vector<4x16xf32>
    %312 = tpu.matmul %311, %16, %cst_126 {dimension_numbers = #tpu.dot_dimension_numbers<[1], [0], [0], [1], [0, 0, 1, 1], [], []>} : vector<4x128xf32>, vector<128x16xf32>, vector<4x16xf32> -> vector<4x16xf32>
    %313 = arith.mulf %264, %264 : vector<4x8xf32>
    %cst_127 = arith.constant dense<0.000000e+00> : vector<4xf32>
    %314 = vector.multi_reduction <add>, %313, %cst_127 [1] : vector<4x8xf32> to vector<4xf32>
    %315 = vector.shape_cast %314 : vector<4xf32> to vector<4x1xf32>
    %cst_128 = arith.constant 1.000000e-16 : f32
    %316 = vector.broadcast %cst_128 : f32 to vector<4x16xf32>
    %317 = arith.maximumf %312, %316 : vector<4x16xf32>
    %cst_129 = arith.constant 1.000000e-16 : f32
    %318 = vector.broadcast %cst_129 : f32 to vector<4x1xf32>
    %319 = arith.maximumf %315, %318 : vector<4x1xf32>
    %320 = vector.broadcast %319 : vector<4x1xf32> to vector<4x16xf32>
    %321 = arith.mulf %317, %320 : vector<4x16xf32>
    %322 = math.rsqrt %321 : vector<4x16xf32>
    %323 = arith.mulf %310, %322 : vector<4x16xf32>
    %324 = vector.broadcast %274 : vector<4x1xf32> to vector<4x16xf32>
    %325 = arith.mulf %324, %323 : vector<4x16xf32>
    %cst_130 = arith.constant dense<0xFF800000> : vector<4xf32>
    %326 = vector.multi_reduction <maximumf>, %325, %cst_130 [1] : vector<4x16xf32> to vector<4xf32>
    %327 = vector.shape_cast %326 : vector<4xf32> to vector<4x1xf32>
    %328 = vector.broadcast %327 : vector<4x1xf32> to vector<4x16xf32>
    %329 = arith.subf %325, %328 : vector<4x16xf32>
    %330 = math.exp %329 : vector<4x16xf32>
    %cst_131 = arith.constant dense<0.000000e+00> : vector<4xf32>
    %331 = vector.multi_reduction <add>, %330, %cst_131 [1] : vector<4x16xf32> to vector<4xf32>
    %332 = vector.shape_cast %331 : vector<4xf32> to vector<4x1xf32>
    %333 = vector.broadcast %332 : vector<4x1xf32> to vector<4x16xf32>
    %334 = arith.divf %330, %333 : vector<4x16xf32>
    %335 = vector.broadcast %282 : vector<4x1xf32> to vector<4x16xf32>
    %336 = arith.mulf %335, %334 : vector<4x16xf32>
    %cst_132 = arith.constant 1.000000e+00 : f32
    %337 = vector.broadcast %cst_132 : f32 to vector<4x1xf32>
    %338 = arith.subf %337, %282 : vector<4x1xf32>
    %339 = vector.broadcast %338 : vector<4x1xf32> to vector<4x16xf32>
    %340 = arith.mulf %339, %185 : vector<4x16xf32>
    %341 = arith.addf %336, %340 : vector<4x16xf32>
    %cst_133 = arith.constant dense<0.000000e+00> : vector<4x48xf32>
    %342 = tpu.matmul %341, %14, %cst_133 {dimension_numbers = #tpu.dot_dimension_numbers<[1], [0], [0], [1], [0, 0, 1, 1], [], []>} : vector<4x16xf32>, vector<16x48xf32>, vector<4x48xf32> -> vector<4x48xf32>
    %343 = vector.extract_strided_slice %292 {offsets = [0, 0], sizes = [4, 1], strides = [1, 1]} : vector<4x3xf32> to vector<4x1xf32>
    %344 = vector.extract_strided_slice %342 {offsets = [0, 0], sizes = [4, 16], strides = [1, 1]} : vector<4x48xf32> to vector<4x16xf32>
    %345 = vector.broadcast %343 : vector<4x1xf32> to vector<4x16xf32>
    %346 = arith.mulf %345, %344 : vector<4x16xf32>
    %347 = vector.extract_strided_slice %292 {offsets = [0, 1], sizes = [4, 1], strides = [1, 1]} : vector<4x3xf32> to vector<4x1xf32>
    %348 = vector.extract_strided_slice %342 {offsets = [0, 16], sizes = [4, 16], strides = [1, 1]} : vector<4x48xf32> to vector<4x16xf32>
    %349 = vector.broadcast %347 : vector<4x1xf32> to vector<4x16xf32>
    %350 = arith.mulf %349, %348 : vector<4x16xf32>
    %351 = arith.addf %346, %350 : vector<4x16xf32>
    %352 = vector.extract_strided_slice %292 {offsets = [0, 2], sizes = [4, 1], strides = [1, 1]} : vector<4x3xf32> to vector<4x1xf32>
    %353 = vector.extract_strided_slice %342 {offsets = [0, 32], sizes = [4, 16], strides = [1, 1]} : vector<4x48xf32> to vector<4x16xf32>
    %354 = vector.broadcast %352 : vector<4x1xf32> to vector<4x16xf32>
    %355 = arith.mulf %354, %353 : vector<4x16xf32>
    %356 = arith.addf %351, %355 : vector<4x16xf32>
    %cst_134 = arith.constant 1.000000e-30 : f32
    %357 = vector.broadcast %cst_134 : f32 to vector<4x16xf32>
    %358 = arith.maximumf %356, %357 : vector<4x16xf32>
    %359 = math.log %358 : vector<4x16xf32>
    %360 = vector.broadcast %304 : vector<4x1xf32> to vector<4x16xf32>
    %361 = arith.mulf %360, %359 : vector<4x16xf32>
    %362 = math.exp %361 : vector<4x16xf32>
    %cst_135 = arith.constant dense<0.000000e+00> : vector<4xf32>
    %363 = vector.multi_reduction <add>, %362, %cst_135 [1] : vector<4x16xf32> to vector<4xf32>
    %364 = vector.shape_cast %363 : vector<4xf32> to vector<4x1xf32>
    %cst_136 = arith.constant 1.000000e-16 : f32
    %365 = vector.broadcast %cst_136 : f32 to vector<4x1xf32>
    %366 = arith.addf %364, %365 : vector<4x1xf32>
    %367 = vector.broadcast %366 : vector<4x1xf32> to vector<4x16xf32>
    %368 = arith.divf %362, %367 : vector<4x16xf32>
    %cst_137 = arith.constant dense<0.000000e+00> : vector<2x16xf32>
    %369 = tpu.matmul %22, %368, %cst_137 {dimension_numbers = #tpu.dot_dimension_numbers<[1], [0], [0], [1], [0, 0, 1, 1], [], []>} : vector<2x4xf32>, vector<4x16xf32>, vector<2x16xf32> -> vector<2x16xf32>
    %cst_138 = arith.constant dense<0.000000e+00> : vector<2x16xf32>
    %370 = tpu.matmul %23, %368, %cst_138 {dimension_numbers = #tpu.dot_dimension_numbers<[1], [0], [0], [1], [0, 0, 1, 1], [], []>} : vector<2x4xf32>, vector<4x16xf32>, vector<2x16xf32> -> vector<2x16xf32>
    %cst_139 = arith.constant dense<0.000000e+00> : vector<2x128xf32>
    %371 = tpu.matmul %369, %17, %cst_139 {dimension_numbers = #tpu.dot_dimension_numbers<[1], [0], [0], [1], [0, 0, 1, 1], [], []>} : vector<2x16xf32>, vector<16x128xf32>, vector<2x128xf32> -> vector<2x128xf32>
    %372 = arith.mulf %371, %208 : vector<2x128xf32>
    %cst_140 = arith.constant dense<0.000000e+00> : vector<2x8xf32>
    %373 = tpu.matmul %372, %18, %cst_140 {dimension_numbers = #tpu.dot_dimension_numbers<[1], [0], [0], [1], [0, 0, 1, 1], [], []>} : vector<2x128xf32>, vector<128x8xf32>, vector<2x8xf32> -> vector<2x8xf32>
    %374 = vector.extract_strided_slice %256 {offsets = [0, 28], sizes = [2, 8], strides = [1, 1]} : vector<2x44xf32> to vector<2x8xf32>
    %cst_141 = arith.constant 5.000000e-01 : f32
    %375 = vector.broadcast %cst_141 : f32 to vector<2x8xf32>
    %376 = arith.mulf %375, %374 : vector<2x8xf32>
    %377 = math.tanh %376 : vector<2x8xf32>
    %cst_142 = arith.constant 1.000000e+00 : f32
    %378 = vector.broadcast %cst_142 : f32 to vector<2x8xf32>
    %379 = arith.addf %377, %378 : vector<2x8xf32>
    %cst_143 = arith.constant 5.000000e-01 : f32
    %380 = vector.broadcast %cst_143 : f32 to vector<2x8xf32>
    %381 = arith.mulf %380, %379 : vector<2x8xf32>
    %382 = vector.extract_strided_slice %256 {offsets = [0, 36], sizes = [2, 8], strides = [1, 1]} : vector<2x44xf32> to vector<2x8xf32>
    %cst_144 = arith.constant dense<0.000000e+00> : vector<2x128xf32>
    %383 = tpu.matmul %370, %17, %cst_144 {dimension_numbers = #tpu.dot_dimension_numbers<[1], [0], [0], [1], [0, 0, 1, 1], [], []>} : vector<2x16xf32>, vector<16x128xf32>, vector<2x128xf32> -> vector<2x128xf32>
    %cst_145 = arith.constant dense<0.000000e+00> : vector<2x128xf32>
    %384 = tpu.matmul %381, %15, %cst_145 {dimension_numbers = #tpu.dot_dimension_numbers<[1], [0], [0], [1], [0, 0, 1, 1], [], []>} : vector<2x8xf32>, vector<8x128xf32>, vector<2x128xf32> -> vector<2x128xf32>
    %385 = arith.mulf %383, %384 : vector<2x128xf32>
    %cst_146 = arith.constant 1.000000e+00 : f32
    %386 = vector.broadcast %cst_146 : f32 to vector<2x128xf32>
    %387 = arith.subf %386, %385 : vector<2x128xf32>
    %388 = arith.mulf %208, %387 : vector<2x128xf32>
    %cst_147 = arith.constant dense<0.000000e+00> : vector<2x128xf32>
    %389 = tpu.matmul %382, %15, %cst_147 {dimension_numbers = #tpu.dot_dimension_numbers<[1], [0], [0], [1], [0, 0, 1, 1], [], []>} : vector<2x8xf32>, vector<8x128xf32>, vector<2x128xf32> -> vector<2x128xf32>
    %390 = arith.mulf %383, %389 : vector<2x128xf32>
    %391 = arith.addf %388, %390 : vector<2x128xf32>
    %cst_148 = arith.constant dense<0.000000e+00> : vector<2x8xf32>
    %392 = tpu.matmul %253, %11, %cst_148 {dimension_numbers = #tpu.dot_dimension_numbers<[1], [0], [0], [1], [0, 0, 1, 1], [], []>} : vector<2x32xf32>, vector<32x8xf32>, vector<2x8xf32> -> vector<2x8xf32>
    %cst_149 = arith.constant dense<0.000000e+00> : vector<2x8xf32>
    %393 = tpu.matmul %373, %12, %cst_149 {dimension_numbers = #tpu.dot_dimension_numbers<[1], [0], [0], [1], [0, 0, 1, 1], [], []>} : vector<2x8xf32>, vector<8x8xf32>, vector<2x8xf32> -> vector<2x8xf32>
    %394 = arith.addf %392, %393 : vector<2x8xf32>
    %395 = vector.broadcast %13 : vector<1x8xf32> to vector<2x8xf32>
    %396 = arith.addf %394, %395 : vector<2x8xf32>
    %c0_150 = arith.constant 0 : index
    %c8 = arith.constant 8 : index
    %397 = vector.load %arg18[%c0_150, %c8] : memref<2x64xf32, #tpu.memory_space<vmem>>, vector<2x8xf32>
    tpu.vector_store %arg18[%c0_150, %c8], %396 {strides = array<i32>} : memref<2x64xf32, #tpu.memory_space<vmem>>, vector<2x8xf32>,
    %398 = vector.extract_strided_slice %0 {offsets = [0, 16], sizes = [2, 8], strides = [1, 1]} : vector<2x64xf32> to vector<2x8xf32>
    %cst_151 = arith.constant dense<0.000000e+00> : vector<2x128xf32>
    %399 = tpu.matmul %398, %4, %cst_151 {dimension_numbers = #tpu.dot_dimension_numbers<[1], [0], [0], [1], [0, 0, 1, 1], [], []>} : vector<2x8xf32>, vector<8x128xf32>, vector<2x128xf32> -> vector<2x128xf32>
    %cst_152 = arith.constant dense<0.000000e+00> : vector<2x128xf32>
    %400 = tpu.matmul %373, %5, %cst_152 {dimension_numbers = #tpu.dot_dimension_numbers<[1], [0], [0], [1], [0, 0, 1, 1], [], []>} : vector<2x8xf32>, vector<8x128xf32>, vector<2x128xf32> -> vector<2x128xf32>
    %401 = arith.addf %399, %400 : vector<2x128xf32>
    %cst_153 = arith.constant dense<0.000000e+00> : vector<2x128xf32>
    %402 = tpu.matmul %253, %6, %cst_153 {dimension_numbers = #tpu.dot_dimension_numbers<[1], [0], [0], [1], [0, 0, 1, 1], [], []>} : vector<2x32xf32>, vector<32x128xf32>, vector<2x128xf32> -> vector<2x128xf32>
    %403 = arith.addf %401, %402 : vector<2x128xf32>
    %404 = vector.broadcast %7 : vector<1x128xf32> to vector<2x128xf32>
    %405 = arith.addf %403, %404 : vector<2x128xf32>
    %406 = vector.extract_strided_slice %405 {offsets = [0, 0], sizes = [2, 32], strides = [1, 1]} : vector<2x128xf32> to vector<2x32xf32>
    %cst_154 = arith.constant 5.000000e-01 : f32
    %407 = vector.broadcast %cst_154 : f32 to vector<2x32xf32>
    %408 = arith.mulf %407, %406 : vector<2x32xf32>
    %409 = math.tanh %408 : vector<2x32xf32>
    %cst_155 = arith.constant 1.000000e+00 : f32
    %410 = vector.broadcast %cst_155 : f32 to vector<2x32xf32>
    %411 = arith.addf %409, %410 : vector<2x32xf32>
    %cst_156 = arith.constant 5.000000e-01 : f32
    %412 = vector.broadcast %cst_156 : f32 to vector<2x32xf32>
    %413 = arith.mulf %412, %411 : vector<2x32xf32>
    %414 = vector.extract_strided_slice %405 {offsets = [0, 32], sizes = [2, 32], strides = [1, 1]} : vector<2x128xf32> to vector<2x32xf32>
    %cst_157 = arith.constant 5.000000e-01 : f32
    %415 = vector.broadcast %cst_157 : f32 to vector<2x32xf32>
    %416 = arith.mulf %415, %414 : vector<2x32xf32>
    %417 = math.tanh %416 : vector<2x32xf32>
    %cst_158 = arith.constant 1.000000e+00 : f32
    %418 = vector.broadcast %cst_158 : f32 to vector<2x32xf32>
    %419 = arith.addf %417, %418 : vector<2x32xf32>
    %cst_159 = arith.constant 5.000000e-01 : f32
    %420 = vector.broadcast %cst_159 : f32 to vector<2x32xf32>
    %421 = arith.mulf %420, %419 : vector<2x32xf32>
    %422 = vector.extract_strided_slice %405 {offsets = [0, 64], sizes = [2, 32], strides = [1, 1]} : vector<2x128xf32> to vector<2x32xf32>
    %423 = math.tanh %422 : vector<2x32xf32>
    %424 = vector.extract_strided_slice %405 {offsets = [0, 96], sizes = [2, 32], strides = [1, 1]} : vector<2x128xf32> to vector<2x32xf32>
    %cst_160 = arith.constant 5.000000e-01 : f32
    %425 = vector.broadcast %cst_160 : f32 to vector<2x32xf32>
    %426 = arith.mulf %425, %424 : vector<2x32xf32>
    %427 = math.tanh %426 : vector<2x32xf32>
    %cst_161 = arith.constant 1.000000e+00 : f32
    %428 = vector.broadcast %cst_161 : f32 to vector<2x32xf32>
    %429 = arith.addf %427, %428 : vector<2x32xf32>
    %cst_162 = arith.constant 5.000000e-01 : f32
    %430 = vector.broadcast %cst_162 : f32 to vector<2x32xf32>
    %431 = arith.mulf %430, %429 : vector<2x32xf32>
    %432 = arith.mulf %421, %251 : vector<2x32xf32>
    %433 = arith.mulf %413, %423 : vector<2x32xf32>
    %434 = arith.addf %432, %433 : vector<2x32xf32>
    %435 = math.tanh %434 : vector<2x32xf32>
    %436 = arith.mulf %431, %435 : vector<2x32xf32>
    %cst_163 = arith.constant dense<0.000000e+00> : vector<2x44xf32>
    %437 = tpu.matmul %436, %8, %cst_163 {dimension_numbers = #tpu.dot_dimension_numbers<[1], [0], [0], [1], [0, 0, 1, 1], [], []>} : vector<2x32xf32>, vector<32x44xf32>, vector<2x44xf32> -> vector<2x44xf32>
    %438 = vector.broadcast %9 : vector<1x44xf32> to vector<2x44xf32>
    %439 = arith.addf %437, %438 : vector<2x44xf32>
    %440 = vector.extract_strided_slice %439 {offsets = [0, 0], sizes = [2, 14], strides = [1, 1]} : vector<2x44xf32> to vector<2x14xf32>
    %cst_164 = arith.constant dense<0.000000e+00> : vector<4x14xf32>
    %441 = tpu.matmul %19, %440, %cst_164 {dimension_numbers = #tpu.dot_dimension_numbers<[1], [0], [0], [1], [0, 0, 1, 1], [], []>} : vector<4x2xf32>, vector<2x14xf32>, vector<4x14xf32> -> vector<4x14xf32>
    %442 = vector.extract_strided_slice %439 {offsets = [0, 14], sizes = [2, 14], strides = [1, 1]} : vector<2x44xf32> to vector<2x14xf32>
    %cst_165 = arith.constant dense<0.000000e+00> : vector<4x14xf32>
    %443 = tpu.matmul %20, %442, %cst_165 {dimension_numbers = #tpu.dot_dimension_numbers<[1], [0], [0], [1], [0, 0, 1, 1], [], []>} : vector<4x2xf32>, vector<2x14xf32>, vector<4x14xf32> -> vector<4x14xf32>
    %444 = arith.addf %441, %443 : vector<4x14xf32>
    %445 = vector.extract_strided_slice %444 {offsets = [0, 0], sizes = [4, 8], strides = [1, 1]} : vector<4x14xf32> to vector<4x8xf32>
    %cst_166 = arith.constant 1.000000e-16 : f32
    %446 = vector.broadcast %cst_166 : f32 to vector<4x8xf32>
    %447 = arith.addf %445, %446 : vector<4x8xf32>
    %448 = vector.extract_strided_slice %444 {offsets = [0, 8], sizes = [4, 1], strides = [1, 1]} : vector<4x14xf32> to vector<4x1xf32>
    %cst_167 = arith.constant 2.000000e+01 : f32
    %449 = vector.broadcast %cst_167 : f32 to vector<4x1xf32>
    %450 = arith.cmpf ogt, %448, %449 : vector<4x1xf32>
    %cst_168 = arith.constant 2.000000e+01 : f32
    %451 = vector.broadcast %cst_168 : f32 to vector<4x1xf32>
    %452 = arith.minimumf %448, %451 : vector<4x1xf32>
    %453 = math.exp %452 : vector<4x1xf32>
    %cst_169 = arith.constant 1.000000e+00 : f32
    %454 = vector.broadcast %cst_169 : f32 to vector<4x1xf32>
    %455 = arith.addf %454, %453 : vector<4x1xf32>
    %456 = math.log %455 : vector<4x1xf32>
    %457 = arith.select %450, %448, %456 : vector<4x1xi1>, vector<4x1xf32>
    %458 = vector.extract_strided_slice %444 {offsets = [0, 9], sizes = [4, 1], strides = [1, 1]} : vector<4x14xf32> to vector<4x1xf32>
    %cst_170 = arith.constant 5.000000e-01 : f32
    %459 = vector.broadcast %cst_170 : f32 to vector<4x1xf32>
    %460 = arith.mulf %459, %458 : vector<4x1xf32>
    %461 = math.tanh %460 : vector<4x1xf32>
    %cst_171 = arith.constant 1.000000e+00 : f32
    %462 = vector.broadcast %cst_171 : f32 to vector<4x1xf32>
    %463 = arith.addf %461, %462 : vector<4x1xf32>
    %cst_172 = arith.constant 5.000000e-01 : f32
    %464 = vector.broadcast %cst_172 : f32 to vector<4x1xf32>
    %465 = arith.mulf %464, %463 : vector<4x1xf32>
    %466 = vector.extract_strided_slice %444 {offsets = [0, 10], sizes = [4, 3], strides = [1, 1]} : vector<4x14xf32> to vector<4x3xf32>
    %cst_173 = arith.constant dense<0xFF800000> : vector<4xf32>
    %467 = vector.multi_reduction <maximumf>, %466, %cst_173 [1] : vector<4x3xf32> to vector<4xf32>
    %468 = vector.shape_cast %467 : vector<4xf32> to vector<4x1xf32>
    %469 = vector.broadcast %468 : vector<4x1xf32> to vector<4x3xf32>
    %470 = arith.subf %466, %469 : vector<4x3xf32>
    %471 = math.exp %470 : vector<4x3xf32>
    %cst_174 = arith.constant dense<0.000000e+00> : vector<4xf32>
    %472 = vector.multi_reduction <add>, %471, %cst_174 [1] : vector<4x3xf32> to vector<4xf32>
    %473 = vector.shape_cast %472 : vector<4xf32> to vector<4x1xf32>
    %474 = vector.broadcast %473 : vector<4x1xf32> to vector<4x3xf32>
    %475 = arith.divf %471, %474 : vector<4x3xf32>
    %476 = vector.extract_strided_slice %444 {offsets = [0, 13], sizes = [4, 1], strides = [1, 1]} : vector<4x14xf32> to vector<4x1xf32>
    %cst_175 = arith.constant 2.000000e+01 : f32
    %477 = vector.broadcast %cst_175 : f32 to vector<4x1xf32>
    %478 = arith.cmpf ogt, %476, %477 : vector<4x1xf32>
    %cst_176 = arith.constant 2.000000e+01 : f32
    %479 = vector.broadcast %cst_176 : f32 to vector<4x1xf32>
    %480 = arith.minimumf %476, %479 : vector<4x1xf32>
    %481 = math.exp %480 : vector<4x1xf32>
    %cst_177 = arith.constant 1.000000e+00 : f32
    %482 = vector.broadcast %cst_177 : f32 to vector<4x1xf32>
    %483 = arith.addf %482, %481 : vector<4x1xf32>
    %484 = math.log %483 : vector<4x1xf32>
    %485 = arith.select %478, %476, %484 : vector<4x1xi1>, vector<4x1xf32>
    %cst_178 = arith.constant 1.000000e+00 : f32
    %486 = vector.broadcast %cst_178 : f32 to vector<4x1xf32>
    %487 = arith.addf %486, %485 : vector<4x1xf32>
    %cst_179 = arith.constant 1.000000e-16 : f32
    %488 = vector.broadcast %cst_179 : f32 to vector<2x128xf32>
    %489 = arith.addf %391, %488 : vector<2x128xf32>
    %cst_180 = arith.constant dense<0.000000e+00> : vector<4x128xf32>
    %490 = tpu.matmul %21, %489, %cst_180 {dimension_numbers = #tpu.dot_dimension_numbers<[1], [0], [0], [1], [0, 0, 1, 1], [], []>} : vector<4x2xf32>, vector<2x128xf32>, vector<4x128xf32> -> vector<4x128xf32>
    %cst_181 = arith.constant dense<0.000000e+00> : vector<4x128xf32>
    %491 = tpu.matmul %447, %15, %cst_181 {dimension_numbers = #tpu.dot_dimension_numbers<[1], [0], [0], [1], [0, 0, 1, 1], [], []>} : vector<4x8xf32>, vector<8x128xf32>, vector<4x128xf32> -> vector<4x128xf32>
    %492 = arith.mulf %490, %491 : vector<4x128xf32>
    %cst_182 = arith.constant dense<0.000000e+00> : vector<4x16xf32>
    %493 = tpu.matmul %492, %16, %cst_182 {dimension_numbers = #tpu.dot_dimension_numbers<[1], [0], [0], [1], [0, 0, 1, 1], [], []>} : vector<4x128xf32>, vector<128x16xf32>, vector<4x16xf32> -> vector<4x16xf32>
    %494 = arith.mulf %490, %490 : vector<4x128xf32>
    %cst_183 = arith.constant dense<0.000000e+00> : vector<4x16xf32>
    %495 = tpu.matmul %494, %16, %cst_183 {dimension_numbers = #tpu.dot_dimension_numbers<[1], [0], [0], [1], [0, 0, 1, 1], [], []>} : vector<4x128xf32>, vector<128x16xf32>, vector<4x16xf32> -> vector<4x16xf32>
    %496 = arith.mulf %447, %447 : vector<4x8xf32>
    %cst_184 = arith.constant dense<0.000000e+00> : vector<4xf32>
    %497 = vector.multi_reduction <add>, %496, %cst_184 [1] : vector<4x8xf32> to vector<4xf32>
    %498 = vector.shape_cast %497 : vector<4xf32> to vector<4x1xf32>
    %cst_185 = arith.constant 1.000000e-16 : f32
    %499 = vector.broadcast %cst_185 : f32 to vector<4x16xf32>
    %500 = arith.maximumf %495, %499 : vector<4x16xf32>
    %cst_186 = arith.constant 1.000000e-16 : f32
    %501 = vector.broadcast %cst_186 : f32 to vector<4x1xf32>
    %502 = arith.maximumf %498, %501 : vector<4x1xf32>
    %503 = vector.broadcast %502 : vector<4x1xf32> to vector<4x16xf32>
    %504 = arith.mulf %500, %503 : vector<4x16xf32>
    %505 = math.rsqrt %504 : vector<4x16xf32>
    %506 = arith.mulf %493, %505 : vector<4x16xf32>
    %507 = vector.broadcast %457 : vector<4x1xf32> to vector<4x16xf32>
    %508 = arith.mulf %507, %506 : vector<4x16xf32>
    %cst_187 = arith.constant dense<0xFF800000> : vector<4xf32>
    %509 = vector.multi_reduction <maximumf>, %508, %cst_187 [1] : vector<4x16xf32> to vector<4xf32>
    %510 = vector.shape_cast %509 : vector<4xf32> to vector<4x1xf32>
    %511 = vector.broadcast %510 : vector<4x1xf32> to vector<4x16xf32>
    %512 = arith.subf %508, %511 : vector<4x16xf32>
    %513 = math.exp %512 : vector<4x16xf32>
    %cst_188 = arith.constant dense<0.000000e+00> : vector<4xf32>
    %514 = vector.multi_reduction <add>, %513, %cst_188 [1] : vector<4x16xf32> to vector<4xf32>
    %515 = vector.shape_cast %514 : vector<4xf32> to vector<4x1xf32>
    %516 = vector.broadcast %515 : vector<4x1xf32> to vector<4x16xf32>
    %517 = arith.divf %513, %516 : vector<4x16xf32>
    %518 = vector.broadcast %465 : vector<4x1xf32> to vector<4x16xf32>
    %519 = arith.mulf %518, %517 : vector<4x16xf32>
    %cst_189 = arith.constant 1.000000e+00 : f32
    %520 = vector.broadcast %cst_189 : f32 to vector<4x1xf32>
    %521 = arith.subf %520, %465 : vector<4x1xf32>
    %522 = vector.broadcast %521 : vector<4x1xf32> to vector<4x16xf32>
    %523 = arith.mulf %522, %368 : vector<4x16xf32>
    %524 = arith.addf %519, %523 : vector<4x16xf32>
    %cst_190 = arith.constant dense<0.000000e+00> : vector<4x48xf32>
    %525 = tpu.matmul %524, %14, %cst_190 {dimension_numbers = #tpu.dot_dimension_numbers<[1], [0], [0], [1], [0, 0, 1, 1], [], []>} : vector<4x16xf32>, vector<16x48xf32>, vector<4x48xf32> -> vector<4x48xf32>
    %526 = vector.extract_strided_slice %475 {offsets = [0, 0], sizes = [4, 1], strides = [1, 1]} : vector<4x3xf32> to vector<4x1xf32>
    %527 = vector.extract_strided_slice %525 {offsets = [0, 0], sizes = [4, 16], strides = [1, 1]} : vector<4x48xf32> to vector<4x16xf32>
    %528 = vector.broadcast %526 : vector<4x1xf32> to vector<4x16xf32>
    %529 = arith.mulf %528, %527 : vector<4x16xf32>
    %530 = vector.extract_strided_slice %475 {offsets = [0, 1], sizes = [4, 1], strides = [1, 1]} : vector<4x3xf32> to vector<4x1xf32>
    %531 = vector.extract_strided_slice %525 {offsets = [0, 16], sizes = [4, 16], strides = [1, 1]} : vector<4x48xf32> to vector<4x16xf32>
    %532 = vector.broadcast %530 : vector<4x1xf32> to vector<4x16xf32>
    %533 = arith.mulf %532, %531 : vector<4x16xf32>
    %534 = arith.addf %529, %533 : vector<4x16xf32>
    %535 = vector.extract_strided_slice %475 {offsets = [0, 2], sizes = [4, 1], strides = [1, 1]} : vector<4x3xf32> to vector<4x1xf32>
    %536 = vector.extract_strided_slice %525 {offsets = [0, 32], sizes = [4, 16], strides = [1, 1]} : vector<4x48xf32> to vector<4x16xf32>
    %537 = vector.broadcast %535 : vector<4x1xf32> to vector<4x16xf32>
    %538 = arith.mulf %537, %536 : vector<4x16xf32>
    %539 = arith.addf %534, %538 : vector<4x16xf32>
    %cst_191 = arith.constant 1.000000e-30 : f32
    %540 = vector.broadcast %cst_191 : f32 to vector<4x16xf32>
    %541 = arith.maximumf %539, %540 : vector<4x16xf32>
    %542 = math.log %541 : vector<4x16xf32>
    %543 = vector.broadcast %487 : vector<4x1xf32> to vector<4x16xf32>
    %544 = arith.mulf %543, %542 : vector<4x16xf32>
    %545 = math.exp %544 : vector<4x16xf32>
    %cst_192 = arith.constant dense<0.000000e+00> : vector<4xf32>
    %546 = vector.multi_reduction <add>, %545, %cst_192 [1] : vector<4x16xf32> to vector<4xf32>
    %547 = vector.shape_cast %546 : vector<4xf32> to vector<4x1xf32>
    %cst_193 = arith.constant 1.000000e-16 : f32
    %548 = vector.broadcast %cst_193 : f32 to vector<4x1xf32>
    %549 = arith.addf %547, %548 : vector<4x1xf32>
    %550 = vector.broadcast %549 : vector<4x1xf32> to vector<4x16xf32>
    %551 = arith.divf %545, %550 : vector<4x16xf32>
    %cst_194 = arith.constant dense<0.000000e+00> : vector<2x16xf32>
    %552 = tpu.matmul %22, %551, %cst_194 {dimension_numbers = #tpu.dot_dimension_numbers<[1], [0], [0], [1], [0, 0, 1, 1], [], []>} : vector<2x4xf32>, vector<4x16xf32>, vector<2x16xf32> -> vector<2x16xf32>
    %cst_195 = arith.constant dense<0.000000e+00> : vector<2x16xf32>
    %553 = tpu.matmul %23, %551, %cst_195 {dimension_numbers = #tpu.dot_dimension_numbers<[1], [0], [0], [1], [0, 0, 1, 1], [], []>} : vector<2x4xf32>, vector<4x16xf32>, vector<2x16xf32> -> vector<2x16xf32>
    %cst_196 = arith.constant dense<0.000000e+00> : vector<2x128xf32>
    %554 = tpu.matmul %552, %17, %cst_196 {dimension_numbers = #tpu.dot_dimension_numbers<[1], [0], [0], [1], [0, 0, 1, 1], [], []>} : vector<2x16xf32>, vector<16x128xf32>, vector<2x128xf32> -> vector<2x128xf32>
    %555 = arith.mulf %554, %391 : vector<2x128xf32>
    %cst_197 = arith.constant dense<0.000000e+00> : vector<2x8xf32>
    %556 = tpu.matmul %555, %18, %cst_197 {dimension_numbers = #tpu.dot_dimension_numbers<[1], [0], [0], [1], [0, 0, 1, 1], [], []>} : vector<2x128xf32>, vector<128x8xf32>, vector<2x8xf32> -> vector<2x8xf32>
    %557 = vector.extract_strided_slice %439 {offsets = [0, 28], sizes = [2, 8], strides = [1, 1]} : vector<2x44xf32> to vector<2x8xf32>
    %cst_198 = arith.constant 5.000000e-01 : f32
    %558 = vector.broadcast %cst_198 : f32 to vector<2x8xf32>
    %559 = arith.mulf %558, %557 : vector<2x8xf32>
    %560 = math.tanh %559 : vector<2x8xf32>
    %cst_199 = arith.constant 1.000000e+00 : f32
    %561 = vector.broadcast %cst_199 : f32 to vector<2x8xf32>
    %562 = arith.addf %560, %561 : vector<2x8xf32>
    %cst_200 = arith.constant 5.000000e-01 : f32
    %563 = vector.broadcast %cst_200 : f32 to vector<2x8xf32>
    %564 = arith.mulf %563, %562 : vector<2x8xf32>
    %565 = vector.extract_strided_slice %439 {offsets = [0, 36], sizes = [2, 8], strides = [1, 1]} : vector<2x44xf32> to vector<2x8xf32>
    %cst_201 = arith.constant dense<0.000000e+00> : vector<2x128xf32>
    %566 = tpu.matmul %553, %17, %cst_201 {dimension_numbers = #tpu.dot_dimension_numbers<[1], [0], [0], [1], [0, 0, 1, 1], [], []>} : vector<2x16xf32>, vector<16x128xf32>, vector<2x128xf32> -> vector<2x128xf32>
    %cst_202 = arith.constant dense<0.000000e+00> : vector<2x128xf32>
    %567 = tpu.matmul %564, %15, %cst_202 {dimension_numbers = #tpu.dot_dimension_numbers<[1], [0], [0], [1], [0, 0, 1, 1], [], []>} : vector<2x8xf32>, vector<8x128xf32>, vector<2x128xf32> -> vector<2x128xf32>
    %568 = arith.mulf %566, %567 : vector<2x128xf32>
    %cst_203 = arith.constant 1.000000e+00 : f32
    %569 = vector.broadcast %cst_203 : f32 to vector<2x128xf32>
    %570 = arith.subf %569, %568 : vector<2x128xf32>
    %571 = arith.mulf %391, %570 : vector<2x128xf32>
    %cst_204 = arith.constant dense<0.000000e+00> : vector<2x128xf32>
    %572 = tpu.matmul %565, %15, %cst_204 {dimension_numbers = #tpu.dot_dimension_numbers<[1], [0], [0], [1], [0, 0, 1, 1], [], []>} : vector<2x8xf32>, vector<8x128xf32>, vector<2x128xf32> -> vector<2x128xf32>
    %573 = arith.mulf %566, %572 : vector<2x128xf32>
    %574 = arith.addf %571, %573 : vector<2x128xf32>
    %cst_205 = arith.constant dense<0.000000e+00> : vector<2x8xf32>
    %575 = tpu.matmul %436, %11, %cst_205 {dimension_numbers = #tpu.dot_dimension_numbers<[1], [0], [0], [1], [0, 0, 1, 1], [], []>} : vector<2x32xf32>, vector<32x8xf32>, vector<2x8xf32> -> vector<2x8xf32>
    %cst_206 = arith.constant dense<0.000000e+00> : vector<2x8xf32>
    %576 = tpu.matmul %556, %12, %cst_206 {dimension_numbers = #tpu.dot_dimension_numbers<[1], [0], [0], [1], [0, 0, 1, 1], [], []>} : vector<2x8xf32>, vector<8x8xf32>, vector<2x8xf32> -> vector<2x8xf32>
    %577 = arith.addf %575, %576 : vector<2x8xf32>
    %578 = vector.broadcast %13 : vector<1x8xf32> to vector<2x8xf32>
    %579 = arith.addf %577, %578 : vector<2x8xf32>
    %c0_207 = arith.constant 0 : index
    %c16 = arith.constant 16 : index
    %580 = vector.load %arg18[%c0_207, %c16] : memref<2x64xf32, #tpu.memory_space<vmem>>, vector<2x8xf32>
    tpu.vector_store %arg18[%c0_207, %c16], %579 {strides = array<i32>} : memref<2x64xf32, #tpu.memory_space<vmem>>, vector<2x8xf32>,
    %581 = vector.extract_strided_slice %0 {offsets = [0, 24], sizes = [2, 8], strides = [1, 1]} : vector<2x64xf32> to vector<2x8xf32>
    %cst_208 = arith.constant dense<0.000000e+00> : vector<2x128xf32>
    %582 = tpu.matmul %581, %4, %cst_208 {dimension_numbers = #tpu.dot_dimension_numbers<[1], [0], [0], [1], [0, 0, 1, 1], [], []>} : vector<2x8xf32>, vector<8x128xf32>, vector<2x128xf32> -> vector<2x128xf32>
    %cst_209 = arith.constant dense<0.000000e+00> : vector<2x128xf32>
    %583 = tpu.matmul %556, %5, %cst_209 {dimension_numbers = #tpu.dot_dimension_numbers<[1], [0], [0], [1], [0, 0, 1, 1], [], []>} : vector<2x8xf32>, vector<8x128xf32>, vector<2x128xf32> -> vector<2x128xf32>
    %584 = arith.addf %582, %583 : vector<2x128xf32>
    %cst_210 = arith.constant dense<0.000000e+00> : vector<2x128xf32>
    %585 = tpu.matmul %436, %6, %cst_210 {dimension_numbers = #tpu.dot_dimension_numbers<[1], [0], [0], [1], [0, 0, 1, 1], [], []>} : vector<2x32xf32>, vector<32x128xf32>, vector<2x128xf32> -> vector<2x128xf32>
    %586 = arith.addf %584, %585 : vector<2x128xf32>
    %587 = vector.broadcast %7 : vector<1x128xf32> to vector<2x128xf32>
    %588 = arith.addf %586, %587 : vector<2x128xf32>
    %589 = vector.extract_strided_slice %588 {offsets = [0, 0], sizes = [2, 32], strides = [1, 1]} : vector<2x128xf32> to vector<2x32xf32>
    %cst_211 = arith.constant 5.000000e-01 : f32
    %590 = vector.broadcast %cst_211 : f32 to vector<2x32xf32>
    %591 = arith.mulf %590, %589 : vector<2x32xf32>
    %592 = math.tanh %591 : vector<2x32xf32>
    %cst_212 = arith.constant 1.000000e+00 : f32
    %593 = vector.broadcast %cst_212 : f32 to vector<2x32xf32>
    %594 = arith.addf %592, %593 : vector<2x32xf32>
    %cst_213 = arith.constant 5.000000e-01 : f32
    %595 = vector.broadcast %cst_213 : f32 to vector<2x32xf32>
    %596 = arith.mulf %595, %594 : vector<2x32xf32>
    %597 = vector.extract_strided_slice %588 {offsets = [0, 32], sizes = [2, 32], strides = [1, 1]} : vector<2x128xf32> to vector<2x32xf32>
    %cst_214 = arith.constant 5.000000e-01 : f32
    %598 = vector.broadcast %cst_214 : f32 to vector<2x32xf32>
    %599 = arith.mulf %598, %597 : vector<2x32xf32>
    %600 = math.tanh %599 : vector<2x32xf32>
    %cst_215 = arith.constant 1.000000e+00 : f32
    %601 = vector.broadcast %cst_215 : f32 to vector<2x32xf32>
    %602 = arith.addf %600, %601 : vector<2x32xf32>
    %cst_216 = arith.constant 5.000000e-01 : f32
    %603 = vector.broadcast %cst_216 : f32 to vector<2x32xf32>
    %604 = arith.mulf %603, %602 : vector<2x32xf32>
    %605 = vector.extract_strided_slice %588 {offsets = [0, 64], sizes = [2, 32], strides = [1, 1]} : vector<2x128xf32> to vector<2x32xf32>
    %606 = math.tanh %605 : vector<2x32xf32>
    %607 = vector.extract_strided_slice %588 {offsets = [0, 96], sizes = [2, 32], strides = [1, 1]} : vector<2x128xf32> to vector<2x32xf32>
    %cst_217 = arith.constant 5.000000e-01 : f32
    %608 = vector.broadcast %cst_217 : f32 to vector<2x32xf32>
    %609 = arith.mulf %608, %607 : vector<2x32xf32>
    %610 = math.tanh %609 : vector<2x32xf32>
    %cst_218 = arith.constant 1.000000e+00 : f32
    %611 = vector.broadcast %cst_218 : f32 to vector<2x32xf32>
    %612 = arith.addf %610, %611 : vector<2x32xf32>
    %cst_219 = arith.constant 5.000000e-01 : f32
    %613 = vector.broadcast %cst_219 : f32 to vector<2x32xf32>
    %614 = arith.mulf %613, %612 : vector<2x32xf32>
    %615 = arith.mulf %604, %434 : vector<2x32xf32>
    %616 = arith.mulf %596, %606 : vector<2x32xf32>
    %617 = arith.addf %615, %616 : vector<2x32xf32>
    %618 = math.tanh %617 : vector<2x32xf32>
    %619 = arith.mulf %614, %618 : vector<2x32xf32>
    %cst_220 = arith.constant dense<0.000000e+00> : vector<2x44xf32>
    %620 = tpu.matmul %619, %8, %cst_220 {dimension_numbers = #tpu.dot_dimension_numbers<[1], [0], [0], [1], [0, 0, 1, 1], [], []>} : vector<2x32xf32>, vector<32x44xf32>, vector<2x44xf32> -> vector<2x44xf32>
    %621 = vector.broadcast %9 : vector<1x44xf32> to vector<2x44xf32>
    %622 = arith.addf %620, %621 : vector<2x44xf32>
    %623 = vector.extract_strided_slice %622 {offsets = [0, 0], sizes = [2, 14], strides = [1, 1]} : vector<2x44xf32> to vector<2x14xf32>
    %cst_221 = arith.constant dense<0.000000e+00> : vector<4x14xf32>
    %624 = tpu.matmul %19, %623, %cst_221 {dimension_numbers = #tpu.dot_dimension_numbers<[1], [0], [0], [1], [0, 0, 1, 1], [], []>} : vector<4x2xf32>, vector<2x14xf32>, vector<4x14xf32> -> vector<4x14xf32>
    %625 = vector.extract_strided_slice %622 {offsets = [0, 14], sizes = [2, 14], strides = [1, 1]} : vector<2x44xf32> to vector<2x14xf32>
    %cst_222 = arith.constant dense<0.000000e+00> : vector<4x14xf32>
    %626 = tpu.matmul %20, %625, %cst_222 {dimension_numbers = #tpu.dot_dimension_numbers<[1], [0], [0], [1], [0, 0, 1, 1], [], []>} : vector<4x2xf32>, vector<2x14xf32>, vector<4x14xf32> -> vector<4x14xf32>
    %627 = arith.addf %624, %626 : vector<4x14xf32>
    %628 = vector.extract_strided_slice %627 {offsets = [0, 0], sizes = [4, 8], strides = [1, 1]} : vector<4x14xf32> to vector<4x8xf32>
    %cst_223 = arith.constant 1.000000e-16 : f32
    %629 = vector.broadcast %cst_223 : f32 to vector<4x8xf32>
    %630 = arith.addf %628, %629 : vector<4x8xf32>
    %631 = vector.extract_strided_slice %627 {offsets = [0, 8], sizes = [4, 1], strides = [1, 1]} : vector<4x14xf32> to vector<4x1xf32>
    %cst_224 = arith.constant 2.000000e+01 : f32
    %632 = vector.broadcast %cst_224 : f32 to vector<4x1xf32>
    %633 = arith.cmpf ogt, %631, %632 : vector<4x1xf32>
    %cst_225 = arith.constant 2.000000e+01 : f32
    %634 = vector.broadcast %cst_225 : f32 to vector<4x1xf32>
    %635 = arith.minimumf %631, %634 : vector<4x1xf32>
    %636 = math.exp %635 : vector<4x1xf32>
    %cst_226 = arith.constant 1.000000e+00 : f32
    %637 = vector.broadcast %cst_226 : f32 to vector<4x1xf32>
    %638 = arith.addf %637, %636 : vector<4x1xf32>
    %639 = math.log %638 : vector<4x1xf32>
    %640 = arith.select %633, %631, %639 : vector<4x1xi1>, vector<4x1xf32>
    %641 = vector.extract_strided_slice %627 {offsets = [0, 9], sizes = [4, 1], strides = [1, 1]} : vector<4x14xf32> to vector<4x1xf32>
    %cst_227 = arith.constant 5.000000e-01 : f32
    %642 = vector.broadcast %cst_227 : f32 to vector<4x1xf32>
    %643 = arith.mulf %642, %641 : vector<4x1xf32>
    %644 = math.tanh %643 : vector<4x1xf32>
    %cst_228 = arith.constant 1.000000e+00 : f32
    %645 = vector.broadcast %cst_228 : f32 to vector<4x1xf32>
    %646 = arith.addf %644, %645 : vector<4x1xf32>
    %cst_229 = arith.constant 5.000000e-01 : f32
    %647 = vector.broadcast %cst_229 : f32 to vector<4x1xf32>
    %648 = arith.mulf %647, %646 : vector<4x1xf32>
    %649 = vector.extract_strided_slice %627 {offsets = [0, 10], sizes = [4, 3], strides = [1, 1]} : vector<4x14xf32> to vector<4x3xf32>
    %cst_230 = arith.constant dense<0xFF800000> : vector<4xf32>
    %650 = vector.multi_reduction <maximumf>, %649, %cst_230 [1] : vector<4x3xf32> to vector<4xf32>
    %651 = vector.shape_cast %650 : vector<4xf32> to vector<4x1xf32>
    %652 = vector.broadcast %651 : vector<4x1xf32> to vector<4x3xf32>
    %653 = arith.subf %649, %652 : vector<4x3xf32>
    %654 = math.exp %653 : vector<4x3xf32>
    %cst_231 = arith.constant dense<0.000000e+00> : vector<4xf32>
    %655 = vector.multi_reduction <add>, %654, %cst_231 [1] : vector<4x3xf32> to vector<4xf32>
    %656 = vector.shape_cast %655 : vector<4xf32> to vector<4x1xf32>
    %657 = vector.broadcast %656 : vector<4x1xf32> to vector<4x3xf32>
    %658 = arith.divf %654, %657 : vector<4x3xf32>
    %659 = vector.extract_strided_slice %627 {offsets = [0, 13], sizes = [4, 1], strides = [1, 1]} : vector<4x14xf32> to vector<4x1xf32>
    %cst_232 = arith.constant 2.000000e+01 : f32
    %660 = vector.broadcast %cst_232 : f32 to vector<4x1xf32>
    %661 = arith.cmpf ogt, %659, %660 : vector<4x1xf32>
    %cst_233 = arith.constant 2.000000e+01 : f32
    %662 = vector.broadcast %cst_233 : f32 to vector<4x1xf32>
    %663 = arith.minimumf %659, %662 : vector<4x1xf32>
    %664 = math.exp %663 : vector<4x1xf32>
    %cst_234 = arith.constant 1.000000e+00 : f32
    %665 = vector.broadcast %cst_234 : f32 to vector<4x1xf32>
    %666 = arith.addf %665, %664 : vector<4x1xf32>
    %667 = math.log %666 : vector<4x1xf32>
    %668 = arith.select %661, %659, %667 : vector<4x1xi1>, vector<4x1xf32>
    %cst_235 = arith.constant 1.000000e+00 : f32
    %669 = vector.broadcast %cst_235 : f32 to vector<4x1xf32>
    %670 = arith.addf %669, %668 : vector<4x1xf32>
    %cst_236 = arith.constant 1.000000e-16 : f32
    %671 = vector.broadcast %cst_236 : f32 to vector<2x128xf32>
    %672 = arith.addf %574, %671 : vector<2x128xf32>
    %cst_237 = arith.constant dense<0.000000e+00> : vector<4x128xf32>
    %673 = tpu.matmul %21, %672, %cst_237 {dimension_numbers = #tpu.dot_dimension_numbers<[1], [0], [0], [1], [0, 0, 1, 1], [], []>} : vector<4x2xf32>, vector<2x128xf32>, vector<4x128xf32> -> vector<4x128xf32>
    %cst_238 = arith.constant dense<0.000000e+00> : vector<4x128xf32>
    %674 = tpu.matmul %630, %15, %cst_238 {dimension_numbers = #tpu.dot_dimension_numbers<[1], [0], [0], [1], [0, 0, 1, 1], [], []>} : vector<4x8xf32>, vector<8x128xf32>, vector<4x128xf32> -> vector<4x128xf32>
    %675 = arith.mulf %673, %674 : vector<4x128xf32>
    %cst_239 = arith.constant dense<0.000000e+00> : vector<4x16xf32>
    %676 = tpu.matmul %675, %16, %cst_239 {dimension_numbers = #tpu.dot_dimension_numbers<[1], [0], [0], [1], [0, 0, 1, 1], [], []>} : vector<4x128xf32>, vector<128x16xf32>, vector<4x16xf32> -> vector<4x16xf32>
    %677 = arith.mulf %673, %673 : vector<4x128xf32>
    %cst_240 = arith.constant dense<0.000000e+00> : vector<4x16xf32>
    %678 = tpu.matmul %677, %16, %cst_240 {dimension_numbers = #tpu.dot_dimension_numbers<[1], [0], [0], [1], [0, 0, 1, 1], [], []>} : vector<4x128xf32>, vector<128x16xf32>, vector<4x16xf32> -> vector<4x16xf32>
    %679 = arith.mulf %630, %630 : vector<4x8xf32>
    %cst_241 = arith.constant dense<0.000000e+00> : vector<4xf32>
    %680 = vector.multi_reduction <add>, %679, %cst_241 [1] : vector<4x8xf32> to vector<4xf32>
    %681 = vector.shape_cast %680 : vector<4xf32> to vector<4x1xf32>
    %cst_242 = arith.constant 1.000000e-16 : f32
    %682 = vector.broadcast %cst_242 : f32 to vector<4x16xf32>
    %683 = arith.maximumf %678, %682 : vector<4x16xf32>
    %cst_243 = arith.constant 1.000000e-16 : f32
    %684 = vector.broadcast %cst_243 : f32 to vector<4x1xf32>
    %685 = arith.maximumf %681, %684 : vector<4x1xf32>
    %686 = vector.broadcast %685 : vector<4x1xf32> to vector<4x16xf32>
    %687 = arith.mulf %683, %686 : vector<4x16xf32>
    %688 = math.rsqrt %687 : vector<4x16xf32>
    %689 = arith.mulf %676, %688 : vector<4x16xf32>
    %690 = vector.broadcast %640 : vector<4x1xf32> to vector<4x16xf32>
    %691 = arith.mulf %690, %689 : vector<4x16xf32>
    %cst_244 = arith.constant dense<0xFF800000> : vector<4xf32>
    %692 = vector.multi_reduction <maximumf>, %691, %cst_244 [1] : vector<4x16xf32> to vector<4xf32>
    %693 = vector.shape_cast %692 : vector<4xf32> to vector<4x1xf32>
    %694 = vector.broadcast %693 : vector<4x1xf32> to vector<4x16xf32>
    %695 = arith.subf %691, %694 : vector<4x16xf32>
    %696 = math.exp %695 : vector<4x16xf32>
    %cst_245 = arith.constant dense<0.000000e+00> : vector<4xf32>
    %697 = vector.multi_reduction <add>, %696, %cst_245 [1] : vector<4x16xf32> to vector<4xf32>
    %698 = vector.shape_cast %697 : vector<4xf32> to vector<4x1xf32>
    %699 = vector.broadcast %698 : vector<4x1xf32> to vector<4x16xf32>
    %700 = arith.divf %696, %699 : vector<4x16xf32>
    %701 = vector.broadcast %648 : vector<4x1xf32> to vector<4x16xf32>
    %702 = arith.mulf %701, %700 : vector<4x16xf32>
    %cst_246 = arith.constant 1.000000e+00 : f32
    %703 = vector.broadcast %cst_246 : f32 to vector<4x1xf32>
    %704 = arith.subf %703, %648 : vector<4x1xf32>
    %705 = vector.broadcast %704 : vector<4x1xf32> to vector<4x16xf32>
    %706 = arith.mulf %705, %551 : vector<4x16xf32>
    %707 = arith.addf %702, %706 : vector<4x16xf32>
    %cst_247 = arith.constant dense<0.000000e+00> : vector<4x48xf32>
    %708 = tpu.matmul %707, %14, %cst_247 {dimension_numbers = #tpu.dot_dimension_numbers<[1], [0], [0], [1], [0, 0, 1, 1], [], []>} : vector<4x16xf32>, vector<16x48xf32>, vector<4x48xf32> -> vector<4x48xf32>
    %709 = vector.extract_strided_slice %658 {offsets = [0, 0], sizes = [4, 1], strides = [1, 1]} : vector<4x3xf32> to vector<4x1xf32>
    %710 = vector.extract_strided_slice %708 {offsets = [0, 0], sizes = [4, 16], strides = [1, 1]} : vector<4x48xf32> to vector<4x16xf32>
    %711 = vector.broadcast %709 : vector<4x1xf32> to vector<4x16xf32>
    %712 = arith.mulf %711, %710 : vector<4x16xf32>
    %713 = vector.extract_strided_slice %658 {offsets = [0, 1], sizes = [4, 1], strides = [1, 1]} : vector<4x3xf32> to vector<4x1xf32>
    %714 = vector.extract_strided_slice %708 {offsets = [0, 16], sizes = [4, 16], strides = [1, 1]} : vector<4x48xf32> to vector<4x16xf32>
    %715 = vector.broadcast %713 : vector<4x1xf32> to vector<4x16xf32>
    %716 = arith.mulf %715, %714 : vector<4x16xf32>
    %717 = arith.addf %712, %716 : vector<4x16xf32>
    %718 = vector.extract_strided_slice %658 {offsets = [0, 2], sizes = [4, 1], strides = [1, 1]} : vector<4x3xf32> to vector<4x1xf32>
    %719 = vector.extract_strided_slice %708 {offsets = [0, 32], sizes = [4, 16], strides = [1, 1]} : vector<4x48xf32> to vector<4x16xf32>
    %720 = vector.broadcast %718 : vector<4x1xf32> to vector<4x16xf32>
    %721 = arith.mulf %720, %719 : vector<4x16xf32>
    %722 = arith.addf %717, %721 : vector<4x16xf32>
    %cst_248 = arith.constant 1.000000e-30 : f32
    %723 = vector.broadcast %cst_248 : f32 to vector<4x16xf32>
    %724 = arith.maximumf %722, %723 : vector<4x16xf32>
    %725 = math.log %724 : vector<4x16xf32>
    %726 = vector.broadcast %670 : vector<4x1xf32> to vector<4x16xf32>
    %727 = arith.mulf %726, %725 : vector<4x16xf32>
    %728 = math.exp %727 : vector<4x16xf32>
    %cst_249 = arith.constant dense<0.000000e+00> : vector<4xf32>
    %729 = vector.multi_reduction <add>, %728, %cst_249 [1] : vector<4x16xf32> to vector<4xf32>
    %730 = vector.shape_cast %729 : vector<4xf32> to vector<4x1xf32>
    %cst_250 = arith.constant 1.000000e-16 : f32
    %731 = vector.broadcast %cst_250 : f32 to vector<4x1xf32>
    %732 = arith.addf %730, %731 : vector<4x1xf32>
    %733 = vector.broadcast %732 : vector<4x1xf32> to vector<4x16xf32>
    %734 = arith.divf %728, %733 : vector<4x16xf32>
    %cst_251 = arith.constant dense<0.000000e+00> : vector<2x16xf32>
    %735 = tpu.matmul %22, %734, %cst_251 {dimension_numbers = #tpu.dot_dimension_numbers<[1], [0], [0], [1], [0, 0, 1, 1], [], []>} : vector<2x4xf32>, vector<4x16xf32>, vector<2x16xf32> -> vector<2x16xf32>
    %cst_252 = arith.constant dense<0.000000e+00> : vector<2x16xf32>
    %736 = tpu.matmul %23, %734, %cst_252 {dimension_numbers = #tpu.dot_dimension_numbers<[1], [0], [0], [1], [0, 0, 1, 1], [], []>} : vector<2x4xf32>, vector<4x16xf32>, vector<2x16xf32> -> vector<2x16xf32>
    %cst_253 = arith.constant dense<0.000000e+00> : vector<2x128xf32>
    %737 = tpu.matmul %735, %17, %cst_253 {dimension_numbers = #tpu.dot_dimension_numbers<[1], [0], [0], [1], [0, 0, 1, 1], [], []>} : vector<2x16xf32>, vector<16x128xf32>, vector<2x128xf32> -> vector<2x128xf32>
    %738 = arith.mulf %737, %574 : vector<2x128xf32>
    %cst_254 = arith.constant dense<0.000000e+00> : vector<2x8xf32>
    %739 = tpu.matmul %738, %18, %cst_254 {dimension_numbers = #tpu.dot_dimension_numbers<[1], [0], [0], [1], [0, 0, 1, 1], [], []>} : vector<2x128xf32>, vector<128x8xf32>, vector<2x8xf32> -> vector<2x8xf32>
    %740 = vector.extract_strided_slice %622 {offsets = [0, 28], sizes = [2, 8], strides = [1, 1]} : vector<2x44xf32> to vector<2x8xf32>
    %cst_255 = arith.constant 5.000000e-01 : f32
    %741 = vector.broadcast %cst_255 : f32 to vector<2x8xf32>
    %742 = arith.mulf %741, %740 : vector<2x8xf32>
    %743 = math.tanh %742 : vector<2x8xf32>
    %cst_256 = arith.constant 1.000000e+00 : f32
    %744 = vector.broadcast %cst_256 : f32 to vector<2x8xf32>
    %745 = arith.addf %743, %744 : vector<2x8xf32>
    %cst_257 = arith.constant 5.000000e-01 : f32
    %746 = vector.broadcast %cst_257 : f32 to vector<2x8xf32>
    %747 = arith.mulf %746, %745 : vector<2x8xf32>
    %748 = vector.extract_strided_slice %622 {offsets = [0, 36], sizes = [2, 8], strides = [1, 1]} : vector<2x44xf32> to vector<2x8xf32>
    %cst_258 = arith.constant dense<0.000000e+00> : vector<2x128xf32>
    %749 = tpu.matmul %736, %17, %cst_258 {dimension_numbers = #tpu.dot_dimension_numbers<[1], [0], [0], [1], [0, 0, 1, 1], [], []>} : vector<2x16xf32>, vector<16x128xf32>, vector<2x128xf32> -> vector<2x128xf32>
    %cst_259 = arith.constant dense<0.000000e+00> : vector<2x128xf32>
    %750 = tpu.matmul %747, %15, %cst_259 {dimension_numbers = #tpu.dot_dimension_numbers<[1], [0], [0], [1], [0, 0, 1, 1], [], []>} : vector<2x8xf32>, vector<8x128xf32>, vector<2x128xf32> -> vector<2x128xf32>
    %751 = arith.mulf %749, %750 : vector<2x128xf32>
    %cst_260 = arith.constant 1.000000e+00 : f32
    %752 = vector.broadcast %cst_260 : f32 to vector<2x128xf32>
    %753 = arith.subf %752, %751 : vector<2x128xf32>
    %754 = arith.mulf %574, %753 : vector<2x128xf32>
    %cst_261 = arith.constant dense<0.000000e+00> : vector<2x128xf32>
    %755 = tpu.matmul %748, %15, %cst_261 {dimension_numbers = #tpu.dot_dimension_numbers<[1], [0], [0], [1], [0, 0, 1, 1], [], []>} : vector<2x8xf32>, vector<8x128xf32>, vector<2x128xf32> -> vector<2x128xf32>
    %756 = arith.mulf %749, %755 : vector<2x128xf32>
    %757 = arith.addf %754, %756 : vector<2x128xf32>
    %cst_262 = arith.constant dense<0.000000e+00> : vector<2x8xf32>
    %758 = tpu.matmul %619, %11, %cst_262 {dimension_numbers = #tpu.dot_dimension_numbers<[1], [0], [0], [1], [0, 0, 1, 1], [], []>} : vector<2x32xf32>, vector<32x8xf32>, vector<2x8xf32> -> vector<2x8xf32>
    %cst_263 = arith.constant dense<0.000000e+00> : vector<2x8xf32>
    %759 = tpu.matmul %739, %12, %cst_263 {dimension_numbers = #tpu.dot_dimension_numbers<[1], [0], [0], [1], [0, 0, 1, 1], [], []>} : vector<2x8xf32>, vector<8x8xf32>, vector<2x8xf32> -> vector<2x8xf32>
    %760 = arith.addf %758, %759 : vector<2x8xf32>
    %761 = vector.broadcast %13 : vector<1x8xf32> to vector<2x8xf32>
    %762 = arith.addf %760, %761 : vector<2x8xf32>
    %c0_264 = arith.constant 0 : index
    %c24 = arith.constant 24 : index
    %763 = vector.load %arg18[%c0_264, %c24] : memref<2x64xf32, #tpu.memory_space<vmem>>, vector<2x8xf32>
    tpu.vector_store %arg18[%c0_264, %c24], %762 {strides = array<i32>} : memref<2x64xf32, #tpu.memory_space<vmem>>, vector<2x8xf32>,
    %764 = vector.extract_strided_slice %0 {offsets = [0, 32], sizes = [2, 8], strides = [1, 1]} : vector<2x64xf32> to vector<2x8xf32>
    %cst_265 = arith.constant dense<0.000000e+00> : vector<2x128xf32>
    %765 = tpu.matmul %764, %4, %cst_265 {dimension_numbers = #tpu.dot_dimension_numbers<[1], [0], [0], [1], [0, 0, 1, 1], [], []>} : vector<2x8xf32>, vector<8x128xf32>, vector<2x128xf32> -> vector<2x128xf32>
    %cst_266 = arith.constant dense<0.000000e+00> : vector<2x128xf32>
    %766 = tpu.matmul %739, %5, %cst_266 {dimension_numbers = #tpu.dot_dimension_numbers<[1], [0], [0], [1], [0, 0, 1, 1], [], []>} : vector<2x8xf32>, vector<8x128xf32>, vector<2x128xf32> -> vector<2x128xf32>
    %767 = arith.addf %765, %766 : vector<2x128xf32>
    %cst_267 = arith.constant dense<0.000000e+00> : vector<2x128xf32>
    %768 = tpu.matmul %619, %6, %cst_267 {dimension_numbers = #tpu.dot_dimension_numbers<[1], [0], [0], [1], [0, 0, 1, 1], [], []>} : vector<2x32xf32>, vector<32x128xf32>, vector<2x128xf32> -> vector<2x128xf32>
    %769 = arith.addf %767, %768 : vector<2x128xf32>
    %770 = vector.broadcast %7 : vector<1x128xf32> to vector<2x128xf32>
    %771 = arith.addf %769, %770 : vector<2x128xf32>
    %772 = vector.extract_strided_slice %771 {offsets = [0, 0], sizes = [2, 32], strides = [1, 1]} : vector<2x128xf32> to vector<2x32xf32>
    %cst_268 = arith.constant 5.000000e-01 : f32
    %773 = vector.broadcast %cst_268 : f32 to vector<2x32xf32>
    %774 = arith.mulf %773, %772 : vector<2x32xf32>
    %775 = math.tanh %774 : vector<2x32xf32>
    %cst_269 = arith.constant 1.000000e+00 : f32
    %776 = vector.broadcast %cst_269 : f32 to vector<2x32xf32>
    %777 = arith.addf %775, %776 : vector<2x32xf32>
    %cst_270 = arith.constant 5.000000e-01 : f32
    %778 = vector.broadcast %cst_270 : f32 to vector<2x32xf32>
    %779 = arith.mulf %778, %777 : vector<2x32xf32>
    %780 = vector.extract_strided_slice %771 {offsets = [0, 32], sizes = [2, 32], strides = [1, 1]} : vector<2x128xf32> to vector<2x32xf32>
    %cst_271 = arith.constant 5.000000e-01 : f32
    %781 = vector.broadcast %cst_271 : f32 to vector<2x32xf32>
    %782 = arith.mulf %781, %780 : vector<2x32xf32>
    %783 = math.tanh %782 : vector<2x32xf32>
    %cst_272 = arith.constant 1.000000e+00 : f32
    %784 = vector.broadcast %cst_272 : f32 to vector<2x32xf32>
    %785 = arith.addf %783, %784 : vector<2x32xf32>
    %cst_273 = arith.constant 5.000000e-01 : f32
    %786 = vector.broadcast %cst_273 : f32 to vector<2x32xf32>
    %787 = arith.mulf %786, %785 : vector<2x32xf32>
    %788 = vector.extract_strided_slice %771 {offsets = [0, 64], sizes = [2, 32], strides = [1, 1]} : vector<2x128xf32> to vector<2x32xf32>
    %789 = math.tanh %788 : vector<2x32xf32>
    %790 = vector.extract_strided_slice %771 {offsets = [0, 96], sizes = [2, 32], strides = [1, 1]} : vector<2x128xf32> to vector<2x32xf32>
    %cst_274 = arith.constant 5.000000e-01 : f32
    %791 = vector.broadcast %cst_274 : f32 to vector<2x32xf32>
    %792 = arith.mulf %791, %790 : vector<2x32xf32>
    %793 = math.tanh %792 : vector<2x32xf32>
    %cst_275 = arith.constant 1.000000e+00 : f32
    %794 = vector.broadcast %cst_275 : f32 to vector<2x32xf32>
    %795 = arith.addf %793, %794 : vector<2x32xf32>
    %cst_276 = arith.constant 5.000000e-01 : f32
    %796 = vector.broadcast %cst_276 : f32 to vector<2x32xf32>
    %797 = arith.mulf %796, %795 : vector<2x32xf32>
    %798 = arith.mulf %787, %617 : vector<2x32xf32>
    %799 = arith.mulf %779, %789 : vector<2x32xf32>
    %800 = arith.addf %798, %799 : vector<2x32xf32>
    %801 = math.tanh %800 : vector<2x32xf32>
    %802 = arith.mulf %797, %801 : vector<2x32xf32>
    %cst_277 = arith.constant dense<0.000000e+00> : vector<2x44xf32>
    %803 = tpu.matmul %802, %8, %cst_277 {dimension_numbers = #tpu.dot_dimension_numbers<[1], [0], [0], [1], [0, 0, 1, 1], [], []>} : vector<2x32xf32>, vector<32x44xf32>, vector<2x44xf32> -> vector<2x44xf32>
    %804 = vector.broadcast %9 : vector<1x44xf32> to vector<2x44xf32>
    %805 = arith.addf %803, %804 : vector<2x44xf32>
    %806 = vector.extract_strided_slice %805 {offsets = [0, 0], sizes = [2, 14], strides = [1, 1]} : vector<2x44xf32> to vector<2x14xf32>
    %cst_278 = arith.constant dense<0.000000e+00> : vector<4x14xf32>
    %807 = tpu.matmul %19, %806, %cst_278 {dimension_numbers = #tpu.dot_dimension_numbers<[1], [0], [0], [1], [0, 0, 1, 1], [], []>} : vector<4x2xf32>, vector<2x14xf32>, vector<4x14xf32> -> vector<4x14xf32>
    %808 = vector.extract_strided_slice %805 {offsets = [0, 14], sizes = [2, 14], strides = [1, 1]} : vector<2x44xf32> to vector<2x14xf32>
    %cst_279 = arith.constant dense<0.000000e+00> : vector<4x14xf32>
    %809 = tpu.matmul %20, %808, %cst_279 {dimension_numbers = #tpu.dot_dimension_numbers<[1], [0], [0], [1], [0, 0, 1, 1], [], []>} : vector<4x2xf32>, vector<2x14xf32>, vector<4x14xf32> -> vector<4x14xf32>
    %810 = arith.addf %807, %809 : vector<4x14xf32>
    %811 = vector.extract_strided_slice %810 {offsets = [0, 0], sizes = [4, 8], strides = [1, 1]} : vector<4x14xf32> to vector<4x8xf32>
    %cst_280 = arith.constant 1.000000e-16 : f32
    %812 = vector.broadcast %cst_280 : f32 to vector<4x8xf32>
    %813 = arith.addf %811, %812 : vector<4x8xf32>
    %814 = vector.extract_strided_slice %810 {offsets = [0, 8], sizes = [4, 1], strides = [1, 1]} : vector<4x14xf32> to vector<4x1xf32>
    %cst_281 = arith.constant 2.000000e+01 : f32
    %815 = vector.broadcast %cst_281 : f32 to vector<4x1xf32>
    %816 = arith.cmpf ogt, %814, %815 : vector<4x1xf32>
    %cst_282 = arith.constant 2.000000e+01 : f32
    %817 = vector.broadcast %cst_282 : f32 to vector<4x1xf32>
    %818 = arith.minimumf %814, %817 : vector<4x1xf32>
    %819 = math.exp %818 : vector<4x1xf32>
    %cst_283 = arith.constant 1.000000e+00 : f32
    %820 = vector.broadcast %cst_283 : f32 to vector<4x1xf32>
    %821 = arith.addf %820, %819 : vector<4x1xf32>
    %822 = math.log %821 : vector<4x1xf32>
    %823 = arith.select %816, %814, %822 : vector<4x1xi1>, vector<4x1xf32>
    %824 = vector.extract_strided_slice %810 {offsets = [0, 9], sizes = [4, 1], strides = [1, 1]} : vector<4x14xf32> to vector<4x1xf32>
    %cst_284 = arith.constant 5.000000e-01 : f32
    %825 = vector.broadcast %cst_284 : f32 to vector<4x1xf32>
    %826 = arith.mulf %825, %824 : vector<4x1xf32>
    %827 = math.tanh %826 : vector<4x1xf32>
    %cst_285 = arith.constant 1.000000e+00 : f32
    %828 = vector.broadcast %cst_285 : f32 to vector<4x1xf32>
    %829 = arith.addf %827, %828 : vector<4x1xf32>
    %cst_286 = arith.constant 5.000000e-01 : f32
    %830 = vector.broadcast %cst_286 : f32 to vector<4x1xf32>
    %831 = arith.mulf %830, %829 : vector<4x1xf32>
    %832 = vector.extract_strided_slice %810 {offsets = [0, 10], sizes = [4, 3], strides = [1, 1]} : vector<4x14xf32> to vector<4x3xf32>
    %cst_287 = arith.constant dense<0xFF800000> : vector<4xf32>
    %833 = vector.multi_reduction <maximumf>, %832, %cst_287 [1] : vector<4x3xf32> to vector<4xf32>
    %834 = vector.shape_cast %833 : vector<4xf32> to vector<4x1xf32>
    %835 = vector.broadcast %834 : vector<4x1xf32> to vector<4x3xf32>
    %836 = arith.subf %832, %835 : vector<4x3xf32>
    %837 = math.exp %836 : vector<4x3xf32>
    %cst_288 = arith.constant dense<0.000000e+00> : vector<4xf32>
    %838 = vector.multi_reduction <add>, %837, %cst_288 [1] : vector<4x3xf32> to vector<4xf32>
    %839 = vector.shape_cast %838 : vector<4xf32> to vector<4x1xf32>
    %840 = vector.broadcast %839 : vector<4x1xf32> to vector<4x3xf32>
    %841 = arith.divf %837, %840 : vector<4x3xf32>
    %842 = vector.extract_strided_slice %810 {offsets = [0, 13], sizes = [4, 1], strides = [1, 1]} : vector<4x14xf32> to vector<4x1xf32>
    %cst_289 = arith.constant 2.000000e+01 : f32
    %843 = vector.broadcast %cst_289 : f32 to vector<4x1xf32>
    %844 = arith.cmpf ogt, %842, %843 : vector<4x1xf32>
    %cst_290 = arith.constant 2.000000e+01 : f32
    %845 = vector.broadcast %cst_290 : f32 to vector<4x1xf32>
    %846 = arith.minimumf %842, %845 : vector<4x1xf32>
    %847 = math.exp %846 : vector<4x1xf32>
    %cst_291 = arith.constant 1.000000e+00 : f32
    %848 = vector.broadcast %cst_291 : f32 to vector<4x1xf32>
    %849 = arith.addf %848, %847 : vector<4x1xf32>
    %850 = math.log %849 : vector<4x1xf32>
    %851 = arith.select %844, %842, %850 : vector<4x1xi1>, vector<4x1xf32>
    %cst_292 = arith.constant 1.000000e+00 : f32
    %852 = vector.broadcast %cst_292 : f32 to vector<4x1xf32>
    %853 = arith.addf %852, %851 : vector<4x1xf32>
    %cst_293 = arith.constant 1.000000e-16 : f32
    %854 = vector.broadcast %cst_293 : f32 to vector<2x128xf32>
    %855 = arith.addf %757, %854 : vector<2x128xf32>
    %cst_294 = arith.constant dense<0.000000e+00> : vector<4x128xf32>
    %856 = tpu.matmul %21, %855, %cst_294 {dimension_numbers = #tpu.dot_dimension_numbers<[1], [0], [0], [1], [0, 0, 1, 1], [], []>} : vector<4x2xf32>, vector<2x128xf32>, vector<4x128xf32> -> vector<4x128xf32>
    %cst_295 = arith.constant dense<0.000000e+00> : vector<4x128xf32>
    %857 = tpu.matmul %813, %15, %cst_295 {dimension_numbers = #tpu.dot_dimension_numbers<[1], [0], [0], [1], [0, 0, 1, 1], [], []>} : vector<4x8xf32>, vector<8x128xf32>, vector<4x128xf32> -> vector<4x128xf32>
    %858 = arith.mulf %856, %857 : vector<4x128xf32>
    %cst_296 = arith.constant dense<0.000000e+00> : vector<4x16xf32>
    %859 = tpu.matmul %858, %16, %cst_296 {dimension_numbers = #tpu.dot_dimension_numbers<[1], [0], [0], [1], [0, 0, 1, 1], [], []>} : vector<4x128xf32>, vector<128x16xf32>, vector<4x16xf32> -> vector<4x16xf32>
    %860 = arith.mulf %856, %856 : vector<4x128xf32>
    %cst_297 = arith.constant dense<0.000000e+00> : vector<4x16xf32>
    %861 = tpu.matmul %860, %16, %cst_297 {dimension_numbers = #tpu.dot_dimension_numbers<[1], [0], [0], [1], [0, 0, 1, 1], [], []>} : vector<4x128xf32>, vector<128x16xf32>, vector<4x16xf32> -> vector<4x16xf32>
    %862 = arith.mulf %813, %813 : vector<4x8xf32>
    %cst_298 = arith.constant dense<0.000000e+00> : vector<4xf32>
    %863 = vector.multi_reduction <add>, %862, %cst_298 [1] : vector<4x8xf32> to vector<4xf32>
    %864 = vector.shape_cast %863 : vector<4xf32> to vector<4x1xf32>
    %cst_299 = arith.constant 1.000000e-16 : f32
    %865 = vector.broadcast %cst_299 : f32 to vector<4x16xf32>
    %866 = arith.maximumf %861, %865 : vector<4x16xf32>
    %cst_300 = arith.constant 1.000000e-16 : f32
    %867 = vector.broadcast %cst_300 : f32 to vector<4x1xf32>
    %868 = arith.maximumf %864, %867 : vector<4x1xf32>
    %869 = vector.broadcast %868 : vector<4x1xf32> to vector<4x16xf32>
    %870 = arith.mulf %866, %869 : vector<4x16xf32>
    %871 = math.rsqrt %870 : vector<4x16xf32>
    %872 = arith.mulf %859, %871 : vector<4x16xf32>
    %873 = vector.broadcast %823 : vector<4x1xf32> to vector<4x16xf32>
    %874 = arith.mulf %873, %872 : vector<4x16xf32>
    %cst_301 = arith.constant dense<0xFF800000> : vector<4xf32>
    %875 = vector.multi_reduction <maximumf>, %874, %cst_301 [1] : vector<4x16xf32> to vector<4xf32>
    %876 = vector.shape_cast %875 : vector<4xf32> to vector<4x1xf32>
    %877 = vector.broadcast %876 : vector<4x1xf32> to vector<4x16xf32>
    %878 = arith.subf %874, %877 : vector<4x16xf32>
    %879 = math.exp %878 : vector<4x16xf32>
    %cst_302 = arith.constant dense<0.000000e+00> : vector<4xf32>
    %880 = vector.multi_reduction <add>, %879, %cst_302 [1] : vector<4x16xf32> to vector<4xf32>
    %881 = vector.shape_cast %880 : vector<4xf32> to vector<4x1xf32>
    %882 = vector.broadcast %881 : vector<4x1xf32> to vector<4x16xf32>
    %883 = arith.divf %879, %882 : vector<4x16xf32>
    %884 = vector.broadcast %831 : vector<4x1xf32> to vector<4x16xf32>
    %885 = arith.mulf %884, %883 : vector<4x16xf32>
    %cst_303 = arith.constant 1.000000e+00 : f32
    %886 = vector.broadcast %cst_303 : f32 to vector<4x1xf32>
    %887 = arith.subf %886, %831 : vector<4x1xf32>
    %888 = vector.broadcast %887 : vector<4x1xf32> to vector<4x16xf32>
    %889 = arith.mulf %888, %734 : vector<4x16xf32>
    %890 = arith.addf %885, %889 : vector<4x16xf32>
    %cst_304 = arith.constant dense<0.000000e+00> : vector<4x48xf32>
    %891 = tpu.matmul %890, %14, %cst_304 {dimension_numbers = #tpu.dot_dimension_numbers<[1], [0], [0], [1], [0, 0, 1, 1], [], []>} : vector<4x16xf32>, vector<16x48xf32>, vector<4x48xf32> -> vector<4x48xf32>
    %892 = vector.extract_strided_slice %841 {offsets = [0, 0], sizes = [4, 1], strides = [1, 1]} : vector<4x3xf32> to vector<4x1xf32>
    %893 = vector.extract_strided_slice %891 {offsets = [0, 0], sizes = [4, 16], strides = [1, 1]} : vector<4x48xf32> to vector<4x16xf32>
    %894 = vector.broadcast %892 : vector<4x1xf32> to vector<4x16xf32>
    %895 = arith.mulf %894, %893 : vector<4x16xf32>
    %896 = vector.extract_strided_slice %841 {offsets = [0, 1], sizes = [4, 1], strides = [1, 1]} : vector<4x3xf32> to vector<4x1xf32>
    %897 = vector.extract_strided_slice %891 {offsets = [0, 16], sizes = [4, 16], strides = [1, 1]} : vector<4x48xf32> to vector<4x16xf32>
    %898 = vector.broadcast %896 : vector<4x1xf32> to vector<4x16xf32>
    %899 = arith.mulf %898, %897 : vector<4x16xf32>
    %900 = arith.addf %895, %899 : vector<4x16xf32>
    %901 = vector.extract_strided_slice %841 {offsets = [0, 2], sizes = [4, 1], strides = [1, 1]} : vector<4x3xf32> to vector<4x1xf32>
    %902 = vector.extract_strided_slice %891 {offsets = [0, 32], sizes = [4, 16], strides = [1, 1]} : vector<4x48xf32> to vector<4x16xf32>
    %903 = vector.broadcast %901 : vector<4x1xf32> to vector<4x16xf32>
    %904 = arith.mulf %903, %902 : vector<4x16xf32>
    %905 = arith.addf %900, %904 : vector<4x16xf32>
    %cst_305 = arith.constant 1.000000e-30 : f32
    %906 = vector.broadcast %cst_305 : f32 to vector<4x16xf32>
    %907 = arith.maximumf %905, %906 : vector<4x16xf32>
    %908 = math.log %907 : vector<4x16xf32>
    %909 = vector.broadcast %853 : vector<4x1xf32> to vector<4x16xf32>
    %910 = arith.mulf %909, %908 : vector<4x16xf32>
    %911 = math.exp %910 : vector<4x16xf32>
    %cst_306 = arith.constant dense<0.000000e+00> : vector<4xf32>
    %912 = vector.multi_reduction <add>, %911, %cst_306 [1] : vector<4x16xf32> to vector<4xf32>
    %913 = vector.shape_cast %912 : vector<4xf32> to vector<4x1xf32>
    %cst_307 = arith.constant 1.000000e-16 : f32
    %914 = vector.broadcast %cst_307 : f32 to vector<4x1xf32>
    %915 = arith.addf %913, %914 : vector<4x1xf32>
    %916 = vector.broadcast %915 : vector<4x1xf32> to vector<4x16xf32>
    %917 = arith.divf %911, %916 : vector<4x16xf32>
    %cst_308 = arith.constant dense<0.000000e+00> : vector<2x16xf32>
    %918 = tpu.matmul %22, %917, %cst_308 {dimension_numbers = #tpu.dot_dimension_numbers<[1], [0], [0], [1], [0, 0, 1, 1], [], []>} : vector<2x4xf32>, vector<4x16xf32>, vector<2x16xf32> -> vector<2x16xf32>
    %cst_309 = arith.constant dense<0.000000e+00> : vector<2x16xf32>
    %919 = tpu.matmul %23, %917, %cst_309 {dimension_numbers = #tpu.dot_dimension_numbers<[1], [0], [0], [1], [0, 0, 1, 1], [], []>} : vector<2x4xf32>, vector<4x16xf32>, vector<2x16xf32> -> vector<2x16xf32>
    %cst_310 = arith.constant dense<0.000000e+00> : vector<2x128xf32>
    %920 = tpu.matmul %918, %17, %cst_310 {dimension_numbers = #tpu.dot_dimension_numbers<[1], [0], [0], [1], [0, 0, 1, 1], [], []>} : vector<2x16xf32>, vector<16x128xf32>, vector<2x128xf32> -> vector<2x128xf32>
    %921 = arith.mulf %920, %757 : vector<2x128xf32>
    %cst_311 = arith.constant dense<0.000000e+00> : vector<2x8xf32>
    %922 = tpu.matmul %921, %18, %cst_311 {dimension_numbers = #tpu.dot_dimension_numbers<[1], [0], [0], [1], [0, 0, 1, 1], [], []>} : vector<2x128xf32>, vector<128x8xf32>, vector<2x8xf32> -> vector<2x8xf32>
    %923 = vector.extract_strided_slice %805 {offsets = [0, 28], sizes = [2, 8], strides = [1, 1]} : vector<2x44xf32> to vector<2x8xf32>
    %cst_312 = arith.constant 5.000000e-01 : f32
    %924 = vector.broadcast %cst_312 : f32 to vector<2x8xf32>
    %925 = arith.mulf %924, %923 : vector<2x8xf32>
    %926 = math.tanh %925 : vector<2x8xf32>
    %cst_313 = arith.constant 1.000000e+00 : f32
    %927 = vector.broadcast %cst_313 : f32 to vector<2x8xf32>
    %928 = arith.addf %926, %927 : vector<2x8xf32>
    %cst_314 = arith.constant 5.000000e-01 : f32
    %929 = vector.broadcast %cst_314 : f32 to vector<2x8xf32>
    %930 = arith.mulf %929, %928 : vector<2x8xf32>
    %931 = vector.extract_strided_slice %805 {offsets = [0, 36], sizes = [2, 8], strides = [1, 1]} : vector<2x44xf32> to vector<2x8xf32>
    %cst_315 = arith.constant dense<0.000000e+00> : vector<2x128xf32>
    %932 = tpu.matmul %919, %17, %cst_315 {dimension_numbers = #tpu.dot_dimension_numbers<[1], [0], [0], [1], [0, 0, 1, 1], [], []>} : vector<2x16xf32>, vector<16x128xf32>, vector<2x128xf32> -> vector<2x128xf32>
    %cst_316 = arith.constant dense<0.000000e+00> : vector<2x128xf32>
    %933 = tpu.matmul %930, %15, %cst_316 {dimension_numbers = #tpu.dot_dimension_numbers<[1], [0], [0], [1], [0, 0, 1, 1], [], []>} : vector<2x8xf32>, vector<8x128xf32>, vector<2x128xf32> -> vector<2x128xf32>
    %934 = arith.mulf %932, %933 : vector<2x128xf32>
    %cst_317 = arith.constant 1.000000e+00 : f32
    %935 = vector.broadcast %cst_317 : f32 to vector<2x128xf32>
    %936 = arith.subf %935, %934 : vector<2x128xf32>
    %937 = arith.mulf %757, %936 : vector<2x128xf32>
    %cst_318 = arith.constant dense<0.000000e+00> : vector<2x128xf32>
    %938 = tpu.matmul %931, %15, %cst_318 {dimension_numbers = #tpu.dot_dimension_numbers<[1], [0], [0], [1], [0, 0, 1, 1], [], []>} : vector<2x8xf32>, vector<8x128xf32>, vector<2x128xf32> -> vector<2x128xf32>
    %939 = arith.mulf %932, %938 : vector<2x128xf32>
    %940 = arith.addf %937, %939 : vector<2x128xf32>
    %cst_319 = arith.constant dense<0.000000e+00> : vector<2x8xf32>
    %941 = tpu.matmul %802, %11, %cst_319 {dimension_numbers = #tpu.dot_dimension_numbers<[1], [0], [0], [1], [0, 0, 1, 1], [], []>} : vector<2x32xf32>, vector<32x8xf32>, vector<2x8xf32> -> vector<2x8xf32>
    %cst_320 = arith.constant dense<0.000000e+00> : vector<2x8xf32>
    %942 = tpu.matmul %922, %12, %cst_320 {dimension_numbers = #tpu.dot_dimension_numbers<[1], [0], [0], [1], [0, 0, 1, 1], [], []>} : vector<2x8xf32>, vector<8x8xf32>, vector<2x8xf32> -> vector<2x8xf32>
    %943 = arith.addf %941, %942 : vector<2x8xf32>
    %944 = vector.broadcast %13 : vector<1x8xf32> to vector<2x8xf32>
    %945 = arith.addf %943, %944 : vector<2x8xf32>
    %c0_321 = arith.constant 0 : index
    %c32 = arith.constant 32 : index
    %946 = vector.load %arg18[%c0_321, %c32] : memref<2x64xf32, #tpu.memory_space<vmem>>, vector<2x8xf32>
    tpu.vector_store %arg18[%c0_321, %c32], %945 {strides = array<i32>} : memref<2x64xf32, #tpu.memory_space<vmem>>, vector<2x8xf32>,
    %947 = vector.extract_strided_slice %0 {offsets = [0, 40], sizes = [2, 8], strides = [1, 1]} : vector<2x64xf32> to vector<2x8xf32>
    %cst_322 = arith.constant dense<0.000000e+00> : vector<2x128xf32>
    %948 = tpu.matmul %947, %4, %cst_322 {dimension_numbers = #tpu.dot_dimension_numbers<[1], [0], [0], [1], [0, 0, 1, 1], [], []>} : vector<2x8xf32>, vector<8x128xf32>, vector<2x128xf32> -> vector<2x128xf32>
    %cst_323 = arith.constant dense<0.000000e+00> : vector<2x128xf32>
    %949 = tpu.matmul %922, %5, %cst_323 {dimension_numbers = #tpu.dot_dimension_numbers<[1], [0], [0], [1], [0, 0, 1, 1], [], []>} : vector<2x8xf32>, vector<8x128xf32>, vector<2x128xf32> -> vector<2x128xf32>
    %950 = arith.addf %948, %949 : vector<2x128xf32>
    %cst_324 = arith.constant dense<0.000000e+00> : vector<2x128xf32>
    %951 = tpu.matmul %802, %6, %cst_324 {dimension_numbers = #tpu.dot_dimension_numbers<[1], [0], [0], [1], [0, 0, 1, 1], [], []>} : vector<2x32xf32>, vector<32x128xf32>, vector<2x128xf32> -> vector<2x128xf32>
    %952 = arith.addf %950, %951 : vector<2x128xf32>
    %953 = vector.broadcast %7 : vector<1x128xf32> to vector<2x128xf32>
    %954 = arith.addf %952, %953 : vector<2x128xf32>
    %955 = vector.extract_strided_slice %954 {offsets = [0, 0], sizes = [2, 32], strides = [1, 1]} : vector<2x128xf32> to vector<2x32xf32>
    %cst_325 = arith.constant 5.000000e-01 : f32
    %956 = vector.broadcast %cst_325 : f32 to vector<2x32xf32>
    %957 = arith.mulf %956, %955 : vector<2x32xf32>
    %958 = math.tanh %957 : vector<2x32xf32>
    %cst_326 = arith.constant 1.000000e+00 : f32
    %959 = vector.broadcast %cst_326 : f32 to vector<2x32xf32>
    %960 = arith.addf %958, %959 : vector<2x32xf32>
    %cst_327 = arith.constant 5.000000e-01 : f32
    %961 = vector.broadcast %cst_327 : f32 to vector<2x32xf32>
    %962 = arith.mulf %961, %960 : vector<2x32xf32>
    %963 = vector.extract_strided_slice %954 {offsets = [0, 32], sizes = [2, 32], strides = [1, 1]} : vector<2x128xf32> to vector<2x32xf32>
    %cst_328 = arith.constant 5.000000e-01 : f32
    %964 = vector.broadcast %cst_328 : f32 to vector<2x32xf32>
    %965 = arith.mulf %964, %963 : vector<2x32xf32>
    %966 = math.tanh %965 : vector<2x32xf32>
    %cst_329 = arith.constant 1.000000e+00 : f32
    %967 = vector.broadcast %cst_329 : f32 to vector<2x32xf32>
    %968 = arith.addf %966, %967 : vector<2x32xf32>
    %cst_330 = arith.constant 5.000000e-01 : f32
    %969 = vector.broadcast %cst_330 : f32 to vector<2x32xf32>
    %970 = arith.mulf %969, %968 : vector<2x32xf32>
    %971 = vector.extract_strided_slice %954 {offsets = [0, 64], sizes = [2, 32], strides = [1, 1]} : vector<2x128xf32> to vector<2x32xf32>
    %972 = math.tanh %971 : vector<2x32xf32>
    %973 = vector.extract_strided_slice %954 {offsets = [0, 96], sizes = [2, 32], strides = [1, 1]} : vector<2x128xf32> to vector<2x32xf32>
    %cst_331 = arith.constant 5.000000e-01 : f32
    %974 = vector.broadcast %cst_331 : f32 to vector<2x32xf32>
    %975 = arith.mulf %974, %973 : vector<2x32xf32>
    %976 = math.tanh %975 : vector<2x32xf32>
    %cst_332 = arith.constant 1.000000e+00 : f32
    %977 = vector.broadcast %cst_332 : f32 to vector<2x32xf32>
    %978 = arith.addf %976, %977 : vector<2x32xf32>
    %cst_333 = arith.constant 5.000000e-01 : f32
    %979 = vector.broadcast %cst_333 : f32 to vector<2x32xf32>
    %980 = arith.mulf %979, %978 : vector<2x32xf32>
    %981 = arith.mulf %970, %800 : vector<2x32xf32>
    %982 = arith.mulf %962, %972 : vector<2x32xf32>
    %983 = arith.addf %981, %982 : vector<2x32xf32>
    %984 = math.tanh %983 : vector<2x32xf32>
    %985 = arith.mulf %980, %984 : vector<2x32xf32>
    %cst_334 = arith.constant dense<0.000000e+00> : vector<2x44xf32>
    %986 = tpu.matmul %985, %8, %cst_334 {dimension_numbers = #tpu.dot_dimension_numbers<[1], [0], [0], [1], [0, 0, 1, 1], [], []>} : vector<2x32xf32>, vector<32x44xf32>, vector<2x44xf32> -> vector<2x44xf32>
    %987 = vector.broadcast %9 : vector<1x44xf32> to vector<2x44xf32>
    %988 = arith.addf %986, %987 : vector<2x44xf32>
    %989 = vector.extract_strided_slice %988 {offsets = [0, 0], sizes = [2, 14], strides = [1, 1]} : vector<2x44xf32> to vector<2x14xf32>
    %cst_335 = arith.constant dense<0.000000e+00> : vector<4x14xf32>
    %990 = tpu.matmul %19, %989, %cst_335 {dimension_numbers = #tpu.dot_dimension_numbers<[1], [0], [0], [1], [0, 0, 1, 1], [], []>} : vector<4x2xf32>, vector<2x14xf32>, vector<4x14xf32> -> vector<4x14xf32>
    %991 = vector.extract_strided_slice %988 {offsets = [0, 14], sizes = [2, 14], strides = [1, 1]} : vector<2x44xf32> to vector<2x14xf32>
    %cst_336 = arith.constant dense<0.000000e+00> : vector<4x14xf32>
    %992 = tpu.matmul %20, %991, %cst_336 {dimension_numbers = #tpu.dot_dimension_numbers<[1], [0], [0], [1], [0, 0, 1, 1], [], []>} : vector<4x2xf32>, vector<2x14xf32>, vector<4x14xf32> -> vector<4x14xf32>
    %993 = arith.addf %990, %992 : vector<4x14xf32>
    %994 = vector.extract_strided_slice %993 {offsets = [0, 0], sizes = [4, 8], strides = [1, 1]} : vector<4x14xf32> to vector<4x8xf32>
    %cst_337 = arith.constant 1.000000e-16 : f32
    %995 = vector.broadcast %cst_337 : f32 to vector<4x8xf32>
    %996 = arith.addf %994, %995 : vector<4x8xf32>
    %997 = vector.extract_strided_slice %993 {offsets = [0, 8], sizes = [4, 1], strides = [1, 1]} : vector<4x14xf32> to vector<4x1xf32>
    %cst_338 = arith.constant 2.000000e+01 : f32
    %998 = vector.broadcast %cst_338 : f32 to vector<4x1xf32>
    %999 = arith.cmpf ogt, %997, %998 : vector<4x1xf32>
    %cst_339 = arith.constant 2.000000e+01 : f32
    %1000 = vector.broadcast %cst_339 : f32 to vector<4x1xf32>
    %1001 = arith.minimumf %997, %1000 : vector<4x1xf32>
    %1002 = math.exp %1001 : vector<4x1xf32>
    %cst_340 = arith.constant 1.000000e+00 : f32
    %1003 = vector.broadcast %cst_340 : f32 to vector<4x1xf32>
    %1004 = arith.addf %1003, %1002 : vector<4x1xf32>
    %1005 = math.log %1004 : vector<4x1xf32>
    %1006 = arith.select %999, %997, %1005 : vector<4x1xi1>, vector<4x1xf32>
    %1007 = vector.extract_strided_slice %993 {offsets = [0, 9], sizes = [4, 1], strides = [1, 1]} : vector<4x14xf32> to vector<4x1xf32>
    %cst_341 = arith.constant 5.000000e-01 : f32
    %1008 = vector.broadcast %cst_341 : f32 to vector<4x1xf32>
    %1009 = arith.mulf %1008, %1007 : vector<4x1xf32>
    %1010 = math.tanh %1009 : vector<4x1xf32>
    %cst_342 = arith.constant 1.000000e+00 : f32
    %1011 = vector.broadcast %cst_342 : f32 to vector<4x1xf32>
    %1012 = arith.addf %1010, %1011 : vector<4x1xf32>
    %cst_343 = arith.constant 5.000000e-01 : f32
    %1013 = vector.broadcast %cst_343 : f32 to vector<4x1xf32>
    %1014 = arith.mulf %1013, %1012 : vector<4x1xf32>
    %1015 = vector.extract_strided_slice %993 {offsets = [0, 10], sizes = [4, 3], strides = [1, 1]} : vector<4x14xf32> to vector<4x3xf32>
    %cst_344 = arith.constant dense<0xFF800000> : vector<4xf32>
    %1016 = vector.multi_reduction <maximumf>, %1015, %cst_344 [1] : vector<4x3xf32> to vector<4xf32>
    %1017 = vector.shape_cast %1016 : vector<4xf32> to vector<4x1xf32>
    %1018 = vector.broadcast %1017 : vector<4x1xf32> to vector<4x3xf32>
    %1019 = arith.subf %1015, %1018 : vector<4x3xf32>
    %1020 = math.exp %1019 : vector<4x3xf32>
    %cst_345 = arith.constant dense<0.000000e+00> : vector<4xf32>
    %1021 = vector.multi_reduction <add>, %1020, %cst_345 [1] : vector<4x3xf32> to vector<4xf32>
    %1022 = vector.shape_cast %1021 : vector<4xf32> to vector<4x1xf32>
    %1023 = vector.broadcast %1022 : vector<4x1xf32> to vector<4x3xf32>
    %1024 = arith.divf %1020, %1023 : vector<4x3xf32>
    %1025 = vector.extract_strided_slice %993 {offsets = [0, 13], sizes = [4, 1], strides = [1, 1]} : vector<4x14xf32> to vector<4x1xf32>
    %cst_346 = arith.constant 2.000000e+01 : f32
    %1026 = vector.broadcast %cst_346 : f32 to vector<4x1xf32>
    %1027 = arith.cmpf ogt, %1025, %1026 : vector<4x1xf32>
    %cst_347 = arith.constant 2.000000e+01 : f32
    %1028 = vector.broadcast %cst_347 : f32 to vector<4x1xf32>
    %1029 = arith.minimumf %1025, %1028 : vector<4x1xf32>
    %1030 = math.exp %1029 : vector<4x1xf32>
    %cst_348 = arith.constant 1.000000e+00 : f32
    %1031 = vector.broadcast %cst_348 : f32 to vector<4x1xf32>
    %1032 = arith.addf %1031, %1030 : vector<4x1xf32>
    %1033 = math.log %1032 : vector<4x1xf32>
    %1034 = arith.select %1027, %1025, %1033 : vector<4x1xi1>, vector<4x1xf32>
    %cst_349 = arith.constant 1.000000e+00 : f32
    %1035 = vector.broadcast %cst_349 : f32 to vector<4x1xf32>
    %1036 = arith.addf %1035, %1034 : vector<4x1xf32>
    %cst_350 = arith.constant 1.000000e-16 : f32
    %1037 = vector.broadcast %cst_350 : f32 to vector<2x128xf32>
    %1038 = arith.addf %940, %1037 : vector<2x128xf32>
    %cst_351 = arith.constant dense<0.000000e+00> : vector<4x128xf32>
    %1039 = tpu.matmul %21, %1038, %cst_351 {dimension_numbers = #tpu.dot_dimension_numbers<[1], [0], [0], [1], [0, 0, 1, 1], [], []>} : vector<4x2xf32>, vector<2x128xf32>, vector<4x128xf32> -> vector<4x128xf32>
    %cst_352 = arith.constant dense<0.000000e+00> : vector<4x128xf32>
    %1040 = tpu.matmul %996, %15, %cst_352 {dimension_numbers = #tpu.dot_dimension_numbers<[1], [0], [0], [1], [0, 0, 1, 1], [], []>} : vector<4x8xf32>, vector<8x128xf32>, vector<4x128xf32> -> vector<4x128xf32>
    %1041 = arith.mulf %1039, %1040 : vector<4x128xf32>
    %cst_353 = arith.constant dense<0.000000e+00> : vector<4x16xf32>
    %1042 = tpu.matmul %1041, %16, %cst_353 {dimension_numbers = #tpu.dot_dimension_numbers<[1], [0], [0], [1], [0, 0, 1, 1], [], []>} : vector<4x128xf32>, vector<128x16xf32>, vector<4x16xf32> -> vector<4x16xf32>
    %1043 = arith.mulf %1039, %1039 : vector<4x128xf32>
    %cst_354 = arith.constant dense<0.000000e+00> : vector<4x16xf32>
    %1044 = tpu.matmul %1043, %16, %cst_354 {dimension_numbers = #tpu.dot_dimension_numbers<[1], [0], [0], [1], [0, 0, 1, 1], [], []>} : vector<4x128xf32>, vector<128x16xf32>, vector<4x16xf32> -> vector<4x16xf32>
    %1045 = arith.mulf %996, %996 : vector<4x8xf32>
    %cst_355 = arith.constant dense<0.000000e+00> : vector<4xf32>
    %1046 = vector.multi_reduction <add>, %1045, %cst_355 [1] : vector<4x8xf32> to vector<4xf32>
    %1047 = vector.shape_cast %1046 : vector<4xf32> to vector<4x1xf32>
    %cst_356 = arith.constant 1.000000e-16 : f32
    %1048 = vector.broadcast %cst_356 : f32 to vector<4x16xf32>
    %1049 = arith.maximumf %1044, %1048 : vector<4x16xf32>
    %cst_357 = arith.constant 1.000000e-16 : f32
    %1050 = vector.broadcast %cst_357 : f32 to vector<4x1xf32>
    %1051 = arith.maximumf %1047, %1050 : vector<4x1xf32>
    %1052 = vector.broadcast %1051 : vector<4x1xf32> to vector<4x16xf32>
    %1053 = arith.mulf %1049, %1052 : vector<4x16xf32>
    %1054 = math.rsqrt %1053 : vector<4x16xf32>
    %1055 = arith.mulf %1042, %1054 : vector<4x16xf32>
    %1056 = vector.broadcast %1006 : vector<4x1xf32> to vector<4x16xf32>
    %1057 = arith.mulf %1056, %1055 : vector<4x16xf32>
    %cst_358 = arith.constant dense<0xFF800000> : vector<4xf32>
    %1058 = vector.multi_reduction <maximumf>, %1057, %cst_358 [1] : vector<4x16xf32> to vector<4xf32>
    %1059 = vector.shape_cast %1058 : vector<4xf32> to vector<4x1xf32>
    %1060 = vector.broadcast %1059 : vector<4x1xf32> to vector<4x16xf32>
    %1061 = arith.subf %1057, %1060 : vector<4x16xf32>
    %1062 = math.exp %1061 : vector<4x16xf32>
    %cst_359 = arith.constant dense<0.000000e+00> : vector<4xf32>
    %1063 = vector.multi_reduction <add>, %1062, %cst_359 [1] : vector<4x16xf32> to vector<4xf32>
    %1064 = vector.shape_cast %1063 : vector<4xf32> to vector<4x1xf32>
    %1065 = vector.broadcast %1064 : vector<4x1xf32> to vector<4x16xf32>
    %1066 = arith.divf %1062, %1065 : vector<4x16xf32>
    %1067 = vector.broadcast %1014 : vector<4x1xf32> to vector<4x16xf32>
    %1068 = arith.mulf %1067, %1066 : vector<4x16xf32>
    %cst_360 = arith.constant 1.000000e+00 : f32
    %1069 = vector.broadcast %cst_360 : f32 to vector<4x1xf32>
    %1070 = arith.subf %1069, %1014 : vector<4x1xf32>
    %1071 = vector.broadcast %1070 : vector<4x1xf32> to vector<4x16xf32>
    %1072 = arith.mulf %1071, %917 : vector<4x16xf32>
    %1073 = arith.addf %1068, %1072 : vector<4x16xf32>
    %cst_361 = arith.constant dense<0.000000e+00> : vector<4x48xf32>
    %1074 = tpu.matmul %1073, %14, %cst_361 {dimension_numbers = #tpu.dot_dimension_numbers<[1], [0], [0], [1], [0, 0, 1, 1], [], []>} : vector<4x16xf32>, vector<16x48xf32>, vector<4x48xf32> -> vector<4x48xf32>
    %1075 = vector.extract_strided_slice %1024 {offsets = [0, 0], sizes = [4, 1], strides = [1, 1]} : vector<4x3xf32> to vector<4x1xf32>
    %1076 = vector.extract_strided_slice %1074 {offsets = [0, 0], sizes = [4, 16], strides = [1, 1]} : vector<4x48xf32> to vector<4x16xf32>
    %1077 = vector.broadcast %1075 : vector<4x1xf32> to vector<4x16xf32>
    %1078 = arith.mulf %1077, %1076 : vector<4x16xf32>
    %1079 = vector.extract_strided_slice %1024 {offsets = [0, 1], sizes = [4, 1], strides = [1, 1]} : vector<4x3xf32> to vector<4x1xf32>
    %1080 = vector.extract_strided_slice %1074 {offsets = [0, 16], sizes = [4, 16], strides = [1, 1]} : vector<4x48xf32> to vector<4x16xf32>
    %1081 = vector.broadcast %1079 : vector<4x1xf32> to vector<4x16xf32>
    %1082 = arith.mulf %1081, %1080 : vector<4x16xf32>
    %1083 = arith.addf %1078, %1082 : vector<4x16xf32>
    %1084 = vector.extract_strided_slice %1024 {offsets = [0, 2], sizes = [4, 1], strides = [1, 1]} : vector<4x3xf32> to vector<4x1xf32>
    %1085 = vector.extract_strided_slice %1074 {offsets = [0, 32], sizes = [4, 16], strides = [1, 1]} : vector<4x48xf32> to vector<4x16xf32>
    %1086 = vector.broadcast %1084 : vector<4x1xf32> to vector<4x16xf32>
    %1087 = arith.mulf %1086, %1085 : vector<4x16xf32>
    %1088 = arith.addf %1083, %1087 : vector<4x16xf32>
    %cst_362 = arith.constant 1.000000e-30 : f32
    %1089 = vector.broadcast %cst_362 : f32 to vector<4x16xf32>
    %1090 = arith.maximumf %1088, %1089 : vector<4x16xf32>
    %1091 = math.log %1090 : vector<4x16xf32>
    %1092 = vector.broadcast %1036 : vector<4x1xf32> to vector<4x16xf32>
    %1093 = arith.mulf %1092, %1091 : vector<4x16xf32>
    %1094 = math.exp %1093 : vector<4x16xf32>
    %cst_363 = arith.constant dense<0.000000e+00> : vector<4xf32>
    %1095 = vector.multi_reduction <add>, %1094, %cst_363 [1] : vector<4x16xf32> to vector<4xf32>
    %1096 = vector.shape_cast %1095 : vector<4xf32> to vector<4x1xf32>
    %cst_364 = arith.constant 1.000000e-16 : f32
    %1097 = vector.broadcast %cst_364 : f32 to vector<4x1xf32>
    %1098 = arith.addf %1096, %1097 : vector<4x1xf32>
    %1099 = vector.broadcast %1098 : vector<4x1xf32> to vector<4x16xf32>
    %1100 = arith.divf %1094, %1099 : vector<4x16xf32>
    %cst_365 = arith.constant dense<0.000000e+00> : vector<2x16xf32>
    %1101 = tpu.matmul %22, %1100, %cst_365 {dimension_numbers = #tpu.dot_dimension_numbers<[1], [0], [0], [1], [0, 0, 1, 1], [], []>} : vector<2x4xf32>, vector<4x16xf32>, vector<2x16xf32> -> vector<2x16xf32>
    %cst_366 = arith.constant dense<0.000000e+00> : vector<2x16xf32>
    %1102 = tpu.matmul %23, %1100, %cst_366 {dimension_numbers = #tpu.dot_dimension_numbers<[1], [0], [0], [1], [0, 0, 1, 1], [], []>} : vector<2x4xf32>, vector<4x16xf32>, vector<2x16xf32> -> vector<2x16xf32>
    %cst_367 = arith.constant dense<0.000000e+00> : vector<2x128xf32>
    %1103 = tpu.matmul %1101, %17, %cst_367 {dimension_numbers = #tpu.dot_dimension_numbers<[1], [0], [0], [1], [0, 0, 1, 1], [], []>} : vector<2x16xf32>, vector<16x128xf32>, vector<2x128xf32> -> vector<2x128xf32>
    %1104 = arith.mulf %1103, %940 : vector<2x128xf32>
    %cst_368 = arith.constant dense<0.000000e+00> : vector<2x8xf32>
    %1105 = tpu.matmul %1104, %18, %cst_368 {dimension_numbers = #tpu.dot_dimension_numbers<[1], [0], [0], [1], [0, 0, 1, 1], [], []>} : vector<2x128xf32>, vector<128x8xf32>, vector<2x8xf32> -> vector<2x8xf32>
    %1106 = vector.extract_strided_slice %988 {offsets = [0, 28], sizes = [2, 8], strides = [1, 1]} : vector<2x44xf32> to vector<2x8xf32>
    %cst_369 = arith.constant 5.000000e-01 : f32
    %1107 = vector.broadcast %cst_369 : f32 to vector<2x8xf32>
    %1108 = arith.mulf %1107, %1106 : vector<2x8xf32>
    %1109 = math.tanh %1108 : vector<2x8xf32>
    %cst_370 = arith.constant 1.000000e+00 : f32
    %1110 = vector.broadcast %cst_370 : f32 to vector<2x8xf32>
    %1111 = arith.addf %1109, %1110 : vector<2x8xf32>
    %cst_371 = arith.constant 5.000000e-01 : f32
    %1112 = vector.broadcast %cst_371 : f32 to vector<2x8xf32>
    %1113 = arith.mulf %1112, %1111 : vector<2x8xf32>
    %1114 = vector.extract_strided_slice %988 {offsets = [0, 36], sizes = [2, 8], strides = [1, 1]} : vector<2x44xf32> to vector<2x8xf32>
    %cst_372 = arith.constant dense<0.000000e+00> : vector<2x128xf32>
    %1115 = tpu.matmul %1102, %17, %cst_372 {dimension_numbers = #tpu.dot_dimension_numbers<[1], [0], [0], [1], [0, 0, 1, 1], [], []>} : vector<2x16xf32>, vector<16x128xf32>, vector<2x128xf32> -> vector<2x128xf32>
    %cst_373 = arith.constant dense<0.000000e+00> : vector<2x128xf32>
    %1116 = tpu.matmul %1113, %15, %cst_373 {dimension_numbers = #tpu.dot_dimension_numbers<[1], [0], [0], [1], [0, 0, 1, 1], [], []>} : vector<2x8xf32>, vector<8x128xf32>, vector<2x128xf32> -> vector<2x128xf32>
    %1117 = arith.mulf %1115, %1116 : vector<2x128xf32>
    %cst_374 = arith.constant 1.000000e+00 : f32
    %1118 = vector.broadcast %cst_374 : f32 to vector<2x128xf32>
    %1119 = arith.subf %1118, %1117 : vector<2x128xf32>
    %1120 = arith.mulf %940, %1119 : vector<2x128xf32>
    %cst_375 = arith.constant dense<0.000000e+00> : vector<2x128xf32>
    %1121 = tpu.matmul %1114, %15, %cst_375 {dimension_numbers = #tpu.dot_dimension_numbers<[1], [0], [0], [1], [0, 0, 1, 1], [], []>} : vector<2x8xf32>, vector<8x128xf32>, vector<2x128xf32> -> vector<2x128xf32>
    %1122 = arith.mulf %1115, %1121 : vector<2x128xf32>
    %1123 = arith.addf %1120, %1122 : vector<2x128xf32>
    %cst_376 = arith.constant dense<0.000000e+00> : vector<2x8xf32>
    %1124 = tpu.matmul %985, %11, %cst_376 {dimension_numbers = #tpu.dot_dimension_numbers<[1], [0], [0], [1], [0, 0, 1, 1], [], []>} : vector<2x32xf32>, vector<32x8xf32>, vector<2x8xf32> -> vector<2x8xf32>
    %cst_377 = arith.constant dense<0.000000e+00> : vector<2x8xf32>
    %1125 = tpu.matmul %1105, %12, %cst_377 {dimension_numbers = #tpu.dot_dimension_numbers<[1], [0], [0], [1], [0, 0, 1, 1], [], []>} : vector<2x8xf32>, vector<8x8xf32>, vector<2x8xf32> -> vector<2x8xf32>
    %1126 = arith.addf %1124, %1125 : vector<2x8xf32>
    %1127 = vector.broadcast %13 : vector<1x8xf32> to vector<2x8xf32>
    %1128 = arith.addf %1126, %1127 : vector<2x8xf32>
    %c0_378 = arith.constant 0 : index
    %c40 = arith.constant 40 : index
    %1129 = vector.load %arg18[%c0_378, %c40] : memref<2x64xf32, #tpu.memory_space<vmem>>, vector<2x8xf32>
    tpu.vector_store %arg18[%c0_378, %c40], %1128 {strides = array<i32>} : memref<2x64xf32, #tpu.memory_space<vmem>>, vector<2x8xf32>,
    %1130 = vector.extract_strided_slice %0 {offsets = [0, 48], sizes = [2, 8], strides = [1, 1]} : vector<2x64xf32> to vector<2x8xf32>
    %cst_379 = arith.constant dense<0.000000e+00> : vector<2x128xf32>
    %1131 = tpu.matmul %1130, %4, %cst_379 {dimension_numbers = #tpu.dot_dimension_numbers<[1], [0], [0], [1], [0, 0, 1, 1], [], []>} : vector<2x8xf32>, vector<8x128xf32>, vector<2x128xf32> -> vector<2x128xf32>
    %cst_380 = arith.constant dense<0.000000e+00> : vector<2x128xf32>
    %1132 = tpu.matmul %1105, %5, %cst_380 {dimension_numbers = #tpu.dot_dimension_numbers<[1], [0], [0], [1], [0, 0, 1, 1], [], []>} : vector<2x8xf32>, vector<8x128xf32>, vector<2x128xf32> -> vector<2x128xf32>
    %1133 = arith.addf %1131, %1132 : vector<2x128xf32>
    %cst_381 = arith.constant dense<0.000000e+00> : vector<2x128xf32>
    %1134 = tpu.matmul %985, %6, %cst_381 {dimension_numbers = #tpu.dot_dimension_numbers<[1], [0], [0], [1], [0, 0, 1, 1], [], []>} : vector<2x32xf32>, vector<32x128xf32>, vector<2x128xf32> -> vector<2x128xf32>
    %1135 = arith.addf %1133, %1134 : vector<2x128xf32>
    %1136 = vector.broadcast %7 : vector<1x128xf32> to vector<2x128xf32>
    %1137 = arith.addf %1135, %1136 : vector<2x128xf32>
    %1138 = vector.extract_strided_slice %1137 {offsets = [0, 0], sizes = [2, 32], strides = [1, 1]} : vector<2x128xf32> to vector<2x32xf32>
    %cst_382 = arith.constant 5.000000e-01 : f32
    %1139 = vector.broadcast %cst_382 : f32 to vector<2x32xf32>
    %1140 = arith.mulf %1139, %1138 : vector<2x32xf32>
    %1141 = math.tanh %1140 : vector<2x32xf32>
    %cst_383 = arith.constant 1.000000e+00 : f32
    %1142 = vector.broadcast %cst_383 : f32 to vector<2x32xf32>
    %1143 = arith.addf %1141, %1142 : vector<2x32xf32>
    %cst_384 = arith.constant 5.000000e-01 : f32
    %1144 = vector.broadcast %cst_384 : f32 to vector<2x32xf32>
    %1145 = arith.mulf %1144, %1143 : vector<2x32xf32>
    %1146 = vector.extract_strided_slice %1137 {offsets = [0, 32], sizes = [2, 32], strides = [1, 1]} : vector<2x128xf32> to vector<2x32xf32>
    %cst_385 = arith.constant 5.000000e-01 : f32
    %1147 = vector.broadcast %cst_385 : f32 to vector<2x32xf32>
    %1148 = arith.mulf %1147, %1146 : vector<2x32xf32>
    %1149 = math.tanh %1148 : vector<2x32xf32>
    %cst_386 = arith.constant 1.000000e+00 : f32
    %1150 = vector.broadcast %cst_386 : f32 to vector<2x32xf32>
    %1151 = arith.addf %1149, %1150 : vector<2x32xf32>
    %cst_387 = arith.constant 5.000000e-01 : f32
    %1152 = vector.broadcast %cst_387 : f32 to vector<2x32xf32>
    %1153 = arith.mulf %1152, %1151 : vector<2x32xf32>
    %1154 = vector.extract_strided_slice %1137 {offsets = [0, 64], sizes = [2, 32], strides = [1, 1]} : vector<2x128xf32> to vector<2x32xf32>
    %1155 = math.tanh %1154 : vector<2x32xf32>
    %1156 = vector.extract_strided_slice %1137 {offsets = [0, 96], sizes = [2, 32], strides = [1, 1]} : vector<2x128xf32> to vector<2x32xf32>
    %cst_388 = arith.constant 5.000000e-01 : f32
    %1157 = vector.broadcast %cst_388 : f32 to vector<2x32xf32>
    %1158 = arith.mulf %1157, %1156 : vector<2x32xf32>
    %1159 = math.tanh %1158 : vector<2x32xf32>
    %cst_389 = arith.constant 1.000000e+00 : f32
    %1160 = vector.broadcast %cst_389 : f32 to vector<2x32xf32>
    %1161 = arith.addf %1159, %1160 : vector<2x32xf32>
    %cst_390 = arith.constant 5.000000e-01 : f32
    %1162 = vector.broadcast %cst_390 : f32 to vector<2x32xf32>
    %1163 = arith.mulf %1162, %1161 : vector<2x32xf32>
    %1164 = arith.mulf %1153, %983 : vector<2x32xf32>
    %1165 = arith.mulf %1145, %1155 : vector<2x32xf32>
    %1166 = arith.addf %1164, %1165 : vector<2x32xf32>
    %1167 = math.tanh %1166 : vector<2x32xf32>
    %1168 = arith.mulf %1163, %1167 : vector<2x32xf32>
    %cst_391 = arith.constant dense<0.000000e+00> : vector<2x44xf32>
    %1169 = tpu.matmul %1168, %8, %cst_391 {dimension_numbers = #tpu.dot_dimension_numbers<[1], [0], [0], [1], [0, 0, 1, 1], [], []>} : vector<2x32xf32>, vector<32x44xf32>, vector<2x44xf32> -> vector<2x44xf32>
    %1170 = vector.broadcast %9 : vector<1x44xf32> to vector<2x44xf32>
    %1171 = arith.addf %1169, %1170 : vector<2x44xf32>
    %1172 = vector.extract_strided_slice %1171 {offsets = [0, 0], sizes = [2, 14], strides = [1, 1]} : vector<2x44xf32> to vector<2x14xf32>
    %cst_392 = arith.constant dense<0.000000e+00> : vector<4x14xf32>
    %1173 = tpu.matmul %19, %1172, %cst_392 {dimension_numbers = #tpu.dot_dimension_numbers<[1], [0], [0], [1], [0, 0, 1, 1], [], []>} : vector<4x2xf32>, vector<2x14xf32>, vector<4x14xf32> -> vector<4x14xf32>
    %1174 = vector.extract_strided_slice %1171 {offsets = [0, 14], sizes = [2, 14], strides = [1, 1]} : vector<2x44xf32> to vector<2x14xf32>
    %cst_393 = arith.constant dense<0.000000e+00> : vector<4x14xf32>
    %1175 = tpu.matmul %20, %1174, %cst_393 {dimension_numbers = #tpu.dot_dimension_numbers<[1], [0], [0], [1], [0, 0, 1, 1], [], []>} : vector<4x2xf32>, vector<2x14xf32>, vector<4x14xf32> -> vector<4x14xf32>
    %1176 = arith.addf %1173, %1175 : vector<4x14xf32>
    %1177 = vector.extract_strided_slice %1176 {offsets = [0, 0], sizes = [4, 8], strides = [1, 1]} : vector<4x14xf32> to vector<4x8xf32>
    %cst_394 = arith.constant 1.000000e-16 : f32
    %1178 = vector.broadcast %cst_394 : f32 to vector<4x8xf32>
    %1179 = arith.addf %1177, %1178 : vector<4x8xf32>
    %1180 = vector.extract_strided_slice %1176 {offsets = [0, 8], sizes = [4, 1], strides = [1, 1]} : vector<4x14xf32> to vector<4x1xf32>
    %cst_395 = arith.constant 2.000000e+01 : f32
    %1181 = vector.broadcast %cst_395 : f32 to vector<4x1xf32>
    %1182 = arith.cmpf ogt, %1180, %1181 : vector<4x1xf32>
    %cst_396 = arith.constant 2.000000e+01 : f32
    %1183 = vector.broadcast %cst_396 : f32 to vector<4x1xf32>
    %1184 = arith.minimumf %1180, %1183 : vector<4x1xf32>
    %1185 = math.exp %1184 : vector<4x1xf32>
    %cst_397 = arith.constant 1.000000e+00 : f32
    %1186 = vector.broadcast %cst_397 : f32 to vector<4x1xf32>
    %1187 = arith.addf %1186, %1185 : vector<4x1xf32>
    %1188 = math.log %1187 : vector<4x1xf32>
    %1189 = arith.select %1182, %1180, %1188 : vector<4x1xi1>, vector<4x1xf32>
    %1190 = vector.extract_strided_slice %1176 {offsets = [0, 9], sizes = [4, 1], strides = [1, 1]} : vector<4x14xf32> to vector<4x1xf32>
    %cst_398 = arith.constant 5.000000e-01 : f32
    %1191 = vector.broadcast %cst_398 : f32 to vector<4x1xf32>
    %1192 = arith.mulf %1191, %1190 : vector<4x1xf32>
    %1193 = math.tanh %1192 : vector<4x1xf32>
    %cst_399 = arith.constant 1.000000e+00 : f32
    %1194 = vector.broadcast %cst_399 : f32 to vector<4x1xf32>
    %1195 = arith.addf %1193, %1194 : vector<4x1xf32>
    %cst_400 = arith.constant 5.000000e-01 : f32
    %1196 = vector.broadcast %cst_400 : f32 to vector<4x1xf32>
    %1197 = arith.mulf %1196, %1195 : vector<4x1xf32>
    %1198 = vector.extract_strided_slice %1176 {offsets = [0, 10], sizes = [4, 3], strides = [1, 1]} : vector<4x14xf32> to vector<4x3xf32>
    %cst_401 = arith.constant dense<0xFF800000> : vector<4xf32>
    %1199 = vector.multi_reduction <maximumf>, %1198, %cst_401 [1] : vector<4x3xf32> to vector<4xf32>
    %1200 = vector.shape_cast %1199 : vector<4xf32> to vector<4x1xf32>
    %1201 = vector.broadcast %1200 : vector<4x1xf32> to vector<4x3xf32>
    %1202 = arith.subf %1198, %1201 : vector<4x3xf32>
    %1203 = math.exp %1202 : vector<4x3xf32>
    %cst_402 = arith.constant dense<0.000000e+00> : vector<4xf32>
    %1204 = vector.multi_reduction <add>, %1203, %cst_402 [1] : vector<4x3xf32> to vector<4xf32>
    %1205 = vector.shape_cast %1204 : vector<4xf32> to vector<4x1xf32>
    %1206 = vector.broadcast %1205 : vector<4x1xf32> to vector<4x3xf32>
    %1207 = arith.divf %1203, %1206 : vector<4x3xf32>
    %1208 = vector.extract_strided_slice %1176 {offsets = [0, 13], sizes = [4, 1], strides = [1, 1]} : vector<4x14xf32> to vector<4x1xf32>
    %cst_403 = arith.constant 2.000000e+01 : f32
    %1209 = vector.broadcast %cst_403 : f32 to vector<4x1xf32>
    %1210 = arith.cmpf ogt, %1208, %1209 : vector<4x1xf32>
    %cst_404 = arith.constant 2.000000e+01 : f32
    %1211 = vector.broadcast %cst_404 : f32 to vector<4x1xf32>
    %1212 = arith.minimumf %1208, %1211 : vector<4x1xf32>
    %1213 = math.exp %1212 : vector<4x1xf32>
    %cst_405 = arith.constant 1.000000e+00 : f32
    %1214 = vector.broadcast %cst_405 : f32 to vector<4x1xf32>
    %1215 = arith.addf %1214, %1213 : vector<4x1xf32>
    %1216 = math.log %1215 : vector<4x1xf32>
    %1217 = arith.select %1210, %1208, %1216 : vector<4x1xi1>, vector<4x1xf32>
    %cst_406 = arith.constant 1.000000e+00 : f32
    %1218 = vector.broadcast %cst_406 : f32 to vector<4x1xf32>
    %1219 = arith.addf %1218, %1217 : vector<4x1xf32>
    %cst_407 = arith.constant 1.000000e-16 : f32
    %1220 = vector.broadcast %cst_407 : f32 to vector<2x128xf32>
    %1221 = arith.addf %1123, %1220 : vector<2x128xf32>
    %cst_408 = arith.constant dense<0.000000e+00> : vector<4x128xf32>
    %1222 = tpu.matmul %21, %1221, %cst_408 {dimension_numbers = #tpu.dot_dimension_numbers<[1], [0], [0], [1], [0, 0, 1, 1], [], []>} : vector<4x2xf32>, vector<2x128xf32>, vector<4x128xf32> -> vector<4x128xf32>
    %cst_409 = arith.constant dense<0.000000e+00> : vector<4x128xf32>
    %1223 = tpu.matmul %1179, %15, %cst_409 {dimension_numbers = #tpu.dot_dimension_numbers<[1], [0], [0], [1], [0, 0, 1, 1], [], []>} : vector<4x8xf32>, vector<8x128xf32>, vector<4x128xf32> -> vector<4x128xf32>
    %1224 = arith.mulf %1222, %1223 : vector<4x128xf32>
    %cst_410 = arith.constant dense<0.000000e+00> : vector<4x16xf32>
    %1225 = tpu.matmul %1224, %16, %cst_410 {dimension_numbers = #tpu.dot_dimension_numbers<[1], [0], [0], [1], [0, 0, 1, 1], [], []>} : vector<4x128xf32>, vector<128x16xf32>, vector<4x16xf32> -> vector<4x16xf32>
    %1226 = arith.mulf %1222, %1222 : vector<4x128xf32>
    %cst_411 = arith.constant dense<0.000000e+00> : vector<4x16xf32>
    %1227 = tpu.matmul %1226, %16, %cst_411 {dimension_numbers = #tpu.dot_dimension_numbers<[1], [0], [0], [1], [0, 0, 1, 1], [], []>} : vector<4x128xf32>, vector<128x16xf32>, vector<4x16xf32> -> vector<4x16xf32>
    %1228 = arith.mulf %1179, %1179 : vector<4x8xf32>
    %cst_412 = arith.constant dense<0.000000e+00> : vector<4xf32>
    %1229 = vector.multi_reduction <add>, %1228, %cst_412 [1] : vector<4x8xf32> to vector<4xf32>
    %1230 = vector.shape_cast %1229 : vector<4xf32> to vector<4x1xf32>
    %cst_413 = arith.constant 1.000000e-16 : f32
    %1231 = vector.broadcast %cst_413 : f32 to vector<4x16xf32>
    %1232 = arith.maximumf %1227, %1231 : vector<4x16xf32>
    %cst_414 = arith.constant 1.000000e-16 : f32
    %1233 = vector.broadcast %cst_414 : f32 to vector<4x1xf32>
    %1234 = arith.maximumf %1230, %1233 : vector<4x1xf32>
    %1235 = vector.broadcast %1234 : vector<4x1xf32> to vector<4x16xf32>
    %1236 = arith.mulf %1232, %1235 : vector<4x16xf32>
    %1237 = math.rsqrt %1236 : vector<4x16xf32>
    %1238 = arith.mulf %1225, %1237 : vector<4x16xf32>
    %1239 = vector.broadcast %1189 : vector<4x1xf32> to vector<4x16xf32>
    %1240 = arith.mulf %1239, %1238 : vector<4x16xf32>
    %cst_415 = arith.constant dense<0xFF800000> : vector<4xf32>
    %1241 = vector.multi_reduction <maximumf>, %1240, %cst_415 [1] : vector<4x16xf32> to vector<4xf32>
    %1242 = vector.shape_cast %1241 : vector<4xf32> to vector<4x1xf32>
    %1243 = vector.broadcast %1242 : vector<4x1xf32> to vector<4x16xf32>
    %1244 = arith.subf %1240, %1243 : vector<4x16xf32>
    %1245 = math.exp %1244 : vector<4x16xf32>
    %cst_416 = arith.constant dense<0.000000e+00> : vector<4xf32>
    %1246 = vector.multi_reduction <add>, %1245, %cst_416 [1] : vector<4x16xf32> to vector<4xf32>
    %1247 = vector.shape_cast %1246 : vector<4xf32> to vector<4x1xf32>
    %1248 = vector.broadcast %1247 : vector<4x1xf32> to vector<4x16xf32>
    %1249 = arith.divf %1245, %1248 : vector<4x16xf32>
    %1250 = vector.broadcast %1197 : vector<4x1xf32> to vector<4x16xf32>
    %1251 = arith.mulf %1250, %1249 : vector<4x16xf32>
    %cst_417 = arith.constant 1.000000e+00 : f32
    %1252 = vector.broadcast %cst_417 : f32 to vector<4x1xf32>
    %1253 = arith.subf %1252, %1197 : vector<4x1xf32>
    %1254 = vector.broadcast %1253 : vector<4x1xf32> to vector<4x16xf32>
    %1255 = arith.mulf %1254, %1100 : vector<4x16xf32>
    %1256 = arith.addf %1251, %1255 : vector<4x16xf32>
    %cst_418 = arith.constant dense<0.000000e+00> : vector<4x48xf32>
    %1257 = tpu.matmul %1256, %14, %cst_418 {dimension_numbers = #tpu.dot_dimension_numbers<[1], [0], [0], [1], [0, 0, 1, 1], [], []>} : vector<4x16xf32>, vector<16x48xf32>, vector<4x48xf32> -> vector<4x48xf32>
    %1258 = vector.extract_strided_slice %1207 {offsets = [0, 0], sizes = [4, 1], strides = [1, 1]} : vector<4x3xf32> to vector<4x1xf32>
    %1259 = vector.extract_strided_slice %1257 {offsets = [0, 0], sizes = [4, 16], strides = [1, 1]} : vector<4x48xf32> to vector<4x16xf32>
    %1260 = vector.broadcast %1258 : vector<4x1xf32> to vector<4x16xf32>
    %1261 = arith.mulf %1260, %1259 : vector<4x16xf32>
    %1262 = vector.extract_strided_slice %1207 {offsets = [0, 1], sizes = [4, 1], strides = [1, 1]} : vector<4x3xf32> to vector<4x1xf32>
    %1263 = vector.extract_strided_slice %1257 {offsets = [0, 16], sizes = [4, 16], strides = [1, 1]} : vector<4x48xf32> to vector<4x16xf32>
    %1264 = vector.broadcast %1262 : vector<4x1xf32> to vector<4x16xf32>
    %1265 = arith.mulf %1264, %1263 : vector<4x16xf32>
    %1266 = arith.addf %1261, %1265 : vector<4x16xf32>
    %1267 = vector.extract_strided_slice %1207 {offsets = [0, 2], sizes = [4, 1], strides = [1, 1]} : vector<4x3xf32> to vector<4x1xf32>
    %1268 = vector.extract_strided_slice %1257 {offsets = [0, 32], sizes = [4, 16], strides = [1, 1]} : vector<4x48xf32> to vector<4x16xf32>
    %1269 = vector.broadcast %1267 : vector<4x1xf32> to vector<4x16xf32>
    %1270 = arith.mulf %1269, %1268 : vector<4x16xf32>
    %1271 = arith.addf %1266, %1270 : vector<4x16xf32>
    %cst_419 = arith.constant 1.000000e-30 : f32
    %1272 = vector.broadcast %cst_419 : f32 to vector<4x16xf32>
    %1273 = arith.maximumf %1271, %1272 : vector<4x16xf32>
    %1274 = math.log %1273 : vector<4x16xf32>
    %1275 = vector.broadcast %1219 : vector<4x1xf32> to vector<4x16xf32>
    %1276 = arith.mulf %1275, %1274 : vector<4x16xf32>
    %1277 = math.exp %1276 : vector<4x16xf32>
    %cst_420 = arith.constant dense<0.000000e+00> : vector<4xf32>
    %1278 = vector.multi_reduction <add>, %1277, %cst_420 [1] : vector<4x16xf32> to vector<4xf32>
    %1279 = vector.shape_cast %1278 : vector<4xf32> to vector<4x1xf32>
    %cst_421 = arith.constant 1.000000e-16 : f32
    %1280 = vector.broadcast %cst_421 : f32 to vector<4x1xf32>
    %1281 = arith.addf %1279, %1280 : vector<4x1xf32>
    %1282 = vector.broadcast %1281 : vector<4x1xf32> to vector<4x16xf32>
    %1283 = arith.divf %1277, %1282 : vector<4x16xf32>
    %cst_422 = arith.constant dense<0.000000e+00> : vector<2x16xf32>
    %1284 = tpu.matmul %22, %1283, %cst_422 {dimension_numbers = #tpu.dot_dimension_numbers<[1], [0], [0], [1], [0, 0, 1, 1], [], []>} : vector<2x4xf32>, vector<4x16xf32>, vector<2x16xf32> -> vector<2x16xf32>
    %cst_423 = arith.constant dense<0.000000e+00> : vector<2x16xf32>
    %1285 = tpu.matmul %23, %1283, %cst_423 {dimension_numbers = #tpu.dot_dimension_numbers<[1], [0], [0], [1], [0, 0, 1, 1], [], []>} : vector<2x4xf32>, vector<4x16xf32>, vector<2x16xf32> -> vector<2x16xf32>
    %cst_424 = arith.constant dense<0.000000e+00> : vector<2x128xf32>
    %1286 = tpu.matmul %1284, %17, %cst_424 {dimension_numbers = #tpu.dot_dimension_numbers<[1], [0], [0], [1], [0, 0, 1, 1], [], []>} : vector<2x16xf32>, vector<16x128xf32>, vector<2x128xf32> -> vector<2x128xf32>
    %1287 = arith.mulf %1286, %1123 : vector<2x128xf32>
    %cst_425 = arith.constant dense<0.000000e+00> : vector<2x8xf32>
    %1288 = tpu.matmul %1287, %18, %cst_425 {dimension_numbers = #tpu.dot_dimension_numbers<[1], [0], [0], [1], [0, 0, 1, 1], [], []>} : vector<2x128xf32>, vector<128x8xf32>, vector<2x8xf32> -> vector<2x8xf32>
    %1289 = vector.extract_strided_slice %1171 {offsets = [0, 28], sizes = [2, 8], strides = [1, 1]} : vector<2x44xf32> to vector<2x8xf32>
    %cst_426 = arith.constant 5.000000e-01 : f32
    %1290 = vector.broadcast %cst_426 : f32 to vector<2x8xf32>
    %1291 = arith.mulf %1290, %1289 : vector<2x8xf32>
    %1292 = math.tanh %1291 : vector<2x8xf32>
    %cst_427 = arith.constant 1.000000e+00 : f32
    %1293 = vector.broadcast %cst_427 : f32 to vector<2x8xf32>
    %1294 = arith.addf %1292, %1293 : vector<2x8xf32>
    %cst_428 = arith.constant 5.000000e-01 : f32
    %1295 = vector.broadcast %cst_428 : f32 to vector<2x8xf32>
    %1296 = arith.mulf %1295, %1294 : vector<2x8xf32>
    %1297 = vector.extract_strided_slice %1171 {offsets = [0, 36], sizes = [2, 8], strides = [1, 1]} : vector<2x44xf32> to vector<2x8xf32>
    %cst_429 = arith.constant dense<0.000000e+00> : vector<2x128xf32>
    %1298 = tpu.matmul %1285, %17, %cst_429 {dimension_numbers = #tpu.dot_dimension_numbers<[1], [0], [0], [1], [0, 0, 1, 1], [], []>} : vector<2x16xf32>, vector<16x128xf32>, vector<2x128xf32> -> vector<2x128xf32>
    %cst_430 = arith.constant dense<0.000000e+00> : vector<2x128xf32>
    %1299 = tpu.matmul %1296, %15, %cst_430 {dimension_numbers = #tpu.dot_dimension_numbers<[1], [0], [0], [1], [0, 0, 1, 1], [], []>} : vector<2x8xf32>, vector<8x128xf32>, vector<2x128xf32> -> vector<2x128xf32>
    %1300 = arith.mulf %1298, %1299 : vector<2x128xf32>
    %cst_431 = arith.constant 1.000000e+00 : f32
    %1301 = vector.broadcast %cst_431 : f32 to vector<2x128xf32>
    %1302 = arith.subf %1301, %1300 : vector<2x128xf32>
    %1303 = arith.mulf %1123, %1302 : vector<2x128xf32>
    %cst_432 = arith.constant dense<0.000000e+00> : vector<2x128xf32>
    %1304 = tpu.matmul %1297, %15, %cst_432 {dimension_numbers = #tpu.dot_dimension_numbers<[1], [0], [0], [1], [0, 0, 1, 1], [], []>} : vector<2x8xf32>, vector<8x128xf32>, vector<2x128xf32> -> vector<2x128xf32>
    %1305 = arith.mulf %1298, %1304 : vector<2x128xf32>
    %1306 = arith.addf %1303, %1305 : vector<2x128xf32>
    %cst_433 = arith.constant dense<0.000000e+00> : vector<2x8xf32>
    %1307 = tpu.matmul %1168, %11, %cst_433 {dimension_numbers = #tpu.dot_dimension_numbers<[1], [0], [0], [1], [0, 0, 1, 1], [], []>} : vector<2x32xf32>, vector<32x8xf32>, vector<2x8xf32> -> vector<2x8xf32>
    %cst_434 = arith.constant dense<0.000000e+00> : vector<2x8xf32>
    %1308 = tpu.matmul %1288, %12, %cst_434 {dimension_numbers = #tpu.dot_dimension_numbers<[1], [0], [0], [1], [0, 0, 1, 1], [], []>} : vector<2x8xf32>, vector<8x8xf32>, vector<2x8xf32> -> vector<2x8xf32>
    %1309 = arith.addf %1307, %1308 : vector<2x8xf32>
    %1310 = vector.broadcast %13 : vector<1x8xf32> to vector<2x8xf32>
    %1311 = arith.addf %1309, %1310 : vector<2x8xf32>
    %c0_435 = arith.constant 0 : index
    %c48 = arith.constant 48 : index
    %1312 = vector.load %arg18[%c0_435, %c48] : memref<2x64xf32, #tpu.memory_space<vmem>>, vector<2x8xf32>
    tpu.vector_store %arg18[%c0_435, %c48], %1311 {strides = array<i32>} : memref<2x64xf32, #tpu.memory_space<vmem>>, vector<2x8xf32>,
    %1313 = vector.extract_strided_slice %0 {offsets = [0, 56], sizes = [2, 8], strides = [1, 1]} : vector<2x64xf32> to vector<2x8xf32>
    %cst_436 = arith.constant dense<0.000000e+00> : vector<2x128xf32>
    %1314 = tpu.matmul %1313, %4, %cst_436 {dimension_numbers = #tpu.dot_dimension_numbers<[1], [0], [0], [1], [0, 0, 1, 1], [], []>} : vector<2x8xf32>, vector<8x128xf32>, vector<2x128xf32> -> vector<2x128xf32>
    %cst_437 = arith.constant dense<0.000000e+00> : vector<2x128xf32>
    %1315 = tpu.matmul %1288, %5, %cst_437 {dimension_numbers = #tpu.dot_dimension_numbers<[1], [0], [0], [1], [0, 0, 1, 1], [], []>} : vector<2x8xf32>, vector<8x128xf32>, vector<2x128xf32> -> vector<2x128xf32>
    %1316 = arith.addf %1314, %1315 : vector<2x128xf32>
    %cst_438 = arith.constant dense<0.000000e+00> : vector<2x128xf32>
    %1317 = tpu.matmul %1168, %6, %cst_438 {dimension_numbers = #tpu.dot_dimension_numbers<[1], [0], [0], [1], [0, 0, 1, 1], [], []>} : vector<2x32xf32>, vector<32x128xf32>, vector<2x128xf32> -> vector<2x128xf32>
    %1318 = arith.addf %1316, %1317 : vector<2x128xf32>
    %1319 = vector.broadcast %7 : vector<1x128xf32> to vector<2x128xf32>
    %1320 = arith.addf %1318, %1319 : vector<2x128xf32>
    %1321 = vector.extract_strided_slice %1320 {offsets = [0, 0], sizes = [2, 32], strides = [1, 1]} : vector<2x128xf32> to vector<2x32xf32>
    %cst_439 = arith.constant 5.000000e-01 : f32
    %1322 = vector.broadcast %cst_439 : f32 to vector<2x32xf32>
    %1323 = arith.mulf %1322, %1321 : vector<2x32xf32>
    %1324 = math.tanh %1323 : vector<2x32xf32>
    %cst_440 = arith.constant 1.000000e+00 : f32
    %1325 = vector.broadcast %cst_440 : f32 to vector<2x32xf32>
    %1326 = arith.addf %1324, %1325 : vector<2x32xf32>
    %cst_441 = arith.constant 5.000000e-01 : f32
    %1327 = vector.broadcast %cst_441 : f32 to vector<2x32xf32>
    %1328 = arith.mulf %1327, %1326 : vector<2x32xf32>
    %1329 = vector.extract_strided_slice %1320 {offsets = [0, 32], sizes = [2, 32], strides = [1, 1]} : vector<2x128xf32> to vector<2x32xf32>
    %cst_442 = arith.constant 5.000000e-01 : f32
    %1330 = vector.broadcast %cst_442 : f32 to vector<2x32xf32>
    %1331 = arith.mulf %1330, %1329 : vector<2x32xf32>
    %1332 = math.tanh %1331 : vector<2x32xf32>
    %cst_443 = arith.constant 1.000000e+00 : f32
    %1333 = vector.broadcast %cst_443 : f32 to vector<2x32xf32>
    %1334 = arith.addf %1332, %1333 : vector<2x32xf32>
    %cst_444 = arith.constant 5.000000e-01 : f32
    %1335 = vector.broadcast %cst_444 : f32 to vector<2x32xf32>
    %1336 = arith.mulf %1335, %1334 : vector<2x32xf32>
    %1337 = vector.extract_strided_slice %1320 {offsets = [0, 64], sizes = [2, 32], strides = [1, 1]} : vector<2x128xf32> to vector<2x32xf32>
    %1338 = math.tanh %1337 : vector<2x32xf32>
    %1339 = vector.extract_strided_slice %1320 {offsets = [0, 96], sizes = [2, 32], strides = [1, 1]} : vector<2x128xf32> to vector<2x32xf32>
    %cst_445 = arith.constant 5.000000e-01 : f32
    %1340 = vector.broadcast %cst_445 : f32 to vector<2x32xf32>
    %1341 = arith.mulf %1340, %1339 : vector<2x32xf32>
    %1342 = math.tanh %1341 : vector<2x32xf32>
    %cst_446 = arith.constant 1.000000e+00 : f32
    %1343 = vector.broadcast %cst_446 : f32 to vector<2x32xf32>
    %1344 = arith.addf %1342, %1343 : vector<2x32xf32>
    %cst_447 = arith.constant 5.000000e-01 : f32
    %1345 = vector.broadcast %cst_447 : f32 to vector<2x32xf32>
    %1346 = arith.mulf %1345, %1344 : vector<2x32xf32>
    %1347 = arith.mulf %1336, %1166 : vector<2x32xf32>
    %1348 = arith.mulf %1328, %1338 : vector<2x32xf32>
    %1349 = arith.addf %1347, %1348 : vector<2x32xf32>
    %1350 = math.tanh %1349 : vector<2x32xf32>
    %1351 = arith.mulf %1346, %1350 : vector<2x32xf32>
    %cst_448 = arith.constant dense<0.000000e+00> : vector<2x44xf32>
    %1352 = tpu.matmul %1351, %8, %cst_448 {dimension_numbers = #tpu.dot_dimension_numbers<[1], [0], [0], [1], [0, 0, 1, 1], [], []>} : vector<2x32xf32>, vector<32x44xf32>, vector<2x44xf32> -> vector<2x44xf32>
    %1353 = vector.broadcast %9 : vector<1x44xf32> to vector<2x44xf32>
    %1354 = arith.addf %1352, %1353 : vector<2x44xf32>
    %1355 = vector.extract_strided_slice %1354 {offsets = [0, 0], sizes = [2, 14], strides = [1, 1]} : vector<2x44xf32> to vector<2x14xf32>
    %cst_449 = arith.constant dense<0.000000e+00> : vector<4x14xf32>
    %1356 = tpu.matmul %19, %1355, %cst_449 {dimension_numbers = #tpu.dot_dimension_numbers<[1], [0], [0], [1], [0, 0, 1, 1], [], []>} : vector<4x2xf32>, vector<2x14xf32>, vector<4x14xf32> -> vector<4x14xf32>
    %1357 = vector.extract_strided_slice %1354 {offsets = [0, 14], sizes = [2, 14], strides = [1, 1]} : vector<2x44xf32> to vector<2x14xf32>
    %cst_450 = arith.constant dense<0.000000e+00> : vector<4x14xf32>
    %1358 = tpu.matmul %20, %1357, %cst_450 {dimension_numbers = #tpu.dot_dimension_numbers<[1], [0], [0], [1], [0, 0, 1, 1], [], []>} : vector<4x2xf32>, vector<2x14xf32>, vector<4x14xf32> -> vector<4x14xf32>
    %1359 = arith.addf %1356, %1358 : vector<4x14xf32>
    %1360 = vector.extract_strided_slice %1359 {offsets = [0, 0], sizes = [4, 8], strides = [1, 1]} : vector<4x14xf32> to vector<4x8xf32>
    %cst_451 = arith.constant 1.000000e-16 : f32
    %1361 = vector.broadcast %cst_451 : f32 to vector<4x8xf32>
    %1362 = arith.addf %1360, %1361 : vector<4x8xf32>
    %1363 = vector.extract_strided_slice %1359 {offsets = [0, 8], sizes = [4, 1], strides = [1, 1]} : vector<4x14xf32> to vector<4x1xf32>
    %cst_452 = arith.constant 2.000000e+01 : f32
    %1364 = vector.broadcast %cst_452 : f32 to vector<4x1xf32>
    %1365 = arith.cmpf ogt, %1363, %1364 : vector<4x1xf32>
    %cst_453 = arith.constant 2.000000e+01 : f32
    %1366 = vector.broadcast %cst_453 : f32 to vector<4x1xf32>
    %1367 = arith.minimumf %1363, %1366 : vector<4x1xf32>
    %1368 = math.exp %1367 : vector<4x1xf32>
    %cst_454 = arith.constant 1.000000e+00 : f32
    %1369 = vector.broadcast %cst_454 : f32 to vector<4x1xf32>
    %1370 = arith.addf %1369, %1368 : vector<4x1xf32>
    %1371 = math.log %1370 : vector<4x1xf32>
    %1372 = arith.select %1365, %1363, %1371 : vector<4x1xi1>, vector<4x1xf32>
    %1373 = vector.extract_strided_slice %1359 {offsets = [0, 9], sizes = [4, 1], strides = [1, 1]} : vector<4x14xf32> to vector<4x1xf32>
    %cst_455 = arith.constant 5.000000e-01 : f32
    %1374 = vector.broadcast %cst_455 : f32 to vector<4x1xf32>
    %1375 = arith.mulf %1374, %1373 : vector<4x1xf32>
    %1376 = math.tanh %1375 : vector<4x1xf32>
    %cst_456 = arith.constant 1.000000e+00 : f32
    %1377 = vector.broadcast %cst_456 : f32 to vector<4x1xf32>
    %1378 = arith.addf %1376, %1377 : vector<4x1xf32>
    %cst_457 = arith.constant 5.000000e-01 : f32
    %1379 = vector.broadcast %cst_457 : f32 to vector<4x1xf32>
    %1380 = arith.mulf %1379, %1378 : vector<4x1xf32>
    %1381 = vector.extract_strided_slice %1359 {offsets = [0, 10], sizes = [4, 3], strides = [1, 1]} : vector<4x14xf32> to vector<4x3xf32>
    %cst_458 = arith.constant dense<0xFF800000> : vector<4xf32>
    %1382 = vector.multi_reduction <maximumf>, %1381, %cst_458 [1] : vector<4x3xf32> to vector<4xf32>
    %1383 = vector.shape_cast %1382 : vector<4xf32> to vector<4x1xf32>
    %1384 = vector.broadcast %1383 : vector<4x1xf32> to vector<4x3xf32>
    %1385 = arith.subf %1381, %1384 : vector<4x3xf32>
    %1386 = math.exp %1385 : vector<4x3xf32>
    %cst_459 = arith.constant dense<0.000000e+00> : vector<4xf32>
    %1387 = vector.multi_reduction <add>, %1386, %cst_459 [1] : vector<4x3xf32> to vector<4xf32>
    %1388 = vector.shape_cast %1387 : vector<4xf32> to vector<4x1xf32>
    %1389 = vector.broadcast %1388 : vector<4x1xf32> to vector<4x3xf32>
    %1390 = arith.divf %1386, %1389 : vector<4x3xf32>
    %1391 = vector.extract_strided_slice %1359 {offsets = [0, 13], sizes = [4, 1], strides = [1, 1]} : vector<4x14xf32> to vector<4x1xf32>
    %cst_460 = arith.constant 2.000000e+01 : f32
    %1392 = vector.broadcast %cst_460 : f32 to vector<4x1xf32>
    %1393 = arith.cmpf ogt, %1391, %1392 : vector<4x1xf32>
    %cst_461 = arith.constant 2.000000e+01 : f32
    %1394 = vector.broadcast %cst_461 : f32 to vector<4x1xf32>
    %1395 = arith.minimumf %1391, %1394 : vector<4x1xf32>
    %1396 = math.exp %1395 : vector<4x1xf32>
    %cst_462 = arith.constant 1.000000e+00 : f32
    %1397 = vector.broadcast %cst_462 : f32 to vector<4x1xf32>
    %1398 = arith.addf %1397, %1396 : vector<4x1xf32>
    %1399 = math.log %1398 : vector<4x1xf32>
    %1400 = arith.select %1393, %1391, %1399 : vector<4x1xi1>, vector<4x1xf32>
    %cst_463 = arith.constant 1.000000e+00 : f32
    %1401 = vector.broadcast %cst_463 : f32 to vector<4x1xf32>
    %1402 = arith.addf %1401, %1400 : vector<4x1xf32>
    %cst_464 = arith.constant 1.000000e-16 : f32
    %1403 = vector.broadcast %cst_464 : f32 to vector<2x128xf32>
    %1404 = arith.addf %1306, %1403 : vector<2x128xf32>
    %cst_465 = arith.constant dense<0.000000e+00> : vector<4x128xf32>
    %1405 = tpu.matmul %21, %1404, %cst_465 {dimension_numbers = #tpu.dot_dimension_numbers<[1], [0], [0], [1], [0, 0, 1, 1], [], []>} : vector<4x2xf32>, vector<2x128xf32>, vector<4x128xf32> -> vector<4x128xf32>
    %cst_466 = arith.constant dense<0.000000e+00> : vector<4x128xf32>
    %1406 = tpu.matmul %1362, %15, %cst_466 {dimension_numbers = #tpu.dot_dimension_numbers<[1], [0], [0], [1], [0, 0, 1, 1], [], []>} : vector<4x8xf32>, vector<8x128xf32>, vector<4x128xf32> -> vector<4x128xf32>
    %1407 = arith.mulf %1405, %1406 : vector<4x128xf32>
    %cst_467 = arith.constant dense<0.000000e+00> : vector<4x16xf32>
    %1408 = tpu.matmul %1407, %16, %cst_467 {dimension_numbers = #tpu.dot_dimension_numbers<[1], [0], [0], [1], [0, 0, 1, 1], [], []>} : vector<4x128xf32>, vector<128x16xf32>, vector<4x16xf32> -> vector<4x16xf32>
    %1409 = arith.mulf %1405, %1405 : vector<4x128xf32>
    %cst_468 = arith.constant dense<0.000000e+00> : vector<4x16xf32>
    %1410 = tpu.matmul %1409, %16, %cst_468 {dimension_numbers = #tpu.dot_dimension_numbers<[1], [0], [0], [1], [0, 0, 1, 1], [], []>} : vector<4x128xf32>, vector<128x16xf32>, vector<4x16xf32> -> vector<4x16xf32>
    %1411 = arith.mulf %1362, %1362 : vector<4x8xf32>
    %cst_469 = arith.constant dense<0.000000e+00> : vector<4xf32>
    %1412 = vector.multi_reduction <add>, %1411, %cst_469 [1] : vector<4x8xf32> to vector<4xf32>
    %1413 = vector.shape_cast %1412 : vector<4xf32> to vector<4x1xf32>
    %cst_470 = arith.constant 1.000000e-16 : f32
    %1414 = vector.broadcast %cst_470 : f32 to vector<4x16xf32>
    %1415 = arith.maximumf %1410, %1414 : vector<4x16xf32>
    %cst_471 = arith.constant 1.000000e-16 : f32
    %1416 = vector.broadcast %cst_471 : f32 to vector<4x1xf32>
    %1417 = arith.maximumf %1413, %1416 : vector<4x1xf32>
    %1418 = vector.broadcast %1417 : vector<4x1xf32> to vector<4x16xf32>
    %1419 = arith.mulf %1415, %1418 : vector<4x16xf32>
    %1420 = math.rsqrt %1419 : vector<4x16xf32>
    %1421 = arith.mulf %1408, %1420 : vector<4x16xf32>
    %1422 = vector.broadcast %1372 : vector<4x1xf32> to vector<4x16xf32>
    %1423 = arith.mulf %1422, %1421 : vector<4x16xf32>
    %cst_472 = arith.constant dense<0xFF800000> : vector<4xf32>
    %1424 = vector.multi_reduction <maximumf>, %1423, %cst_472 [1] : vector<4x16xf32> to vector<4xf32>
    %1425 = vector.shape_cast %1424 : vector<4xf32> to vector<4x1xf32>
    %1426 = vector.broadcast %1425 : vector<4x1xf32> to vector<4x16xf32>
    %1427 = arith.subf %1423, %1426 : vector<4x16xf32>
    %1428 = math.exp %1427 : vector<4x16xf32>
    %cst_473 = arith.constant dense<0.000000e+00> : vector<4xf32>
    %1429 = vector.multi_reduction <add>, %1428, %cst_473 [1] : vector<4x16xf32> to vector<4xf32>
    %1430 = vector.shape_cast %1429 : vector<4xf32> to vector<4x1xf32>
    %1431 = vector.broadcast %1430 : vector<4x1xf32> to vector<4x16xf32>
    %1432 = arith.divf %1428, %1431 : vector<4x16xf32>
    %1433 = vector.broadcast %1380 : vector<4x1xf32> to vector<4x16xf32>
    %1434 = arith.mulf %1433, %1432 : vector<4x16xf32>
    %cst_474 = arith.constant 1.000000e+00 : f32
    %1435 = vector.broadcast %cst_474 : f32 to vector<4x1xf32>
    %1436 = arith.subf %1435, %1380 : vector<4x1xf32>
    %1437 = vector.broadcast %1436 : vector<4x1xf32> to vector<4x16xf32>
    %1438 = arith.mulf %1437, %1283 : vector<4x16xf32>
    %1439 = arith.addf %1434, %1438 : vector<4x16xf32>
    %cst_475 = arith.constant dense<0.000000e+00> : vector<4x48xf32>
    %1440 = tpu.matmul %1439, %14, %cst_475 {dimension_numbers = #tpu.dot_dimension_numbers<[1], [0], [0], [1], [0, 0, 1, 1], [], []>} : vector<4x16xf32>, vector<16x48xf32>, vector<4x48xf32> -> vector<4x48xf32>
    %1441 = vector.extract_strided_slice %1390 {offsets = [0, 0], sizes = [4, 1], strides = [1, 1]} : vector<4x3xf32> to vector<4x1xf32>
    %1442 = vector.extract_strided_slice %1440 {offsets = [0, 0], sizes = [4, 16], strides = [1, 1]} : vector<4x48xf32> to vector<4x16xf32>
    %1443 = vector.broadcast %1441 : vector<4x1xf32> to vector<4x16xf32>
    %1444 = arith.mulf %1443, %1442 : vector<4x16xf32>
    %1445 = vector.extract_strided_slice %1390 {offsets = [0, 1], sizes = [4, 1], strides = [1, 1]} : vector<4x3xf32> to vector<4x1xf32>
    %1446 = vector.extract_strided_slice %1440 {offsets = [0, 16], sizes = [4, 16], strides = [1, 1]} : vector<4x48xf32> to vector<4x16xf32>
    %1447 = vector.broadcast %1445 : vector<4x1xf32> to vector<4x16xf32>
    %1448 = arith.mulf %1447, %1446 : vector<4x16xf32>
    %1449 = arith.addf %1444, %1448 : vector<4x16xf32>
    %1450 = vector.extract_strided_slice %1390 {offsets = [0, 2], sizes = [4, 1], strides = [1, 1]} : vector<4x3xf32> to vector<4x1xf32>
    %1451 = vector.extract_strided_slice %1440 {offsets = [0, 32], sizes = [4, 16], strides = [1, 1]} : vector<4x48xf32> to vector<4x16xf32>
    %1452 = vector.broadcast %1450 : vector<4x1xf32> to vector<4x16xf32>
    %1453 = arith.mulf %1452, %1451 : vector<4x16xf32>
    %1454 = arith.addf %1449, %1453 : vector<4x16xf32>
    %cst_476 = arith.constant 1.000000e-30 : f32
    %1455 = vector.broadcast %cst_476 : f32 to vector<4x16xf32>
    %1456 = arith.maximumf %1454, %1455 : vector<4x16xf32>
    %1457 = math.log %1456 : vector<4x16xf32>
    %1458 = vector.broadcast %1402 : vector<4x1xf32> to vector<4x16xf32>
    %1459 = arith.mulf %1458, %1457 : vector<4x16xf32>
    %1460 = math.exp %1459 : vector<4x16xf32>
    %cst_477 = arith.constant dense<0.000000e+00> : vector<4xf32>
    %1461 = vector.multi_reduction <add>, %1460, %cst_477 [1] : vector<4x16xf32> to vector<4xf32>
    %1462 = vector.shape_cast %1461 : vector<4xf32> to vector<4x1xf32>
    %cst_478 = arith.constant 1.000000e-16 : f32
    %1463 = vector.broadcast %cst_478 : f32 to vector<4x1xf32>
    %1464 = arith.addf %1462, %1463 : vector<4x1xf32>
    %1465 = vector.broadcast %1464 : vector<4x1xf32> to vector<4x16xf32>
    %1466 = arith.divf %1460, %1465 : vector<4x16xf32>
    %cst_479 = arith.constant dense<0.000000e+00> : vector<2x16xf32>
    %1467 = tpu.matmul %22, %1466, %cst_479 {dimension_numbers = #tpu.dot_dimension_numbers<[1], [0], [0], [1], [0, 0, 1, 1], [], []>} : vector<2x4xf32>, vector<4x16xf32>, vector<2x16xf32> -> vector<2x16xf32>
    %cst_480 = arith.constant dense<0.000000e+00> : vector<2x16xf32>
    %1468 = tpu.matmul %23, %1466, %cst_480 {dimension_numbers = #tpu.dot_dimension_numbers<[1], [0], [0], [1], [0, 0, 1, 1], [], []>} : vector<2x4xf32>, vector<4x16xf32>, vector<2x16xf32> -> vector<2x16xf32>
    %cst_481 = arith.constant dense<0.000000e+00> : vector<2x128xf32>
    %1469 = tpu.matmul %1467, %17, %cst_481 {dimension_numbers = #tpu.dot_dimension_numbers<[1], [0], [0], [1], [0, 0, 1, 1], [], []>} : vector<2x16xf32>, vector<16x128xf32>, vector<2x128xf32> -> vector<2x128xf32>
    %1470 = arith.mulf %1469, %1306 : vector<2x128xf32>
    %cst_482 = arith.constant dense<0.000000e+00> : vector<2x8xf32>
    %1471 = tpu.matmul %1470, %18, %cst_482 {dimension_numbers = #tpu.dot_dimension_numbers<[1], [0], [0], [1], [0, 0, 1, 1], [], []>} : vector<2x128xf32>, vector<128x8xf32>, vector<2x8xf32> -> vector<2x8xf32>
    %1472 = vector.extract_strided_slice %1354 {offsets = [0, 28], sizes = [2, 8], strides = [1, 1]} : vector<2x44xf32> to vector<2x8xf32>
    %cst_483 = arith.constant 5.000000e-01 : f32
    %1473 = vector.broadcast %cst_483 : f32 to vector<2x8xf32>
    %1474 = arith.mulf %1473, %1472 : vector<2x8xf32>
    %1475 = math.tanh %1474 : vector<2x8xf32>
    %cst_484 = arith.constant 1.000000e+00 : f32
    %1476 = vector.broadcast %cst_484 : f32 to vector<2x8xf32>
    %1477 = arith.addf %1475, %1476 : vector<2x8xf32>
    %cst_485 = arith.constant 5.000000e-01 : f32
    %1478 = vector.broadcast %cst_485 : f32 to vector<2x8xf32>
    %1479 = arith.mulf %1478, %1477 : vector<2x8xf32>
    %1480 = vector.extract_strided_slice %1354 {offsets = [0, 36], sizes = [2, 8], strides = [1, 1]} : vector<2x44xf32> to vector<2x8xf32>
    %cst_486 = arith.constant dense<0.000000e+00> : vector<2x128xf32>
    %1481 = tpu.matmul %1468, %17, %cst_486 {dimension_numbers = #tpu.dot_dimension_numbers<[1], [0], [0], [1], [0, 0, 1, 1], [], []>} : vector<2x16xf32>, vector<16x128xf32>, vector<2x128xf32> -> vector<2x128xf32>
    %cst_487 = arith.constant dense<0.000000e+00> : vector<2x128xf32>
    %1482 = tpu.matmul %1479, %15, %cst_487 {dimension_numbers = #tpu.dot_dimension_numbers<[1], [0], [0], [1], [0, 0, 1, 1], [], []>} : vector<2x8xf32>, vector<8x128xf32>, vector<2x128xf32> -> vector<2x128xf32>
    %1483 = arith.mulf %1481, %1482 : vector<2x128xf32>
    %cst_488 = arith.constant 1.000000e+00 : f32
    %1484 = vector.broadcast %cst_488 : f32 to vector<2x128xf32>
    %1485 = arith.subf %1484, %1483 : vector<2x128xf32>
    %1486 = arith.mulf %1306, %1485 : vector<2x128xf32>
    %cst_489 = arith.constant dense<0.000000e+00> : vector<2x128xf32>
    %1487 = tpu.matmul %1480, %15, %cst_489 {dimension_numbers = #tpu.dot_dimension_numbers<[1], [0], [0], [1], [0, 0, 1, 1], [], []>} : vector<2x8xf32>, vector<8x128xf32>, vector<2x128xf32> -> vector<2x128xf32>
    %1488 = arith.mulf %1481, %1487 : vector<2x128xf32>
    %1489 = arith.addf %1486, %1488 : vector<2x128xf32>
    %cst_490 = arith.constant dense<0.000000e+00> : vector<2x8xf32>
    %1490 = tpu.matmul %1351, %11, %cst_490 {dimension_numbers = #tpu.dot_dimension_numbers<[1], [0], [0], [1], [0, 0, 1, 1], [], []>} : vector<2x32xf32>, vector<32x8xf32>, vector<2x8xf32> -> vector<2x8xf32>
    %cst_491 = arith.constant dense<0.000000e+00> : vector<2x8xf32>
    %1491 = tpu.matmul %1471, %12, %cst_491 {dimension_numbers = #tpu.dot_dimension_numbers<[1], [0], [0], [1], [0, 0, 1, 1], [], []>} : vector<2x8xf32>, vector<8x8xf32>, vector<2x8xf32> -> vector<2x8xf32>
    %1492 = arith.addf %1490, %1491 : vector<2x8xf32>
    %1493 = vector.broadcast %13 : vector<1x8xf32> to vector<2x8xf32>
    %1494 = arith.addf %1492, %1493 : vector<2x8xf32>
    %c0_492 = arith.constant 0 : index
    %c56 = arith.constant 56 : index
    %1495 = vector.load %arg18[%c0_492, %c56] : memref<2x64xf32, #tpu.memory_space<vmem>>, vector<2x8xf32>
    tpu.vector_store %arg18[%c0_492, %c56], %1494 {strides = array<i32>} : memref<2x64xf32, #tpu.memory_space<vmem>>, vector<2x8xf32>,
    %cst_493 = arith.constant 0.000000e+00 : f32
    %1496 = vector.broadcast %cst_493 : f32 to vector<2x128xf32>
    %c0_494 = arith.constant 0 : index
    %c0_495 = arith.constant 0 : index
    %1497 = vector.load %arg19[%c0_494, %c0_495] : memref<2x128xf32, #tpu.memory_space<vmem>>, vector<2x128xf32>
    tpu.vector_store %arg19[%c0_494, %c0_495], %1496 {strides = array<i32>} : memref<2x128xf32, #tpu.memory_space<vmem>>, vector<2x128xf32>,
    %c0_496 = arith.constant 0 : index
    %c8_497 = arith.constant 8 : index
    %1498 = vector.load %arg19[%c0_496, %c8_497] : memref<2x128xf32, #tpu.memory_space<vmem>>, vector<2x8xf32>
    tpu.vector_store %arg19[%c0_496, %c8_497], %1471 {strides = array<i32>} : memref<2x128xf32, #tpu.memory_space<vmem>>, vector<2x8xf32>,
    %c0_498 = arith.constant 0 : index
    %c16_499 = arith.constant 16 : index
    %1499 = vector.load %arg19[%c0_498, %c16_499] : memref<2x128xf32, #tpu.memory_space<vmem>>, vector<2x32xf32>
    tpu.vector_store %arg19[%c0_498, %c16_499], %1351 {strides = array<i32>} : memref<2x128xf32, #tpu.memory_space<vmem>>, vector<2x32xf32>,
    %c0_500 = arith.constant 0 : index
    %c48_501 = arith.constant 48 : index
    %1500 = vector.load %arg19[%c0_500, %c48_501] : memref<2x128xf32, #tpu.memory_space<vmem>>, vector<2x32xf32>
    tpu.vector_store %arg19[%c0_500, %c48_501], %1349 {strides = array<i32>} : memref<2x128xf32, #tpu.memory_space<vmem>>, vector<2x32xf32>,
    %c0_502 = arith.constant 0 : index
    %c80 = arith.constant 80 : index
    %1501 = vector.load %arg19[%c0_502, %c80] : memref<2x128xf32, #tpu.memory_space<vmem>>, vector<2x16xf32>
    tpu.vector_store %arg19[%c0_502, %c80], %1467 {strides = array<i32>} : memref<2x128xf32, #tpu.memory_space<vmem>>, vector<2x16xf32>,
    %c0_503 = arith.constant 0 : index
    %c96 = arith.constant 96 : index
    %1502 = vector.load %arg19[%c0_503, %c96] : memref<2x128xf32, #tpu.memory_space<vmem>>, vector<2x16xf32>
    tpu.vector_store %arg19[%c0_503, %c96], %1468 {strides = array<i32>} : memref<2x128xf32, #tpu.memory_space<vmem>>, vector<2x16xf32>,
    %c0_504 = arith.constant 0 : index
    %c0_505 = arith.constant 0 : index
    %1503 = vector.load %arg20[%c0_504, %c0_505] : memref<2x128xf32, #tpu.memory_space<vmem>>, vector<2x128xf32>
    tpu.vector_store %arg20[%c0_504, %c0_505], %1489 {strides = array<i32>} : memref<2x128xf32, #tpu.memory_space<vmem>>, vector<2x128xf32>,
    return
  }
}

</mosaic_0001>

<bundles_post_ra>
// kernel: tpu_custom_call.1
= control target key start
LH: loop header
LB: loop body
LE: loop exit
PB: predicated region body
PF: predicated region fallthrough
CT: control target
= control target key end

     0   :  { %s8929_s0 = inlined_call_operand.vmem [shape: f32[2,64], index: 0, kind: input, shape index: {}]   ;;  %s8930_s1 = inlined_call_operand.vmem [shape: f32[2,128], index: 1, kind: input, shape index: {}]   ;;  %s8931_s2 = inlined_call_operand.vmem [shape: f32[2,128], index: 2, kind: input, shape index: {}]   ;;  %s8932_s3 = inlined_call_operand.vmem [shape: f32[48,128], index: 3, kind: input, shape index: {}]   ;;  %s8933_s4 = inlined_call_operand.vmem [shape: f32[1,128], index: 4, kind: input, shape index: {}]   ;;  %s8934_s5 = inlined_call_operand.vmem [shape: f32[32,44], index: 5, kind: input, shape index: {}]   ;;  %s8935_s6 = inlined_call_operand.vmem [shape: f32[1,44], index: 6, kind: input, shape index: {}]   ;;  %s8936_s7 = inlined_call_operand.vmem [shape: f32[40,8], index: 7, kind: input, shape index: {}]   ;;  %s8937_s8 = inlined_call_operand.vmem [shape: f32[1,8], index: 8, kind: input, shape index: {}]   ;;  %s8938_s9 = inlined_call_operand.vmem [shape: f32[16,48], index: 9, kind: input, shape index: {}]   ;;  %s8939_s10 = inlined_call_operand.vmem [shape: f32[8,128], index: 10, kind: input, shape index: {}]   ;;  %s8940_s11 = inlined_call_operand.vmem [shape: f32[128,16], index: 11, kind: input, shape index: {}]   ;;  %s8941_s12 = inlined_call_operand.vmem [shape: f32[16,128], index: 12, kind: input, shape index: {}]   ;;  %s8942_s13 = inlined_call_operand.vmem [shape: f32[128,8], index: 13, kind: input, shape index: {}]   ;;  %s8943_s14 = inlined_call_operand.vmem [shape: f32[4,2], index: 14, kind: input, shape index: {}]   ;;  %s8944_s15 = inlined_call_operand.vmem [shape: f32[4,2], index: 15, kind: input, shape index: {}]   ;;  %s8945_s16 = inlined_call_operand.vmem [shape: f32[2,4], index: 16, kind: input, shape index: {}]   ;;  %s8946_s17 = inlined_call_operand.vmem [shape: f32[2,4], index: 17, kind: input, shape index: {}]   ;;  %s8947_s18 = inlined_call_operand.hbm [shape: f32[2,64], index: 18, kind: output, shape index: {0}]   ;;  %s8948_s19 = inlined_call_operand.hbm [shape: f32[2,128], index: 19, kind: output, shape index: {1}]   ;;  %s8949_s20 = inlined_call_operand.hbm [shape: f32[2,128], index: 20, kind: output, shape index: {2}]  }
   0x1   :  { %9004 = sst [smem:[#allocation22_spill]] %s8929_s0 }
   0x2   :  { %9005 = sst [smem:[#allocation23_spill]] %s8930_s1 }
   0x3   :  { %9006 = sst [smem:[#allocation24_spill]] %s8931_s2 }
   0x4   :  { %9007 = sst [smem:[#allocation25_spill]] %s8932_s3 }
   0x5   :  { %9008 = sst [smem:[#allocation26_spill]] %s8933_s4 }
   0x6   :  { %9009 = sst [smem:[#allocation27_spill]] %s8947_s18 }
   0x7   :  { %9010 = sst [smem:[#allocation28_spill]] %s8948_s19 }
   0x8   :  { %9011 = sst [smem:[#allocation29_spill]] %s8949_s20 }
   0x9   :  { %26 = vsyncpa [#allocation3], 0  ;;  %s9012_s23 = sld [smem:[#allocation23_spill]]  ;;  %s8984_s24 = smov 32  }
   0xa   :  { %s8961_s2 = smov 112  }
   0xf   :  { %v65_v0 = vld [vmem:[%s9012_s23] sm:$0x3] }
  0x10   :  { %128 = vrot.lane.b32.xlu0 %v65_v0, %s8984_s24  ;;  %232 = vrot.lane.b32.xlu1 %v65_v0, %s8961_s2 }
  0x11   :  { %27 = vsyncpa [#allocation5], 0  ;;  %s6251_s25 = smov 120   ;;  %s8953_s3 = smov 48   ;;  %vm186_vm0 = vcmask 64512   ;;  %vm134_vm1 = vcmask 1041408  }
  0x12   :  { %s9013_s28 = sld [smem:[#allocation25_spill]]  ;;  %v6412_v4 = vld [vmem:[%s8944_s15] sm:$0xf]  ;;  %vm130_vm2 = vcmask 15360   ;;  %vm234_vm3 = vcmask 261120   ;;  %s8986_s29 = smov 64  }
  0x13   :  { %s9014_s21 = sld [smem:[#allocation22_spill]]  ;;  %v6446_v12 = vld [vmem:[%s8943_s14] sm:$0xf]  ;;  %v6468_v33 = vld [vmem:[%s8934_s5 + $0x18] sm:$0xff]  ;;  %v6473_v34 = vld [vmem:[%s8934_s5 + $0x10] sm:$0xff]  ;;  %s8955_s23 = smov 114  }
  0x14   :  { %s9015_s4 = sld [smem:[#allocation26_spill]]  ;;  %v6479_v35 = vld [vmem:[%s8934_s5 + $0x8] sm:$0xff]  ;;  %v6485_v36 = vld [vmem:[%s8934_s5] sm:$0xff]  ;;  %v6501_v41 = vadd.f32 %v6412_v4, %v6446_v12  ;;  %v6526_v47 = vld [vmem:[%s8940_s11 + $0x78] sm:$0xff]  ;;  %vm497_vm4 = vcmask 60416   ;;  %vm373_vm6 = vcmask 101456  }
  0x15   :  { %s9016_s1 = sld [smem:[#allocation24_spill]]  ;;  %v6512_v44 = vld [vmem:[%s8935_s6] ss:$0 sm:$0xff]  ;;  %v6531_v48 = vld [vmem:[%s8940_s11 + $0x70] sm:$0xff]  ;;  %v6537_v49 = vld [vmem:[%s8940_s11 + $0x68] sm:$0xff]  ;;  %s8982_s30 = smov 118  }
  0x16   :  { %9017 = vst [vmem:[#allocation9_spill] sm:$0xff] %v6501_v41  ;;  %v6543_v50 = vld [vmem:[%s8940_s11 + $0x60] sm:$0xff]  ;;  %v6549_v51 = vld [vmem:[%s8940_s11 + $0x58] sm:$0xff]  ;;  %v6555_v52 = vld [vmem:[%s8940_s11 + $0x50] sm:$0xff]  ;;  %vm521_vm10 = vcmask 125952   ;;  %vm384_vm11 = vcmask 19456  }
  0x17   :  { %v6561_v53 = vld [vmem:[%s8940_s11 + $0x48] sm:$0xff]  ;;  %v6567_v54 = vld [vmem:[%s8940_s11 + $0x40] sm:$0xff]  ;;  %v6573_v55 = vld [vmem:[%s8940_s11 + $0x38] sm:$0xff]  ;;  %s8980_s0 = smov 92   ;;  %s8959_s26 = smov 96  }
  0x18   :  { %184 = vrot.lane.b32.xlu0 %v65_v0, %s6251_s25  ;;  %v6393_v1 = vld [vmem:[%s9013_s28 + $0x8] sm:$0xff]  ;;  %v6398_v2 = vld [vmem:[%s9013_s28] sm:$0xff]  ;;  %v6431_v8 = vld [vmem:[%s9013_s28 + $0x18] sm:$0xff]  ;;  %s8957_s27 = smov 100   ;;  %s9029_s22 = smov 100  }
  0x19   :  { %204 = vmatpush.msra.mxu2 %v6393_v1  ;;  %227 = vmatpush.msra.mxu3 %v6398_v2  ;;  %v6405_v3 = vld [vmem:[%s9014_s21] sm:$0x3]  ;;  %v6417_v6 = vld [vmem:[%s9013_s28 + $0x28] sm:$0xff]  ;;  %v6437_v9 = vld [vmem:[%s9013_s28 + $0x10] sm:$0xff]  ;;  %s6267_s20 = smov 80   ;;  %s9087_s19 = sld [smem:[#allocation28_spill]] }
  0x1a   :  { %5494 = vmatmul.msk.f32.vlgmr.msra.gmra.mxu3 %vm186_vm0, %v6405_v3  ;;  %v6425_v7 = vld [vmem:[%s9013_s28 + $0x20] sm:$0xff]  ;;  %v6579_v56 = vld [vmem:[%s8940_s11 + $0x30] sm:$0xff]  ;;  %v6585_v57 = vld [vmem:[%s8940_s11 + $0x28] sm:$0xff] }
  0x1b   :  { %v6456_v19 = vld [vmem:[%s9015_s4] ss:$0 sm:$0xff]  ;;  %v6597_v59 = vld [vmem:[%s8940_s11 + $0x18] sm:$0xff]  ;;  %v6603_v60 = vld [vmem:[%s8940_s11 + $0x10] sm:$0xff] }
  0x1c   :  { %v6497_v40 = vld [vmem:[%s9016_s1] sm:$0x3]  ;;  %v6609_v61 = vld [vmem:[%s8940_s11 + $0x8] sm:$0xff] }
  0x1d   :  { %v404_v42 = vadd.f32 1e-16, %v6497_v40  ;;  %v6591_v58 = vld [vmem:[%s8940_s11 + $0x20] sm:$0xff] }
  0x1e   :  { %v6615_v62 = vld [vmem:[%s8940_s11] sm:$0xff] }
  0x20   :  { %157 = vrot.lane.b32.xlu0 %v65_v0, %s8953_s3  ;;  %s9035_s3 = smov 32  }
  0x82   :  { %v129_v5 = vpop.permute.xlu0 %128  ;;  %v233_v10 = vpop.permute.xlu1 %232 }
  0x83   :  { %5489 = vmatpush.msk.msra.mxu0 %vm134_vm1, %v129_v5 }
  0x84   :  { %5490 = vmatmul.msk.f32.vlgmr.msra.gmra.mxu0 %vm130_vm2, %v6412_v4 }
  0x85   :  { %249 = vmatpush.msrb.mxu0 %v6417_v6 }
  0x87   :  { %250 = vmatpush.msrb.mxu0 %v6425_v7 }
  0x89   :  { %251 = vmatpush.msrb.mxu0 %v6431_v8 }
  0x8a   :  { %v185_v11 = vpop.permute.xlu0 %184 }
  0x8b   :  { %5493 = vmatmul.msk.f32.vlgmr.msra.gmra.mxu2 %vm186_vm0, %v185_v11  ;;  %252 = vmatpush.msrb.mxu0 %v6437_v9  ;;  %v8969_v11 = vmov 8  }
  0x8c   :  { %5495 = vmatmul.msk.f32.vlgmr.msrb.gmra.mxu0 %vm234_vm3, %v233_v10  ;;  %5698 = vset.pattern.permute.xlu1 %v8969_v11 }
  0x8d   :  { %5501 = vmatpush.msk.msra.mxu0 %vm134_vm1, %v404_v42 }
  0x92   :  { %v158_v13 = vpop.permute.xlu0 %157 }
  0x93   :  { %5491 = vmatpush.msk.msra.mxu1 %vm134_vm1, %v158_v13  ;;  %v8965_v13 = vmov 9  }
  0x94   :  { %5492 = vmatmul.msk.f32.vlgmr.msra.gmra.mxu1 %vm130_vm2, %v6446_v12  ;;  %5502 = vmatmul.msk.f32.vlgmr.msra.gmra.mxu0 %vm130_vm2, %v6501_v41 }
  0x95   :  { %305 = vmatpush.msrb.mxu1 %v6468_v33  ;;  %5699 = vset.pattern.permute.xlu0 %v8965_v13 }
  0x96   :  { %5700 = vset.pattern.permute.xlu2 %v8965_v13 }
  0x97   :  { %306 = vmatpush.msrb.mxu1 %v6473_v34 }
  0x99   :  { %307 = vmatpush.msrb.mxu1 %v6479_v35 }
  0x9b   :  { %308 = vmatpush.msrb.mxu1 %v6485_v36 }
  0x9d   :  { %v229_v15 = vpop.f32.mrf.mxu3 }
 0x101   :  { %v6451_v14 = vpop.f32.mrf.mxu0 }
 0x109   :  { %v254_v17 = vpop.f32.mrf.mxu0 }
 0x10e   :  { %v206_v16 = vpop.f32.mrf.mxu2 }
 0x10f   :  { %v230_v18 = vadd.f32 %v229_v15, %v206_v16 }
 0x111   :  { %v257_v20 = vadd.f32 %v254_v17, %v230_v18  ;;  %v6507_v43 = vpop.f32.mrf.mxu1  ;;  %v428_v0 = vpop.f32.mrf.mxu0 }
 0x112   :  { %v475_v5 = vmul.f32 %v428_v0, %v428_v0 }
 0x113   :  { %v261_v21 = vadd.f32 %v6456_v19, %v257_v20 }
 0x115   :  { %5754 = vtanh.f32 %v261_v21  ;;  %v262_v23 = vmul.f32 0.5, %v261_v21 }
 0x117   :  { %5756 = vtanh.f32 %v262_v23 }
 0x11b   :  { %v5755_v22 = vpop.eup %5754 }
 0x11c   :  { %270 = vrot.lane.b32.xlu1 %v5755_v22, %s8986_s29 }
 0x11d   :  { %v5757_v24 = vpop.eup %5756 }
 0x11e   :  { %v264_v25 = vadd.f32 1.0, %v5757_v24 }
 0x120   :  { %v265_v26 = vmul.f32 0.5, %v264_v25 }
 0x122   :  { %v268_v29 = vmul.f32 %v265_v26, %v233_v10  ;;  %v6641_v10 = vld [vmem:[%s8939_s10] sm:$0xff] }
 0x123   :  { %449 = vmatpush.msra.mxu1 %v6641_v10 }
 0x18e   :  { %v271_v27 = vpop.permute.xlu1 %270 }
 0x18f   :  { %v273_v28 = vmul.f32 %v271_v27, %v265_v26 }
 0x191   :  { %275 = vrot.lane.b32.xlu2 %v273_v28, %s8984_s24 }
 0x1eb   :  { %v276_v30 = vpop.permute.xlu2 %275 }
 0x1ec   :  { %v6461_v31 = vadd.f32 %v276_v30, %v268_v29 }
 0x1ee   :  { %5758 = vtanh.f32 %v6461_v31 }
 0x1f4   :  { %v5759_v32 = vpop.eup %5758 }
 0x1f5   :  { %281 = vrot.lane.b32.xlu2 %v5759_v32, %s8986_s29 }
 0x24f   :  { %v282_v37 = vpop.permute.xlu2 %281 }
 0x250   :  { %v284_v38 = vmul.f32 %v282_v37, %v265_v26 }
 0x252   :  { %289 = vrot.lane.b32.xlu1 %v284_v38, %s8984_s24 }
 0x2c4   :  { %v6490_v39 = vpop.permute.xlu1 %289 }
 0x2c5   :  { %5496 = vmatmul.msk.f32.vlgmr.msrb.gmra.mxu1 %vm234_vm3, %v6490_v39 }
 0x342   :  { %v310_v45 = vpop.f32.mrf.mxu1 }
 0x343   :  { %v6515_v46 = vadd.f32 %v6512_v44, %v310_v45 }
 0x345   :  { %314 = vrot.lane.b32.xlu2 %v6515_v46, %s8955_s23  ;;  %5499 = vmatpush.msk.msrb.mxu3 %vm134_vm1, %v6515_v46  ;;  %s9036_s23 = smov 118  }
 0x346   :  { %5500 = vmatmul.msk.f32.vlgmr.msrb.gmra.mxu3 %vm130_vm2, %v6446_v12 }
 0x347   :  { %476 = vmatpush.msra.mxu3 %v6526_v47 }
 0x349   :  { %477 = vmatpush.msra.mxu3 %v6531_v48 }
 0x34b   :  { %478 = vmatpush.msra.mxu3 %v6537_v49 }
 0x34d   :  { %479 = vmatpush.msra.mxu3 %v6543_v50 }
 0x34f   :  { %480 = vmatpush.msra.mxu3 %v6549_v51 }
 0x351   :  { %481 = vmatpush.msra.mxu3 %v6555_v52 }
 0x353   :  { %482 = vmatpush.msra.mxu3 %v6561_v53 }
 0x355   :  { %483 = vmatpush.msra.mxu3 %v6567_v54 }
 0x357   :  { %484 = vmatpush.msra.mxu3 %v6573_v55 }
 0x359   :  { %485 = vmatpush.msra.mxu3 %v6579_v56 }
 0x35b   :  { %486 = vmatpush.msra.mxu3 %v6585_v57 }
 0x35d   :  { %487 = vmatpush.msra.mxu3 %v6591_v58 }
 0x35f   :  { %488 = vmatpush.msra.mxu3 %v6597_v59 }
 0x361   :  { %489 = vmatpush.msra.mxu3 %v6603_v60 }
 0x363   :  { %490 = vmatpush.msra.mxu3 %v6609_v61 }
 0x365   :  { %491 = vmatpush.msra.mxu3 %v6615_v62 }
 0x366   :  { %492 = vmatmul.f32.vlgmr.msra.gmra.mxu3 %v475_v5 }
 0x39f   :  { %v315_v63 = vpop.permute.xlu2 %314 }
 0x3a0   :  { %5497 = vmatpush.msk.msrb.mxu2 %vm134_vm1, %v315_v63 }
 0x3a1   :  { %5498 = vmatmul.msk.f32.vlgmr.msrb.gmra.mxu2 %vm130_vm2, %v6412_v4 }
 0x3a2   :  { %455 = vmatpush.msra.mxu2 %v6526_v47 }
 0x3a4   :  { %456 = vmatpush.msra.mxu2 %v6531_v48 }
 0x3a6   :  { %457 = vmatpush.msra.mxu2 %v6537_v49 }
 0x3a8   :  { %458 = vmatpush.msra.mxu2 %v6543_v50 }
 0x3aa   :  { %459 = vmatpush.msra.mxu2 %v6549_v51 }
 0x3ac   :  { %460 = vmatpush.msra.mxu2 %v6555_v52 }
 0x3ae   :  { %461 = vmatpush.msra.mxu2 %v6561_v53 }
 0x3b0   :  { %462 = vmatpush.msra.mxu2 %v6567_v54 }
 0x3b2   :  { %463 = vmatpush.msra.mxu2 %v6573_v55 }
 0x3b4   :  { %464 = vmatpush.msra.mxu2 %v6579_v56 }
 0x3b6   :  { %465 = vmatpush.msra.mxu2 %v6585_v57 }
 0x3b8   :  { %466 = vmatpush.msra.mxu2 %v6591_v58 }
 0x3ba   :  { %467 = vmatpush.msra.mxu2 %v6597_v59 }
 0x3bc   :  { %468 = vmatpush.msra.mxu2 %v6603_v60 }
 0x3be   :  { %469 = vmatpush.msra.mxu2 %v6609_v61 }
 0x3c0   :  { %470 = vmatpush.msra.mxu2 %v6615_v62 }
 0x3c2   :  { %809 = vmatpush.msrb.mxu2 %v6641_v10 }
 0x3c9   :  { %v357_v15 = vpop.f32.mrf.mxu3 }
 0x424   :  { %v335_v16 = vpop.f32.mrf.mxu2 }
 0x425   :  { %v358_v17 = vadd.f32 %v357_v15, %v335_v16 }
 0x427   :  { %v360_v18 = vadd.f32 1e-16, %v358_v17  ;;  %v362_v20 = vmin.f32 %v358_v17, 20.0  ;;  %v369_v24 = vmul.f32 0.5, %v358_v17  ;;  %vm361_vm5 = vcmp.gt.f32.partialorder %v358_v17, 20.0 }
 0x428   :  { %v374_v38 = vsel %vm373_vm6, %v358_v17, -inf }
 0x429   :  { %5503 = vmatmul.msk.f32.vlgmr.msra.gmra.mxu1 %vm186_vm0, %v360_v18  ;;  %v496_v21 = vmul.f32 %v360_v18, %v360_v18  ;;  %v363_v22 = vmul.f32 1.442695, %v362_v20  ;;  %v493_v20 = vpop.f32.mrf.mxu3 }
 0x42b   :  { %v498_v23 = vsel %vm497_vm4, %v496_v21, 0.0  ;;  %5760 = vpow2.f32 %v363_v22  ;;  %v501_v22 = vmax.f32 %v493_v20, 1e-16 }
 0x42c   :  { %499 = vadd.xlane.f32.xlu0 %v498_v23  ;;  %5762 = vtanh.f32 %v369_v24 }
 0x431   :  { %v5761_v25 = vpop.eup %5760 }
 0x432   :  { %v365_v26 = vadd.f32 1.0, %v5761_v25  ;;  %v5763_v27 = vpop.eup %5762 }
 0x433   :  { %v371_v29 = vadd.f32 1.0, %v5763_v27 }
 0x434   :  { %5764 = vlog2.f32 %v365_v26 }
 0x435   :  { %v372_v37 = vmul.f32 0.5, %v371_v29 }
 0x43a   :  { %v5765_v28 = vpop.eup %5764 }
 0x43b   :  { %v367_v30 = vmul.f32 0.6931472, %v5765_v28 }
 0x43d   :  { %v6650_v32 = vsel %vm361_vm5, %v358_v17, %v367_v30  ;;  %vm560_vm5 = vcmask 130048  }
 0x43e   :  { %517 = vperm.xlu1 %5698, %v6650_v32  }
 0x440   :  { %548 = vperm.xlu0 %5699, %v372_v37  }
 0x468   :  { %375 = vmax.xlane.f32.xlu1 %v374_v38 }
 0x49f   :  { %v500_v21 = vpop.xlane.xlu0 %499 }
 0x4a0   :  { %v502_v23 = vmax.f32 %v500_v21, 1e-16  ;;  %v552_v21 = vsub.f32 1.0, %v372_v37  ;;  %v6673_v37 = vld [vmem:[%s8938_s9] sm:$0xff] }
 0x4a2   :  { %v503_v24 = vmul.f32 %v502_v23, %v501_v22 }
 0x4a4   :  { %vm510_vm8 = vweird.f32 %v503_v24 }
 0x4a6   :  { %v451_v42 = vpop.f32.mrf.mxu1 }
 0x4a7   :  { %v454_v45 = vmul.f32 %v451_v42, %v428_v0 }
 0x4a9   :  { %471 = vmatmul.f32.vlgmr.msra.gmra.mxu2 %v454_v45 }
 0x4aa   :  { %880 = vmatpush.msra.mxu2 %v6393_v1 }
 0x4b0   :  { %v518_v63 = vpop.permute.xlu1 %517 }
 0x4db   :  { %v376_v5 = vpop.xlane.xlu1 %375 }
 0x4dc   :  { %v377_v15 = vsub.f32 %v358_v17, %v376_v5 }
 0x4de   :  { %v378_v16 = vmul.f32 1.442695, %v377_v15 }
 0x4e0   :  { %5766 = vpow2.f32 %v378_v16 }
 0x4e1   :  { %5768 = vrsqrt.f32 %v503_v24 }
 0x4e6   :  { %v6655_v18 = vpop.eup %5766 }
 0x4e7   :  { %381 = vrot.lane.b32.xlu1 %v6655_v18, %s8982_s30  ;;  %v5769_v0 = vpop.eup %5768 }
 0x4e8   :  { %v505_v25 = vmul.f32 %v5769_v0, %v503_v24  ;;  %vm511_vm7 = vweird.f32 %v5769_v0 }
 0x4e9   :  { %vm512_vm9 = vmor %vm510_vm8, %vm511_vm7 }
 0x4ea   :  { %v506_v1 = vmul.f32 %v5769_v0, %v505_v25 }
 0x4ec   :  { %v507_v26 = vmul.f32 0.5, %v506_v1 }
 0x4ee   :  { %v508_v27 = vsub.f32 1.5, %v507_v26 }
 0x4f0   :  { %v509_v17 = vmul.f32 %v5769_v0, %v508_v27 }
 0x4f2   :  { %v513_v29 = vsel %vm512_vm9, %v5769_v0, %v509_v17 }
 0x52c   :  { %v472_v28 = vpop.f32.mrf.mxu2 }
 0x52d   :  { %v514_v30 = vmul.f32 %v513_v29, %v472_v28 }
 0x52f   :  { %v520_v38 = vmul.f32 %v518_v63, %v514_v30  ;;  %v6667_v63 = vld [vmem:[%s8938_s9 + $0x8] sm:$0xff] }
 0x530   :  { %578 = vmatpush.msrb.mxu0 %v6667_v63 }
 0x531   :  { %v522_v42 = vsel %vm521_vm10, %v520_v38, -inf }
 0x532   :  { %523 = vmax.xlane.f32.xlu2 %v522_v42  ;;  %579 = vmatpush.msrb.mxu0 %v6673_v37 }
 0x559   :  { %v382_v22 = vpop.permute.xlu1 %381 }
 0x55a   :  { %v385_v23 = vsel %vm384_vm11, %v382_v22, 0.0 }
 0x5a5   :  { %v524_v45 = vpop.xlane.xlu2 %523 }
 0x5a6   :  { %v525_v5 = vsub.f32 %v520_v38, %v524_v45  ;;  %v182_v45 = vadd.f32 %v6507_v43, %v6451_v14 }
 0x5a8   :  { %v526_v15 = vmul.f32 1.442695, %v525_v5 }
 0x5aa   :  { %5770 = vpow2.f32 %v526_v15  ;;  %v549_v15 = vpop.permute.xlu0 %548 }
 0x5b0   :  { %v5771_v16 = vpop.eup %5770 }
 0x5b1   :  { %v528_v20 = vsel %vm521_vm10, %v5771_v16, 0.0 }
 0x5b2   :  { %529 = vadd.xlane.f32.xlu2 %v528_v20 }
 0x5ca   :  { %555 = vperm.xlu2 %5700, %v552_v21  }
 0x5f3   :  { %386 = vadd.xlane.f32.xlu2 %v385_v23  ;;  %v8971_v23 = vmov 11  }
 0x5f4   :  { %5701 = vset.pattern.permute.xlu1 %v8971_v23 }
 0x60b   :  { %790 = vrot.lane.b32.xlu2 %v6515_v46, %s8980_s0 }
 0x625   :  { %v530_v24 = vpop.xlane.xlu2 %529 }
 0x626   :  { %5772 = vrcp.f32 %v530_v24  ;;  %v542_v26 = vand.u32 2147483648, %v530_v24  ;;  %v540_v17 = vand.u32 2147483647, %v530_v24  ;;  %vm536_vm13 = vweird.f32 %v530_v24 }
 0x628   :  { %v543_v29 = vor.u32 1.1754944e-38, %v542_v26  ;;  %vm541_vm15 = vcmp.eq.f32.partialorder %v540_v17, 8.507059e+37 }
 0x62c   :  { %v5773_v0 = vpop.eup %5772 }
 0x62d   :  { %v532_v25 = vmul.f32 %v5773_v0, %v530_v24  ;;  %vm537_vm12 = vweird.f32 %v5773_v0  ;;  %v556_v42 = vpop.permute.xlu2 %555  ;;  %v8973_v24 = vmov 12  }
 0x62e   :  { %vm538_vm14 = vmor %vm536_vm13, %vm537_vm12  ;;  %v558_v21 = vmul.f32 %v556_v42, %v182_v45  ;;  %5702 = vset.pattern.permute.xlu0 %v8973_v24 }
 0x62f   :  { %v533_v1 = vsub.f32 1.0, %v532_v25 }
 0x631   :  { %v534_v27 = vmul.f32 %v5773_v0, %v533_v1 }
 0x633   :  { %v535_v28 = vadd.f32 %v5773_v0, %v534_v27 }
 0x635   :  { %v539_v30 = vsel %vm538_vm14, %v5773_v0, %v535_v28 }
 0x636   :  { %v544_v38 = vsel %vm541_vm15, %v543_v29, %v539_v30 }
 0x637   :  { %v545_v5 = vmul.f32 %v5771_v16, %v544_v38 }
 0x639   :  { %v551_v20 = vmul.f32 %v549_v15, %v545_v5  ;;  %v735_v5 = vmul.f32 0.5, %v6515_v46 }
 0x63b   :  { %v559_v22 = vadd.f32 %v558_v21, %v551_v20 }
 0x63d   :  { %5504 = vmatmul.msk.f32.vlgmr.msrb.gmra.mxu0 %vm560_vm5, %v559_v22 }
 0x666   :  { %v387_v0 = vpop.xlane.xlu2 %386 }
 0x667   :  { %5774 = vrcp.f32 %v387_v0  ;;  %v399_v43 = vand.u32 2147483648, %v387_v0  ;;  %v397_v27 = vand.u32 2147483647, %v387_v0  ;;  %vm393_vm8 = vweird.f32 %v387_v0 }
 0x668   :  { %5776 = vtanh.f32 %v735_v5 }
 0x669   :  { %v400_v28 = vor.u32 1.1754944e-38, %v399_v43  ;;  %vm398_vm12 = vcmp.eq.f32.partialorder %v397_v27, 8.507059e+37 }
 0x66d   :  { %v5775_v25 = vpop.eup %5774 }
 0x66e   :  { %v389_v1 = vmul.f32 %v5775_v25, %v387_v0  ;;  %v791_v26 = vpop.permute.xlu2 %790  ;;  %vm394_vm7 = vweird.f32 %v5775_v25  ;;  %v5777_v20 = vpop.eup %5776 }
 0x66f   :  { %5512 = vmatmul.msk.f32.vlgmr.msrb.gmra.mxu2 %vm186_vm0, %v791_v26  ;;  %vm395_vm9 = vmor %vm393_vm8, %vm394_vm7  ;;  %v737_v21 = vadd.f32 1.0, %v5777_v20  ;;  %vm644_vm8 = vcmask 1043456  }
 0x670   :  { %v390_v14 = vsub.f32 1.0, %v389_v1  ;;  %970 = vmatpush.msrb.mxu2 %v6468_v33  ;;  %v8967_v33 = vmov 10  }
 0x671   :  { %v738_v22 = vmul.f32 0.5, %v737_v21 }
 0x672   :  { %v391_v16 = vmul.f32 %v5775_v25, %v390_v14  ;;  %971 = vmatpush.msrb.mxu2 %v6473_v34  ;;  %v8963_v34 = vmov 13  }
 0x674   :  { %v392_v17 = vadd.f32 %v5775_v25, %v391_v16  ;;  %972 = vmatpush.msrb.mxu2 %v6479_v35 }
 0x676   :  { %v396_v29 = vsel %vm395_vm9, %v5775_v25, %v392_v17  ;;  %973 = vmatpush.msrb.mxu2 %v6485_v36  ;;  %vm640_vm9 = vcmask 31744  }
 0x677   :  { %v401_v30 = vsel %vm398_vm12, %v400_v28, %v396_v29  ;;  %vm863_vm12 = vcmask 58368  }
 0x678   :  { %v402_v38 = vmul.f32 %v6655_v18, %v401_v30  ;;  %v403_v18 = vadd.f32 1.0, %v6650_v32 }
 0x67a   :  { %601 = vperm.xlu0 %5702, %v402_v38   ;;  %591 = vperm.xlu1 %5701, %v402_v38  }
 0x682   :  { %5703 = vset.pattern.permute.xlu1 %v8967_v33  ;;  %5705 = vset.pattern.permute.xlu0 %v8969_v11 }
 0x683   :  { %586 = vperm.xlu1 %5703, %v402_v38  }
 0x68b   :  { %5704 = vset.pattern.permute.xlu1 %v8963_v34 }
 0x6ba   :  { %v581_v35 = vpop.f32.mrf.mxu0 }
 0x6ec   :  { %v602_v42 = vpop.permute.xlu0 %601  ;;  %v592_v45 = vpop.permute.xlu1 %591 }
 0x6ed   :  { %v604_v36 = vmul.f32 %v602_v42, %v581_v35  ;;  %v594_v15 = vmul.f32 %v592_v45, %v581_v35 }
 0x6ef   :  { %606 = vrot.lane.b32.xlu0 %v604_v36, %s8959_s26  ;;  %596 = vrot.lane.b32.xlu1 %v594_v15, %s8961_s2  ;;  %s9020_s26 = smov 114   ;;  %s9028_s2 = smov 96  }
 0x6f2   :  { %v811_v34 = vpop.f32.mrf.mxu2 }
 0x6f5   :  { %v587_v46 = vpop.permute.xlu1 %586 }
 0x6f6   :  { %v589_v0 = vmul.f32 %v587_v46, %v581_v35 }
 0x6f7   :  { %615 = vperm.xlu1 %5704, %v403_v18  }
 0x6ff   :  { %763 = vrot.lane.b32.xlu1 %v738_v22, %s8957_s27  ;;  %s9027_s27 = smov 112  }
 0x700   :  { %5706 = vset.pattern.permute.xlu1 %v8965_v13 }
 0x707   :  { %885 = vrot.lane.b32.xlu1 %v6405_v3, %s6251_s25  ;;  %s6275_s25 = smov [#allocation6]  }
 0x761   :  { %v597_v25 = vpop.permute.xlu1 %596  ;;  %v607_v26 = vpop.permute.xlu0 %606 }
 0x762   :  { %v599_v1 = vadd.f32 %v597_v25, %v589_v0  ;;  %v6704_v0 = vld [vmem:[%s8945_s16] sm:$0x3] }
 0x763   :  { %v6709_v25 = vld [vmem:[%s8946_s17] sm:$0x3] }
 0x764   :  { %v609_v14 = vadd.f32 %v607_v26, %v599_v1  ;;  %v6714_v1 = vld [vmem:[%s8941_s12 + $0x8] sm:$0xff]  ;;  %v6728_v26 = vld [vmem:[%s8941_s12] sm:$0xff] }
 0x766   :  { %v610_v43 = vmax.f32 %v609_v14, 1e-30 }
 0x768   :  { %5778 = vlog2.f32 %v610_v43  ;;  %v6737_v43 = vld [vmem:[%s8942_s13 + $0x78] sm:$0xff] }
 0x769   :  { %v616_v27 = vpop.permute.xlu1 %615 }
 0x76e   :  { %v5779_v32 = vpop.eup %5778 }
 0x76f   :  { %v612_v16 = vmul.f32 0.6931472, %v5779_v32  ;;  %v6742_v32 = vld [vmem:[%s8942_s13 + $0x70] sm:$0xff] }
 0x771   :  { %v618_v17 = vmul.f32 %v616_v27, %v612_v16  ;;  %v6749_v16 = vld [vmem:[%s8942_s13 + $0x68] sm:$0xff]  ;;  %v6755_v27 = vld [vmem:[%s8942_s13 + $0x60] sm:$0xff] }
 0x773   :  { %v619_v28 = vmul.f32 1.442695, %v618_v17 }
 0x775   :  { %5780 = vpow2.f32 %v619_v28  ;;  %v6761_v28 = vld [vmem:[%s8936_s7 + $0x18] sm:$0xff] }
 0x77b   :  { %v5781_v29 = vpop.eup %5780 }
 0x77c   :  { %v621_v30 = vsel %vm521_vm10, %v5781_v29, 0.0 }
 0x77d   :  { %622 = vadd.xlane.f32.xlu0 %v621_v30  ;;  %v6773_v30 = vld [vmem:[%s8936_s7 + $0x10] sm:$0xff] }
 0x7f0   :  { %v623_v38 = vpop.xlane.xlu0 %622 }
 0x7f1   :  { %v624_v3 = vadd.f32 1e-16, %v623_v38  ;;  %v6778_v38 = vld [vmem:[%s8942_s13 + $0x50] sm:$0xff] }
 0x7f3   :  { %5782 = vrcp.f32 %v624_v3  ;;  %v636_v5 = vand.u32 2147483648, %v624_v3  ;;  %v634_v15 = vand.u32 2147483647, %v624_v3  ;;  %vm630_vm14 = vweird.f32 %v624_v3 }
 0x7f5   :  { %v637_v20 = vor.u32 1.1754944e-38, %v636_v5  ;;  %vm635_vm7 = vcmp.eq.f32.partialorder %v634_v15, 8.507059e+37  ;;  %v6809_v5 = vld [vmem:[%s8942_s13 + $0x38] sm:$0xff]  ;;  %v6817_v15 = vld [vmem:[%s8942_s13 + $0x30] sm:$0xff] }
 0x7f9   :  { %v5783_v35 = vpop.eup %5782 }
 0x7fa   :  { %v626_v42 = vmul.f32 %v5783_v35, %v624_v3  ;;  %vm631_vm13 = vweird.f32 %v5783_v35  ;;  %v6785_v3 = vld [vmem:[%s8936_s7 + $0x8] sm:$0xff] }
 0x7fb   :  { %vm632_vm15 = vmor %vm630_vm14, %vm631_vm13 }
 0x7fc   :  { %v627_v45 = vsub.f32 1.0, %v626_v42  ;;  %v6797_v42 = vld [vmem:[%s8936_s7] sm:$0xff] }
 0x7fd   :  { %9018 = vst [vmem:[#allocation10_spill] sm:$0xff] %v6797_v42 }
 0x7fe   :  { %v628_v36 = vmul.f32 %v5783_v35, %v627_v45  ;;  %v6802_v45 = vld [vmem:[%s8942_s13 + $0x40] sm:$0xff] }
 0x800   :  { %v629_v18 = vadd.f32 %v5783_v35, %v628_v36  ;;  %v764_v36 = vpop.permute.xlu1 %763 }
 0x802   :  { %v633_v21 = vsel %vm632_vm15, %v5783_v35, %v629_v18  ;;  %v6790_v35 = vld [vmem:[%s8942_s13 + $0x48] sm:$0xff] }
 0x803   :  { %v638_v22 = vsel %vm635_vm7, %v637_v20, %v633_v21  ;;  %v6824_v18 = vld [vmem:[%s8942_s13 + $0x28] sm:$0xff]  ;;  %v6831_v20 = vld [vmem:[%s8942_s13 + $0x20] sm:$0xff] }
 0x804   :  { %v6699_v46 = vmul.f32 %v5781_v29, %v638_v22  ;;  %v6766_v29 = vld [vmem:[%s8942_s13 + $0x58] sm:$0xff] }
 0x806   :  { %5505 = vmatpush.msk.msrb.mxu1 %vm644_vm8, %v6699_v46  ;;  %5507 = vmatpush.msk.msra.mxu0 %vm644_vm8, %v6699_v46 }
 0x807   :  { %5506 = vmatmul.msk.f32.vlgmr.msrb.gmra.mxu1 %vm640_vm9, %v6704_v0  ;;  %5508 = vmatmul.msk.f32.vlgmr.msra.gmra.mxu0 %vm640_vm9, %v6709_v25 }
 0x808   :  { %708 = vmatpush.msra.mxu1 %v6714_v1  ;;  %715 = vmatpush.msrb.mxu0 %v6737_v43 }
 0x80a   :  { %709 = vmatpush.msra.mxu1 %v6728_v26  ;;  %716 = vmatpush.msrb.mxu0 %v6742_v32 }
 0x80c   :  { %756 = vmatpush.msrb.mxu1 %v6714_v1  ;;  %717 = vmatpush.msrb.mxu0 %v6749_v16 }
 0x80e   :  { %757 = vmatpush.msrb.mxu1 %v6728_v26  ;;  %718 = vmatpush.msrb.mxu0 %v6755_v27 }
 0x810   :  { %719 = vmatpush.msrb.mxu0 %v6766_v29 }
 0x812   :  { %720 = vmatpush.msrb.mxu0 %v6778_v38 }
 0x814   :  { %721 = vmatpush.msrb.mxu0 %v6790_v35 }
 0x816   :  { %722 = vmatpush.msrb.mxu0 %v6802_v45 }
 0x818   :  { %723 = vmatpush.msrb.mxu0 %v6809_v5 }
 0x81a   :  { %724 = vmatpush.msrb.mxu0 %v6817_v15 }
 0x81c   :  { %725 = vmatpush.msrb.mxu0 %v6824_v18 }
 0x81e   :  { %726 = vmatpush.msrb.mxu0 %v6831_v20 }
 0x884   :  { %v665_v14 = vpop.f32.mrf.mxu1  ;;  %v688_v17 = vpop.f32.mrf.mxu0 }
 0x885   :  { %5509 = vmatmul.msk.f32.vlgmr.msra.gmra.mxu1 %vm560_vm5, %v665_v14 }
 0x886   :  { %782 = vmatpush.msra.mxu1 %v6641_v10 }
 0x88d   :  { %5510 = vmatmul.msk.f32.vlgmr.msrb.gmra.mxu1 %vm560_vm5, %v688_v17 }
 0x88e   :  { %851 = vmatpush.msrb.mxu1 %v6761_v28 }
 0x890   :  { %852 = vmatpush.msrb.mxu1 %v6773_v30 }
 0x892   :  { %853 = vmatpush.msrb.mxu1 %v6785_v3 }
 0x894   :  { %854 = vmatpush.msrb.mxu1 %v6797_v42 }
 0x895   :  { %5511 = vmatmul.msk.f32.vlgmr.msra.gmra.mxu1 %vm186_vm0, %v764_v36 }
 0x896   :  { %921 = vmatpush.msra.mxu1 %v6417_v6  ;;  %v6838_v6 = vld [vmem:[%s8942_s13 + $0x18] sm:$0xff] }
 0x897   :  { %727 = vmatpush.msrb.mxu0 %v6838_v6 }
 0x898   :  { %922 = vmatpush.msra.mxu1 %v6425_v7  ;;  %v6847_v7 = vld [vmem:[%s8942_s13 + $0x10] sm:$0xff] }
 0x899   :  { %728 = vmatpush.msrb.mxu0 %v6847_v7 }
 0x89a   :  { %923 = vmatpush.msra.mxu1 %v6431_v8  ;;  %v6856_v8 = vld [vmem:[%s8942_s13 + $0x8] sm:$0xff] }
 0x89b   :  { %729 = vmatpush.msrb.mxu0 %v6856_v8 }
 0x89c   :  { %924 = vmatpush.msra.mxu1 %v6437_v9  ;;  %v6862_v9 = vld [vmem:[%s8942_s13] sm:$0xff] }
 0x89d   :  { %5514 = vmatmul.msk.f32.vlgmr.msrb.gmra.mxu1 %vm234_vm3, %v6490_v39  ;;  %730 = vmatpush.msrb.mxu0 %v6862_v9 }
 0x8a5   :  { %5517 = vmatmul.msk.f32.vlgmr.msra.gmra.mxu1 %vm234_vm3, %v6490_v39 }
 0x902   :  { %v711_v21 = vpop.f32.mrf.mxu1 }
 0x903   :  { %v714_v22 = vmul.f32 %v711_v21, %v6497_v40  ;;  %v6878_v21 = vld [vmem:[%s8936_s7 + $0x20] sm:$0xff] }
 0x904   :  { %834 = vmatpush.msrb.mxu3 %v6878_v21 }
 0x905   :  { %731 = vmatmul.f32.vlgmr.msrb.gmra.mxu0 %v714_v22 }
 0x906   :  { %904 = vmatpush.msra.mxu3 %v6398_v2 }
 0x90a   :  { %v759_v14 = vpop.f32.mrf.mxu1 }
 0x90b   :  { %v814_v13 = vmul.f32 %v811_v34, %v759_v14 }
 0x912   :  { %v784_v39 = vpop.f32.mrf.mxu1 }
 0x913   :  { %v787_v17 = vmul.f32 %v784_v39, %v759_v14 }
 0x915   :  { %v788_v36 = vsub.f32 1.0, %v787_v17 }
 0x917   :  { %v789_v33 = vmul.f32 %v788_v36, %v6497_v40 }
 0x919   :  { %v6867_v11 = vadd.f32 %v814_v13, %v789_v33  ;;  %v886_v13 = vpop.permute.xlu1 %885 }
 0x91b   :  { %9019 = vst [vmem:[#allocation11_spill] sm:$0xff] %v6867_v11  ;;  %v1067_v23 = vadd.f32 1e-16, %v6867_v11 }
 0x91d   :  { %5523 = vmatpush.msk.msrb.mxu1 %vm134_vm1, %v1067_v23 }
 0x91e   :  { %5524 = vmatmul.msk.f32.vlgmr.msrb.gmra.mxu1 %vm130_vm2, %v6501_v41 }
 0x91f   :  { %1235 = vmatpush.msra.mxu1 %v6667_v63  ;;  %v5753_v63 = vld [vmem:[%s8937_s8] ss:$0 sm:$0xff] }
 0x921   :  { %1236 = vmatpush.msra.mxu1 %v6673_v37  ;;  %v856_v37 = vpop.f32.mrf.mxu1 }
 0x929   :  { %v926_v17 = vpop.f32.mrf.mxu1 }
 0x982   :  { %v732_v40 = vpop.f32.mrf.mxu0 }
 0x983   :  { %5513 = vmatmul.msk.f32.vlgmr.msrb.gmra.mxu3 %vm186_vm0, %v732_v40  ;;  %5515 = vmatmul.msk.f32.vlgmr.msra.gmra.mxu2 %vm186_vm0, %v732_v40 }
 0x984   :  { %1109 = vmatpush.msra.mxu2 %v6641_v10 }
 0x98b   :  { %5516 = vmatmul.msk.f32.vlgmr.msra.gmra.mxu3 %vm186_vm0, %v886_v13 }
 0xa06   :  { %v836_v23 = vpop.f32.mrf.mxu3  ;;  %v882_v22 = vpop.f32.mrf.mxu2 }
 0xa07   :  { %v857_v33 = vadd.f32 %v856_v37, %v836_v23 }
 0xa09   :  { %v862_v34 = vadd.f32 %v5753_v63, %v857_v33 }
 0xa0b   :  { %864 = vst.msk [vmem:[#allocation2] sm:$0x3] %vm863_vm12, %v862_v34 }
 0xa0e   :  { %v906_v14 = vpop.f32.mrf.mxu3 }
 0xa0f   :  { %v907_v39 = vadd.f32 %v906_v14, %v882_v22 }
 0xa11   :  { %v929_v36 = vadd.f32 %v926_v17, %v907_v39 }
 0xa13   :  { %v930_v40 = vadd.f32 %v6456_v19, %v929_v36 }
 0xa15   :  { %5784 = vtanh.f32 %v930_v40  ;;  %v931_v13 = vmul.f32 0.5, %v930_v40 }
 0xa17   :  { %5786 = vtanh.f32 %v931_v13 }
 0xa1b   :  { %v5785_v24 = vpop.eup %5784 }
 0xa1c   :  { %938 = vrot.lane.b32.xlu1 %v5785_v24, %s8986_s29 }
 0xa1d   :  { %v5787_v41 = vpop.eup %5786 }
 0xa1e   :  { %v933_v11 = vadd.f32 1.0, %v5787_v41 }
 0xa20   :  { %v934_v42 = vmul.f32 0.5, %v933_v11 }
 0xa22   :  { %v936_v63 = vmul.f32 %v934_v42, %v6461_v31 }
 0xa8e   :  { %v939_v37 = vpop.permute.xlu1 %938 }
 0xa8f   :  { %v941_v23 = vmul.f32 %v939_v37, %v934_v42 }
 0xa91   :  { %943 = vrot.lane.b32.xlu1 %v941_v23, %s8984_s24 }
 0xb03   :  { %v944_v33 = vpop.permute.xlu1 %943 }
 0xb04   :  { %v6893_v34 = vadd.f32 %v944_v33, %v936_v63 }
 0xb06   :  { %5788 = vtanh.f32 %v6893_v34 }
 0xb0c   :  { %v5789_v19 = vpop.eup %5788 }
 0xb0d   :  { %949 = vrot.lane.b32.xlu2 %v5789_v19, %s8986_s29 }
 0xb67   :  { %v950_v24 = vpop.permute.xlu2 %949 }
 0xb68   :  { %v952_v22 = vmul.f32 %v950_v24, %v934_v42 }
 0xb6a   :  { %954 = vrot.lane.b32.xlu1 %v952_v22, %s8984_s24  ;;  %s9037_s24 = smov 92  }
 0xbdc   :  { %v6898_v41 = vpop.permute.xlu1 %954 }
 0xbdd   :  { %5518 = vmatmul.msk.f32.vlgmr.msrb.gmra.mxu2 %vm234_vm3, %v6898_v41 }
 0xc60   :  { %v975_v11 = vpop.f32.mrf.mxu2 }
 0xc61   :  { %v6903_v31 = vadd.f32 %v6512_v44, %v975_v11 }
 0xc63   :  { %979 = vrot.lane.b32.xlu2 %v6903_v31, %s9020_s26  ;;  %5521 = vmatpush.msk.msra.mxu0 %vm134_vm1, %v6903_v31 }
 0xc64   :  { %5522 = vmatmul.msk.f32.vlgmr.msra.gmra.mxu0 %vm130_vm2, %v6446_v12  ;;  %v1088_v12 = vpop.f32.mrf.mxu1 }
 0xc65   :  { %1136 = vmatpush.msrb.mxu0 %v6526_v47  ;;  %v1135_v44 = vmul.f32 %v1088_v12, %v1088_v12 }
 0xc67   :  { %1137 = vmatpush.msrb.mxu0 %v6531_v48 }
 0xc69   :  { %1138 = vmatpush.msrb.mxu0 %v6537_v49 }
 0xc6b   :  { %1139 = vmatpush.msrb.mxu0 %v6543_v50 }
 0xc6d   :  { %1140 = vmatpush.msrb.mxu0 %v6549_v51 }
 0xc6f   :  { %1141 = vmatpush.msrb.mxu0 %v6555_v52 }
 0xc71   :  { %1142 = vmatpush.msrb.mxu0 %v6561_v53 }
 0xc73   :  { %1143 = vmatpush.msrb.mxu0 %v6567_v54 }
 0xc75   :  { %1144 = vmatpush.msrb.mxu0 %v6573_v55 }
 0xc77   :  { %1145 = vmatpush.msrb.mxu0 %v6579_v56 }
 0xc79   :  { %1146 = vmatpush.msrb.mxu0 %v6585_v57 }
 0xc7b   :  { %1147 = vmatpush.msrb.mxu0 %v6591_v58 }
 0xc7d   :  { %1148 = vmatpush.msrb.mxu0 %v6597_v59 }
 0xc7f   :  { %1149 = vmatpush.msrb.mxu0 %v6603_v60 }
 0xc81   :  { %1150 = vmatpush.msrb.mxu0 %v6609_v61 }
 0xc83   :  { %1151 = vmatpush.msrb.mxu0 %v6615_v62 }
 0xc84   :  { %1152 = vmatmul.f32.vlgmr.msrb.gmra.mxu0 %v1135_v44 }
 0xc85   :  { %1483 = vmatpush.msra.mxu0 %v6878_v21 }
 0xc87   :  { %1554 = vmatpush.msrb.mxu0 %v6398_v2 }
 0xcbd   :  { %v980_v42 = vpop.permute.xlu2 %979 }
 0xcbe   :  { %5519 = vmatpush.msk.msrb.mxu3 %vm134_vm1, %v980_v42 }
 0xcbf   :  { %5520 = vmatmul.msk.f32.vlgmr.msrb.gmra.mxu3 %vm130_vm2, %v6412_v4 }
 0xcc0   :  { %1115 = vmatpush.msra.mxu3 %v6526_v47 }
 0xcc2   :  { %1116 = vmatpush.msra.mxu3 %v6531_v48 }
 0xcc4   :  { %1117 = vmatpush.msra.mxu3 %v6537_v49 }
 0xcc6   :  { %1118 = vmatpush.msra.mxu3 %v6543_v50 }
 0xcc8   :  { %1119 = vmatpush.msra.mxu3 %v6549_v51 }
 0xcca   :  { %1120 = vmatpush.msra.mxu3 %v6555_v52 }
 0xccc   :  { %1121 = vmatpush.msra.mxu3 %v6561_v53 }
 0xcce   :  { %1122 = vmatpush.msra.mxu3 %v6567_v54 }
 0xcd0   :  { %1123 = vmatpush.msra.mxu3 %v6573_v55 }
 0xcd2   :  { %1124 = vmatpush.msra.mxu3 %v6579_v56 }
 0xcd4   :  { %1125 = vmatpush.msra.mxu3 %v6585_v57 }
 0xcd6   :  { %1126 = vmatpush.msra.mxu3 %v6591_v58  ;;  %v9021_v58 = vmov 12  }
 0xcd8   :  { %1127 = vmatpush.msra.mxu3 %v6597_v59 }
 0xcda   :  { %1128 = vmatpush.msra.mxu3 %v6603_v60 }
 0xcdc   :  { %1129 = vmatpush.msra.mxu3 %v6609_v61 }
 0xcde   :  { %1130 = vmatpush.msra.mxu3 %v6615_v62  ;;  %v6959_v62 = vld [vmem:[%s9013_s28 + $0x8] sm:$0xff] }
 0xce0   :  { %1458 = vmatpush.msrb.mxu3 %v6641_v10 }
 0xce1   :  { %v1022_v2 = vpop.f32.mrf.mxu0 }
 0xd01   :  { %v1153_v14 = vpop.f32.mrf.mxu0 }
 0xd02   :  { %v1160_v17 = vmax.f32 %v1153_v14, 1e-16 }
 0xd42   :  { %v1000_v4 = vpop.f32.mrf.mxu3 }
 0xd43   :  { %v1023_v47 = vadd.f32 %v1022_v2, %v1000_v4 }
 0xd45   :  { %v1025_v48 = vadd.f32 1e-16, %v1023_v47  ;;  %v1027_v49 = vmin.f32 %v1023_v47, 20.0  ;;  %vm1026_vm13 = vcmp.gt.f32.partialorder %v1023_v47, 20.0  ;;  %v1038_v59 = vsel %vm373_vm6, %v1023_v47, -inf }
 0xd46   :  { %v1034_v42 = vmul.f32 0.5, %v1023_v47 }
 0xd47   :  { %5525 = vmatmul.msk.f32.vlgmr.msra.gmra.mxu2 %vm186_vm0, %v1025_v48  ;;  %v1156_v50 = vmul.f32 %v1025_v48, %v1025_v48  ;;  %v1028_v51 = vmul.f32 1.442695, %v1027_v49 }
 0xd49   :  { %v1157_v52 = vsel %vm497_vm4, %v1156_v50, 0.0  ;;  %5790 = vpow2.f32 %v1028_v51 }
 0xd4a   :  { %1158 = vadd.xlane.f32.xlu1 %v1157_v52 }
 0xd4f   :  { %v5791_v53 = vpop.eup %5790 }
 0xd50   :  { %v1030_v54 = vadd.f32 1.0, %v5791_v53  ;;  %v9022_v53 = vmov 11  }
 0xd52   :  { %5792 = vlog2.f32 %v1030_v54 }
 0xd58   :  { %v5793_v55 = vpop.eup %5792 }
 0xd59   :  { %v1032_v56 = vmul.f32 0.6931472, %v5793_v55 }
 0xd5b   :  { %v6951_v57 = vsel %vm1026_vm13, %v1023_v47, %v1032_v56 }
 0xd5c   :  { %1176 = vperm.xlu0 %5705, %v6951_v57  }
 0xd64   :  { %5708 = vset.pattern.permute.xlu0 %v9021_v58 }
 0xd86   :  { %1039 = vmax.xlane.f32.xlu0 %v1038_v59 }
 0xdbd   :  { %v1159_v10 = vpop.xlane.xlu1 %1158 }
 0xdbe   :  { %v1161_v39 = vmax.f32 %v1159_v10, 1e-16 }
 0xdc0   :  { %v1162_v36 = vmul.f32 %v1161_v39, %v1160_v17 }
 0xdc2   :  { %5794 = vrsqrt.f32 %v1162_v36  ;;  %vm1169_vm15 = vweird.f32 %v1162_v36 }
 0xdc3   :  { %5796 = vtanh.f32 %v1034_v42 }
 0xdc8   :  { %v5795_v40 = vpop.eup %5794 }
 0xdc9   :  { %v1164_v13 = vmul.f32 %v5795_v40, %v1162_v36  ;;  %vm1170_vm14 = vweird.f32 %v5795_v40  ;;  %v5797_v4 = vpop.eup %5796 }
 0xdca   :  { %v1111_v60 = vpop.f32.mrf.mxu2  ;;  %vm1171_vm7 = vmor %vm1169_vm15, %vm1170_vm14  ;;  %v1036_v49 = vadd.f32 1.0, %v5797_v4 }
 0xdcb   :  { %v1114_v61 = vmul.f32 %v1111_v60, %v1088_v12  ;;  %v1165_v37 = vmul.f32 %v5795_v40, %v1164_v13 }
 0xdcc   :  { %v1037_v51 = vmul.f32 0.5, %v1036_v49 }
 0xdcd   :  { %1131 = vmatmul.f32.vlgmr.msra.gmra.mxu3 %v1114_v61  ;;  %v1166_v23 = vmul.f32 0.5, %v1165_v37 }
 0xdce   :  { %1530 = vmatpush.msra.mxu3 %v6959_v62  ;;  %v1177_v11 = vpop.permute.xlu0 %1176  ;;  %v1210_v61 = vsub.f32 1.0, %v1037_v51 }
 0xdcf   :  { %v1167_v63 = vsub.f32 1.5, %v1166_v23 }
 0xdd1   :  { %v1168_v33 = vmul.f32 %v5795_v40, %v1167_v63 }
 0xdd3   :  { %v1172_v24 = vsel %vm1171_vm7, %v5795_v40, %v1168_v33 }
 0xdf9   :  { %v1040_v2 = vpop.xlane.xlu0 %1039 }
 0xdfa   :  { %v1041_v48 = vsub.f32 %v1023_v47, %v1040_v2  ;;  %v9023_v47 = vmov 8  }
 0xdfc   :  { %v1042_v50 = vmul.f32 1.442695, %v1041_v48 }
 0xdfe   :  { %5798 = vpow2.f32 %v1042_v50 }
 0xe04   :  { %v5799_v52 = vpop.eup %5798 }
 0xe50   :  { %v1132_v19 = vpop.f32.mrf.mxu3 }
 0xe51   :  { %v1173_v22 = vmul.f32 %v1172_v24, %v1132_v19 }
 0xe53   :  { %v1179_v12 = vmul.f32 %v1177_v11, %v1173_v22 }
 0xe55   :  { %v1180_v44 = vsel %vm521_vm10, %v1179_v12, -inf }
 0xe56   :  { %1181 = vmax.xlane.f32.xlu2 %v1180_v44 }
 0xe6e   :  { %1206 = vperm.xlu2 %5700, %v1037_v51  }
 0xe76   :  { %1045 = vrot.lane.b32.xlu2 %v5799_v52, %s8982_s30  ;;  %s6265_s30 = smov 104  }
 0xe77   :  { %5707 = vset.pattern.permute.xlu2 %v9022_v53 }
 0xec9   :  { %v1182_v54 = vpop.xlane.xlu2 %1181 }
 0xeca   :  { %v1183_v55 = vsub.f32 %v1179_v12, %v1182_v54 }
 0xecc   :  { %v1184_v56 = vmul.f32 1.442695, %v1183_v55 }
 0xece   :  { %5800 = vpow2.f32 %v1184_v56 }
 0xed1   :  { %v1207_v10 = vpop.permute.xlu2 %1206 }
 0xed4   :  { %v5801_v59 = vpop.eup %5800 }
 0xed5   :  { %v1186_v60 = vsel %vm521_vm10, %v5801_v59, 0.0 }
 0xed6   :  { %1187 = vadd.xlane.f32.xlu1 %v1186_v60 }
 0xed9   :  { %v1046_v14 = vpop.permute.xlu2 %1045 }
 0xeda   :  { %v1048_v39 = vsel %vm384_vm11, %v1046_v14, 0.0  ;;  %v9025_v14 = vmov 9  }
 0xeef   :  { %1213 = vperm.xlu1 %5706, %v1210_v61  }
 0xef7   :  { %5711 = vset.pattern.permute.xlu1 %v9023_v47 }
 0xf19   :  { %1049 = vadd.xlane.f32.xlu1 %v1048_v39  ;;  %v9026_v39 = vmov 13  }
 0xf49   :  { %v1188_v17 = vpop.xlane.xlu1 %1187 }
 0xf4a   :  { %5802 = vrcp.f32 %v1188_v17  ;;  %v1200_v23 = vand.u32 2147483648, %v1188_v17  ;;  %v1198_v63 = vand.u32 2147483647, %v1188_v17  ;;  %vm1194_vm13 = vweird.f32 %v1188_v17 }
 0xf4c   :  { %v1201_v19 = vor.u32 1.1754944e-38, %v1200_v23  ;;  %vm1199_vm15 = vcmp.eq.f32.partialorder %v1198_v63, 8.507059e+37  ;;  %v1066_v63 = vadd.f32 1.0, %v6951_v57  ;;  %v6995_v57 = vld [vmem:[%s8934_s5 + $0x8] sm:$0xff] }
 0xf50   :  { %v5803_v36 = vpop.eup %5802 }
 0xf51   :  { %v1190_v40 = vmul.f32 %v5803_v36, %v1188_v17  ;;  %vm1195_vm12 = vweird.f32 %v5803_v36 }
 0xf52   :  { %vm1196_vm14 = vmor %vm1194_vm13, %vm1195_vm12 }
 0xf53   :  { %v1191_v13 = vsub.f32 1.0, %v1190_v40 }
 0xf55   :  { %v1192_v37 = vmul.f32 %v5803_v36, %v1191_v13 }
 0xf57   :  { %v1193_v33 = vadd.f32 %v5803_v36, %v1192_v37 }
 0xf59   :  { %v1197_v24 = vsel %vm1196_vm14, %v5803_v36, %v1193_v33 }
 0xf5a   :  { %v1202_v22 = vsel %vm1199_vm15, %v1201_v19, %v1197_v24  ;;  %v6983_v19 = vld [vmem:[%s8934_s5 + $0x18] sm:$0xff] }
 0xf5b   :  { %v1203_v11 = vmul.f32 %v5801_v59, %v1202_v22  ;;  %v7001_v22 = vld [vmem:[%s8934_s5] sm:$0xff] }
 0xf5d   :  { %v1209_v44 = vmul.f32 %v1207_v10, %v1203_v11  ;;  %v9024_v10 = vmov 10  }
 0xf61   :  { %v1214_v12 = vpop.permute.xlu1 %1213 }
 0xf62   :  { %v1216_v42 = vmul.f32 %v1214_v12, %v6699_v46 }
 0xf64   :  { %v1217_v2 = vadd.f32 %v1216_v42, %v1209_v44 }
 0xf66   :  { %5526 = vmatmul.msk.f32.vlgmr.msra.gmra.mxu1 %vm560_vm5, %v1217_v2 }
 0xf8c   :  { %v1050_v4 = vpop.xlane.xlu1 %1049 }
 0xf8d   :  { %5804 = vrcp.f32 %v1050_v4  ;;  %v1062_v51 = vand.u32 2147483648, %v1050_v4  ;;  %v1060_v55 = vand.u32 2147483647, %v1050_v4  ;;  %vm1056_vm12 = vweird.f32 %v1050_v4 }
 0xf8f   :  { %v1063_v59 = vor.u32 1.1754944e-38, %v1062_v51  ;;  %vm1061_vm14 = vcmp.eq.f32.partialorder %v1060_v55, 8.507059e+37 }
 0xf93   :  { %v5805_v48 = vpop.eup %5804 }
 0xf94   :  { %v1052_v49 = vmul.f32 %v5805_v48, %v1050_v4  ;;  %vm1057_vm7 = vweird.f32 %v5805_v48 }
 0xf95   :  { %vm1058_vm13 = vmor %vm1056_vm12, %vm1057_vm7 }
 0xf96   :  { %v1053_v50 = vsub.f32 1.0, %v1052_v49 }
 0xf98   :  { %v1054_v54 = vmul.f32 %v5805_v48, %v1053_v50 }
 0xf9a   :  { %v1055_v56 = vadd.f32 %v5805_v48, %v1054_v54 }
 0xf9c   :  { %v1059_v60 = vsel %vm1058_vm13, %v5805_v48, %v1055_v56 }
 0xf9d   :  { %v1064_v61 = vsel %vm1061_vm14, %v1063_v59, %v1059_v60 }
 0xf9e   :  { %v1065_v46 = vmul.f32 %v5799_v52, %v1064_v61  ;;  %v1384_v52 = vmul.f32 0.5, %v6903_v31  ;;  %v7010_v61 = vld [vmem:[%s9014_s21] sm:$0x3] }
 0xfa0   :  { %1258 = vperm.xlu0 %5708, %v1065_v46   ;;  %1248 = vperm.xlu2 %5707, %v1065_v46   ;;  %5806 = vtanh.f32 %v1384_v52 }
 0xfa6   :  { %v5807_v33 = vpop.eup %5806 }
 0xfa7   :  { %v1386_v24 = vadd.f32 1.0, %v5807_v33 }
 0xfa8   :  { %1439 = vrot.lane.b32.xlu0 %v6903_v31, %s8980_s0  ;;  %5709 = vset.pattern.permute.xlu2 %v9024_v10  ;;  %v6989_v31 = vld [vmem:[%s8934_s5 + $0x10] sm:$0xff]  ;;  %s9045_s0 = smov 64  }
 0xfa9   :  { %1243 = vperm.xlu2 %5709, %v1065_v46   ;;  %5713 = vset.pattern.permute.xlu0 %v9025_v14  ;;  %v1387_v11 = vmul.f32 0.5, %v1386_v24 }
 0xfb1   :  { %5710 = vset.pattern.permute.xlu2 %v9026_v39 }
 0xfe3   :  { %v1238_v17 = vpop.f32.mrf.mxu1 }
 0xffa   :  { %v1249_v36 = vpop.permute.xlu2 %1248 }
 0xffb   :  { %v1251_v40 = vmul.f32 %v1249_v36, %v1238_v17 }
 0xffd   :  { %1253 = vrot.lane.b32.xlu2 %v1251_v40, %s9027_s27 }
0x1003   :  { %v1244_v12 = vpop.permute.xlu2 %1243 }
0x1004   :  { %v1246_v42 = vmul.f32 %v1244_v12, %v1238_v17 }
0x1012   :  { %v1259_v13 = vpop.permute.xlu0 %1258 }
0x1013   :  { %v1261_v37 = vmul.f32 %v1259_v13, %v1238_v17 }
0x1015   :  { %1263 = vrot.lane.b32.xlu2 %v1261_v37, %s9028_s2 }
0x101a   :  { %v1440_v23 = vpop.permute.xlu0 %1439 }
0x101b   :  { %5534 = vmatmul.msk.f32.vlgmr.msrb.gmra.mxu3 %vm186_vm0, %v1440_v23 }
0x101c   :  { %1620 = vmatpush.msrb.mxu3 %v6983_v19 }
0x101d   :  { %1272 = vperm.xlu2 %5710, %v1066_v63  }
0x101e   :  { %1621 = vmatpush.msrb.mxu3 %v6989_v31 }
0x1020   :  { %1622 = vmatpush.msrb.mxu3 %v6995_v57 }
0x1022   :  { %1623 = vmatpush.msrb.mxu3 %v7001_v22 }
0x1025   :  { %1412 = vrot.lane.b32.xlu2 %v1387_v11, %s9029_s22 }
0x1026   :  { %5712 = vset.pattern.permute.xlu2 %v9025_v14 }
0x1057   :  { %v1254_v44 = vpop.permute.xlu2 %1253 }
0x1058   :  { %v1256_v2 = vadd.f32 %v1254_v44, %v1246_v42 }
0x106f   :  { %v1264_v4 = vpop.permute.xlu2 %1263 }
0x1070   :  { %v1266_v48 = vadd.f32 %v1264_v4, %v1256_v2 }
0x1072   :  { %v1267_v49 = vmax.f32 %v1266_v48, 1e-30 }
0x1074   :  { %5808 = vlog2.f32 %v1267_v49 }
0x1077   :  { %v1273_v54 = vpop.permute.xlu2 %1272 }
0x107a   :  { %v5809_v50 = vpop.eup %5808 }
0x107b   :  { %v1269_v51 = vmul.f32 0.6931472, %v5809_v50 }
0x107d   :  { %v1275_v55 = vmul.f32 %v1273_v54, %v1269_v51 }
0x107f   :  { %v1276_v56 = vmul.f32 1.442695, %v1275_v55  ;;  %v7116_v55 = vld [vmem:[%s9015_s4] ss:$0 sm:$0xff] }
0x1081   :  { %5810 = vpow2.f32 %v1276_v56 }
0x1087   :  { %v5811_v59 = vpop.eup %5810 }
0x1088   :  { %v1278_v60 = vsel %vm521_vm10, %v5811_v59, 0.0 }
0x1089   :  { %1279 = vadd.xlane.f32.xlu1 %v1278_v60 }
0x10a2   :  { %1535 = vrot.lane.b32.xlu1 %v7010_v61, %s9027_s27 }
0x10fc   :  { %v1280_v46 = vpop.xlane.xlu1 %1279 }
0x10fd   :  { %v1281_v17 = vadd.f32 1e-16, %v1280_v46 }
0x10ff   :  { %5812 = vrcp.f32 %v1281_v17  ;;  %v1293_v52 = vand.u32 2147483648, %v1281_v17  ;;  %v1291_v23 = vand.u32 2147483647, %v1281_v17  ;;  %vm1287_vm7 = vweird.f32 %v1281_v17 }
0x1101   :  { %v1294_v33 = vor.u32 1.1754944e-38, %v1293_v52  ;;  %vm1292_vm13 = vcmp.eq.f32.partialorder %v1291_v23, 8.507059e+37 }
0x1105   :  { %v5813_v36 = vpop.eup %5812 }
0x1106   :  { %v1283_v40 = vmul.f32 %v5813_v36, %v1281_v17  ;;  %vm1288_vm15 = vweird.f32 %v5813_v36 }
0x1107   :  { %vm1289_vm12 = vmor %vm1287_vm7, %vm1288_vm15 }
0x1108   :  { %v1284_v13 = vsub.f32 1.0, %v1283_v40 }
0x110a   :  { %v1285_v37 = vmul.f32 %v5813_v36, %v1284_v13 }
0x110c   :  { %v1286_v63 = vadd.f32 %v5813_v36, %v1285_v37 }
0x110e   :  { %v1290_v24 = vsel %vm1289_vm12, %v5813_v36, %v1286_v63 }
0x110f   :  { %v1295_v11 = vsel %vm1292_vm13, %v1294_v33, %v1290_v24 }
0x1110   :  { %v7014_v12 = vmul.f32 %v5811_v59, %v1295_v11 }
0x1112   :  { %5527 = vmatpush.msk.msrb.mxu2 %vm644_vm8, %v7014_v12  ;;  %5529 = vmatpush.msk.msrb.mxu1 %vm644_vm8, %v7014_v12 }
0x1113   :  { %5528 = vmatmul.msk.f32.vlgmr.msrb.gmra.mxu2 %vm640_vm9, %v6704_v0  ;;  %5530 = vmatmul.msk.f32.vlgmr.msrb.gmra.mxu1 %vm640_vm9, %v6709_v25  ;;  %v7048_v25 = vld [vmem:[%s8939_s10] sm:$0xff] }
0x1114   :  { %1357 = vmatpush.msra.mxu2 %v6714_v1  ;;  %1364 = vmatpush.msra.mxu1 %v6737_v43  ;;  %v9030_v43 = vld [vmem:[#allocation10_spill] sm:$0xff]  ;;  %v1536_v42 = vpop.permute.xlu1 %1535 }
0x1116   :  { %1358 = vmatpush.msra.mxu2 %v6728_v26  ;;  %1365 = vmatpush.msra.mxu1 %v6742_v32  ;;  %v7060_v32 = vld [vmem:[%s9013_s28 + $0x28] sm:$0xff] }
0x1118   :  { %1405 = vmatpush.msrb.mxu2 %v6714_v1  ;;  %1366 = vmatpush.msra.mxu1 %v6749_v16  ;;  %v7066_v16 = vld [vmem:[%s9013_s28 + $0x20] sm:$0xff] }
0x111a   :  { %1406 = vmatpush.msrb.mxu2 %v6728_v26  ;;  %1367 = vmatpush.msra.mxu1 %v6755_v27  ;;  %v1413_v26 = vpop.permute.xlu2 %1412  ;;  %v7072_v27 = vld [vmem:[%s9013_s28 + $0x18] sm:$0xff] }
0x111c   :  { %1368 = vmatpush.msra.mxu1 %v6766_v29 }
0x111e   :  { %1369 = vmatpush.msra.mxu1 %v6778_v38 }
0x1120   :  { %1370 = vmatpush.msra.mxu1 %v6790_v35 }
0x1122   :  { %1371 = vmatpush.msra.mxu1 %v6802_v45 }
0x1124   :  { %1372 = vmatpush.msra.mxu1 %v6809_v5 }
0x1126   :  { %1373 = vmatpush.msra.mxu1 %v6817_v15  ;;  %v1460_v15 = vpop.f32.mrf.mxu3 }
0x1128   :  { %1374 = vmatpush.msra.mxu1 %v6824_v18 }
0x112a   :  { %1375 = vmatpush.msra.mxu1 %v6831_v20 }
0x112c   :  { %1376 = vmatpush.msra.mxu1 %v6838_v6 }
0x112e   :  { %1377 = vmatpush.msra.mxu1 %v6847_v7 }
0x1130   :  { %1378 = vmatpush.msra.mxu1 %v6856_v8  ;;  %v9032_v8 = vld [vmem:[#allocation9_spill] sm:$0xff] }
0x1132   :  { %1379 = vmatpush.msra.mxu1 %v6862_v9  ;;  %v7096_v9 = vld [vmem:[%s8938_s9 + $0x8] sm:$0xff] }
0x1190   :  { %v1337_v1 = vpop.f32.mrf.mxu1 }
0x1196   :  { %v1317_v0 = vpop.f32.mrf.mxu2 }
0x1197   :  { %5531 = vmatmul.msk.f32.vlgmr.msra.gmra.mxu2 %vm560_vm5, %v1317_v0 }
0x1198   :  { %1431 = vmatpush.msra.mxu2 %v7048_v25 }
0x119f   :  { %5532 = vmatmul.msk.f32.vlgmr.msrb.gmra.mxu2 %vm560_vm5, %v1337_v1 }
0x11a0   :  { %1500 = vmatpush.msrb.mxu2 %v6761_v28  ;;  %v7078_v28 = vld [vmem:[%s9013_s28 + $0x10] sm:$0xff] }
0x11a2   :  { %1501 = vmatpush.msrb.mxu2 %v6773_v30  ;;  %v9031_v30 = vld [vmem:[#allocation11_spill] sm:$0xff] }
0x11a4   :  { %1502 = vmatpush.msrb.mxu2 %v6785_v3 }
0x11a6   :  { %1503 = vmatpush.msrb.mxu2 %v9030_v43  ;;  %v7153_v43 = vld [vmem:[%s8940_s11 + $0x78] sm:$0xff] }
0x11a7   :  { %5533 = vmatmul.msk.f32.vlgmr.msra.gmra.mxu2 %vm186_vm0, %v1413_v26  ;;  %v7146_v26 = vld [vmem:[%s8943_s14] sm:$0xf] }
0x11a8   :  { %1571 = vmatpush.msra.mxu2 %v7060_v32 }
0x11aa   :  { %1572 = vmatpush.msra.mxu2 %v7066_v16 }
0x11ac   :  { %1573 = vmatpush.msra.mxu2 %v7072_v27 }
0x11ae   :  { %1574 = vmatpush.msra.mxu2 %v7078_v28 }
0x11af   :  { %5536 = vmatmul.msk.f32.vlgmr.msrb.gmra.mxu2 %vm234_vm3, %v6898_v41 }
0x11b7   :  { %5539 = vmatmul.msk.f32.vlgmr.msra.gmra.mxu2 %vm234_vm3, %v6898_v41  ;;  %v7102_v41 = vld [vmem:[%s8938_s9] sm:$0xff] }
0x121a   :  { %v1360_v29 = vpop.f32.mrf.mxu2 }
0x121b   :  { %v1363_v38 = vmul.f32 %v1360_v29, %v9031_v30  ;;  %v7159_v29 = vld [vmem:[%s8940_s11 + $0x70] sm:$0xff] }
0x121d   :  { %1380 = vmatmul.f32.vlgmr.msra.gmra.mxu1 %v1363_v38  ;;  %v7171_v38 = vld [vmem:[%s8940_s11 + $0x60] sm:$0xff] }
0x1222   :  { %v1408_v3 = vpop.f32.mrf.mxu2 }
0x1223   :  { %v1463_v18 = vmul.f32 %v1460_v15, %v1408_v3  ;;  %v7201_v15 = vld [vmem:[%s8940_s11 + $0x38] sm:$0xff] }
0x122a   :  { %v1433_v35 = vpop.f32.mrf.mxu2 }
0x122b   :  { %v1436_v45 = vmul.f32 %v1433_v35, %v1408_v3  ;;  %v7177_v3 = vld [vmem:[%s8940_s11 + $0x58] sm:$0xff]  ;;  %v7183_v35 = vld [vmem:[%s8940_s11 + $0x50] sm:$0xff] }
0x122d   :  { %v1437_v5 = vsub.f32 1.0, %v1436_v45  ;;  %v7189_v45 = vld [vmem:[%s8940_s11 + $0x48] sm:$0xff] }
0x122f   :  { %v1438_v20 = vmul.f32 %v1437_v5, %v9031_v30  ;;  %v7165_v30 = vld [vmem:[%s8940_s11 + $0x68] sm:$0xff]  ;;  %v7195_v5 = vld [vmem:[%s8940_s11 + $0x40] sm:$0xff] }
0x1231   :  { %v7087_v6 = vadd.f32 %v1463_v18, %v1438_v20  ;;  %v7207_v18 = vld [vmem:[%s8940_s11 + $0x30] sm:$0xff]  ;;  %v7213_v20 = vld [vmem:[%s8940_s11 + $0x28] sm:$0xff] }
0x1232   :  { %v7109_v2 = vpop.f32.mrf.mxu2 }
0x1233   :  { %v1717_v7 = vadd.f32 1e-16, %v7087_v6  ;;  %9033 = vst [vmem:[#allocation10_spill] sm:$0xff] %v7109_v2 }
0x1235   :  { %5545 = vmatpush.msk.msrb.mxu2 %vm134_vm1, %v1717_v7  ;;  %v7219_v7 = vld [vmem:[%s8940_s11 + $0x20] sm:$0xff] }
0x1236   :  { %5546 = vmatmul.msk.f32.vlgmr.msrb.gmra.mxu2 %vm130_vm2, %v9032_v8 }
0x1237   :  { %1885 = vmatpush.msra.mxu2 %v7096_v9 }
0x1239   :  { %1886 = vmatpush.msra.mxu2 %v7102_v41 }
0x123a   :  { %v1576_v51 = vpop.f32.mrf.mxu2 }
0x129a   :  { %v1381_v44 = vpop.f32.mrf.mxu1 }
0x129b   :  { %5535 = vmatmul.msk.f32.vlgmr.msra.gmra.mxu0 %vm186_vm0, %v1381_v44  ;;  %5537 = vmatmul.msk.f32.vlgmr.msra.gmra.mxu3 %vm186_vm0, %v1381_v44  ;;  %v7225_v44 = vld [vmem:[%s8940_s11 + $0x18] sm:$0xff] }
0x129c   :  { %1759 = vmatpush.msra.mxu3 %v7048_v25 }
0x12a3   :  { %5538 = vmatmul.msk.f32.vlgmr.msrb.gmra.mxu0 %vm186_vm0, %v1536_v42  ;;  %v7231_v42 = vld [vmem:[%s8940_s11 + $0x10] sm:$0xff] }
0x1318   :  { %v7111_v4 = vpop.f32.mrf.mxu0 }
0x1319   :  { %9034 = vst [vmem:[#allocation11_spill] sm:$0xff] %v7111_v4 }
0x131e   :  { %v1532_v48 = vpop.f32.mrf.mxu3 }
0x1320   :  { %v1556_v49 = vpop.f32.mrf.mxu0 }
0x1321   :  { %v1557_v50 = vadd.f32 %v1556_v49, %v1532_v48  ;;  %v7237_v48 = vld [vmem:[%s8940_s11 + $0x8] sm:$0xff]  ;;  %v7243_v49 = vld [vmem:[%s8940_s11] sm:$0xff] }
0x1323   :  { %v1579_v54 = vadd.f32 %v1576_v51, %v1557_v50  ;;  %v1738_v50 = vpop.f32.mrf.mxu2 }
0x1324   :  { %v1785_v51 = vmul.f32 %v1738_v50, %v1738_v50 }
0x1325   :  { %v1580_v56 = vadd.f32 %v7116_v55, %v1579_v54  ;;  %v7250_v54 = vld [vmem:[%s9013_s28] sm:$0xff] }
0x1327   :  { %5814 = vtanh.f32 %v1580_v56  ;;  %v1581_v60 = vmul.f32 0.5, %v1580_v56 }
0x1329   :  { %5816 = vtanh.f32 %v1581_v60 }
0x132d   :  { %v5815_v59 = vpop.eup %5814 }
0x132e   :  { %1588 = vrot.lane.b32.xlu2 %v5815_v59, %s8986_s29  ;;  %v7257_v59 = vld [vmem:[%s8944_s15] sm:$0xf] }
0x132f   :  { %v5817_v46 = vpop.eup %5816 }
0x1330   :  { %v1583_v17 = vadd.f32 1.0, %v5817_v46 }
0x1332   :  { %v1584_v36 = vmul.f32 0.5, %v1583_v17 }
0x1334   :  { %v1586_v52 = vmul.f32 %v1584_v36, %v6893_v34  ;;  %v7134_v34 = vld [vmem:[%s8935_s6] ss:$0 sm:$0xff] }
0x1388   :  { %v1589_v40 = vpop.permute.xlu2 %1588 }
0x1389   :  { %v1591_v13 = vmul.f32 %v1589_v40, %v1584_v36 }
0x138b   :  { %1593 = vrot.lane.b32.xlu0 %v1591_v13, %s9035_s3 }
0x13fd   :  { %v1594_v37 = vpop.permute.xlu0 %1593 }
0x13fe   :  { %v7122_v23 = vadd.f32 %v1594_v37, %v1586_v52 }
0x1400   :  { %5818 = vtanh.f32 %v7122_v23 }
0x1406   :  { %v5819_v63 = vpop.eup %5818 }
0x1407   :  { %1599 = vrot.lane.b32.xlu2 %v5819_v63, %s8986_s29  ;;  %s6276_s29 = smov 56  }
0x1461   :  { %v1600_v33 = vpop.permute.xlu2 %1599 }
0x1462   :  { %v1602_v24 = vmul.f32 %v1600_v33, %v1584_v36 }
0x1464   :  { %1604 = vrot.lane.b32.xlu0 %v1602_v24, %s9035_s3 }
0x14d6   :  { %v7127_v11 = vpop.permute.xlu0 %1604 }
0x14d7   :  { %5540 = vmatmul.msk.f32.vlgmr.msrb.gmra.mxu3 %vm234_vm3, %v7127_v11 }
0x155a   :  { %v1625_v0 = vpop.f32.mrf.mxu3 }
0x155b   :  { %v7137_v1 = vadd.f32 %v7134_v34, %v1625_v0 }
0x155d   :  { %1629 = vrot.lane.b32.xlu2 %v7137_v1, %s9020_s26  ;;  %5543 = vmatpush.msk.msrb.mxu1 %vm134_vm1, %v7137_v1 }
0x155e   :  { %5544 = vmatmul.msk.f32.vlgmr.msrb.gmra.mxu1 %vm130_vm2, %v7146_v26 }
0x155f   :  { %1786 = vmatpush.msra.mxu1 %v7153_v43 }
0x1561   :  { %1787 = vmatpush.msra.mxu1 %v7159_v29 }
0x1563   :  { %1788 = vmatpush.msra.mxu1 %v7165_v30 }
0x1565   :  { %1789 = vmatpush.msra.mxu1 %v7171_v38 }
0x1567   :  { %1790 = vmatpush.msra.mxu1 %v7177_v3 }
0x1569   :  { %1791 = vmatpush.msra.mxu1 %v7183_v35 }
0x156b   :  { %1792 = vmatpush.msra.mxu1 %v7189_v45 }
0x156d   :  { %1793 = vmatpush.msra.mxu1 %v7195_v5 }
0x156f   :  { %1794 = vmatpush.msra.mxu1 %v7201_v15 }
0x1571   :  { %1795 = vmatpush.msra.mxu1 %v7207_v18 }
0x1573   :  { %1796 = vmatpush.msra.mxu1 %v7213_v20 }
0x1575   :  { %1797 = vmatpush.msra.mxu1 %v7219_v7 }
0x1577   :  { %1798 = vmatpush.msra.mxu1 %v7225_v44 }
0x1579   :  { %1799 = vmatpush.msra.mxu1 %v7231_v42 }
0x157b   :  { %1800 = vmatpush.msra.mxu1 %v7237_v48 }
0x157d   :  { %1801 = vmatpush.msra.mxu1 %v7243_v49 }
0x157e   :  { %1802 = vmatmul.f32.vlgmr.msra.gmra.mxu1 %v1785_v51 }
0x157f   :  { %2133 = vmatpush.msrb.mxu1 %v6878_v21 }
0x1581   :  { %2204 = vmatpush.msra.mxu1 %v7250_v54 }
0x15b7   :  { %v1630_v56 = vpop.permute.xlu2 %1629 }
0x15b8   :  { %5541 = vmatpush.msk.msra.mxu0 %vm134_vm1, %v1630_v56 }
0x15b9   :  { %5542 = vmatmul.msk.f32.vlgmr.msra.gmra.mxu0 %vm130_vm2, %v7257_v59 }
0x15ba   :  { %1765 = vmatpush.msrb.mxu0 %v7153_v43 }
0x15bc   :  { %1766 = vmatpush.msrb.mxu0 %v7159_v29 }
0x15be   :  { %1767 = vmatpush.msrb.mxu0 %v7165_v30 }
0x15c0   :  { %1768 = vmatpush.msrb.mxu0 %v7171_v38 }
0x15c2   :  { %1769 = vmatpush.msrb.mxu0 %v7177_v3 }
0x15c4   :  { %1770 = vmatpush.msrb.mxu0 %v7183_v35 }
0x15c6   :  { %1771 = vmatpush.msrb.mxu0 %v7189_v45 }
0x15c8   :  { %1772 = vmatpush.msrb.mxu0 %v7195_v5 }
0x15ca   :  { %1773 = vmatpush.msrb.mxu0 %v7201_v15 }
0x15cc   :  { %1774 = vmatpush.msrb.mxu0 %v7207_v18 }
0x15ce   :  { %1775 = vmatpush.msrb.mxu0 %v7213_v20 }
0x15d0   :  { %1776 = vmatpush.msrb.mxu0 %v7219_v7 }
0x15d2   :  { %1777 = vmatpush.msrb.mxu0 %v7225_v44 }
0x15d4   :  { %1778 = vmatpush.msrb.mxu0 %v7231_v42 }
0x15d6   :  { %1779 = vmatpush.msrb.mxu0 %v7237_v48 }
0x15d8   :  { %1780 = vmatpush.msrb.mxu0 %v7243_v49 }
0x15da   :  { %2108 = vmatpush.msra.mxu0 %v7048_v25 }
0x15db   :  { %v1672_v21 = vpop.f32.mrf.mxu1 }
0x1636   :  { %v1650_v60 = vpop.f32.mrf.mxu0 }
0x1637   :  { %v7278_v46 = vadd.f32 %v1672_v21, %v1650_v60 }
0x1639   :  { %v1675_v17 = vadd.f32 1e-16, %v7278_v46  ;;  %v1677_v36 = vmin.f32 %v7278_v46, 20.0  ;;  %v1684_v63 = vmul.f32 0.5, %v7278_v46  ;;  %v1688_v24 = vsel %vm373_vm6, %v7278_v46, -inf }
0x163a   :  { %vm1676_vm14 = vcmp.gt.f32.partialorder %v7278_v46, 20.0 }
0x163b   :  { %5547 = vmatmul.msk.f32.vlgmr.msra.gmra.mxu3 %vm186_vm0, %v1675_v17  ;;  %v1806_v40 = vmul.f32 %v1675_v17, %v1675_v17  ;;  %v1678_v13 = vmul.f32 1.442695, %v1677_v36 }
0x163d   :  { %v1807_v52 = vsel %vm497_vm4, %v1806_v40, 0.0  ;;  %5820 = vpow2.f32 %v1678_v13 }
0x163e   :  { %1808 = vadd.xlane.f32.xlu0 %v1807_v52 }
0x1643   :  { %v5821_v37 = vpop.eup %5820 }
0x1644   :  { %v1680_v33 = vadd.f32 1.0, %v5821_v37  ;;  %v1803_v37 = vpop.f32.mrf.mxu1 }
0x1646   :  { %1689 = vmax.xlane.f32.xlu0 %v1688_v24  ;;  %5822 = vlog2.f32 %v1680_v33  ;;  %v1810_v33 = vmax.f32 %v1803_v37, 1e-16 }
0x1647   :  { %5824 = vtanh.f32 %v1684_v63 }
0x164c   :  { %v5823_v0 = vpop.eup %5822 }
0x164d   :  { %v5825_v51 = vpop.eup %5824  ;;  %v1682_v56 = vmul.f32 0.6931472, %v5823_v0 }
0x164e   :  { %v1686_v60 = vadd.f32 1.0, %v5825_v51 }
0x164f   :  { %v7289_v21 = vsel %vm1676_vm14, %v7278_v46, %v1682_v56 }
0x1650   :  { %1826 = vperm.xlu1 %5711, %v7289_v21   ;;  %v1687_v17 = vmul.f32 0.5, %v1686_v60 }
0x1652   :  { %v1860_v36 = vsub.f32 1.0, %v1687_v17 }
0x1658   :  { %5714 = vset.pattern.permute.xlu1 %v9022_v53 }
0x165a   :  { %1863 = vperm.xlu0 %5713, %v1860_v36  }
0x1662   :  { %5716 = vset.pattern.permute.xlu0 %v9024_v10 }
0x16b1   :  { %v1809_v52 = vpop.xlane.xlu0 %1808 }
0x16b2   :  { %v1811_v63 = vmax.f32 %v1809_v52, 1e-16 }
0x16b4   :  { %v1812_v24 = vmul.f32 %v1811_v63, %v1810_v33 }
0x16b6   :  { %5826 = vrsqrt.f32 %v1812_v24  ;;  %vm1819_vm7 = vweird.f32 %v1812_v24 }
0x16bc   :  { %v5827_v0 = vpop.eup %5826 }
0x16bd   :  { %v1814_v51 = vmul.f32 %v5827_v0, %v1812_v24  ;;  %vm1820_vm15 = vweird.f32 %v5827_v0  ;;  %v1690_v24 = vpop.xlane.xlu0 %1689 }
0x16be   :  { %v1761_v40 = vpop.f32.mrf.mxu3  ;;  %vm1821_vm12 = vmor %vm1819_vm7, %vm1820_vm15 }
0x16bf   :  { %v1764_v13 = vmul.f32 %v1761_v40, %v1738_v50  ;;  %v1815_v56 = vmul.f32 %v5827_v0, %v1814_v51 }
0x16c1   :  { %1781 = vmatmul.f32.vlgmr.msrb.gmra.mxu0 %v1764_v13  ;;  %v1816_v60 = vmul.f32 0.5, %v1815_v56 }
0x16c2   :  { %2180 = vmatpush.msrb.mxu0 %v6959_v62  ;;  %v1827_v13 = vpop.permute.xlu1 %1826 }
0x16c3   :  { %v1817_v2 = vsub.f32 1.5, %v1816_v60 }
0x16c5   :  { %v1818_v4 = vmul.f32 %v5827_v0, %v1817_v2 }
0x16c7   :  { %v1822_v50 = vsel %vm1821_vm12, %v5827_v0, %v1818_v4  ;;  %v1691_v4 = vsub.f32 %v7278_v46, %v1690_v24 }
0x16c9   :  { %v1692_v0 = vmul.f32 1.442695, %v1691_v4 }
0x16cc   :  { %v1864_v46 = vpop.permute.xlu0 %1863 }
0x16cd   :  { %v1866_v24 = vmul.f32 %v1864_v46, %v7014_v12 }
0x173e   :  { %v1782_v36 = vpop.f32.mrf.mxu0 }
0x173f   :  { %v1823_v40 = vmul.f32 %v1822_v50, %v1782_v36 }
0x1741   :  { %v1829_v62 = vmul.f32 %v1827_v13, %v1823_v40 }
0x1743   :  { %v1830_v10 = vsel %vm521_vm10, %v1829_v62, -inf }
0x1744   :  { %1831 = vmax.xlane.f32.xlu2 %v1830_v10 }
0x175c   :  { %1856 = vperm.xlu2 %5712, %v1687_v17  }
0x1764   :  { %5721 = vset.pattern.permute.xlu2 %v9022_v53 }
0x17b7   :  { %v1832_v52 = vpop.xlane.xlu2 %1831 }
0x17b8   :  { %v1833_v37 = vsub.f32 %v1829_v62, %v1832_v52 }
0x17ba   :  { %v1834_v63 = vmul.f32 1.442695, %v1833_v37 }
0x17bc   :  { %5828 = vpow2.f32 %v1834_v63 }
0x17bd   :  { %5830 = vpow2.f32 %v1692_v0 }
0x17c2   :  { %v5829_v33 = vpop.eup %5828 }
0x17c3   :  { %v1836_v2 = vsel %vm521_vm10, %v5829_v33, 0.0  ;;  %v5831_v51 = vpop.eup %5830 }
0x17c4   :  { %1837 = vadd.xlane.f32.xlu1 %v1836_v2  ;;  %v1857_v2 = vpop.permute.xlu2 %1856 }
0x17dd   :  { %1695 = vrot.lane.b32.xlu1 %v5831_v51, %s9036_s23 }
0x1837   :  { %v1838_v10 = vpop.xlane.xlu1 %1837 }
0x1838   :  { %5832 = vrcp.f32 %v1838_v10  ;;  %v1850_v36 = vand.u32 2147483648, %v1838_v10  ;;  %v1848_v40 = vand.u32 2147483647, %v1838_v10  ;;  %vm1844_vm14 = vweird.f32 %v1838_v10 }
0x183a   :  { %v1851_v62 = vor.u32 1.1754944e-38, %v1850_v36  ;;  %vm1849_vm7 = vcmp.eq.f32.partialorder %v1848_v40, 8.507059e+37 }
0x183e   :  { %v5833_v17 = vpop.eup %5832 }
0x183f   :  { %v1840_v56 = vmul.f32 %v5833_v17, %v1838_v10  ;;  %vm1845_vm13 = vweird.f32 %v5833_v17  ;;  %v2034_v10 = vmul.f32 0.5, %v7137_v1 }
0x1840   :  { %vm1846_vm15 = vmor %vm1844_vm14, %vm1845_vm13 }
0x1841   :  { %v1841_v60 = vsub.f32 1.0, %v1840_v56  ;;  %5834 = vtanh.f32 %v2034_v10 }
0x1843   :  { %v1842_v50 = vmul.f32 %v5833_v17, %v1841_v60 }
0x1845   :  { %v1843_v13 = vadd.f32 %v5833_v17, %v1842_v50 }
0x1847   :  { %v1847_v52 = vsel %vm1846_vm15, %v5833_v17, %v1843_v13  ;;  %v5835_v60 = vpop.eup %5834 }
0x1848   :  { %v1852_v37 = vsel %vm1849_vm7, %v1851_v62, %v1847_v52  ;;  %v2036_v17 = vadd.f32 1.0, %v5835_v60 }
0x1849   :  { %v1853_v63 = vmul.f32 %v5829_v33, %v1852_v37 }
0x184a   :  { %v2037_v36 = vmul.f32 0.5, %v2036_v17 }
0x184b   :  { %v1859_v4 = vmul.f32 %v1857_v2, %v1853_v63 }
0x184d   :  { %v1867_v0 = vadd.f32 %v1866_v24, %v1859_v4  ;;  %v1716_v24 = vadd.f32 1.0, %v7289_v21 }
0x184f   :  { %v1696_v53 = vpop.permute.xlu1 %1695  ;;  %5548 = vmatmul.msk.f32.vlgmr.msra.gmra.mxu2 %vm560_vm5, %v1867_v0 }
0x1850   :  { %v1698_v56 = vsel %vm384_vm11, %v1696_v53, 0.0 }
0x1851   :  { %1699 = vadd.xlane.f32.xlu2 %v1698_v56 }
0x1869   :  { %2062 = vrot.lane.b32.xlu2 %v2037_v36, %s9029_s22 }
0x18c4   :  { %v1700_v33 = vpop.xlane.xlu2 %1699 }
0x18c5   :  { %5836 = vrcp.f32 %v1700_v33  ;;  %v1712_v13 = vand.u32 2147483648, %v1700_v33  ;;  %v1710_v52 = vand.u32 2147483647, %v1700_v33  ;;  %vm1706_vm13 = vweird.f32 %v1700_v33 }
0x18c7   :  { %v1713_v46 = vor.u32 1.1754944e-38, %v1712_v13  ;;  %vm1711_vm15 = vcmp.eq.f32.partialorder %v1710_v52, 8.507059e+37 }
0x18cb   :  { %v5837_v50 = vpop.eup %5836 }
0x18cc   :  { %v1702_v12 = vmul.f32 %v5837_v50, %v1700_v33  ;;  %vm1707_vm12 = vweird.f32 %v5837_v50 }
0x18cd   :  { %vm1708_vm14 = vmor %vm1706_vm13, %vm1707_vm12 }
0x18ce   :  { %v1703_v40 = vsub.f32 1.0, %v1702_v12 }
0x18d0   :  { %v1704_v62 = vmul.f32 %v5837_v50, %v1703_v40 }
0x18d2   :  { %v1705_v53 = vadd.f32 %v5837_v50, %v1704_v62  ;;  %v1888_v4 = vpop.f32.mrf.mxu2 }
0x18d4   :  { %v1709_v37 = vsel %vm1708_vm14, %v5837_v50, %v1705_v53 }
0x18d5   :  { %v1714_v63 = vsel %vm1711_vm15, %v1713_v46, %v1709_v37 }
0x18d6   :  { %v1715_v2 = vmul.f32 %v5831_v51, %v1714_v63 }
0x18d8   :  { %1893 = vperm.xlu0 %5716, %v1715_v2   ;;  %1898 = vperm.xlu1 %5714, %v1715_v2  }
0x18e0   :  { %5717 = vset.pattern.permute.xlu0 %v9026_v39  ;;  %5715 = vset.pattern.permute.xlu1 %v9021_v58 }
0x18e1   :  { %1922 = vperm.xlu0 %5717, %v1716_v24   ;;  %1908 = vperm.xlu1 %5715, %v1715_v2  }
0x18e9   :  { %2089 = vrot.lane.b32.xlu0 %v7137_v1, %s9037_s24  ;;  %5720 = vset.pattern.permute.xlu1 %v9025_v14 }
0x18ea   :  { %5718 = vset.pattern.permute.xlu0 %v9023_v47 }
0x18f1   :  { %2185 = vrot.lane.b32.xlu0 %v7010_v61, %s6265_s30  ;;  %s6266_s30 = smov 88  }
0x194a   :  { %v1894_v0 = vpop.permute.xlu0 %1893  ;;  %v1899_v51 = vpop.permute.xlu1 %1898 }
0x194b   :  { %v1901_v56 = vmul.f32 %v1899_v51, %v1888_v4  ;;  %v1896_v36 = vmul.f32 %v1894_v0, %v1888_v4 }
0x194d   :  { %1903 = vrot.lane.b32.xlu1 %v1901_v56, %s9027_s27 }
0x1953   :  { %v1923_v21 = vpop.permute.xlu0 %1922  ;;  %v1909_v10 = vpop.permute.xlu1 %1908 }
0x1954   :  { %v1911_v60 = vmul.f32 %v1909_v10, %v1888_v4 }
0x1956   :  { %1913 = vrot.lane.b32.xlu1 %v1911_v60, %s9028_s2  ;;  %v7329_v60 = vld [vmem:[%s8945_s16] sm:$0x3] }
0x195b   :  { %v2090_v17 = vpop.permute.xlu0 %2089 }
0x195c   :  { %5556 = vmatmul.msk.f32.vlgmr.msra.gmra.mxu0 %vm186_vm0, %v2090_v17  ;;  %v7336_v17 = vld [vmem:[%s8946_s17] sm:$0x3] }
0x195d   :  { %2270 = vmatpush.msra.mxu0 %v6983_v19 }
0x195f   :  { %2271 = vmatpush.msra.mxu0 %v6989_v31 }
0x1961   :  { %2272 = vmatpush.msra.mxu0 %v6995_v57 }
0x1963   :  { %2273 = vmatpush.msra.mxu0 %v7001_v22 }
0x19bf   :  { %v1904_v1 = vpop.permute.xlu1 %1903 }
0x19c0   :  { %v1906_v33 = vadd.f32 %v1904_v1, %v1896_v36  ;;  %v7343_v1 = vld [vmem:[%s8941_s12 + $0x8] sm:$0xff]  ;;  %v7349_v36 = vld [vmem:[%s8942_s13 + $0x78] sm:$0xff] }
0x19c8   :  { %v1914_v50 = vpop.permute.xlu1 %1913 }
0x19c9   :  { %v1916_v12 = vadd.f32 %v1914_v50, %v1906_v33  ;;  %v7355_v33 = vld [vmem:[%s8941_s12] sm:$0xff]  ;;  %v7361_v50 = vld [vmem:[%s8942_s13 + $0x70] sm:$0xff] }
0x19cb   :  { %v1917_v40 = vmax.f32 %v1916_v12, 1e-30  ;;  %v7368_v12 = vld [vmem:[%s8942_s13 + $0x68] sm:$0xff] }
0x19cd   :  { %5838 = vlog2.f32 %v1917_v40  ;;  %v7375_v40 = vld [vmem:[%s8942_s13 + $0x60] sm:$0xff] }
0x19d3   :  { %v5839_v13 = vpop.eup %5838 }
0x19d4   :  { %v1919_v62 = vmul.f32 0.6931472, %v5839_v13  ;;  %v7381_v13 = vld [vmem:[%s8942_s13 + $0x58] sm:$0xff] }
0x19d6   :  { %v1925_v52 = vmul.f32 %v1923_v21, %v1919_v62  ;;  %v7387_v62 = vld [vmem:[%s8942_s13 + $0x50] sm:$0xff] }
0x19d8   :  { %v1926_v53 = vmul.f32 1.442695, %v1925_v52  ;;  %v7393_v52 = vld [vmem:[%s8942_s13 + $0x48] sm:$0xff] }
0x19da   :  { %5840 = vpow2.f32 %v1926_v53  ;;  %v7399_v53 = vld [vmem:[%s8942_s13 + $0x40] sm:$0xff] }
0x19e0   :  { %v5841_v46 = vpop.eup %5840 }
0x19e1   :  { %v1928_v19 = vsel %vm521_vm10, %v5841_v46, 0.0 }
0x19e2   :  { %1929 = vadd.xlane.f32.xlu1 %v1928_v19  ;;  %v7411_v19 = vld [vmem:[%s8942_s13 + $0x30] sm:$0xff] }
0x1a55   :  { %v1930_v31 = vpop.xlane.xlu1 %1929 }
0x1a56   :  { %v1931_v57 = vadd.f32 1e-16, %v1930_v31  ;;  %v7417_v31 = vld [vmem:[%s8942_s13 + $0x28] sm:$0xff] }
0x1a58   :  { %5842 = vrcp.f32 %v1931_v57  ;;  %v1943_v2 = vand.u32 2147483648, %v1931_v57  ;;  %v1941_v4 = vand.u32 2147483647, %v1931_v57  ;;  %vm1937_vm12 = vweird.f32 %v1931_v57 }
0x1a5a   :  { %v1944_v51 = vor.u32 1.1754944e-38, %v1943_v2  ;;  %vm1942_vm14 = vcmp.eq.f32.partialorder %v1941_v4, 8.507059e+37  ;;  %v7447_v2 = vld [vmem:[%s8942_s13] sm:$0xff] }
0x1a5b   :  { %9038 = vst [vmem:[#allocation9_spill] sm:$0xff] %v7447_v2 }
0x1a5e   :  { %v5843_v22 = vpop.eup %5842 }
0x1a5f   :  { %v1933_v37 = vmul.f32 %v5843_v22, %v1931_v57  ;;  %vm1938_vm7 = vweird.f32 %v5843_v22  ;;  %v7423_v57 = vld [vmem:[%s8942_s13 + $0x20] sm:$0xff] }
0x1a60   :  { %vm1939_vm13 = vmor %vm1937_vm12, %vm1938_vm7 }
0x1a61   :  { %v1934_v63 = vsub.f32 1.0, %v1933_v37  ;;  %v7435_v37 = vld [vmem:[%s8942_s13 + $0x10] sm:$0xff] }
0x1a63   :  { %v1935_v24 = vmul.f32 %v5843_v22, %v1934_v63  ;;  %v7441_v63 = vld [vmem:[%s8942_s13 + $0x8] sm:$0xff] }
0x1a65   :  { %v1936_v0 = vadd.f32 %v5843_v22, %v1935_v24 }
0x1a67   :  { %v1940_v56 = vsel %vm1939_vm13, %v5843_v22, %v1936_v0  ;;  %v7429_v22 = vld [vmem:[%s8942_s13 + $0x18] sm:$0xff] }
0x1a68   :  { %v1945_v21 = vsel %vm1942_vm14, %v1944_v51, %v1940_v56  ;;  %v7456_v0 = vld [vmem:[%s8936_s7 + $0x18] sm:$0xff]  ;;  %v7462_v51 = vld [vmem:[%s8936_s7 + $0x10] sm:$0xff]  ;;  %v7468_v56 = vld [vmem:[%s8936_s7 + $0x8] sm:$0xff] }
0x1a69   :  { %v7320_v10 = vmul.f32 %v5841_v46, %v1945_v21  ;;  %v7405_v46 = vld [vmem:[%s8942_s13 + $0x38] sm:$0xff]  ;;  %9039 = vst [vmem:[#allocation12_spill] sm:$0xff] %v7456_v0  ;;  %v2063_v21 = vpop.permute.xlu2 %2062 }
0x1a6a   :  { %9040 = vst [vmem:[#allocation13_spill] sm:$0xff] %v7462_v51 }
0x1a6b   :  { %5549 = vmatpush.msk.msrb.mxu3 %vm644_vm8, %v7320_v10  ;;  %5551 = vmatpush.msk.msrb.mxu2 %vm644_vm8, %v7320_v10  ;;  %9041 = vst [vmem:[#allocation14_spill] sm:$0xff] %v7468_v56 }
0x1a6c   :  { %5550 = vmatmul.msk.f32.vlgmr.msrb.gmra.mxu3 %vm640_vm9, %v7329_v60  ;;  %5552 = vmatmul.msk.f32.vlgmr.msrb.gmra.mxu2 %vm640_vm9, %v7336_v17 }
0x1a6d   :  { %2007 = vmatpush.msra.mxu3 %v7343_v1  ;;  %2014 = vmatpush.msra.mxu2 %v7349_v36 }
0x1a6f   :  { %2008 = vmatpush.msra.mxu3 %v7355_v33  ;;  %2015 = vmatpush.msra.mxu2 %v7361_v50 }
0x1a71   :  { %2055 = vmatpush.msrb.mxu3 %v7343_v1  ;;  %2016 = vmatpush.msra.mxu2 %v7368_v12 }
0x1a73   :  { %2056 = vmatpush.msrb.mxu3 %v7355_v33  ;;  %2017 = vmatpush.msra.mxu2 %v7375_v40 }
0x1a75   :  { %2018 = vmatpush.msra.mxu2 %v7381_v13 }
0x1a77   :  { %2019 = vmatpush.msra.mxu2 %v7387_v62 }
0x1a79   :  { %2020 = vmatpush.msra.mxu2 %v7393_v52 }
0x1a7b   :  { %2021 = vmatpush.msra.mxu2 %v7399_v53 }
0x1a7d   :  { %2022 = vmatpush.msra.mxu2 %v7405_v46 }
0x1a7f   :  { %2023 = vmatpush.msra.mxu2 %v7411_v19 }
0x1a81   :  { %2024 = vmatpush.msra.mxu2 %v7417_v31 }
0x1a83   :  { %2025 = vmatpush.msra.mxu2 %v7423_v57 }
0x1a85   :  { %2026 = vmatpush.msra.mxu2 %v7429_v22 }
0x1a87   :  { %2027 = vmatpush.msra.mxu2 %v7435_v37 }
0x1a89   :  { %2028 = vmatpush.msra.mxu2 %v7441_v63 }
0x1a8b   :  { %2029 = vmatpush.msra.mxu2 %v7447_v2 }
0x1aef   :  { %v1967_v24 = vpop.f32.mrf.mxu3  ;;  %v1987_v4 = vpop.f32.mrf.mxu2 }
0x1af0   :  { %5553 = vmatmul.msk.f32.vlgmr.msra.gmra.mxu3 %vm560_vm5, %v1967_v24  ;;  %v7474_v24 = vld [vmem:[%s8936_s7] sm:$0xff] }
0x1af1   :  { %2081 = vmatpush.msra.mxu3 %v7048_v25  ;;  %9042 = vst [vmem:[#allocation15_spill] sm:$0xff] %v7474_v24 }
0x1af8   :  { %5554 = vmatmul.msk.f32.vlgmr.msrb.gmra.mxu3 %vm560_vm5, %v1987_v4 }
0x1af9   :  { %2150 = vmatpush.msrb.mxu3 %v7456_v0 }
0x1afb   :  { %2151 = vmatpush.msrb.mxu3 %v7462_v51 }
0x1afd   :  { %2152 = vmatpush.msrb.mxu3 %v7468_v56 }
0x1aff   :  { %2153 = vmatpush.msrb.mxu3 %v7474_v24 }
0x1b00   :  { %5555 = vmatmul.msk.f32.vlgmr.msra.gmra.mxu3 %vm186_vm0, %v2063_v21 }
0x1b01   :  { %2221 = vmatpush.msra.mxu3 %v7060_v32 }
0x1b03   :  { %2222 = vmatpush.msra.mxu3 %v7066_v16 }
0x1b05   :  { %2223 = vmatpush.msra.mxu3 %v7072_v27  ;;  %v2110_v27 = vpop.f32.mrf.mxu0 }
0x1b07   :  { %2224 = vmatpush.msra.mxu3 %v7078_v28 }
0x1b08   :  { %5558 = vmatmul.msk.f32.vlgmr.msrb.gmra.mxu3 %vm234_vm3, %v7127_v11 }
0x1b10   :  { %5561 = vmatmul.msk.f32.vlgmr.msra.gmra.mxu3 %vm234_vm3, %v7127_v11 }
0x1b73   :  { %v2010_v4 = vpop.f32.mrf.mxu3 }
0x1b74   :  { %v2013_v21 = vmul.f32 %v2010_v4, %v7087_v6 }
0x1b76   :  { %2030 = vmatmul.f32.vlgmr.msra.gmra.mxu2 %v2013_v21 }
0x1b7b   :  { %v2058_v32 = vpop.f32.mrf.mxu3 }
0x1b7c   :  { %v2113_v51 = vmul.f32 %v2110_v27, %v2058_v32 }
0x1b83   :  { %v2083_v24 = vpop.f32.mrf.mxu3 }
0x1b84   :  { %v2086_v16 = vmul.f32 %v2083_v24, %v2058_v32 }
0x1b86   :  { %v2087_v56 = vsub.f32 1.0, %v2086_v16 }
0x1b88   :  { %v2088_v28 = vmul.f32 %v2087_v56, %v7087_v6  ;;  %v2186_v6 = vpop.permute.xlu0 %2185 }
0x1b8a   :  { %v7489_v0 = vadd.f32 %v2113_v51, %v2088_v28 }
0x1b8b   :  { %v7501_v11 = vpop.f32.mrf.mxu3 }
0x1b8c   :  { %v2367_v2 = vadd.f32 1e-16, %v7489_v0  ;;  %9043 = vst [vmem:[#allocation16_spill] sm:$0xff] %v7501_v11 }
0x1b8e   :  { %5567 = vmatpush.msk.msrb.mxu3 %vm134_vm1, %v2367_v2 }
0x1b8f   :  { %5568 = vmatmul.msk.f32.vlgmr.msrb.gmra.mxu3 %vm130_vm2, %v9032_v8 }
0x1b90   :  { %2535 = vmatpush.msra.mxu3 %v7096_v9 }
0x1b92   :  { %2536 = vmatpush.msra.mxu3 %v7102_v41 }
0x1b93   :  { %v2226_v9 = vpop.f32.mrf.mxu3 }
0x1bf9   :  { %v2031_v61 = vpop.f32.mrf.mxu2 }
0x1bfa   :  { %5557 = vmatmul.msk.f32.vlgmr.msrb.gmra.mxu1 %vm186_vm0, %v2031_v61  ;;  %5559 = vmatmul.msk.f32.vlgmr.msrb.gmra.mxu0 %vm186_vm0, %v2031_v61 }
0x1bfb   :  { %2409 = vmatpush.msrb.mxu0 %v7048_v25 }
0x1c02   :  { %5560 = vmatmul.msk.f32.vlgmr.msra.gmra.mxu1 %vm186_vm0, %v2186_v6 }
0x1c77   :  { %v7503_v2 = vpop.f32.mrf.mxu1  ;;  %v2182_v51 = vpop.f32.mrf.mxu0 }
0x1c78   :  { %9044 = vst [vmem:[#allocation17_spill] sm:$0xff] %v7503_v2 }
0x1c7f   :  { %v2206_v56 = vpop.f32.mrf.mxu1 }
0x1c80   :  { %v2207_v24 = vadd.f32 %v2206_v56, %v2182_v51 }
0x1c82   :  { %v2229_v4 = vadd.f32 %v2226_v9, %v2207_v24 }
0x1c84   :  { %v2230_v41 = vadd.f32 %v7116_v55, %v2229_v4 }
0x1c86   :  { %5844 = vtanh.f32 %v2230_v41  ;;  %v2231_v32 = vmul.f32 0.5, %v2230_v41 }
0x1c88   :  { %5846 = vtanh.f32 %v2231_v32 }
0x1c8c   :  { %v5845_v21 = vpop.eup %5844 }
0x1c8d   :  { %2238 = vrot.lane.b32.xlu2 %v5845_v21, %s9045_s0 }
0x1c8e   :  { %v5847_v16 = vpop.eup %5846 }
0x1c8f   :  { %v2233_v27 = vadd.f32 1.0, %v5847_v16 }
0x1c91   :  { %v2234_v28 = vmul.f32 0.5, %v2233_v27 }
0x1c93   :  { %v2236_v11 = vmul.f32 %v2234_v28, %v7122_v23 }
0x1ce7   :  { %v2239_v61 = vpop.permute.xlu2 %2238 }
0x1ce8   :  { %v2241_v6 = vmul.f32 %v2239_v61, %v2234_v28 }
0x1cea   :  { %2243 = vrot.lane.b32.xlu0 %v2241_v6, %s9035_s3  ;;  %v7584_v6 = vld [vmem:[%s9013_s28 + $0x8] sm:$0xff] }
0x1d5c   :  { %v2244_v51 = vpop.permute.xlu0 %2243 }
0x1d5d   :  { %v7509_v56 = vadd.f32 %v2244_v51, %v2236_v11 }
0x1d5f   :  { %5848 = vtanh.f32 %v7509_v56 }
0x1d65   :  { %v5849_v55 = vpop.eup %5848 }
0x1d66   :  { %2249 = vrot.lane.b32.xlu2 %v5849_v55, %s9045_s0 }
0x1dc0   :  { %v2250_v24 = vpop.permute.xlu2 %2249 }
0x1dc1   :  { %v2252_v9 = vmul.f32 %v2250_v24, %v2234_v28 }
0x1dc3   :  { %2254 = vrot.lane.b32.xlu0 %v2252_v9, %s9035_s3 }
0x1e35   :  { %v7514_v4 = vpop.permute.xlu0 %2254 }
0x1e36   :  { %5562 = vmatmul.msk.f32.vlgmr.msra.gmra.mxu0 %vm234_vm3, %v7514_v4 }
0x1eb3   :  { %v2275_v41 = vpop.f32.mrf.mxu0 }
0x1eb4   :  { %v7519_v23 = vadd.f32 %v7134_v34, %v2275_v41  ;;  %v7546_v34 = vld [vmem:[%s8936_s7 + $0x20] sm:$0xff] }
0x1eb6   :  { %2279 = vrot.lane.b32.xlu2 %v7519_v23, %s9020_s26  ;;  %5565 = vmatpush.msk.msrb.mxu2 %vm134_vm1, %v7519_v23 }
0x1eb7   :  { %5566 = vmatmul.msk.f32.vlgmr.msrb.gmra.mxu2 %vm130_vm2, %v7146_v26  ;;  %v2388_v26 = vpop.f32.mrf.mxu3 }
0x1eb8   :  { %2436 = vmatpush.msra.mxu2 %v7153_v43  ;;  %v2435_v11 = vmul.f32 %v2388_v26, %v2388_v26 }
0x1eba   :  { %2437 = vmatpush.msra.mxu2 %v7159_v29 }
0x1ebc   :  { %2438 = vmatpush.msra.mxu2 %v7165_v30 }
0x1ebe   :  { %2439 = vmatpush.msra.mxu2 %v7171_v38 }
0x1ec0   :  { %2440 = vmatpush.msra.mxu2 %v7177_v3 }
0x1ec2   :  { %2441 = vmatpush.msra.mxu2 %v7183_v35 }
0x1ec4   :  { %2442 = vmatpush.msra.mxu2 %v7189_v45 }
0x1ec6   :  { %2443 = vmatpush.msra.mxu2 %v7195_v5 }
0x1ec8   :  { %2444 = vmatpush.msra.mxu2 %v7201_v15 }
0x1eca   :  { %2445 = vmatpush.msra.mxu2 %v7207_v18 }
0x1ecc   :  { %2446 = vmatpush.msra.mxu2 %v7213_v20 }
0x1ece   :  { %2447 = vmatpush.msra.mxu2 %v7219_v7 }
0x1ed0   :  { %2448 = vmatpush.msra.mxu2 %v7225_v44 }
0x1ed2   :  { %2449 = vmatpush.msra.mxu2 %v7231_v42 }
0x1ed4   :  { %2450 = vmatpush.msra.mxu2 %v7237_v48 }
0x1ed6   :  { %2451 = vmatpush.msra.mxu2 %v7243_v49 }
0x1ed7   :  { %2452 = vmatmul.f32.vlgmr.msra.gmra.mxu2 %v2435_v11 }
0x1ed8   :  { %2783 = vmatpush.msrb.mxu2 %v7546_v34 }
0x1eda   :  { %2854 = vmatpush.msra.mxu2 %v7250_v54 }
0x1f10   :  { %v2280_v21 = vpop.permute.xlu2 %2279 }
0x1f11   :  { %5563 = vmatpush.msk.msrb.mxu1 %vm134_vm1, %v2280_v21 }
0x1f12   :  { %5564 = vmatmul.msk.f32.vlgmr.msrb.gmra.mxu1 %vm130_vm2, %v7257_v59 }
0x1f13   :  { %2415 = vmatpush.msra.mxu1 %v7153_v43 }
0x1f15   :  { %2416 = vmatpush.msra.mxu1 %v7159_v29 }
0x1f17   :  { %2417 = vmatpush.msra.mxu1 %v7165_v30 }
0x1f19   :  { %2418 = vmatpush.msra.mxu1 %v7171_v38 }
0x1f1b   :  { %2419 = vmatpush.msra.mxu1 %v7177_v3 }
0x1f1d   :  { %2420 = vmatpush.msra.mxu1 %v7183_v35 }
0x1f1f   :  { %2421 = vmatpush.msra.mxu1 %v7189_v45 }
0x1f21   :  { %2422 = vmatpush.msra.mxu1 %v7195_v5 }
0x1f23   :  { %2423 = vmatpush.msra.mxu1 %v7201_v15 }
0x1f25   :  { %2424 = vmatpush.msra.mxu1 %v7207_v18 }
0x1f27   :  { %2425 = vmatpush.msra.mxu1 %v7213_v20 }
0x1f29   :  { %2426 = vmatpush.msra.mxu1 %v7219_v7 }
0x1f2b   :  { %2427 = vmatpush.msra.mxu1 %v7225_v44 }
0x1f2d   :  { %2428 = vmatpush.msra.mxu1 %v7231_v42 }
0x1f2f   :  { %2429 = vmatpush.msra.mxu1 %v7237_v48 }
0x1f31   :  { %2430 = vmatpush.msra.mxu1 %v7243_v49 }
0x1f33   :  { %2758 = vmatpush.msrb.mxu1 %v7048_v25 }
0x1f3a   :  { %v2322_v43 = vpop.f32.mrf.mxu2 }
0x1f5a   :  { %v2453_v55 = vpop.f32.mrf.mxu2 }
0x1f5b   :  { %v2460_v9 = vmax.f32 %v2453_v55, 1e-16 }
0x1f8f   :  { %v2300_v29 = vpop.f32.mrf.mxu1 }
0x1f90   :  { %v2323_v30 = vadd.f32 %v2322_v43, %v2300_v29 }
0x1f92   :  { %v2325_v38 = vadd.f32 1e-16, %v2323_v30  ;;  %v2327_v3 = vmin.f32 %v2323_v30, 20.0  ;;  %v2338_v20 = vsel %vm373_vm6, %v2323_v30, -inf  ;;  %v2334_v25 = vmul.f32 0.5, %v2323_v30 }
0x1f93   :  { %vm2326_vm15 = vcmp.gt.f32.partialorder %v2323_v30, 20.0 }
0x1f94   :  { %5569 = vmatmul.msk.f32.vlgmr.msrb.gmra.mxu0 %vm186_vm0, %v2325_v38  ;;  %v2456_v35 = vmul.f32 %v2325_v38, %v2325_v38  ;;  %v2328_v45 = vmul.f32 1.442695, %v2327_v3 }
0x1f96   :  { %v2457_v5 = vsel %vm497_vm4, %v2456_v35, 0.0  ;;  %5850 = vpow2.f32 %v2328_v45 }
0x1f97   :  { %2458 = vadd.xlane.f32.xlu1 %v2457_v5 }
0x1f9c   :  { %v5851_v15 = vpop.eup %5850 }
0x1f9d   :  { %v2330_v18 = vadd.f32 1.0, %v5851_v15 }
0x1f9f   :  { %2339 = vmax.xlane.f32.xlu1 %v2338_v20  ;;  %5852 = vlog2.f32 %v2330_v18 }
0x1fa0   :  { %5854 = vtanh.f32 %v2334_v25 }
0x1fa5   :  { %v5853_v7 = vpop.eup %5852 }
0x1fa6   :  { %v2332_v44 = vmul.f32 0.6931472, %v5853_v7  ;;  %v5855_v48 = vpop.eup %5854 }
0x1fa7   :  { %v2336_v49 = vadd.f32 1.0, %v5855_v48 }
0x1fa8   :  { %v7573_v42 = vsel %vm2326_vm15, %v2323_v30, %v2332_v44 }
0x1fa9   :  { %2476 = vperm.xlu0 %5718, %v7573_v42   ;;  %v7576_v54 = vmul.f32 0.5, %v2336_v49 }
0x1fb1   :  { %5719 = vset.pattern.permute.xlu0 %v9025_v14 }
0x1fb2   :  { %2506 = vperm.xlu0 %5719, %v7576_v54  }
0x1fba   :  { %5728 = vset.pattern.permute.xlu0 %v9021_v58 }
0x200a   :  { %v2459_v59 = vpop.xlane.xlu1 %2458 }
0x200b   :  { %v2461_v24 = vmax.f32 %v2459_v59, 1e-16 }
0x200d   :  { %v2462_v41 = vmul.f32 %v2461_v24, %v2460_v9 }
0x200f   :  { %vm2469_vm12 = vweird.f32 %v2462_v41 }
0x2011   :  { %v2411_v32 = vpop.f32.mrf.mxu0 }
0x2012   :  { %v2414_v16 = vmul.f32 %v2411_v32, %v2388_v26  ;;  %v2340_v27 = vpop.xlane.xlu1 %2339 }
0x2013   :  { %v2341_v28 = vsub.f32 %v2323_v30, %v2340_v27 }
0x2014   :  { %2431 = vmatmul.f32.vlgmr.msra.gmra.mxu1 %v2414_v16 }
0x2015   :  { %v2342_v61 = vmul.f32 1.442695, %v2341_v28  ;;  %2830 = vmatpush.msra.mxu1 %v7584_v6 }
0x2017   :  { %5856 = vpow2.f32 %v2342_v61 }
0x2018   :  { %5858 = vrsqrt.f32 %v2462_v41 }
0x201b   :  { %v2477_v21 = vpop.permute.xlu0 %2476 }
0x201d   :  { %v5857_v51 = vpop.eup %5856 }
0x201e   :  { %2345 = vrot.lane.b32.xlu0 %v5857_v51, %s9036_s23  ;;  %v5859_v26 = vpop.eup %5858 }
0x201f   :  { %v2464_v11 = vmul.f32 %v5859_v26, %v2462_v41  ;;  %vm2470_vm7 = vweird.f32 %v5859_v26 }
0x2020   :  { %vm2471_vm13 = vmor %vm2469_vm12, %vm2470_vm7 }
0x2021   :  { %v2465_v43 = vmul.f32 %v5859_v26, %v2464_v11 }
0x2023   :  { %v2466_v29 = vmul.f32 0.5, %v2465_v43 }
0x2024   :  { %v7588_v30 = vpop.permute.xlu0 %2506 }
0x2025   :  { %v2467_v38 = vsub.f32 1.5, %v2466_v29  ;;  %v7599_v29 = vld [vmem:[%s8934_s5 + $0x18] sm:$0xff] }
0x2027   :  { %v2468_v3 = vmul.f32 %v5859_v26, %v2467_v38  ;;  %v7605_v38 = vld [vmem:[%s8934_s5 + $0x10] sm:$0xff] }
0x2029   :  { %v2472_v5 = vsel %vm2471_vm13, %v5859_v26, %v2468_v3  ;;  %v7617_v3 = vld [vmem:[%s8934_s5] sm:$0xff] }
0x2090   :  { %v2346_v35 = vpop.permute.xlu0 %2345 }
0x2091   :  { %v2432_v45 = vpop.f32.mrf.mxu1  ;;  %v2348_v15 = vsel %vm384_vm11, %v2346_v35, 0.0  ;;  %v2510_v35 = vsub.f32 1.0, %v7576_v54 }
0x2092   :  { %v2473_v18 = vmul.f32 %v2472_v5, %v2432_v45  ;;  %2349 = vadd.xlane.f32.xlu0 %v2348_v15  ;;  %v9046_v45 = vmov 10  }
0x2094   :  { %v2479_v20 = vmul.f32 %v2477_v21, %v2473_v18 }
0x2096   :  { %v2480_v25 = vsel %vm521_vm10, %v2479_v20, -inf }
0x2097   :  { %2481 = vmax.xlane.f32.xlu2 %v2480_v25 }
0x20a6   :  { %2739 = vrot.lane.b32.xlu0 %v7519_v23, %s9037_s24 }
0x2105   :  { %v2350_v7 = vpop.xlane.xlu0 %2349 }
0x2106   :  { %5860 = vrcp.f32 %v2350_v7  ;;  %v2362_v27 = vand.u32 2147483648, %v2350_v7  ;;  %v2360_v61 = vand.u32 2147483647, %v2350_v7  ;;  %vm2356_vm15 = vweird.f32 %v2350_v7 }
0x2108   :  { %v2363_v24 = vor.u32 1.1754944e-38, %v2362_v27  ;;  %vm2361_vm12 = vcmp.eq.f32.partialorder %v2360_v61, 8.507059e+37 }
0x210a   :  { %v2482_v44 = vpop.xlane.xlu2 %2481 }
0x210b   :  { %v2483_v48 = vsub.f32 %v2479_v20, %v2482_v44 }
0x210c   :  { %v5861_v49 = vpop.eup %5860 }
0x210d   :  { %v2352_v59 = vmul.f32 %v5861_v49, %v2350_v7  ;;  %v2484_v32 = vmul.f32 1.442695, %v2483_v48  ;;  %vm2357_vm14 = vweird.f32 %v5861_v49 }
0x210e   :  { %vm2358_vm7 = vmor %vm2356_vm15, %vm2357_vm14 }
0x210f   :  { %v2353_v16 = vsub.f32 1.0, %v2352_v59  ;;  %5862 = vpow2.f32 %v2484_v32 }
0x2111   :  { %v2354_v28 = vmul.f32 %v5861_v49, %v2353_v16 }
0x2113   :  { %v2355_v55 = vadd.f32 %v5861_v49, %v2354_v28 }
0x2115   :  { %v5863_v9 = vpop.eup %5862  ;;  %v2359_v41 = vsel %vm2358_vm7, %v5861_v49, %v2355_v55 }
0x2116   :  { %v2486_v26 = vsel %vm521_vm10, %v5863_v9, 0.0  ;;  %v2364_v11 = vsel %vm2361_vm12, %v2363_v24, %v2359_v41 }
0x2117   :  { %2487 = vadd.xlane.f32.xlu1 %v2486_v26  ;;  %v2365_v21 = vmul.f32 %v5857_v51, %v2364_v11  ;;  %v7611_v51 = vld [vmem:[%s8934_s5 + $0x8] sm:$0xff]  ;;  %v2684_v26 = vmul.f32 0.5, %v7519_v23  ;;  %v7637_v23 = vld [vmem:[%s9014_s21] sm:$0x3] }
0x2118   :  { %v2740_v43 = vpop.permute.xlu0 %2739 }
0x2119   :  { %5578 = vmatmul.msk.f32.vlgmr.msrb.gmra.mxu1 %vm186_vm0, %v2740_v43  ;;  %2548 = vperm.xlu2 %5721, %v2365_v21  }
0x211a   :  { %2920 = vmatpush.msrb.mxu1 %v7599_v29 }
0x211c   :  { %2921 = vmatpush.msrb.mxu1 %v7605_v38 }
0x211e   :  { %2922 = vmatpush.msrb.mxu1 %v7611_v51 }
0x2120   :  { %2923 = vmatpush.msrb.mxu1 %v7617_v3 }
0x2121   :  { %5726 = vset.pattern.permute.xlu2 %v9025_v14 }
0x2130   :  { %2513 = vperm.xlu1 %5720, %v2510_v35  }
0x2138   :  { %5722 = vset.pattern.permute.xlu1 %v9021_v58 }
0x2139   :  { %2558 = vperm.xlu1 %5722, %v2365_v21  }
0x2141   :  { %5723 = vset.pattern.permute.xlu1 %v9046_v45 }
0x2142   :  { %2543 = vperm.xlu1 %5723, %v2365_v21  }
0x214a   :  { %5724 = vset.pattern.permute.xlu1 %v9026_v39 }
0x2173   :  { %v2549_v55 = vpop.permute.xlu2 %2548 }
0x218a   :  { %v2488_v5 = vpop.xlane.xlu1 %2487 }
0x218b   :  { %5864 = vrcp.f32 %v2488_v5  ;;  %v2500_v7 = vand.u32 2147483648, %v2488_v5  ;;  %v2498_v44 = vand.u32 2147483647, %v2488_v5  ;;  %vm2494_vm14 = vweird.f32 %v2488_v5 }
0x218c   :  { %5866 = vtanh.f32 %v2684_v26 }
0x218d   :  { %v2501_v54 = vor.u32 1.1754944e-38, %v2500_v7  ;;  %vm2499_vm7 = vcmp.eq.f32.partialorder %v2498_v44, 8.507059e+37 }
0x2191   :  { %v5865_v15 = vpop.eup %5864 }
0x2192   :  { %v2490_v18 = vmul.f32 %v5865_v15, %v2488_v5  ;;  %vm2495_vm13 = vweird.f32 %v5865_v15 }
0x2193   :  { %vm2496_vm15 = vmor %vm2494_vm14, %vm2495_vm13 }
0x2194   :  { %v2491_v20 = vsub.f32 1.0, %v2490_v18 }
0x2196   :  { %v2492_v25 = vmul.f32 %v5865_v15, %v2491_v20 }
0x2198   :  { %v2493_v48 = vadd.f32 %v5865_v15, %v2492_v25 }
0x219a   :  { %v2497_v49 = vsel %vm2496_vm15, %v5865_v15, %v2493_v48 }
0x219b   :  { %v2502_v59 = vsel %vm2499_vm7, %v2501_v54, %v2497_v49 }
0x219c   :  { %v2503_v32 = vmul.f32 %v5863_v9, %v2502_v59  ;;  %v2366_v9 = vadd.f32 1.0, %v7573_v42 }
0x219e   :  { %v2509_v27 = vmul.f32 %v7588_v30, %v2503_v32  ;;  %v5867_v30 = vpop.eup %5866 }
0x21a2   :  { %v2514_v16 = vpop.permute.xlu1 %2513 }
0x21a3   :  { %v2516_v28 = vmul.f32 %v2514_v16, %v7320_v10  ;;  %v2686_v10 = vadd.f32 1.0, %v5867_v30 }
0x21a5   :  { %v2517_v61 = vadd.f32 %v2516_v28, %v2509_v27  ;;  %v2687_v43 = vmul.f32 0.5, %v2686_v10 }
0x21a7   :  { %5570 = vmatmul.msk.f32.vlgmr.msra.gmra.mxu3 %vm560_vm5, %v2517_v61 }
0x21ab   :  { %v2559_v24 = vpop.permute.xlu1 %2558 }
0x21b4   :  { %v2544_v35 = vpop.permute.xlu1 %2543 }
0x222a   :  { %v2538_v41 = vpop.f32.mrf.mxu3 }
0x222b   :  { %v2551_v11 = vmul.f32 %v2549_v55, %v2538_v41  ;;  %v2561_v21 = vmul.f32 %v2559_v24, %v2538_v41  ;;  %v2546_v5 = vmul.f32 %v2544_v35, %v2538_v41 }
0x222d   :  { %2563 = vrot.lane.b32.xlu2 %v2561_v21, %s9028_s2  ;;  %2553 = vrot.lane.b32.xlu1 %v2551_v11, %s9027_s27 }
0x2235   :  { %2572 = vperm.xlu1 %5724, %v2366_v9  }
0x223d   :  { %2712 = vrot.lane.b32.xlu1 %v2687_v43, %s9029_s22  ;;  %v2760_v43 = vpop.f32.mrf.mxu1 }
0x223e   :  { %5725 = vset.pattern.permute.xlu1 %v9023_v47 }
0x2245   :  { %2835 = vrot.lane.b32.xlu1 %v7637_v23, %s9028_s2 }
0x2287   :  { %v2564_v18 = vpop.permute.xlu2 %2563 }
0x229f   :  { %v2554_v15 = vpop.permute.xlu1 %2553 }
0x22a0   :  { %v2556_v42 = vadd.f32 %v2554_v15, %v2546_v5 }
0x22a2   :  { %v2566_v20 = vadd.f32 %v2564_v18, %v2556_v42 }
0x22a4   :  { %v2567_v25 = vmax.f32 %v2566_v20, 1e-30 }
0x22a6   :  { %5868 = vlog2.f32 %v2567_v25 }
0x22a7   :  { %v2573_v48 = vpop.permute.xlu1 %2572 }
0x22ac   :  { %v5869_v7 = vpop.eup %5868 }
0x22ad   :  { %v2569_v44 = vmul.f32 0.6931472, %v5869_v7 }
0x22af   :  { %v2575_v54 = vmul.f32 %v2573_v48, %v2569_v44 }
0x22b1   :  { %v2576_v49 = vmul.f32 1.442695, %v2575_v54 }
0x22b3   :  { %5870 = vpow2.f32 %v2576_v49 }
0x22b9   :  { %v5871_v59 = vpop.eup %5870 }
0x22ba   :  { %v2578_v32 = vsel %vm521_vm10, %v5871_v59, 0.0 }
0x22bb   :  { %2579 = vadd.xlane.f32.xlu2 %v2578_v32  ;;  %v7744_v32 = vld [vmem:[%s9015_s4] ss:$0 sm:$0xff] }
0x232e   :  { %v2580_v16 = vpop.xlane.xlu2 %2579 }
0x232f   :  { %v2581_v27 = vadd.f32 1e-16, %v2580_v16 }
0x2331   :  { %5872 = vrcp.f32 %v2581_v27  ;;  %v2593_v24 = vand.u32 2147483648, %v2581_v27  ;;  %v2591_v26 = vand.u32 2147483647, %v2581_v27  ;;  %vm2587_vm13 = vweird.f32 %v2581_v27 }
0x2333   :  { %v2594_v21 = vor.u32 1.1754944e-38, %v2593_v24  ;;  %vm2592_vm15 = vcmp.eq.f32.partialorder %v2591_v26, 8.507059e+37 }
0x2337   :  { %v5873_v28 = vpop.eup %5872 }
0x2338   :  { %v2583_v61 = vmul.f32 %v5873_v28, %v2581_v27  ;;  %vm2588_vm12 = vweird.f32 %v5873_v28 }
0x2339   :  { %vm2589_vm14 = vmor %vm2587_vm13, %vm2588_vm12 }
0x233a   :  { %v2584_v55 = vsub.f32 1.0, %v2583_v61 }
0x233c   :  { %v2585_v41 = vmul.f32 %v5873_v28, %v2584_v55 }
0x233e   :  { %v2586_v11 = vadd.f32 %v5873_v28, %v2585_v41 }
0x2340   :  { %v2590_v9 = vsel %vm2589_vm14, %v5873_v28, %v2586_v11 }
0x2341   :  { %v2595_v30 = vsel %vm2592_vm15, %v2594_v21, %v2590_v9 }
0x2342   :  { %v7642_v10 = vmul.f32 %v5871_v59, %v2595_v30 }
0x2344   :  { %5571 = vmatpush.msk.msra.mxu0 %vm644_vm8, %v7642_v10  ;;  %5573 = vmatpush.msk.msrb.mxu3 %vm644_vm8, %v7642_v10 }
0x2345   :  { %5572 = vmatmul.msk.f32.vlgmr.msra.gmra.mxu0 %vm640_vm9, %v7329_v60  ;;  %5574 = vmatmul.msk.f32.vlgmr.msrb.gmra.mxu3 %vm640_vm9, %v7336_v17  ;;  %v9047_v60 = vld [vmem:[#allocation9_spill] sm:$0xff] }
0x2346   :  { %2657 = vmatpush.msrb.mxu0 %v7343_v1  ;;  %2664 = vmatpush.msra.mxu3 %v7349_v36 }
0x2348   :  { %2658 = vmatpush.msrb.mxu0 %v7355_v33  ;;  %2665 = vmatpush.msra.mxu3 %v7361_v50  ;;  %v9049_v50 = vld [vmem:[#allocation13_spill] sm:$0xff] }
0x234a   :  { %2705 = vmatpush.msra.mxu0 %v7343_v1  ;;  %2666 = vmatpush.msra.mxu3 %v7368_v12  ;;  %v7676_v1 = vld [vmem:[%s8939_s10] sm:$0xff]  ;;  %v9050_v12 = vld [vmem:[#allocation14_spill] sm:$0xff] }
0x234c   :  { %2706 = vmatpush.msra.mxu0 %v7355_v33  ;;  %2667 = vmatpush.msra.mxu3 %v7375_v40  ;;  %v9048_v33 = vld [vmem:[#allocation12_spill] sm:$0xff]  ;;  %v2713_v40 = vpop.permute.xlu1 %2712 }
0x234e   :  { %2668 = vmatpush.msra.mxu3 %v7381_v13  ;;  %v9051_v13 = vld [vmem:[#allocation15_spill] sm:$0xff] }
0x2350   :  { %2669 = vmatpush.msra.mxu3 %v7387_v62  ;;  %v7688_v62 = vld [vmem:[%s9013_s28 + $0x28] sm:$0xff] }
0x2352   :  { %2670 = vmatpush.msra.mxu3 %v7393_v52  ;;  %v7694_v52 = vld [vmem:[%s9013_s28 + $0x20] sm:$0xff] }
0x2354   :  { %2671 = vmatpush.msra.mxu3 %v7399_v53  ;;  %v7700_v53 = vld [vmem:[%s9013_s28 + $0x18] sm:$0xff]  ;;  %v2836_v20 = vpop.permute.xlu1 %2835 }
0x2356   :  { %2672 = vmatpush.msra.mxu3 %v7405_v46  ;;  %v7706_v46 = vld [vmem:[%s9013_s28 + $0x10] sm:$0xff] }
0x2358   :  { %2673 = vmatpush.msra.mxu3 %v7411_v19 }
0x235a   :  { %2674 = vmatpush.msra.mxu3 %v7417_v31 }
0x235c   :  { %2675 = vmatpush.msra.mxu3 %v7423_v57 }
0x235e   :  { %2676 = vmatpush.msra.mxu3 %v7429_v22 }
0x2360   :  { %2677 = vmatpush.msra.mxu3 %v7435_v37 }
0x2362   :  { %2678 = vmatpush.msra.mxu3 %v7441_v63 }
0x2364   :  { %2679 = vmatpush.msra.mxu3 %v9047_v60 }
0x23c2   :  { %v2617_v17 = vpop.f32.mrf.mxu0 }
0x23c3   :  { %5575 = vmatmul.msk.f32.vlgmr.msrb.gmra.mxu0 %vm560_vm5, %v2617_v17 }
0x23c4   :  { %2731 = vmatpush.msrb.mxu0 %v7676_v1 }
0x23c8   :  { %v2637_v36 = vpop.f32.mrf.mxu3 }
0x23cb   :  { %5576 = vmatmul.msk.f32.vlgmr.msra.gmra.mxu0 %vm560_vm5, %v2637_v36 }
0x23cc   :  { %2800 = vmatpush.msra.mxu0 %v9048_v33 }
0x23ce   :  { %2801 = vmatpush.msra.mxu0 %v9049_v50 }
0x23d0   :  { %2802 = vmatpush.msra.mxu0 %v9050_v12  ;;  %v7774_v12 = vld [vmem:[%s8943_s14] sm:$0xf] }
0x23d2   :  { %2803 = vmatpush.msra.mxu0 %v9051_v13  ;;  %v7787_v13 = vld [vmem:[%s8940_s11 + $0x70] sm:$0xff] }
0x23d3   :  { %5577 = vmatmul.msk.f32.vlgmr.msrb.gmra.mxu0 %vm186_vm0, %v2713_v40  ;;  %v7781_v40 = vld [vmem:[%s8940_s11 + $0x78] sm:$0xff] }
0x23d4   :  { %2871 = vmatpush.msrb.mxu0 %v7688_v62 }
0x23d6   :  { %2872 = vmatpush.msrb.mxu0 %v7694_v52 }
0x23d8   :  { %2873 = vmatpush.msrb.mxu0 %v7700_v53 }
0x23da   :  { %2874 = vmatpush.msrb.mxu0 %v7706_v46 }
0x23db   :  { %5580 = vmatmul.msk.f32.vlgmr.msra.gmra.mxu0 %vm234_vm3, %v7514_v4 }
0x23e3   :  { %5583 = vmatmul.msk.f32.vlgmr.msrb.gmra.mxu0 %vm234_vm3, %v7514_v4  ;;  %v7724_v4 = vld [vmem:[%s8938_s9 + $0x8] sm:$0xff] }
0x2440   :  { %v2660_v19 = vpop.f32.mrf.mxu0 }
0x2441   :  { %v2663_v31 = vmul.f32 %v2660_v19, %v7489_v0  ;;  %v7793_v19 = vld [vmem:[%s8940_s11 + $0x68] sm:$0xff] }
0x2443   :  { %2680 = vmatmul.f32.vlgmr.msra.gmra.mxu3 %v2663_v31  ;;  %v7799_v31 = vld [vmem:[%s8940_s11 + $0x60] sm:$0xff] }
0x2448   :  { %v2708_v57 = vpop.f32.mrf.mxu0 }
0x2449   :  { %v2763_v35 = vmul.f32 %v2760_v43, %v2708_v57  ;;  %v7829_v43 = vld [vmem:[%s8940_s11 + $0x38] sm:$0xff] }
0x2450   :  { %v2733_v22 = vpop.f32.mrf.mxu0 }
0x2451   :  { %v2736_v37 = vmul.f32 %v2733_v22, %v2708_v57  ;;  %v7805_v57 = vld [vmem:[%s8940_s11 + $0x58] sm:$0xff]  ;;  %v7811_v22 = vld [vmem:[%s8940_s11 + $0x50] sm:$0xff] }
0x2453   :  { %v2737_v63 = vsub.f32 1.0, %v2736_v37  ;;  %v7817_v37 = vld [vmem:[%s8940_s11 + $0x48] sm:$0xff] }
0x2455   :  { %v2738_v5 = vmul.f32 %v2737_v63, %v7489_v0  ;;  %v7730_v0 = vld [vmem:[%s8938_s9] sm:$0xff] }
0x2456   :  { %v7823_v63 = vld [vmem:[%s8940_s11 + $0x40] sm:$0xff] }
0x2457   :  { %v7715_v15 = vadd.f32 %v2763_v35, %v2738_v5  ;;  %v7835_v35 = vld [vmem:[%s8940_s11 + $0x30] sm:$0xff]  ;;  %v7841_v5 = vld [vmem:[%s8940_s11 + $0x28] sm:$0xff] }
0x2458   :  { %v7737_v25 = vpop.f32.mrf.mxu0 }
0x2459   :  { %v3017_v42 = vadd.f32 1e-16, %v7715_v15  ;;  %9052 = vst [vmem:[#allocation9_spill] sm:$0xff] %v7737_v25 }
0x245b   :  { %5589 = vmatpush.msk.msra.mxu0 %vm134_vm1, %v3017_v42  ;;  %v7847_v42 = vld [vmem:[%s8940_s11 + $0x20] sm:$0xff] }
0x245c   :  { %5590 = vmatmul.msk.f32.vlgmr.msra.gmra.mxu0 %vm130_vm2, %v9032_v8 }
0x245d   :  { %3185 = vmatpush.msrb.mxu0 %v7724_v4 }
0x245f   :  { %3186 = vmatpush.msrb.mxu0 %v7730_v0 }
0x2460   :  { %v2876_v49 = vpop.f32.mrf.mxu0 }
0x24c6   :  { %v2681_v18 = vpop.f32.mrf.mxu3 }
0x24c7   :  { %5579 = vmatmul.msk.f32.vlgmr.msrb.gmra.mxu2 %vm186_vm0, %v2681_v18  ;;  %5581 = vmatmul.msk.f32.vlgmr.msra.gmra.mxu1 %vm186_vm0, %v2681_v18  ;;  %v7853_v18 = vld [vmem:[%s8940_s11 + $0x18] sm:$0xff] }
0x24c8   :  { %3059 = vmatpush.msra.mxu1 %v7676_v1 }
0x24cf   :  { %5582 = vmatmul.msk.f32.vlgmr.msra.gmra.mxu2 %vm186_vm0, %v2836_v20  ;;  %v7859_v20 = vld [vmem:[%s8940_s11 + $0x10] sm:$0xff] }
0x2544   :  { %v2832_v44 = vpop.f32.mrf.mxu1 }
0x254a   :  { %v7739_v7 = vpop.f32.mrf.mxu2 }
0x254b   :  { %9053 = vst [vmem:[#allocation12_spill] sm:$0xff] %v7739_v7 }
0x2552   :  { %v2856_v48 = vpop.f32.mrf.mxu2 }
0x2553   :  { %v2857_v54 = vadd.f32 %v2856_v48, %v2832_v44  ;;  %v7865_v44 = vld [vmem:[%s8940_s11 + $0x8] sm:$0xff]  ;;  %v7871_v48 = vld [vmem:[%s8940_s11] sm:$0xff] }
0x2555   :  { %v2879_v59 = vadd.f32 %v2876_v49, %v2857_v54  ;;  %v3038_v54 = vpop.f32.mrf.mxu0 }
0x2556   :  { %v3085_v49 = vmul.f32 %v3038_v54, %v3038_v54 }
0x2557   :  { %v2880_v16 = vadd.f32 %v7744_v32, %v2879_v59  ;;  %v7878_v59 = vld [vmem:[%s9013_s28] sm:$0xff] }
0x2559   :  { %5874 = vtanh.f32 %v2880_v16  ;;  %v2881_v28 = vmul.f32 0.5, %v2880_v16 }
0x255b   :  { %5876 = vtanh.f32 %v2881_v28 }
0x255f   :  { %v5875_v27 = vpop.eup %5874 }
0x2560   :  { %2888 = vrot.lane.b32.xlu1 %v5875_v27, %s9045_s0  ;;  %v7885_v27 = vld [vmem:[%s8944_s15] sm:$0xf] }
0x2561   :  { %v5877_v61 = vpop.eup %5876  ;;  %9054 = vst [vmem:[#allocation13_spill] sm:$0xff] %v7885_v27 }
0x2562   :  { %v2883_v55 = vadd.f32 1.0, %v5877_v61 }
0x2564   :  { %v2884_v24 = vmul.f32 0.5, %v2883_v55 }
0x2566   :  { %v2886_v11 = vmul.f32 %v2884_v24, %v7509_v56  ;;  %v7762_v56 = vld [vmem:[%s8935_s6] ss:$0 sm:$0xff] }
0x25d2   :  { %v2889_v41 = vpop.permute.xlu1 %2888 }
0x25d3   :  { %v2891_v26 = vmul.f32 %v2889_v41, %v2884_v24 }
0x25d5   :  { %2893 = vrot.lane.b32.xlu0 %v2891_v26, %s9035_s3 }
0x2647   :  { %v2894_v21 = vpop.permute.xlu0 %2893 }
0x2648   :  { %v7750_v9 = vadd.f32 %v2894_v21, %v2886_v11 }
0x264a   :  { %5878 = vtanh.f32 %v7750_v9 }
0x2650   :  { %v5879_v30 = vpop.eup %5878 }
0x2651   :  { %2899 = vrot.lane.b32.xlu1 %v5879_v30, %s9045_s0 }
0x26c3   :  { %v2900_v60 = vpop.permute.xlu1 %2899 }
0x26c4   :  { %v2902_v17 = vmul.f32 %v2900_v60, %v2884_v24 }
0x26c6   :  { %2904 = vrot.lane.b32.xlu0 %v2902_v17, %s9035_s3 }
0x2738   :  { %v7755_v36 = vpop.permute.xlu0 %2904 }
0x2739   :  { %5584 = vmatmul.msk.f32.vlgmr.msrb.gmra.mxu1 %vm234_vm3, %v7755_v36 }
0x27b6   :  { %v2925_v33 = vpop.f32.mrf.mxu1 }
0x27b7   :  { %v7765_v50 = vadd.f32 %v7762_v56, %v2925_v33 }
0x27b9   :  { %2929 = vrot.lane.b32.xlu1 %v7765_v50, %s9020_s26  ;;  %5587 = vmatpush.msk.msrb.mxu3 %vm134_vm1, %v7765_v50 }
0x27ba   :  { %5588 = vmatmul.msk.f32.vlgmr.msrb.gmra.mxu3 %vm130_vm2, %v7774_v12 }
0x27bb   :  { %3086 = vmatpush.msra.mxu3 %v7781_v40 }
0x27bd   :  { %3087 = vmatpush.msra.mxu3 %v7787_v13 }
0x27bf   :  { %3088 = vmatpush.msra.mxu3 %v7793_v19 }
0x27c1   :  { %3089 = vmatpush.msra.mxu3 %v7799_v31 }
0x27c3   :  { %3090 = vmatpush.msra.mxu3 %v7805_v57 }
0x27c5   :  { %3091 = vmatpush.msra.mxu3 %v7811_v22 }
0x27c7   :  { %3092 = vmatpush.msra.mxu3 %v7817_v37 }
0x27c9   :  { %3093 = vmatpush.msra.mxu3 %v7823_v63 }
0x27cb   :  { %3094 = vmatpush.msra.mxu3 %v7829_v43 }
0x27cd   :  { %3095 = vmatpush.msra.mxu3 %v7835_v35 }
0x27cf   :  { %3096 = vmatpush.msra.mxu3 %v7841_v5 }
0x27d1   :  { %3097 = vmatpush.msra.mxu3 %v7847_v42 }
0x27d3   :  { %3098 = vmatpush.msra.mxu3 %v7853_v18 }
0x27d5   :  { %3099 = vmatpush.msra.mxu3 %v7859_v20 }
0x27d7   :  { %3100 = vmatpush.msra.mxu3 %v7865_v44 }
0x27d9   :  { %3101 = vmatpush.msra.mxu3 %v7871_v48 }
0x27da   :  { %3102 = vmatmul.f32.vlgmr.msra.gmra.mxu3 %v3085_v49  ;;  %v9055_v49 = vmov 11  }
0x27db   :  { %3433 = vmatpush.msrb.mxu3 %v7546_v34 }
0x27dd   :  { %3504 = vmatpush.msra.mxu3 %v7878_v59 }
0x282b   :  { %v2930_v16 = vpop.permute.xlu1 %2929 }
0x282c   :  { %5585 = vmatpush.msk.msrb.mxu2 %vm134_vm1, %v2930_v16 }
0x282d   :  { %5586 = vmatmul.msk.f32.vlgmr.msrb.gmra.mxu2 %vm130_vm2, %v7885_v27 }
0x282e   :  { %3065 = vmatpush.msra.mxu2 %v7781_v40 }
0x2830   :  { %3066 = vmatpush.msra.mxu2 %v7787_v13 }
0x2832   :  { %3067 = vmatpush.msra.mxu2 %v7793_v19 }
0x2834   :  { %3068 = vmatpush.msra.mxu2 %v7799_v31 }
0x2836   :  { %3069 = vmatpush.msra.mxu2 %v7805_v57 }
0x2838   :  { %3070 = vmatpush.msra.mxu2 %v7811_v22 }
0x283a   :  { %3071 = vmatpush.msra.mxu2 %v7817_v37 }
0x283c   :  { %3072 = vmatpush.msra.mxu2 %v7823_v63 }
0x283d   :  { %v2972_v34 = vpop.f32.mrf.mxu3 }
0x283e   :  { %3073 = vmatpush.msra.mxu2 %v7829_v43 }
0x2840   :  { %3074 = vmatpush.msra.mxu2 %v7835_v35 }
0x2842   :  { %3075 = vmatpush.msra.mxu2 %v7841_v5 }
0x2844   :  { %3076 = vmatpush.msra.mxu2 %v7847_v42 }
0x2846   :  { %3077 = vmatpush.msra.mxu2 %v7853_v18 }
0x2848   :  { %3078 = vmatpush.msra.mxu2 %v7859_v20 }
0x284a   :  { %3079 = vmatpush.msra.mxu2 %v7865_v44 }
0x284c   :  { %3080 = vmatpush.msra.mxu2 %v7871_v48 }
0x284e   :  { %3408 = vmatpush.msrb.mxu2 %v7676_v1 }
0x28b0   :  { %v2950_v28 = vpop.f32.mrf.mxu2 }
0x28b1   :  { %v2973_v61 = vadd.f32 %v2972_v34, %v2950_v28 }
0x28b3   :  { %v2975_v55 = vadd.f32 1e-16, %v2973_v61  ;;  %v2977_v24 = vmin.f32 %v2973_v61, 20.0  ;;  %vm2976_vm7 = vcmp.gt.f32.partialorder %v2973_v61, 20.0  ;;  %v2988_v16 = vsel %vm373_vm6, %v2973_v61, -inf }
0x28b5   :  { %5591 = vmatmul.msk.f32.vlgmr.msra.gmra.mxu1 %vm186_vm0, %v2975_v55  ;;  %v3106_v41 = vmul.f32 %v2975_v55, %v2975_v55  ;;  %v2978_v26 = vmul.f32 1.442695, %v2977_v24 }
0x28b7   :  { %v3107_v11 = vsel %vm497_vm4, %v3106_v41, 0.0  ;;  %5880 = vpow2.f32 %v2978_v26 }
0x28b8   :  { %3108 = vadd.xlane.f32.xlu0 %v3107_v11 }
0x28bd   :  { %v5881_v21 = vpop.eup %5880 }
0x28be   :  { %v2980_v30 = vadd.f32 1.0, %v5881_v21  ;;  %v3103_v21 = vpop.f32.mrf.mxu3 }
0x28c0   :  { %5882 = vlog2.f32 %v2980_v30 }
0x28c6   :  { %v5883_v60 = vpop.eup %5882 }
0x28c7   :  { %v2982_v17 = vmul.f32 0.6931472, %v5883_v60  ;;  %v3110_v60 = vmax.f32 %v3103_v21, 1e-16  ;;  %v2984_v21 = vmul.f32 0.5, %v2973_v61 }
0x28c9   :  { %v7908_v33 = vsel %vm2976_vm7, %v2973_v61, %v2982_v17 }
0x28ca   :  { %3126 = vperm.xlu1 %5725, %v7908_v33  }
0x28d2   :  { %5727 = vset.pattern.permute.xlu1 %v9055_v49 }
0x28f4   :  { %2989 = vmax.xlane.f32.xlu1 %v2988_v16 }
0x292b   :  { %v3109_v30 = vpop.xlane.xlu0 %3108 }
0x292c   :  { %v3111_v17 = vmax.f32 %v3109_v30, 1e-16 }
0x292e   :  { %v3112_v16 = vmul.f32 %v3111_v17, %v3110_v60 }
0x2930   :  { %vm3119_vm13 = vweird.f32 %v3112_v16 }
0x2932   :  { %v3061_v34 = vpop.f32.mrf.mxu1 }
0x2933   :  { %v3064_v28 = vmul.f32 %v3061_v34, %v3038_v54 }
0x2935   :  { %3081 = vmatmul.f32.vlgmr.msra.gmra.mxu2 %v3064_v28 }
0x2936   :  { %3480 = vmatpush.msra.mxu2 %v7584_v6 }
0x293c   :  { %v3127_v55 = vpop.permute.xlu1 %3126 }
0x2967   :  { %v2990_v24 = vpop.xlane.xlu1 %2989 }
0x2968   :  { %v2991_v41 = vsub.f32 %v2973_v61, %v2990_v24 }
0x296a   :  { %v2992_v26 = vmul.f32 1.442695, %v2991_v41 }
0x296c   :  { %5884 = vpow2.f32 %v2992_v26 }
0x296d   :  { %5886 = vrsqrt.f32 %v3112_v16 }
0x296e   :  { %5888 = vtanh.f32 %v2984_v21 }
0x2972   :  { %v7914_v11 = vpop.eup %5884 }
0x2973   :  { %2995 = vrot.lane.b32.xlu0 %v7914_v11, %s9036_s23  ;;  %v5887_v54 = vpop.eup %5886 }
0x2974   :  { %v3114_v34 = vmul.f32 %v5887_v54, %v3112_v16  ;;  %vm3120_vm12 = vweird.f32 %v5887_v54  ;;  %v5889_v30 = vpop.eup %5888 }
0x2975   :  { %vm3121_vm14 = vmor %vm3119_vm13, %vm3120_vm12  ;;  %v2986_v60 = vadd.f32 1.0, %v5889_v30 }
0x2976   :  { %v3115_v28 = vmul.f32 %v5887_v54, %v3114_v34 }
0x2977   :  { %v2987_v17 = vmul.f32 0.5, %v2986_v60 }
0x2978   :  { %v3116_v6 = vmul.f32 0.5, %v3115_v28 }
0x297a   :  { %v3117_v25 = vsub.f32 1.5, %v3116_v6 }
0x297c   :  { %v3118_v7 = vmul.f32 %v5887_v54, %v3117_v25 }
0x297e   :  { %v3122_v41 = vsel %vm3121_vm14, %v5887_v54, %v3118_v7  ;;  %v3160_v7 = vsub.f32 1.0, %v2987_v17 }
0x29b8   :  { %v3082_v24 = vpop.f32.mrf.mxu2 }
0x29b9   :  { %v3123_v26 = vmul.f32 %v3122_v41, %v3082_v24 }
0x29bb   :  { %v3129_v2 = vmul.f32 %v3127_v55, %v3123_v26 }
0x29bd   :  { %v3130_v58 = vsel %vm521_vm10, %v3129_v2, -inf }
0x29be   :  { %3131 = vmax.xlane.f32.xlu2 %v3130_v58 }
0x29d6   :  { %3156 = vperm.xlu2 %5726, %v2987_v17  }
0x29e5   :  { %v2996_v55 = vpop.permute.xlu0 %2995 }
0x29e6   :  { %v2998_v54 = vsel %vm384_vm11, %v2996_v55, 0.0 }
0x2a31   :  { %v3132_v34 = vpop.xlane.xlu2 %3131 }
0x2a32   :  { %v3133_v28 = vsub.f32 %v3129_v2, %v3132_v34 }
0x2a34   :  { %v3134_v6 = vmul.f32 1.442695, %v3133_v28 }
0x2a36   :  { %5890 = vpow2.f32 %v3134_v6 }
0x2a39   :  { %v3157_v58 = vpop.permute.xlu2 %3156 }
0x2a3c   :  { %v5891_v25 = vpop.eup %5890 }
0x2a3d   :  { %v3136_v16 = vsel %vm521_vm10, %v5891_v25, 0.0 }
0x2a3e   :  { %3137 = vadd.xlane.f32.xlu2 %v3136_v16 }
0x2a56   :  { %3163 = vperm.xlu2 %5726, %v3160_v7  }
0x2a7f   :  { %2999 = vadd.xlane.f32.xlu2 %v2998_v54 }
0x2ab1   :  { %v3138_v61 = vpop.xlane.xlu2 %3137 }
0x2ab2   :  { %5892 = vrcp.f32 %v3138_v61  ;;  %v3150_v21 = vand.u32 2147483648, %v3138_v61  ;;  %v3148_v30 = vand.u32 2147483647, %v3138_v61  ;;  %vm3144_vm7 = vweird.f32 %v3138_v61 }
0x2ab4   :  { %v3151_v34 = vor.u32 1.1754944e-38, %v3150_v21  ;;  %vm3149_vm13 = vcmp.eq.f32.partialorder %v3148_v30, 8.507059e+37 }
0x2ab8   :  { %v5893_v24 = vpop.eup %5892 }
0x2ab9   :  { %v3140_v41 = vmul.f32 %v5893_v24, %v3138_v61  ;;  %vm3145_vm15 = vweird.f32 %v5893_v24  ;;  %v3164_v6 = vpop.permute.xlu2 %3163 }
0x2aba   :  { %vm3146_vm12 = vmor %vm3144_vm7, %vm3145_vm15  ;;  %v3166_v55 = vmul.f32 %v3164_v6, %v7642_v10 }
0x2abb   :  { %v3141_v26 = vsub.f32 1.0, %v3140_v41 }
0x2abd   :  { %v3142_v2 = vmul.f32 %v5893_v24, %v3141_v26 }
0x2abf   :  { %v3143_v60 = vadd.f32 %v5893_v24, %v3142_v2 }
0x2ac1   :  { %v3147_v17 = vsel %vm3146_vm12, %v5893_v24, %v3143_v60 }
0x2ac2   :  { %v3152_v28 = vsel %vm3149_vm13, %v3151_v34, %v3147_v17 }
0x2ac3   :  { %v3153_v16 = vmul.f32 %v5891_v25, %v3152_v28 }
0x2ac5   :  { %v3159_v7 = vmul.f32 %v3157_v58, %v3153_v16  ;;  %v3016_v16 = vadd.f32 1.0, %v7908_v33 }
0x2ac7   :  { %v3167_v54 = vadd.f32 %v3166_v55, %v3159_v7 }
0x2ac9   :  { %5592 = vmatmul.msk.f32.vlgmr.msrb.gmra.mxu0 %vm560_vm5, %v3167_v54 }
0x2af2   :  { %v3000_v41 = vpop.xlane.xlu2 %2999 }
0x2af3   :  { %5894 = vrcp.f32 %v3000_v41  ;;  %v3012_v2 = vand.u32 2147483648, %v3000_v41  ;;  %v3010_v21 = vand.u32 2147483647, %v3000_v41  ;;  %vm3006_vm15 = vweird.f32 %v3000_v41 }
0x2af5   :  { %v3013_v30 = vor.u32 1.1754944e-38, %v3012_v2  ;;  %vm3011_vm12 = vcmp.eq.f32.partialorder %v3010_v21, 8.507059e+37 }
0x2af9   :  { %v5895_v26 = vpop.eup %5894 }
0x2afa   :  { %v3002_v49 = vmul.f32 %v5895_v26, %v3000_v41  ;;  %vm3007_vm14 = vweird.f32 %v5895_v26 }
0x2afb   :  { %vm3008_vm7 = vmor %vm3006_vm15, %vm3007_vm14 }
0x2afc   :  { %v3003_v27 = vsub.f32 1.0, %v3002_v49 }
0x2afe   :  { %v3004_v61 = vmul.f32 %v5895_v26, %v3003_v27  ;;  %v3334_v27 = vmul.f32 0.5, %v7765_v50 }
0x2b00   :  { %v3005_v24 = vadd.f32 %v5895_v26, %v3004_v61  ;;  %5896 = vtanh.f32 %v3334_v27 }
0x2b02   :  { %v3009_v25 = vsel %vm3008_vm7, %v5895_v26, %v3005_v24 }
0x2b03   :  { %v3014_v58 = vsel %vm3011_vm12, %v3013_v30, %v3009_v25 }
0x2b04   :  { %v3015_v10 = vmul.f32 %v7914_v11, %v3014_v58 }
0x2b06   :  { %3208 = vperm.xlu0 %5728, %v3015_v10   ;;  %3198 = vperm.xlu1 %5727, %v3015_v10   ;;  %v5897_v6 = vpop.eup %5896 }
0x2b07   :  { %v3336_v11 = vadd.f32 1.0, %v5897_v6 }
0x2b09   :  { %v3337_v7 = vmul.f32 0.5, %v3336_v11 }
0x2b0e   :  { %5729 = vset.pattern.permute.xlu1 %v9046_v45  ;;  %5730 = vset.pattern.permute.xlu0 %v9026_v39 }
0x2b0f   :  { %3193 = vperm.xlu1 %5729, %v3015_v10  }
0x2b17   :  { %5731 = vset.pattern.permute.xlu1 %v9023_v47 }
0x2b46   :  { %v3188_v49 = vpop.f32.mrf.mxu0 }
0x2b78   :  { %v3209_v60 = vpop.permute.xlu0 %3208  ;;  %v3199_v34 = vpop.permute.xlu1 %3198 }
0x2b79   :  { %v3211_v17 = vmul.f32 %v3209_v60, %v3188_v49  ;;  %v3201_v28 = vmul.f32 %v3199_v34, %v3188_v49 }
0x2b7b   :  { %3213 = vrot.lane.b32.xlu1 %v3211_v17, %s9028_s2  ;;  %3203 = vrot.lane.b32.xlu0 %v3201_v28, %s9027_s27 }
0x2b81   :  { %v3194_v55 = vpop.permute.xlu1 %3193 }
0x2b82   :  { %v3196_v54 = vmul.f32 %v3194_v55, %v3188_v49 }
0x2b83   :  { %3362 = vrot.lane.b32.xlu1 %v3337_v7, %s9029_s22  ;;  %3222 = vperm.xlu0 %5730, %v3016_v16  }
0x2b8b   :  { %5732 = vset.pattern.permute.xlu0 %v9025_v14  ;;  %3485 = vrot.lane.b32.xlu1 %v7637_v23, %s6266_s30  ;;  %s5460_s30 = sshll.u32 %s9087_s19, 4  ;;  %s5461_s30 = int_to_ptr.hbm [resolvable:$true] %s5460_s30 }
0x2bed   :  { %v3204_v41 = vpop.permute.xlu0 %3203  ;;  %v3214_v2 = vpop.permute.xlu1 %3213 }
0x2bee   :  { %v3206_v26 = vadd.f32 %v3204_v41, %v3196_v54 }
0x2bf0   :  { %v3216_v61 = vadd.f32 %v3214_v2, %v3206_v26  ;;  %v7976_v2 = vld [vmem:[%s8941_s12] sm:$0xff] }
0x2bf2   :  { %v3217_v21 = vmax.f32 %v3216_v61, 1e-30  ;;  %v7982_v61 = vld [vmem:[%s8942_s13 + $0x70] sm:$0xff] }
0x2bf4   :  { %5898 = vlog2.f32 %v3217_v21  ;;  %v7989_v21 = vld [vmem:[%s8942_s13 + $0x68] sm:$0xff] }
0x2bf5   :  { %v3223_v25 = vpop.permute.xlu0 %3222 }
0x2bfa   :  { %v5899_v24 = vpop.eup %5898 }
0x2bfb   :  { %v3219_v30 = vmul.f32 0.6931472, %v5899_v24  ;;  %v7996_v24 = vld [vmem:[%s8942_s13 + $0x60] sm:$0xff] }
0x2bfd   :  { %v3225_v58 = vmul.f32 %v3223_v25, %v3219_v30  ;;  %v8002_v30 = vld [vmem:[%s8942_s13 + $0x58] sm:$0xff]  ;;  %v8008_v25 = vld [vmem:[%s8942_s13 + $0x50] sm:$0xff] }
0x2bff   :  { %v3226_v10 = vmul.f32 1.442695, %v3225_v58  ;;  %v8014_v58 = vld [vmem:[%s8942_s13 + $0x48] sm:$0xff] }
0x2c01   :  { %5900 = vpow2.f32 %v3226_v10  ;;  %v8020_v10 = vld [vmem:[%s8942_s13 + $0x40] sm:$0xff] }
0x2c07   :  { %v5901_v33 = vpop.eup %5900 }
0x2c08   :  { %v3228_v27 = vsel %vm521_vm10, %v5901_v33, 0.0 }
0x2c09   :  { %3229 = vadd.xlane.f32.xlu2 %v3228_v27  ;;  %v8032_v27 = vld [vmem:[%s8942_s13 + $0x30] sm:$0xff] }
0x2c21   :  { %3389 = vrot.lane.b32.xlu2 %v7765_v50, %s9037_s24 }
0x2c7c   :  { %v3230_v49 = vpop.xlane.xlu2 %3229 }
0x2c7d   :  { %v3231_v60 = vadd.f32 1e-16, %v3230_v49  ;;  %v8038_v49 = vld [vmem:[%s8942_s13 + $0x28] sm:$0xff] }
0x2c7f   :  { %5902 = vrcp.f32 %v3231_v60  ;;  %v3243_v11 = vand.u32 2147483648, %v3231_v60  ;;  %v3241_v7 = vand.u32 2147483647, %v3231_v60  ;;  %vm3237_vm14 = vweird.f32 %v3231_v60 }
0x2c81   :  { %v3244_v55 = vor.u32 1.1754944e-38, %v3243_v11  ;;  %vm3242_vm7 = vcmp.eq.f32.partialorder %v3241_v7, 8.507059e+37  ;;  %v8077_v7 = vld [vmem:[%s8936_s7 + $0x18] sm:$0xff] }
0x2c84   :  { %v3390_v34 = vpop.permute.xlu2 %3389 }
0x2c85   :  { %v5903_v17 = vpop.eup %5902  ;;  %5600 = vmatmul.msk.f32.vlgmr.msrb.gmra.mxu2 %vm186_vm0, %v3390_v34  ;;  %v8050_v34 = vld [vmem:[%s8942_s13 + $0x18] sm:$0xff] }
0x2c86   :  { %v3233_v28 = vmul.f32 %v5903_v17, %v3231_v60  ;;  %3570 = vmatpush.msrb.mxu2 %v7599_v29  ;;  %vm3238_vm13 = vweird.f32 %v5903_v17  ;;  %v7950_v29 = vld [vmem:[%s8945_s16] sm:$0x3] }
0x2c87   :  { %vm3239_vm15 = vmor %vm3237_vm14, %vm3238_vm13  ;;  %v8044_v60 = vld [vmem:[%s8942_s13 + $0x20] sm:$0xff] }
0x2c88   :  { %v3234_v6 = vsub.f32 1.0, %v3233_v28  ;;  %3571 = vmatpush.msrb.mxu2 %v7605_v38  ;;  %v7957_v38 = vld [vmem:[%s8946_s17] sm:$0x3]  ;;  %v8062_v28 = vld [vmem:[%s8942_s13 + $0x8] sm:$0xff] }
0x2c8a   :  { %v3235_v16 = vmul.f32 %v5903_v17, %v3234_v6  ;;  %3572 = vmatpush.msrb.mxu2 %v7611_v51  ;;  %v7964_v51 = vld [vmem:[%s8941_s12 + $0x8] sm:$0xff]  ;;  %v8068_v6 = vld [vmem:[%s8942_s13] sm:$0xff] }
0x2c8c   :  { %v3236_v50 = vadd.f32 %v5903_v17, %v3235_v16  ;;  %3573 = vmatpush.msrb.mxu2 %v7617_v3  ;;  %v7970_v3 = vld [vmem:[%s8942_s13 + $0x78] sm:$0xff] }
0x2c8e   :  { %v3240_v54 = vsel %vm3239_vm15, %v5903_v17, %v3236_v50  ;;  %v8056_v17 = vld [vmem:[%s8942_s13 + $0x10] sm:$0xff] }
0x2c8f   :  { %v3245_v41 = vsel %vm3242_vm7, %v3244_v55, %v3240_v54  ;;  %v8083_v50 = vld [vmem:[%s8936_s7 + $0x10] sm:$0xff]  ;;  %v8089_v55 = vld [vmem:[%s8936_s7 + $0x8] sm:$0xff]  ;;  %v3363_v54 = vpop.permute.xlu1 %3362 }
0x2c90   :  { %v7941_v26 = vmul.f32 %v5901_v33, %v3245_v41  ;;  %v8026_v33 = vld [vmem:[%s8942_s13 + $0x38] sm:$0xff]  ;;  %9056 = vst [vmem:[#allocation14_spill] sm:$0xff] %v8083_v50  ;;  %v8095_v41 = vld [vmem:[%s8936_s7] sm:$0xff] }
0x2c91   :  { %9057 = vst [vmem:[#allocation15_spill] sm:$0xff] %v8089_v55 }
0x2c92   :  { %5593 = vmatpush.msk.msrb.mxu1 %vm644_vm8, %v7941_v26  ;;  %5595 = vmatpush.msk.msra.mxu0 %vm644_vm8, %v7941_v26  ;;  %9058 = vst [vmem:[#allocation18_spill] sm:$0xff] %v8095_v41 }
0x2c93   :  { %5594 = vmatmul.msk.f32.vlgmr.msrb.gmra.mxu1 %vm640_vm9, %v7950_v29  ;;  %5596 = vmatmul.msk.f32.vlgmr.msra.gmra.mxu0 %vm640_vm9, %v7957_v38 }
0x2c94   :  { %3307 = vmatpush.msra.mxu1 %v7964_v51  ;;  %3314 = vmatpush.msrb.mxu0 %v7970_v3 }
0x2c96   :  { %3308 = vmatpush.msra.mxu1 %v7976_v2  ;;  %3315 = vmatpush.msrb.mxu0 %v7982_v61 }
0x2c98   :  { %3355 = vmatpush.msrb.mxu1 %v7964_v51  ;;  %3316 = vmatpush.msrb.mxu0 %v7989_v21 }
0x2c9a   :  { %3356 = vmatpush.msrb.mxu1 %v7976_v2  ;;  %3317 = vmatpush.msrb.mxu0 %v7996_v24 }
0x2c9c   :  { %3318 = vmatpush.msrb.mxu0 %v8002_v30 }
0x2c9e   :  { %3319 = vmatpush.msrb.mxu0 %v8008_v25 }
0x2ca0   :  { %3320 = vmatpush.msrb.mxu0 %v8014_v58 }
0x2ca2   :  { %3321 = vmatpush.msrb.mxu0 %v8020_v10 }
0x2ca4   :  { %3322 = vmatpush.msrb.mxu0 %v8026_v33 }
0x2ca6   :  { %3323 = vmatpush.msrb.mxu0 %v8032_v27 }
0x2ca8   :  { %3324 = vmatpush.msrb.mxu0 %v8038_v49 }
0x2caa   :  { %3325 = vmatpush.msrb.mxu0 %v8044_v60 }
0x2cac   :  { %3326 = vmatpush.msrb.mxu0 %v8050_v34 }
0x2cae   :  { %3327 = vmatpush.msrb.mxu0 %v8056_v17 }
0x2cb0   :  { %3328 = vmatpush.msrb.mxu0 %v8062_v28 }
0x2cb2   :  { %3329 = vmatpush.msrb.mxu0 %v8068_v6 }
0x2d10   :  { %v3267_v11 = vpop.f32.mrf.mxu1  ;;  %v3287_v16 = vpop.f32.mrf.mxu0 }
0x2d11   :  { %5597 = vmatmul.msk.f32.vlgmr.msra.gmra.mxu1 %vm560_vm5, %v3267_v11 }
0x2d12   :  { %3381 = vmatpush.msra.mxu1 %v7676_v1 }
0x2d19   :  { %5598 = vmatmul.msk.f32.vlgmr.msrb.gmra.mxu1 %vm560_vm5, %v3287_v16 }
0x2d1a   :  { %3450 = vmatpush.msrb.mxu1 %v8077_v7 }
0x2d1c   :  { %3451 = vmatpush.msrb.mxu1 %v8083_v50 }
0x2d1e   :  { %3452 = vmatpush.msrb.mxu1 %v8089_v55  ;;  %v3410_v55 = vpop.f32.mrf.mxu2 }
0x2d20   :  { %3453 = vmatpush.msrb.mxu1 %v8095_v41 }
0x2d21   :  { %5599 = vmatmul.msk.f32.vlgmr.msra.gmra.mxu1 %vm186_vm0, %v3363_v54 }
0x2d22   :  { %3521 = vmatpush.msra.mxu1 %v7688_v62 }
0x2d24   :  { %3522 = vmatpush.msra.mxu1 %v7694_v52 }
0x2d26   :  { %3523 = vmatpush.msra.mxu1 %v7700_v53 }
0x2d28   :  { %3524 = vmatpush.msra.mxu1 %v7706_v46 }
0x2d29   :  { %5602 = vmatmul.msk.f32.vlgmr.msrb.gmra.mxu1 %vm234_vm3, %v7755_v36 }
0x2d31   :  { %5605 = vmatmul.msk.f32.vlgmr.msra.gmra.mxu1 %vm234_vm3, %v7755_v36 }
0x2d8e   :  { %v3310_v11 = vpop.f32.mrf.mxu1 }
0x2d8f   :  { %v3313_v16 = vmul.f32 %v3310_v11, %v7715_v15 }
0x2d91   :  { %3330 = vmatmul.f32.vlgmr.msrb.gmra.mxu0 %v3313_v16 }
0x2d96   :  { %v3358_v62 = vpop.f32.mrf.mxu1 }
0x2d97   :  { %v3413_v23 = vmul.f32 %v3410_v55, %v3358_v62 }
0x2d9e   :  { %v3383_v54 = vpop.f32.mrf.mxu1 }
0x2d9f   :  { %v3386_v52 = vmul.f32 %v3383_v54, %v3358_v62 }
0x2da1   :  { %v3387_v41 = vsub.f32 1.0, %v3386_v52 }
0x2da3   :  { %v3388_v53 = vmul.f32 %v3387_v41, %v7715_v15  ;;  %v3486_v15 = vpop.permute.xlu1 %3485 }
0x2da5   :  { %v8110_v50 = vadd.f32 %v3413_v23, %v3388_v53 }
0x2da6   :  { %v8122_v55 = vpop.f32.mrf.mxu1 }
0x2da7   :  { %v3667_v46 = vadd.f32 1e-16, %v8110_v50  ;;  %9059 = vst [vmem:[#allocation19_spill] sm:$0xff] %v8122_v55 }
0x2da9   :  { %5611 = vmatpush.msk.msrb.mxu1 %vm134_vm1, %v3667_v46 }
0x2daa   :  { %5612 = vmatmul.msk.f32.vlgmr.msrb.gmra.mxu1 %vm130_vm2, %v9032_v8 }
0x2dab   :  { %3835 = vmatpush.msra.mxu1 %v7724_v4 }
0x2dad   :  { %3836 = vmatpush.msra.mxu1 %v7730_v0 }
0x2dae   :  { %v3526_v4 = vpop.f32.mrf.mxu1 }
0x2e0e   :  { %v3331_v36 = vpop.f32.mrf.mxu0 }
0x2e0f   :  { %5601 = vmatmul.msk.f32.vlgmr.msrb.gmra.mxu3 %vm186_vm0, %v3331_v36  ;;  %5603 = vmatmul.msk.f32.vlgmr.msra.gmra.mxu2 %vm186_vm0, %v3331_v36 }
0x2e10   :  { %3709 = vmatpush.msra.mxu2 %v7676_v1 }
0x2e17   :  { %5604 = vmatmul.msk.f32.vlgmr.msra.gmra.mxu3 %vm186_vm0, %v3486_v15 }
0x2e92   :  { %v8124_v41 = vpop.f32.mrf.mxu3  ;;  %v3482_v11 = vpop.f32.mrf.mxu2 }
0x2e93   :  { %9060 = vst [vmem:[#allocation20_spill] sm:$0xff] %v8124_v41 }
0x2e9a   :  { %v3506_v16 = vpop.f32.mrf.mxu3 }
0x2e9b   :  { %v3507_v62 = vadd.f32 %v3506_v16, %v3482_v11 }
0x2e9d   :  { %v3529_v54 = vadd.f32 %v3526_v4, %v3507_v62 }
0x2e9f   :  { %v3530_v0 = vadd.f32 %v7744_v32, %v3529_v54 }
0x2ea1   :  { %5904 = vtanh.f32 %v3530_v0  ;;  %v3531_v23 = vmul.f32 0.5, %v3530_v0 }
0x2ea3   :  { %5906 = vtanh.f32 %v3531_v23 }
0x2ea7   :  { %v5905_v52 = vpop.eup %5904 }
0x2ea8   :  { %3538 = vrot.lane.b32.xlu0 %v5905_v52, %s9045_s0  ;;  %v9061_v52 = vld [vmem:[#allocation13_spill] sm:$0xff] }
0x2ea9   :  { %v5907_v53 = vpop.eup %5906 }
0x2eaa   :  { %v3533_v46 = vadd.f32 1.0, %v5907_v53 }
0x2eac   :  { %v3534_v36 = vmul.f32 0.5, %v3533_v46 }
0x2eae   :  { %v3536_v41 = vmul.f32 %v3534_v36, %v7750_v9 }
0x2f1a   :  { %v3539_v15 = vpop.permute.xlu0 %3538 }
0x2f1b   :  { %v3541_v55 = vmul.f32 %v3539_v15, %v3534_v36 }
0x2f1d   :  { %3543 = vrot.lane.b32.xlu1 %v3541_v55, %s9035_s3 }
0x2f8f   :  { %v3544_v11 = vpop.permute.xlu1 %3543 }
0x2f90   :  { %v8130_v16 = vadd.f32 %v3544_v11, %v3536_v41 }
0x2f92   :  { %5908 = vtanh.f32 %v8130_v16 }
0x2f98   :  { %v5909_v32 = vpop.eup %5908 }
0x2f99   :  { %3549 = vrot.lane.b32.xlu0 %v5909_v32, %s9045_s0 }
0x300b   :  { %v3550_v62 = vpop.permute.xlu0 %3549 }
0x300c   :  { %v3552_v4 = vmul.f32 %v3550_v62, %v3534_v36 }
0x300e   :  { %3554 = vrot.lane.b32.xlu1 %v3552_v4, %s9035_s3 }
0x3080   :  { %v8135_v54 = vpop.permute.xlu1 %3554 }
0x3081   :  { %5606 = vmatmul.msk.f32.vlgmr.msrb.gmra.mxu2 %vm234_vm3, %v8135_v54 }
0x3104   :  { %v3575_v55 = vpop.f32.mrf.mxu2 }
0x3105   :  { %v8140_v9 = vadd.f32 %v7762_v56, %v3575_v55  ;;  %v8167_v56 = vld [vmem:[%s8936_s7 + $0x20] sm:$0xff] }
0x3107   :  { %3579 = vrot.lane.b32.xlu0 %v8140_v9, %s9020_s26  ;;  %5609 = vmatpush.msk.msra.mxu0 %vm134_vm1, %v8140_v9 }
0x3108   :  { %5610 = vmatmul.msk.f32.vlgmr.msra.gmra.mxu0 %vm130_vm2, %v7774_v12  ;;  %v3688_v12 = vpop.f32.mrf.mxu1 }
0x3109   :  { %3736 = vmatpush.msrb.mxu0 %v7781_v40  ;;  %v3735_v41 = vmul.f32 %v3688_v12, %v3688_v12 }
0x310b   :  { %3737 = vmatpush.msrb.mxu0 %v7787_v13 }
0x310d   :  { %3738 = vmatpush.msrb.mxu0 %v7793_v19 }
0x310f   :  { %3739 = vmatpush.msrb.mxu0 %v7799_v31 }
0x3111   :  { %3740 = vmatpush.msrb.mxu0 %v7805_v57 }
0x3113   :  { %3741 = vmatpush.msrb.mxu0 %v7811_v22 }
0x3115   :  { %3742 = vmatpush.msrb.mxu0 %v7817_v37 }
0x3117   :  { %3743 = vmatpush.msrb.mxu0 %v7823_v63 }
0x3119   :  { %3744 = vmatpush.msrb.mxu0 %v7829_v43 }
0x311b   :  { %3745 = vmatpush.msrb.mxu0 %v7835_v35 }
0x311d   :  { %3746 = vmatpush.msrb.mxu0 %v7841_v5 }
0x311f   :  { %3747 = vmatpush.msrb.mxu0 %v7847_v42 }
0x3121   :  { %3748 = vmatpush.msrb.mxu0 %v7853_v18 }
0x3123   :  { %3749 = vmatpush.msrb.mxu0 %v7859_v20 }
0x3125   :  { %3750 = vmatpush.msrb.mxu0 %v7865_v44 }
0x3127   :  { %3751 = vmatpush.msrb.mxu0 %v7871_v48 }
0x3128   :  { %3752 = vmatmul.f32.vlgmr.msrb.gmra.mxu0 %v3735_v41 }
0x3129   :  { %4083 = vmatpush.msra.mxu0 %v8167_v56 }
0x312b   :  { %4154 = vmatpush.msrb.mxu0 %v7878_v59  ;;  %v8201_v59 = vld [vmem:[%s9013_s28 + $0x8] sm:$0xff] }
0x3179   :  { %v3580_v0 = vpop.permute.xlu0 %3579 }
0x317a   :  { %5607 = vmatpush.msk.msrb.mxu3 %vm134_vm1, %v3580_v0 }
0x317b   :  { %5608 = vmatmul.msk.f32.vlgmr.msrb.gmra.mxu3 %vm130_vm2, %v9061_v52 }
0x317c   :  { %3715 = vmatpush.msra.mxu3 %v7781_v40 }
0x317e   :  { %3716 = vmatpush.msra.mxu3 %v7787_v13 }
0x3180   :  { %3717 = vmatpush.msra.mxu3 %v7793_v19 }
0x3182   :  { %3718 = vmatpush.msra.mxu3 %v7799_v31 }
0x3184   :  { %3719 = vmatpush.msra.mxu3 %v7805_v57 }
0x3185   :  { %v3622_v40 = vpop.f32.mrf.mxu0 }
0x3186   :  { %3720 = vmatpush.msra.mxu3 %v7811_v22 }
0x3188   :  { %3721 = vmatpush.msra.mxu3 %v7817_v37 }
0x318a   :  { %3722 = vmatpush.msra.mxu3 %v7823_v63 }
0x318c   :  { %3723 = vmatpush.msra.mxu3 %v7829_v43 }
0x318e   :  { %3724 = vmatpush.msra.mxu3 %v7835_v35 }
0x3190   :  { %3725 = vmatpush.msra.mxu3 %v7841_v5 }
0x3192   :  { %3726 = vmatpush.msra.mxu3 %v7847_v42 }
0x3194   :  { %3727 = vmatpush.msra.mxu3 %v7853_v18  ;;  %v9062_v18 = vmov 11  }
0x3196   :  { %3728 = vmatpush.msra.mxu3 %v7859_v20 }
0x3198   :  { %3729 = vmatpush.msra.mxu3 %v7865_v44 }
0x319a   :  { %3730 = vmatpush.msra.mxu3 %v7871_v48 }
0x319c   :  { %4058 = vmatpush.msrb.mxu3 %v7676_v1 }
0x31a5   :  { %v3753_v11 = vpop.f32.mrf.mxu0 }
0x31a6   :  { %v3760_v62 = vmax.f32 %v3753_v11, 1e-16  ;;  %v3984_v11 = vmul.f32 0.5, %v8140_v9 }
0x31fe   :  { %v3600_v13 = vpop.f32.mrf.mxu3 }
0x31ff   :  { %v3623_v19 = vadd.f32 %v3622_v40, %v3600_v13 }
0x3201   :  { %v3625_v31 = vadd.f32 1e-16, %v3623_v19  ;;  %v3627_v57 = vmin.f32 %v3623_v19, 20.0  ;;  %vm3626_vm12 = vcmp.gt.f32.partialorder %v3623_v19, 20.0  ;;  %v3638_v20 = vsel %vm373_vm6, %v3623_v19, -inf }
0x3203   :  { %5613 = vmatmul.msk.f32.vlgmr.msra.gmra.mxu2 %vm186_vm0, %v3625_v31  ;;  %v3756_v22 = vmul.f32 %v3625_v31, %v3625_v31  ;;  %v3628_v37 = vmul.f32 1.442695, %v3627_v57 }
0x3205   :  { %v3757_v63 = vsel %vm497_vm4, %v3756_v22, 0.0  ;;  %5910 = vpow2.f32 %v3628_v37 }
0x3206   :  { %3758 = vadd.xlane.f32.xlu2 %v3757_v63 }
0x320b   :  { %v5911_v43 = vpop.eup %5910 }
0x320c   :  { %v3630_v35 = vadd.f32 1.0, %v5911_v43  ;;  %v3634_v43 = vmul.f32 0.5, %v3623_v19 }
0x320e   :  { %5912 = vlog2.f32 %v3630_v35 }
0x3214   :  { %v5913_v5 = vpop.eup %5912 }
0x3215   :  { %v3632_v42 = vmul.f32 0.6931472, %v5913_v5 }
0x3217   :  { %v8193_v1 = vsel %vm3626_vm12, %v3623_v19, %v3632_v42 }
0x3218   :  { %3776 = vperm.xlu1 %5731, %v8193_v1  }
0x3220   :  { %5733 = vset.pattern.permute.xlu1 %v9062_v18 }
0x3242   :  { %3639 = vmax.xlane.f32.xlu1 %v3638_v20 }
0x3279   :  { %v3759_v32 = vpop.xlane.xlu2 %3758 }
0x327a   :  { %v3761_v4 = vmax.f32 %v3759_v32, 1e-16 }
0x327c   :  { %v3762_v55 = vmul.f32 %v3761_v4, %v3760_v62 }
0x327e   :  { %vm3769_vm14 = vweird.f32 %v3762_v55 }
0x3286   :  { %v3711_v44 = vpop.f32.mrf.mxu2 }
0x3287   :  { %v3714_v48 = vmul.f32 %v3711_v44, %v3688_v12 }
0x3289   :  { %3731 = vmatmul.f32.vlgmr.msra.gmra.mxu3 %v3714_v48 }
0x328a   :  { %4130 = vmatpush.msra.mxu3 %v8201_v59  ;;  %v3777_v23 = vpop.permute.xlu1 %3776 }
0x32b5   :  { %v3640_v53 = vpop.xlane.xlu1 %3639 }
0x32b6   :  { %v3641_v46 = vsub.f32 %v3623_v19, %v3640_v53 }
0x32b8   :  { %v3642_v36 = vmul.f32 1.442695, %v3641_v46 }
0x32ba   :  { %5914 = vpow2.f32 %v3642_v36 }
0x32bb   :  { %5916 = vrsqrt.f32 %v3762_v55 }
0x32bc   :  { %5918 = vtanh.f32 %v3634_v43 }
0x32c0   :  { %v8204_v15 = vpop.eup %5914 }
0x32c1   :  { %3645 = vrot.lane.b32.xlu1 %v8204_v15, %s9036_s23  ;;  %v5917_v12 = vpop.eup %5916 }
0x32c2   :  { %v3764_v41 = vmul.f32 %v5917_v12, %v3762_v55  ;;  %vm3770_vm13 = vweird.f32 %v5917_v12  ;;  %v5919_v35 = vpop.eup %5918 }
0x32c3   :  { %vm3771_vm15 = vmor %vm3769_vm14, %vm3770_vm13  ;;  %v3636_v5 = vadd.f32 1.0, %v5919_v35 }
0x32c4   :  { %v3765_v0 = vmul.f32 %v5917_v12, %v3764_v41 }
0x32c5   :  { %v3637_v42 = vmul.f32 0.5, %v3636_v5 }
0x32c6   :  { %v3766_v52 = vmul.f32 0.5, %v3765_v0 }
0x32c8   :  { %v3767_v40 = vsub.f32 1.5, %v3766_v52 }
0x32ca   :  { %v3768_v13 = vmul.f32 %v5917_v12, %v3767_v40 }
0x32cc   :  { %v3772_v57 = vsel %vm3771_vm15, %v5917_v12, %v3768_v13 }
0x330c   :  { %v3732_v31 = vpop.f32.mrf.mxu3 }
0x330d   :  { %v3773_v22 = vmul.f32 %v3772_v57, %v3732_v31 }
0x330f   :  { %v3779_v37 = vmul.f32 %v3777_v23, %v3773_v22  ;;  %v3810_v23 = vsub.f32 1.0, %v3637_v42 }
0x3311   :  { %v3780_v63 = vsel %vm521_vm10, %v3779_v37, -inf }
0x3312   :  { %3781 = vmax.xlane.f32.xlu0 %v3780_v63 }
0x3326   :  { %3806 = vperm.xlu0 %5732, %v3637_v42  }
0x332e   :  { %5735 = vset.pattern.permute.xlu0 %v9046_v45 }
0x3333   :  { %v3646_v19 = vpop.permute.xlu1 %3645 }
0x3334   :  { %v3648_v36 = vsel %vm384_vm11, %v3646_v19, 0.0 }
0x3385   :  { %v3782_v20 = vpop.xlane.xlu0 %3781 }
0x3386   :  { %v3783_v44 = vsub.f32 %v3779_v37, %v3782_v20 }
0x3388   :  { %v3784_v48 = vmul.f32 1.442695, %v3783_v44 }
0x338a   :  { %5920 = vpow2.f32 %v3784_v48 }
0x338b   :  { %5922 = vtanh.f32 %v3984_v11 }
0x3390   :  { %v5921_v53 = vpop.eup %5920 }
0x3391   :  { %v3786_v46 = vsel %vm521_vm10, %v5921_v53, 0.0  ;;  %v5923_v32 = vpop.eup %5922 }
0x3392   :  { %3787 = vadd.xlane.f32.xlu2 %v3786_v46  ;;  %v3986_v62 = vadd.f32 1.0, %v5923_v32 }
0x3394   :  { %v3987_v4 = vmul.f32 0.5, %v3986_v62 }
0x3398   :  { %v3807_v35 = vpop.permute.xlu0 %3806 }
0x33aa   :  { %3813 = vperm.xlu2 %5726, %v3810_v23  }
0x33b2   :  { %5737 = vset.pattern.permute.xlu2 %v9023_v47 }
0x33d3   :  { %3649 = vadd.xlane.f32.xlu2 %v3648_v36 }
0x33eb   :  { %4012 = vrot.lane.b32.xlu2 %v3987_v4, %s9029_s22 }
0x3405   :  { %v3788_v55 = vpop.xlane.xlu2 %3787 }
0x3406   :  { %5924 = vrcp.f32 %v3788_v55  ;;  %v3800_v52 = vand.u32 2147483648, %v3788_v55  ;;  %v3798_v13 = vand.u32 2147483647, %v3788_v55  ;;  %vm3794_vm12 = vweird.f32 %v3788_v55 }
0x3408   :  { %v3801_v57 = vor.u32 1.1754944e-38, %v3800_v52  ;;  %vm3799_vm14 = vcmp.eq.f32.partialorder %v3798_v13, 8.507059e+37 }
0x340c   :  { %v5925_v12 = vpop.eup %5924 }
0x340d   :  { %v3790_v41 = vmul.f32 %v5925_v12, %v3788_v55  ;;  %vm3795_vm7 = vweird.f32 %v5925_v12  ;;  %v3814_v63 = vpop.permute.xlu2 %3813  ;;  %v3666_v55 = vadd.f32 1.0, %v8193_v1 }
0x340e   :  { %vm3796_vm13 = vmor %vm3794_vm12, %vm3795_vm7  ;;  %v3816_v42 = vmul.f32 %v3814_v63, %v7941_v26 }
0x340f   :  { %v3791_v0 = vsub.f32 1.0, %v3790_v41 }
0x3411   :  { %v3792_v40 = vmul.f32 %v5925_v12, %v3791_v0 }
0x3413   :  { %v3793_v31 = vadd.f32 %v5925_v12, %v3792_v40 }
0x3415   :  { %v3797_v22 = vsel %vm3796_vm13, %v5925_v12, %v3793_v31  ;;  %v9063_v12 = vmov 12  }
0x3416   :  { %v3802_v37 = vsel %vm3799_vm14, %v3801_v57, %v3797_v22  ;;  %v8237_v57 = vld [vmem:[%s8934_s5 + $0x10] sm:$0xff]  ;;  %v8243_v22 = vld [vmem:[%s8934_s5 + $0x8] sm:$0xff] }
0x3417   :  { %v3803_v43 = vmul.f32 %v5921_v53, %v3802_v37  ;;  %v8249_v37 = vld [vmem:[%s8934_s5] sm:$0xff] }
0x3419   :  { %v3809_v5 = vmul.f32 %v3807_v35, %v3803_v43 }
0x341b   :  { %v3817_v20 = vadd.f32 %v3816_v42, %v3809_v5 }
0x341d   :  { %5614 = vmatmul.msk.f32.vlgmr.msra.gmra.mxu1 %vm560_vm5, %v3817_v20 }
0x3446   :  { %v3650_v44 = vpop.xlane.xlu2 %3649 }
0x3447   :  { %5926 = vrcp.f32 %v3650_v44  ;;  %v3662_v19 = vand.u32 2147483648, %v3650_v44  ;;  %v3660_v11 = vand.u32 2147483647, %v3650_v44  ;;  %vm3656_vm7 = vweird.f32 %v3650_v44 }
0x3449   :  { %v3663_v62 = vor.u32 1.1754944e-38, %v3662_v19  ;;  %vm3661_vm13 = vcmp.eq.f32.partialorder %v3660_v11, 8.507059e+37 }
0x344d   :  { %v5927_v48 = vpop.eup %5926 }
0x344e   :  { %v3652_v46 = vmul.f32 %v5927_v48, %v3650_v44  ;;  %vm3657_vm15 = vweird.f32 %v5927_v48 }
0x344f   :  { %vm3658_vm12 = vmor %vm3656_vm7, %vm3657_vm15 }
0x3450   :  { %v3653_v23 = vsub.f32 1.0, %v3652_v46 }
0x3452   :  { %v3654_v36 = vmul.f32 %v5927_v48, %v3653_v23 }
0x3454   :  { %v3655_v32 = vadd.f32 %v5927_v48, %v3654_v36 }
0x3456   :  { %v3659_v53 = vsel %vm3658_vm12, %v5927_v48, %v3655_v32 }
0x3457   :  { %v3664_v4 = vsel %vm3661_vm13, %v3663_v62, %v3659_v53 }
0x3458   :  { %v3665_v26 = vmul.f32 %v8204_v15, %v3664_v4 }
0x345a   :  { %3843 = vperm.xlu0 %5735, %v3665_v26   ;;  %3848 = vperm.xlu1 %5733, %v3665_v26  }
0x3462   :  { %5736 = vset.pattern.permute.xlu0 %v9026_v39  ;;  %5734 = vset.pattern.permute.xlu1 %v9063_v12 }
0x3463   :  { %3872 = vperm.xlu0 %5736, %v3666_v55   ;;  %3858 = vperm.xlu1 %5734, %v3665_v26  }
0x346b   :  { %4039 = vrot.lane.b32.xlu0 %v8140_v9, %s9037_s24  ;;  %5738 = vset.pattern.permute.xlu1 %v9025_v14  ;;  %v8231_v9 = vld [vmem:[%s8934_s5 + $0x18] sm:$0xff] }
0x346c   :  { %5740 = vset.pattern.permute.xlu0 %v9063_v12 }
0x349a   :  { %v3838_v41 = vpop.f32.mrf.mxu1 }
0x34cc   :  { %v3849_v0 = vpop.permute.xlu1 %3848  ;;  %v3844_v15 = vpop.permute.xlu0 %3843 }
0x34cd   :  { %v3851_v52 = vmul.f32 %v3849_v0, %v3838_v41  ;;  %v3846_v43 = vmul.f32 %v3844_v15, %v3838_v41 }
0x34cf   :  { %3853 = vrot.lane.b32.xlu1 %v3851_v52, %s9027_s27 }
0x34d5   :  { %v3859_v1 = vpop.permute.xlu1 %3858  ;;  %v3873_v40 = vpop.permute.xlu0 %3872 }
0x34d6   :  { %v3861_v13 = vmul.f32 %v3859_v1, %v3838_v41 }
0x34d8   :  { %3863 = vrot.lane.b32.xlu1 %v3861_v13, %s9028_s2 }
0x34dd   :  { %v4040_v31 = vpop.permute.xlu0 %4039 }
0x34de   :  { %5622 = vmatmul.msk.f32.vlgmr.msrb.gmra.mxu3 %vm186_vm0, %v4040_v31 }
0x34df   :  { %4220 = vmatpush.msrb.mxu3 %v8231_v9 }
0x34e1   :  { %4221 = vmatpush.msrb.mxu3 %v8237_v57 }
0x34e3   :  { %4222 = vmatpush.msrb.mxu3 %v8243_v22 }
0x34e5   :  { %4223 = vmatpush.msrb.mxu3 %v8249_v37 }
0x3541   :  { %v3854_v63 = vpop.permute.xlu1 %3853 }
0x3542   :  { %v3856_v35 = vadd.f32 %v3854_v63, %v3846_v43 }
0x354a   :  { %v3864_v5 = vpop.permute.xlu1 %3863 }
0x354b   :  { %v3866_v42 = vadd.f32 %v3864_v5, %v3856_v35 }
0x354d   :  { %v3867_v20 = vmax.f32 %v3866_v42, 1e-30 }
0x354f   :  { %5928 = vlog2.f32 %v3867_v20 }
0x3555   :  { %v5929_v44 = vpop.eup %5928 }
0x3556   :  { %v3869_v48 = vmul.f32 0.6931472, %v5929_v44 }
0x3558   :  { %v3875_v46 = vmul.f32 %v3873_v40, %v3869_v48 }
0x355a   :  { %v3876_v23 = vmul.f32 1.442695, %v3875_v46 }
0x355c   :  { %5930 = vpow2.f32 %v3876_v23  ;;  %v8362_v23 = vld [vmem:[%s9015_s4] ss:$0 sm:$0xff]  ;;  %s6269_s4 = smov 40  }
0x3562   :  { %v5931_v19 = vpop.eup %5930 }
0x3563   :  { %v3878_v36 = vsel %vm521_vm10, %v5931_v19, 0.0 }
0x3564   :  { %3879 = vadd.xlane.f32.xlu1 %v3878_v36 }
0x35d7   :  { %v3880_v11 = vpop.xlane.xlu1 %3879 }
0x35d8   :  { %v3881_v32 = vadd.f32 1e-16, %v3880_v11 }
0x35da   :  { %5932 = vrcp.f32 %v3881_v32  ;;  %v3893_v26 = vand.u32 2147483648, %v3881_v32  ;;  %v3891_v41 = vand.u32 2147483647, %v3881_v32  ;;  %vm3887_vm15 = vweird.f32 %v3881_v32 }
0x35dc   :  { %v3894_v15 = vor.u32 1.1754944e-38, %v3893_v26  ;;  %vm3892_vm12 = vcmp.eq.f32.partialorder %v3891_v41, 8.507059e+37 }
0x35e0   :  { %v5933_v62 = vpop.eup %5932 }
0x35e1   :  { %v3883_v53 = vmul.f32 %v5933_v62, %v3881_v32  ;;  %vm3888_vm14 = vweird.f32 %v5933_v62 }
0x35e2   :  { %vm3889_vm7 = vmor %vm3887_vm15, %vm3888_vm14 }
0x35e3   :  { %v3884_v4 = vsub.f32 1.0, %v3883_v53 }
0x35e5   :  { %v3885_v55 = vmul.f32 %v5933_v62, %v3884_v4 }
0x35e7   :  { %v3886_v0 = vadd.f32 %v5933_v62, %v3885_v55 }
0x35e9   :  { %v3890_v52 = vsel %vm3889_vm7, %v5933_v62, %v3886_v0 }
0x35ea   :  { %v3895_v1 = vsel %vm3892_vm12, %v3894_v15, %v3890_v52 }
0x35eb   :  { %v8253_v40 = vmul.f32 %v5931_v19, %v3895_v1 }
0x35ed   :  { %5615 = vmatpush.msk.msrb.mxu2 %vm644_vm8, %v8253_v40  ;;  %5617 = vmatpush.msk.msrb.mxu1 %vm644_vm8, %v8253_v40 }
0x35ee   :  { %5616 = vmatmul.msk.f32.vlgmr.msrb.gmra.mxu2 %vm640_vm9, %v7950_v29  ;;  %5618 = vmatmul.msk.f32.vlgmr.msrb.gmra.mxu1 %vm640_vm9, %v7957_v38  ;;  %v8287_v38 = vld [vmem:[%s8939_s10] sm:$0xff] }
0x35ef   :  { %3957 = vmatpush.msra.mxu2 %v7964_v51  ;;  %3964 = vmatpush.msra.mxu1 %v7970_v3  ;;  %v9064_v3 = vld [vmem:[#allocation14_spill] sm:$0xff] }
0x35f1   :  { %3958 = vmatpush.msra.mxu2 %v7976_v2  ;;  %3965 = vmatpush.msra.mxu1 %v7982_v61  ;;  %v4013_v61 = vpop.permute.xlu2 %4012 }
0x35f3   :  { %4005 = vmatpush.msrb.mxu2 %v7964_v51  ;;  %3966 = vmatpush.msra.mxu1 %v7989_v21  ;;  %v9066_v21 = vld [vmem:[#allocation18_spill] sm:$0xff] }
0x35f5   :  { %4006 = vmatpush.msrb.mxu2 %v7976_v2  ;;  %3967 = vmatpush.msra.mxu1 %v7996_v24  ;;  %v9065_v2 = vld [vmem:[#allocation15_spill] sm:$0xff]  ;;  %v8299_v24 = vld [vmem:[%s9013_s28 + $0x28] sm:$0xff] }
0x35f7   :  { %3968 = vmatpush.msra.mxu1 %v8002_v30  ;;  %v8305_v30 = vld [vmem:[%s9013_s28 + $0x20] sm:$0xff] }
0x35f9   :  { %3969 = vmatpush.msra.mxu1 %v8008_v25  ;;  %v8311_v25 = vld [vmem:[%s9013_s28 + $0x18] sm:$0xff] }
0x35fb   :  { %3970 = vmatpush.msra.mxu1 %v8014_v58  ;;  %v8317_v58 = vld [vmem:[%s9013_s28 + $0x10] sm:$0xff] }
0x35fd   :  { %3971 = vmatpush.msra.mxu1 %v8020_v10  ;;  %v8325_v10 = vld [vmem:[%s9014_s21] sm:$0x3]  ;;  %s9088_s21 = sld [smem:[#allocation29_spill]] }
0x35fe   :  { %4135 = vrot.lane.b32.xlu0 %v8325_v10, %s6267_s20 }
0x35ff   :  { %3972 = vmatpush.msra.mxu1 %v8026_v33 }
0x3601   :  { %3973 = vmatpush.msra.mxu1 %v8032_v27 }
0x3603   :  { %3974 = vmatpush.msra.mxu1 %v8038_v49 }
0x3605   :  { %3975 = vmatpush.msra.mxu1 %v8044_v60 }
0x3607   :  { %3976 = vmatpush.msra.mxu1 %v8050_v34 }
0x3609   :  { %3977 = vmatpush.msra.mxu1 %v8056_v17 }
0x360b   :  { %3978 = vmatpush.msra.mxu1 %v8062_v28  ;;  %v4060_v28 = vpop.f32.mrf.mxu3 }
0x360d   :  { %3979 = vmatpush.msra.mxu1 %v8068_v6 }
0x366b   :  { %v3937_v51 = vpop.f32.mrf.mxu1 }
0x3670   :  { %v4136_v43 = vpop.permute.xlu0 %4135 }
0x3671   :  { %v3917_v29 = vpop.f32.mrf.mxu2 }
0x3672   :  { %5619 = vmatmul.msk.f32.vlgmr.msra.gmra.mxu2 %vm560_vm5, %v3917_v29 }
0x3673   :  { %4031 = vmatpush.msra.mxu2 %v8287_v38 }
0x367a   :  { %5620 = vmatmul.msk.f32.vlgmr.msrb.gmra.mxu2 %vm560_vm5, %v3937_v51 }
0x367b   :  { %4100 = vmatpush.msrb.mxu2 %v8077_v7 }
0x367d   :  { %4101 = vmatpush.msrb.mxu2 %v9064_v3 }
0x367f   :  { %4102 = vmatpush.msrb.mxu2 %v9065_v2  ;;  %v8392_v2 = vld [vmem:[%s8943_s14] sm:$0xf] }
0x3681   :  { %4103 = vmatpush.msrb.mxu2 %v9066_v21  ;;  %v8405_v21 = vld [vmem:[%s8940_s11 + $0x70] sm:$0xff] }
0x3682   :  { %5621 = vmatmul.msk.f32.vlgmr.msra.gmra.mxu2 %vm186_vm0, %v4013_v61  ;;  %v8399_v61 = vld [vmem:[%s8940_s11 + $0x78] sm:$0xff] }
0x3683   :  { %4171 = vmatpush.msra.mxu2 %v8299_v24 }
0x3685   :  { %4172 = vmatpush.msra.mxu2 %v8305_v30 }
0x3687   :  { %4173 = vmatpush.msra.mxu2 %v8311_v25 }
0x3689   :  { %4174 = vmatpush.msra.mxu2 %v8317_v58 }
0x368a   :  { %5624 = vmatmul.msk.f32.vlgmr.msrb.gmra.mxu2 %vm234_vm3, %v8135_v54 }
0x3692   :  { %5627 = vmatmul.msk.f32.vlgmr.msra.gmra.mxu2 %vm234_vm3, %v8135_v54  ;;  %v8342_v54 = vld [vmem:[%s8938_s9 + $0x8] sm:$0xff] }
0x36f5   :  { %v3960_v33 = vpop.f32.mrf.mxu2 }
0x36f6   :  { %v3963_v27 = vmul.f32 %v3960_v33, %v8110_v50  ;;  %v8411_v33 = vld [vmem:[%s8940_s11 + $0x68] sm:$0xff] }
0x36f8   :  { %3980 = vmatmul.f32.vlgmr.msra.gmra.mxu1 %v3963_v27  ;;  %v8417_v27 = vld [vmem:[%s8940_s11 + $0x60] sm:$0xff] }
0x36fd   :  { %v4008_v49 = vpop.f32.mrf.mxu2 }
0x36fe   :  { %v4063_v6 = vmul.f32 %v4060_v28, %v4008_v49  ;;  %v8447_v28 = vld [vmem:[%s8940_s11 + $0x38] sm:$0xff] }
0x3705   :  { %v4033_v60 = vpop.f32.mrf.mxu2 }
0x3706   :  { %v4036_v34 = vmul.f32 %v4033_v60, %v4008_v49  ;;  %v8423_v49 = vld [vmem:[%s8940_s11 + $0x58] sm:$0xff]  ;;  %v8429_v60 = vld [vmem:[%s8940_s11 + $0x50] sm:$0xff] }
0x3708   :  { %v4037_v17 = vsub.f32 1.0, %v4036_v34  ;;  %v8435_v34 = vld [vmem:[%s8940_s11 + $0x48] sm:$0xff] }
0x370a   :  { %v4038_v7 = vmul.f32 %v4037_v17, %v8110_v50  ;;  %v8348_v50 = vld [vmem:[%s8938_s9] sm:$0xff]  ;;  %s6268_s9 = smov 72  }
0x370b   :  { %v8441_v17 = vld [vmem:[%s8940_s11 + $0x40] sm:$0xff] }
0x370c   :  { %v8333_v13 = vadd.f32 %v4063_v6, %v4038_v7  ;;  %v8453_v6 = vld [vmem:[%s8940_s11 + $0x30] sm:$0xff]  ;;  %v8459_v7 = vld [vmem:[%s8940_s11 + $0x28] sm:$0xff] }
0x370d   :  { %v8355_v35 = vpop.f32.mrf.mxu2 }
0x370e   :  { %v4317_v31 = vadd.f32 1e-16, %v8333_v13  ;;  %9067 = vst [vmem:[#allocation13_spill] sm:$0xff] %v8355_v35 }
0x3710   :  { %5633 = vmatpush.msk.msrb.mxu2 %vm134_vm1, %v4317_v31  ;;  %v8465_v31 = vld [vmem:[%s8940_s11 + $0x20] sm:$0xff] }
0x3711   :  { %5634 = vmatmul.msk.f32.vlgmr.msrb.gmra.mxu2 %vm130_vm2, %v9032_v8 }
0x3712   :  { %4485 = vmatpush.msra.mxu2 %v8342_v54 }
0x3714   :  { %4486 = vmatpush.msra.mxu2 %v8348_v50 }
0x3715   :  { %v4176_v48 = vpop.f32.mrf.mxu2 }
0x3775   :  { %v3981_v63 = vpop.f32.mrf.mxu1 }
0x3776   :  { %5623 = vmatmul.msk.f32.vlgmr.msra.gmra.mxu0 %vm186_vm0, %v3981_v63  ;;  %5625 = vmatmul.msk.f32.vlgmr.msra.gmra.mxu3 %vm186_vm0, %v3981_v63  ;;  %v8471_v63 = vld [vmem:[%s8940_s11 + $0x18] sm:$0xff] }
0x3777   :  { %4359 = vmatpush.msra.mxu3 %v8287_v38 }
0x377e   :  { %5626 = vmatmul.msk.f32.vlgmr.msrb.gmra.mxu0 %vm186_vm0, %v4136_v43  ;;  %v8477_v43 = vld [vmem:[%s8940_s11 + $0x10] sm:$0xff] }
0x37f3   :  { %v8357_v5 = vpop.f32.mrf.mxu0 }
0x37f4   :  { %9068 = vst [vmem:[#allocation14_spill] sm:$0xff] %v8357_v5 }
0x37f9   :  { %v4132_v42 = vpop.f32.mrf.mxu3 }
0x37fb   :  { %v4156_v20 = vpop.f32.mrf.mxu0 }
0x37fc   :  { %v4157_v44 = vadd.f32 %v4156_v20, %v4132_v42  ;;  %v8483_v42 = vld [vmem:[%s8940_s11 + $0x8] sm:$0xff]  ;;  %v8489_v20 = vld [vmem:[%s8940_s11] sm:$0xff]  ;;  %s5469_s11 = sshll.u32 %s6275_s25, 4  ;;  %s5470_s11 = int_to_ptr.vmem [resolvable:$true] %s5469_s11 }
0x37fe   :  { %v4179_v46 = vadd.f32 %v4176_v48, %v4157_v44  ;;  %v4338_v44 = vpop.f32.mrf.mxu2 }
0x37ff   :  { %v4385_v48 = vmul.f32 %v4338_v44, %v4338_v44 }
0x3800   :  { %v4180_v19 = vadd.f32 %v8362_v23, %v4179_v46  ;;  %v6144_v46 = vld [vmem:[%s9013_s28] sm:$0xff] }
0x3802   :  { %5934 = vtanh.f32 %v4180_v19  ;;  %v4181_v11 = vmul.f32 0.5, %v4180_v19 }
0x3804   :  { %5936 = vtanh.f32 %v4181_v11 }
0x3808   :  { %v5935_v36 = vpop.eup %5934 }
0x3809   :  { %4188 = vrot.lane.b32.xlu0 %v5935_v36, %s9045_s0  ;;  %v8500_v36 = vld [vmem:[%s8944_s15] sm:$0xf] }
0x380a   :  { %v5937_v32 = vpop.eup %5936 }
0x380b   :  { %v4183_v62 = vadd.f32 1.0, %v5937_v32 }
0x380d   :  { %v4184_v53 = vmul.f32 0.5, %v4183_v62 }
0x380f   :  { %v4186_v55 = vmul.f32 %v4184_v53, %v8130_v16  ;;  %v8380_v16 = vld [vmem:[%s8935_s6] ss:$0 sm:$0xff]  ;;  %s5471_s6 = sshll.u32 %s9088_s21, 4  ;;  %s5472_s6 = int_to_ptr.hbm [resolvable:$true] %s5471_s6 }
0x387b   :  { %v4189_v4 = vpop.permute.xlu0 %4188 }
0x387c   :  { %v4191_v26 = vmul.f32 %v4189_v4, %v4184_v53 }
0x387e   :  { %4193 = vrot.lane.b32.xlu2 %v4191_v26, %s9035_s3 }
0x38d8   :  { %v4194_v41 = vpop.permute.xlu2 %4193 }
0x38d9   :  { %v8368_v0 = vadd.f32 %v4194_v41, %v4186_v55 }
0x38db   :  { %5938 = vtanh.f32 %v8368_v0 }
0x38e1   :  { %v5939_v15 = vpop.eup %5938 }
0x38e2   :  { %4199 = vrot.lane.b32.xlu0 %v5939_v15, %s9045_s0 }
0x3954   :  { %v4200_v52 = vpop.permute.xlu0 %4199 }
0x3955   :  { %v4202_v1 = vmul.f32 %v4200_v52, %v4184_v53 }
0x3957   :  { %4204 = vrot.lane.b32.xlu2 %v4202_v1, %s9035_s3 }
0x39b1   :  { %v8373_v29 = vpop.permute.xlu2 %4204 }
0x39b2   :  { %5628 = vmatmul.msk.f32.vlgmr.msrb.gmra.mxu3 %vm234_vm3, %v8373_v29 }
0x3a35   :  { %v4225_v51 = vpop.f32.mrf.mxu3 }
0x3a36   :  { %v8383_v3 = vadd.f32 %v8380_v16, %v4225_v51 }
0x3a38   :  { %4229 = vrot.lane.b32.xlu0 %v8383_v3, %s9020_s26  ;;  %5631 = vmatpush.msk.msrb.mxu1 %vm134_vm1, %v8383_v3 }
0x3a39   :  { %5632 = vmatmul.msk.f32.vlgmr.msrb.gmra.mxu1 %vm130_vm2, %v8392_v2 }
0x3a3a   :  { %4386 = vmatpush.msra.mxu1 %v8399_v61 }
0x3a3c   :  { %4387 = vmatpush.msra.mxu1 %v8405_v21 }
0x3a3e   :  { %4388 = vmatpush.msra.mxu1 %v8411_v33 }
0x3a40   :  { %4389 = vmatpush.msra.mxu1 %v8417_v27 }
0x3a42   :  { %4390 = vmatpush.msra.mxu1 %v8423_v49 }
0x3a44   :  { %4391 = vmatpush.msra.mxu1 %v8429_v60 }
0x3a46   :  { %4392 = vmatpush.msra.mxu1 %v8435_v34 }
0x3a48   :  { %4393 = vmatpush.msra.mxu1 %v8441_v17 }
0x3a4a   :  { %4394 = vmatpush.msra.mxu1 %v8447_v28 }
0x3a4c   :  { %4395 = vmatpush.msra.mxu1 %v8453_v6 }
0x3a4e   :  { %4396 = vmatpush.msra.mxu1 %v8459_v7 }
0x3a50   :  { %4397 = vmatpush.msra.mxu1 %v8465_v31 }
0x3a52   :  { %4398 = vmatpush.msra.mxu1 %v8471_v63 }
0x3a54   :  { %4399 = vmatpush.msra.mxu1 %v8477_v43 }
0x3a56   :  { %4400 = vmatpush.msra.mxu1 %v8483_v42 }
0x3a58   :  { %4401 = vmatpush.msra.mxu1 %v8489_v20 }
0x3a59   :  { %4402 = vmatmul.f32.vlgmr.msra.gmra.mxu1 %v4385_v48 }
0x3a5a   :  { %4733 = vmatpush.msrb.mxu1 %v8167_v56 }
0x3a5c   :  { %4804 = vmatpush.msra.mxu1 %v6144_v46 }
0x3aaa   :  { %v4230_v19 = vpop.permute.xlu0 %4229 }
0x3aab   :  { %5629 = vmatpush.msk.msra.mxu0 %vm134_vm1, %v4230_v19 }
0x3aac   :  { %5630 = vmatmul.msk.f32.vlgmr.msra.gmra.mxu0 %vm130_vm2, %v8500_v36 }
0x3aad   :  { %4365 = vmatpush.msrb.mxu0 %v8399_v61 }
0x3aaf   :  { %4366 = vmatpush.msrb.mxu0 %v8405_v21 }
0x3ab1   :  { %4367 = vmatpush.msrb.mxu0 %v8411_v33 }
0x3ab3   :  { %4368 = vmatpush.msrb.mxu0 %v8417_v27 }
0x3ab5   :  { %4369 = vmatpush.msrb.mxu0 %v8423_v49 }
0x3ab6   :  { %v4272_v56 = vpop.f32.mrf.mxu1 }
0x3ab7   :  { %4370 = vmatpush.msrb.mxu0 %v8429_v60 }
0x3ab9   :  { %4371 = vmatpush.msrb.mxu0 %v8435_v34 }
0x3abb   :  { %4372 = vmatpush.msrb.mxu0 %v8441_v17 }
0x3abd   :  { %4373 = vmatpush.msrb.mxu0 %v8447_v28 }
0x3abf   :  { %4374 = vmatpush.msrb.mxu0 %v8453_v6 }
0x3ac1   :  { %4375 = vmatpush.msrb.mxu0 %v8459_v7 }
0x3ac3   :  { %4376 = vmatpush.msrb.mxu0 %v8465_v31 }
0x3ac5   :  { %4377 = vmatpush.msrb.mxu0 %v8471_v63 }
0x3ac7   :  { %4378 = vmatpush.msrb.mxu0 %v8477_v43 }
0x3ac9   :  { %4379 = vmatpush.msrb.mxu0 %v8483_v42 }
0x3acb   :  { %4380 = vmatpush.msrb.mxu0 %v8489_v20 }
0x3acd   :  { %4708 = vmatpush.msra.mxu0 %v8287_v38 }
0x3b29   :  { %v4250_v11 = vpop.f32.mrf.mxu0 }
0x3b2a   :  { %v4273_v32 = vadd.f32 %v4272_v56, %v4250_v11 }
0x3b2c   :  { %v4275_v62 = vadd.f32 1e-16, %v4273_v32  ;;  %v4277_v53 = vmin.f32 %v4273_v32, 20.0  ;;  %v4284_v52 = vmul.f32 0.5, %v4273_v32  ;;  %vm4276_vm13 = vcmp.gt.f32.partialorder %v4273_v32, 20.0 }
0x3b2d   :  { %v4288_v11 = vsel %vm373_vm6, %v4273_v32, -inf }
0x3b2e   :  { %5635 = vmatmul.msk.f32.vlgmr.msra.gmra.mxu3 %vm186_vm0, %v4275_v62  ;;  %v4406_v4 = vmul.f32 %v4275_v62, %v4275_v62  ;;  %v4278_v26 = vmul.f32 1.442695, %v4277_v53 }
0x3b30   :  { %v4407_v55 = vsel %vm497_vm4, %v4406_v4, 0.0  ;;  %5940 = vpow2.f32 %v4278_v26  ;;  %v4403_v4 = vpop.f32.mrf.mxu1 }
0x3b31   :  { %4408 = vadd.xlane.f32.xlu1 %v4407_v55  ;;  %v4410_v55 = vmax.f32 %v4403_v4, 1e-16 }
0x3b36   :  { %v5941_v41 = vpop.eup %5940 }
0x3b37   :  { %v4280_v15 = vadd.f32 1.0, %v5941_v41 }
0x3b39   :  { %5942 = vlog2.f32 %v4280_v15 }
0x3b3a   :  { %5944 = vtanh.f32 %v4284_v52 }
0x3b3f   :  { %v5943_v1 = vpop.eup %5942 }
0x3b40   :  { %v4282_v51 = vmul.f32 0.6931472, %v5943_v1  ;;  %v5945_v48 = vpop.eup %5944 }
0x3b41   :  { %v4286_v19 = vadd.f32 1.0, %v5945_v48 }
0x3b42   :  { %v4283_v46 = vsel %vm4276_vm13, %v4273_v32, %v4282_v51 }
0x3b43   :  { %4426 = vperm.xlu2 %5737, %v4283_v46   ;;  %v4287_v56 = vmul.f32 0.5, %v4286_v19 }
0x3b4a   :  { %4456 = vperm.xlu1 %5738, %v4287_v56  }
0x3b4b   :  { %5739 = vset.pattern.permute.xlu2 %v9062_v18 }
0x3b6c   :  { %4289 = vmax.xlane.f32.xlu2 %v4288_v11 }
0x3b9d   :  { %v4427_v11 = vpop.permute.xlu2 %4426 }
0x3ba4   :  { %v4409_v26 = vpop.xlane.xlu1 %4408 }
0x3ba5   :  { %v4411_v41 = vmax.f32 %v4409_v26, 1e-16 }
0x3ba7   :  { %v4412_v15 = vmul.f32 %v4411_v41, %v4410_v55 }
0x3ba9   :  { %5946 = vrsqrt.f32 %v4412_v15  ;;  %vm4419_vm15 = vweird.f32 %v4412_v15 }
0x3baf   :  { %v5947_v52 = vpop.eup %5946 }
0x3bb0   :  { %v4414_v1 = vmul.f32 %v5947_v52, %v4412_v15  ;;  %vm4420_vm14 = vweird.f32 %v5947_v52 }
0x3bb1   :  { %v4361_v62 = vpop.f32.mrf.mxu3  ;;  %vm4421_vm7 = vmor %vm4419_vm15, %vm4420_vm14 }
0x3bb2   :  { %v4364_v53 = vmul.f32 %v4361_v62, %v4338_v44  ;;  %v4415_v51 = vmul.f32 %v5947_v52, %v4414_v1 }
0x3bb4   :  { %4381 = vmatmul.f32.vlgmr.msrb.gmra.mxu0 %v4364_v53  ;;  %v4416_v48 = vmul.f32 0.5, %v4415_v51 }
0x3bb5   :  { %4780 = vmatpush.msrb.mxu0 %v8201_v59 }
0x3bb6   :  { %v4417_v19 = vsub.f32 1.5, %v4416_v48 }
0x3bb8   :  { %v4418_v35 = vmul.f32 %v5947_v52, %v4417_v19 }
0x3bba   :  { %v4422_v62 = vsel %vm4421_vm7, %v5947_v52, %v4418_v35  ;;  %v4460_v35 = vsub.f32 1.0, %v4287_v56  ;;  %v4316_v52 = vadd.f32 1.0, %v4283_v46 }
0x3bdf   :  { %v4290_v4 = vpop.xlane.xlu2 %4289 }
0x3be0   :  { %v4291_v26 = vsub.f32 %v4273_v32, %v4290_v4 }
0x3be2   :  { %v4292_v55 = vmul.f32 1.442695, %v4291_v26 }
0x3be4   :  { %5948 = vpow2.f32 %v4292_v55 }
0x3bea   :  { %v5949_v41 = vpop.eup %5948 }
0x3c31   :  { %v4382_v44 = vpop.f32.mrf.mxu0 }
0x3c32   :  { %v4423_v53 = vmul.f32 %v4422_v62, %v4382_v44 }
0x3c34   :  { %v4429_v59 = vmul.f32 %v4427_v11, %v4423_v53  ;;  %v4457_v11 = vpop.permute.xlu1 %4456 }
0x3c36   :  { %v4430_v5 = vsel %vm521_vm10, %v4429_v59, -inf }
0x3c37   :  { %4431 = vmax.xlane.f32.xlu0 %v4430_v5 }
0x3c4b   :  { %4295 = vrot.lane.b32.xlu0 %v5949_v41, %s9036_s23 }
0x3caa   :  { %v4432_v1 = vpop.xlane.xlu0 %4431 }
0x3cab   :  { %v4433_v51 = vsub.f32 %v4429_v59, %v4432_v1 }
0x3cad   :  { %v4434_v48 = vmul.f32 1.442695, %v4433_v51 }
0x3caf   :  { %5950 = vpow2.f32 %v4434_v48 }
0x3cb5   :  { %v5951_v15 = vpop.eup %5950 }
0x3cb6   :  { %v4436_v19 = vsel %vm521_vm10, %v5951_v15, 0.0 }
0x3cb7   :  { %4437 = vadd.xlane.f32.xlu1 %v4436_v19 }
0x3cbd   :  { %v4296_v5 = vpop.permute.xlu0 %4295 }
0x3cbe   :  { %v4298_v32 = vsel %vm384_vm11, %v4296_v5, 0.0 }
0x3cd0   :  { %4463 = vperm.xlu1 %5738, %v4460_v35  }
0x3cd8   :  { %5742 = vset.pattern.permute.xlu1 %v9026_v39 }
0x3cfa   :  { %4299 = vadd.xlane.f32.xlu1 %v4298_v32 }
0x3d13   :  { %4522 = vperm.xlu1 %5742, %v4316_v52  }
0x3d1b   :  { %5744 = vset.pattern.permute.xlu1 %v9025_v14 }
0x3d2a   :  { %v4438_v44 = vpop.xlane.xlu1 %4437 }
0x3d2b   :  { %5952 = vrcp.f32 %v4438_v44  ;;  %v4450_v56 = vand.u32 2147483648, %v4438_v44  ;;  %v4448_v26 = vand.u32 2147483647, %v4438_v44  ;;  %vm4444_vm13 = vweird.f32 %v4438_v44 }
0x3d2d   :  { %v4451_v1 = vor.u32 1.1754944e-38, %v4450_v56  ;;  %vm4449_vm15 = vcmp.eq.f32.partialorder %v4448_v26, 8.507059e+37 }
0x3d31   :  { %v5953_v62 = vpop.eup %5952 }
0x3d32   :  { %v4440_v53 = vmul.f32 %v5953_v62, %v4438_v44  ;;  %vm4445_vm12 = vweird.f32 %v5953_v62 }
0x3d33   :  { %vm4446_vm14 = vmor %vm4444_vm13, %vm4445_vm12 }
0x3d34   :  { %v4441_v59 = vsub.f32 1.0, %v4440_v53 }
0x3d36   :  { %v4442_v4 = vmul.f32 %v5953_v62, %v4441_v59 }
0x3d38   :  { %v4443_v55 = vadd.f32 %v5953_v62, %v4442_v4 }
0x3d3a   :  { %v4447_v51 = vsel %vm4446_vm14, %v5953_v62, %v4443_v55 }
0x3d3b   :  { %v4452_v46 = vsel %vm4449_vm15, %v4451_v1, %v4447_v51  ;;  %v4634_v51 = vmul.f32 0.5, %v8383_v3 }
0x3d3c   :  { %v4453_v48 = vmul.f32 %v5951_v15, %v4452_v46 }
0x3d3e   :  { %v4459_v35 = vmul.f32 %v4457_v11, %v4453_v48 }
0x3d42   :  { %v4464_v19 = vpop.permute.xlu1 %4463 }
0x3d43   :  { %v4466_v5 = vmul.f32 %v4464_v19, %v8253_v40 }
0x3d45   :  { %v4467_v32 = vadd.f32 %v4466_v5, %v4459_v35 }
0x3d47   :  { %5636 = vmatmul.msk.f32.vlgmr.msra.gmra.mxu2 %vm560_vm5, %v4467_v32 }
0x3d6d   :  { %v4300_v52 = vpop.xlane.xlu1 %4299 }
0x3d6e   :  { %5954 = vrcp.f32 %v4300_v52  ;;  %v4312_v4 = vand.u32 2147483648, %v4300_v52  ;;  %v4310_v56 = vand.u32 2147483647, %v4300_v52  ;;  %vm4306_vm12 = vweird.f32 %v4300_v52 }
0x3d6f   :  { %5956 = vtanh.f32 %v4634_v51 }
0x3d70   :  { %v4313_v15 = vor.u32 1.1754944e-38, %v4312_v4  ;;  %vm4311_vm14 = vcmp.eq.f32.partialorder %v4310_v56, 8.507059e+37 }
0x3d74   :  { %v5955_v53 = vpop.eup %5954 }
0x3d75   :  { %v4302_v59 = vmul.f32 %v5955_v53, %v4300_v52  ;;  %vm4307_vm7 = vweird.f32 %v5955_v53 }
0x3d76   :  { %vm4308_vm13 = vmor %vm4306_vm12, %vm4307_vm7 }
0x3d77   :  { %v4303_v39 = vsub.f32 1.0, %v4302_v59 }
0x3d79   :  { %v4304_v44 = vmul.f32 %v5955_v53, %v4303_v39 }
0x3d7b   :  { %v4305_v62 = vadd.f32 %v5955_v53, %v4304_v44 }
0x3d7d   :  { %v4309_v11 = vsel %vm4308_vm13, %v5955_v53, %v4305_v62 }
0x3d7e   :  { %v4314_v26 = vsel %vm4311_vm14, %v4313_v15, %v4309_v11 }
0x3d7f   :  { %v4315_v40 = vmul.f32 %v5949_v41, %v4314_v26  ;;  %v5957_v41 = vpop.eup %5956 }
0x3d80   :  { %v4636_v19 = vadd.f32 1.0, %v5957_v41 }
0x3d81   :  { %4508 = vperm.xlu0 %5740, %v4315_v40   ;;  %4498 = vperm.xlu2 %5739, %v4315_v40  }
0x3d82   :  { %v4637_v35 = vmul.f32 0.5, %v4636_v19 }
0x3d85   :  { %v4523_v62 = vpop.permute.xlu1 %4522 }
0x3d89   :  { %5741 = vset.pattern.permute.xlu2 %v9046_v45  ;;  %5745 = vset.pattern.permute.xlu0 %v9025_v14 }
0x3d8a   :  { %4493 = vperm.xlu2 %5741, %v4315_v40  }
0x3d92   :  { %5743 = vset.pattern.permute.xlu2 %v9023_v47 }
0x3dca   :  { %v4488_v39 = vpop.f32.mrf.mxu2 }
0x3ddb   :  { %v4499_v55 = vpop.permute.xlu2 %4498 }
0x3ddc   :  { %v4501_v1 = vmul.f32 %v4499_v55, %v4488_v39 }
0x3dde   :  { %4503 = vrot.lane.b32.xlu2 %v4501_v1, %s9027_s27 }
0x3de4   :  { %v4494_v47 = vpop.permute.xlu2 %4493 }
0x3de5   :  { %v4496_v5 = vmul.f32 %v4494_v47, %v4488_v39  ;;  %v8560_v47 = vld [vmem:[%s8945_s16] sm:$0x3]  ;;  %s6277_s16 = smov [#allocation2]  }
0x3df3   :  { %v4509_v46 = vpop.permute.xlu0 %4508 }
0x3df4   :  { %v4511_v48 = vmul.f32 %v4509_v46, %v4488_v39 }
0x3df6   :  { %4513 = vrot.lane.b32.xlu0 %v4511_v48, %s9028_s2 }
0x3dfe   :  { %4662 = vrot.lane.b32.xlu0 %v4637_v35, %s9029_s22 }
0x3e06   :  { %4689 = vrot.lane.b32.xlu0 %v8383_v3, %s9037_s24 }
0x3e0e   :  { %4785 = vrot.lane.b32.xlu0 %v8325_v10, %s6268_s9 }
0x3e38   :  { %v4504_v14 = vpop.permute.xlu2 %4503 }
0x3e39   :  { %v4506_v32 = vadd.f32 %v4504_v14, %v4496_v5  ;;  %v8567_v14 = vld [vmem:[%s8946_s17] sm:$0x3]  ;;  %v8574_v5 = vld [vmem:[%s8941_s12 + $0x8] sm:$0xff]  ;;  %s9089_s17 = sld [smem:[#allocation27_spill]] }
0x3e3f   :  { %s5449_s14 = sshll.u32 %s9089_s17, 4  ;;  %s5450_s14 = int_to_ptr.hbm [resolvable:$true] %s5449_s14 }
0x3e68   :  { %v4514_v52 = vpop.permute.xlu0 %4513 }
0x3e69   :  { %v4516_v53 = vadd.f32 %v4514_v52, %v4506_v32  ;;  %v8580_v32 = vld [vmem:[%s8942_s13 + $0x78] sm:$0xff]  ;;  %v8586_v52 = vld [vmem:[%s8941_s12] sm:$0xff] }
0x3e6b   :  { %v4517_v59 = vmax.f32 %v4516_v53, 1e-30  ;;  %v8592_v53 = vld [vmem:[%s8942_s13 + $0x70] sm:$0xff] }
0x3e6d   :  { %5958 = vlog2.f32 %v4517_v59  ;;  %v8599_v59 = vld [vmem:[%s8942_s13 + $0x68] sm:$0xff] }
0x3e70   :  { %v8543_v4 = vpop.permute.xlu0 %4662 }
0x3e73   :  { %v5959_v44 = vpop.eup %5958 }
0x3e74   :  { %v4519_v56 = vmul.f32 0.6931472, %v5959_v44  ;;  %v8606_v44 = vld [vmem:[%s8942_s13 + $0x60] sm:$0xff] }
0x3e76   :  { %v4525_v15 = vmul.f32 %v4523_v62, %v4519_v56  ;;  %v8612_v56 = vld [vmem:[%s8942_s13 + $0x58] sm:$0xff]  ;;  %v8618_v62 = vld [vmem:[%s8942_s13 + $0x50] sm:$0xff] }
0x3e78   :  { %v4526_v11 = vmul.f32 1.442695, %v4525_v15  ;;  %v4690_v26 = vpop.permute.xlu0 %4689  ;;  %v8624_v15 = vld [vmem:[%s8942_s13 + $0x48] sm:$0xff] }
0x3e79   :  { %5644 = vmatmul.msk.f32.vlgmr.msra.gmra.mxu0 %vm186_vm0, %v4690_v26  ;;  %v8636_v26 = vld [vmem:[%s8942_s13 + $0x38] sm:$0xff] }
0x3e7a   :  { %5960 = vpow2.f32 %v4526_v11  ;;  %4870 = vmatpush.msra.mxu0 %v8231_v9  ;;  %v8630_v11 = vld [vmem:[%s8942_s13 + $0x40] sm:$0xff] }
0x3e7c   :  { %4871 = vmatpush.msra.mxu0 %v8237_v57 }
0x3e7e   :  { %4872 = vmatpush.msra.mxu0 %v8243_v22 }
0x3e80   :  { %v5961_v3 = vpop.eup %5960  ;;  %4873 = vmatpush.msra.mxu0 %v8249_v37 }
0x3e81   :  { %v4528_v40 = vsel %vm521_vm10, %v5961_v3, 0.0 }
0x3e82   :  { %4529 = vadd.xlane.f32.xlu2 %v4528_v40  ;;  %v8648_v40 = vld [vmem:[%s8942_s13 + $0x28] sm:$0xff] }
0x3ef5   :  { %v4530_v39 = vpop.xlane.xlu2 %4529 }
0x3ef6   :  { %v4531_v55 = vadd.f32 1e-16, %v4530_v39  ;;  %v8654_v39 = vld [vmem:[%s8942_s13 + $0x20] sm:$0xff] }
0x3ef8   :  { %5962 = vrcp.f32 %v4531_v55  ;;  %v4543_v48 = vand.u32 2147483648, %v4531_v55  ;;  %v4541_v9 = vand.u32 2147483647, %v4531_v55  ;;  %vm4537_vm7 = vweird.f32 %v4531_v55 }
0x3efa   :  { %v4544_v57 = vor.u32 1.1754944e-38, %v4543_v48  ;;  %vm4542_vm13 = vcmp.eq.f32.partialorder %v4541_v9, 8.507059e+37  ;;  %v8687_v9 = vld [vmem:[%s8936_s7 + $0x18] sm:$0xff] }
0x3efe   :  { %v5963_v1 = vpop.eup %5962 }
0x3eff   :  { %v4533_v51 = vmul.f32 %v5963_v1, %v4531_v55  ;;  %vm4538_vm15 = vweird.f32 %v5963_v1  ;;  %v8660_v55 = vld [vmem:[%s8942_s13 + $0x18] sm:$0xff] }
0x3f00   :  { %vm4539_vm12 = vmor %vm4537_vm7, %vm4538_vm15 }
0x3f01   :  { %v4534_v46 = vsub.f32 1.0, %v4533_v51  ;;  %v8672_v51 = vld [vmem:[%s8942_s13 + $0x8] sm:$0xff] }
0x3f03   :  { %v4535_v41 = vmul.f32 %v5963_v1, %v4534_v46  ;;  %v8678_v46 = vld [vmem:[%s8942_s13] sm:$0xff] }
0x3f05   :  { %v4536_v19 = vadd.f32 %v5963_v1, %v4535_v41 }
0x3f07   :  { %v4540_v22 = vsel %vm4539_vm12, %v5963_v1, %v4536_v19  ;;  %v8666_v1 = vld [vmem:[%s8942_s13 + $0x10] sm:$0xff] }
0x3f08   :  { %v4545_v37 = vsel %vm4542_vm13, %v4544_v57, %v4540_v22  ;;  %v8693_v19 = vld [vmem:[%s8936_s7 + $0x10] sm:$0xff]  ;;  %v8699_v57 = vld [vmem:[%s8936_s7 + $0x8] sm:$0xff]  ;;  %v8705_v22 = vld [vmem:[%s8936_s7] sm:$0xff] }
0x3f09   :  { %v8551_v35 = vmul.f32 %v5961_v3, %v4545_v37  ;;  %v8642_v3 = vld [vmem:[%s8942_s13 + $0x30] sm:$0xff]  ;;  %9069 = vst [vmem:[#allocation15_spill] sm:$0xff] %v8693_v19  ;;  %s5447_s13 = sshll.u32 %s6277_s16, 4  ;;  %s5448_s13 = int_to_ptr.vmem [resolvable:$true] %s5447_s13 }
0x3f0a   :  { %9070 = vst [vmem:[#allocation18_spill] sm:$0xff] %v8699_v57 }
0x3f0b   :  { %5637 = vmatpush.msk.msrb.mxu3 %vm644_vm8, %v8551_v35  ;;  %5639 = vmatpush.msk.msrb.mxu2 %vm644_vm8, %v8551_v35  ;;  %9071 = vst [vmem:[#allocation21_spill] sm:$0xff] %v8705_v22 }
0x3f0c   :  { %5638 = vmatmul.msk.f32.vlgmr.msrb.gmra.mxu3 %vm640_vm9, %v8560_v47  ;;  %5640 = vmatmul.msk.f32.vlgmr.msrb.gmra.mxu2 %vm640_vm9, %v8567_v14 }
0x3f0d   :  { %4607 = vmatpush.msra.mxu3 %v8574_v5  ;;  %4614 = vmatpush.msra.mxu2 %v8580_v32 }
0x3f0f   :  { %4608 = vmatpush.msra.mxu3 %v8586_v52  ;;  %4615 = vmatpush.msra.mxu2 %v8592_v53 }
0x3f11   :  { %4655 = vmatpush.msrb.mxu3 %v8574_v5  ;;  %4616 = vmatpush.msra.mxu2 %v8599_v59 }
0x3f13   :  { %4656 = vmatpush.msrb.mxu3 %v8586_v52  ;;  %4617 = vmatpush.msra.mxu2 %v8606_v44 }
0x3f15   :  { %4618 = vmatpush.msra.mxu2 %v8612_v56 }
0x3f17   :  { %4619 = vmatpush.msra.mxu2 %v8618_v62 }
0x3f19   :  { %4620 = vmatpush.msra.mxu2 %v8624_v15 }
0x3f1b   :  { %4621 = vmatpush.msra.mxu2 %v8630_v11 }
0x3f1d   :  { %4622 = vmatpush.msra.mxu2 %v8636_v26 }
0x3f1f   :  { %4623 = vmatpush.msra.mxu2 %v8642_v3 }
0x3f21   :  { %4624 = vmatpush.msra.mxu2 %v8648_v40 }
0x3f23   :  { %4625 = vmatpush.msra.mxu2 %v8654_v39 }
0x3f25   :  { %4626 = vmatpush.msra.mxu2 %v8660_v55 }
0x3f27   :  { %4627 = vmatpush.msra.mxu2 %v8666_v1 }
0x3f29   :  { %4628 = vmatpush.msra.mxu2 %v8672_v51 }
0x3f2b   :  { %4629 = vmatpush.msra.mxu2 %v8678_v46 }
0x3f8f   :  { %v4567_v48 = vpop.f32.mrf.mxu3  ;;  %v4587_v41 = vpop.f32.mrf.mxu2 }
0x3f90   :  { %5641 = vmatmul.msk.f32.vlgmr.msra.gmra.mxu3 %vm560_vm5, %v4567_v48 }
0x3f91   :  { %4681 = vmatpush.msra.mxu3 %v8287_v38 }
0x3f98   :  { %5642 = vmatmul.msk.f32.vlgmr.msrb.gmra.mxu3 %vm560_vm5, %v4587_v41 }
0x3f99   :  { %4750 = vmatpush.msrb.mxu3 %v8687_v9 }
0x3f9b   :  { %4751 = vmatpush.msrb.mxu3 %v8693_v19 }
0x3f9d   :  { %4752 = vmatpush.msrb.mxu3 %v8699_v57 }
0x3f9f   :  { %4753 = vmatpush.msrb.mxu3 %v8705_v22 }
0x3fa0   :  { %5643 = vmatmul.msk.f32.vlgmr.msra.gmra.mxu3 %vm186_vm0, %v8543_v4 }
0x3fa1   :  { %4821 = vmatpush.msra.mxu3 %v8299_v24 }
0x3fa3   :  { %4822 = vmatpush.msra.mxu3 %v8305_v30 }
0x3fa5   :  { %4823 = vmatpush.msra.mxu3 %v8311_v25  ;;  %v4710_v25 = vpop.f32.mrf.mxu0 }
0x3fa7   :  { %4824 = vmatpush.msra.mxu3 %v8317_v58 }
0x3fa8   :  { %5646 = vmatmul.msk.f32.vlgmr.msrb.gmra.mxu3 %vm234_vm3, %v8373_v29 }
0x3fb0   :  { %5649 = vmatmul.msk.f32.vlgmr.msra.gmra.mxu3 %vm234_vm3, %v8373_v29 }
0x4013   :  { %v4610_v37 = vpop.f32.mrf.mxu3 }
0x4014   :  { %v4613_v4 = vmul.f32 %v4610_v37, %v8333_v13 }
0x4016   :  { %4630 = vmatmul.f32.vlgmr.msra.gmra.mxu2 %v4613_v4 }
0x401b   :  { %v4658_v24 = vpop.f32.mrf.mxu3 }
0x401c   :  { %v4713_v22 = vmul.f32 %v4710_v25, %v4658_v24 }
0x4023   :  { %v4683_v48 = vpop.f32.mrf.mxu3 }
0x4024   :  { %v4686_v30 = vmul.f32 %v4683_v48, %v4658_v24 }
0x4026   :  { %v4687_v41 = vsub.f32 1.0, %v4686_v30 }
0x4028   :  { %v4688_v58 = vmul.f32 %v4687_v41, %v8333_v13  ;;  %v4786_v13 = vpop.permute.xlu0 %4785 }
0x402a   :  { %v8721_v57 = vadd.f32 %v4713_v22, %v4688_v58 }
0x402b   :  { %v8733_v29 = vpop.f32.mrf.mxu3 }
0x402c   :  { %v4967_v19 = vadd.f32 1e-16, %v8721_v57 }
0x402e   :  { %5655 = vmatpush.msk.msrb.mxu3 %vm134_vm1, %v4967_v19 }
0x402f   :  { %5656 = vmatmul.msk.f32.vlgmr.msrb.gmra.mxu3 %vm130_vm2, %v9032_v8 }
0x4030   :  { %5135 = vmatpush.msra.mxu3 %v8342_v54 }
0x4032   :  { %5136 = vmatpush.msra.mxu3 %v8348_v50 }
0x4033   :  { %v4826_v54 = vpop.f32.mrf.mxu3 }
0x4099   :  { %v4631_v10 = vpop.f32.mrf.mxu2 }
0x409a   :  { %5645 = vmatmul.msk.f32.vlgmr.msrb.gmra.mxu1 %vm186_vm0, %v4631_v10  ;;  %5647 = vmatmul.msk.f32.vlgmr.msrb.gmra.mxu0 %vm186_vm0, %v4631_v10 }
0x409b   :  { %5009 = vmatpush.msrb.mxu0 %v8287_v38 }
0x40a2   :  { %5648 = vmatmul.msk.f32.vlgmr.msra.gmra.mxu1 %vm186_vm0, %v4786_v13 }
0x4117   :  { %v8735_v19 = vpop.f32.mrf.mxu1  ;;  %v4782_v22 = vpop.f32.mrf.mxu0 }
0x411f   :  { %v4806_v8 = vpop.f32.mrf.mxu1 }
0x4120   :  { %v4807_v37 = vadd.f32 %v4806_v8, %v4782_v22 }
0x4122   :  { %v4829_v4 = vadd.f32 %v4826_v54, %v4807_v37 }
0x4124   :  { %v4830_v50 = vadd.f32 %v8362_v23, %v4829_v4 }
0x4126   :  { %5964 = vtanh.f32 %v4830_v50  ;;  %v4831_v48 = vmul.f32 0.5, %v4830_v50 }
0x4128   :  { %5966 = vtanh.f32 %v4831_v48 }
0x412c   :  { %v5965_v24 = vpop.eup %5964 }
0x412d   :  { %4838 = vrot.lane.b32.xlu1 %v5965_v24, %s9045_s0 }
0x412e   :  { %v5967_v30 = vpop.eup %5966 }
0x412f   :  { %v4833_v41 = vadd.f32 1.0, %v5967_v30 }
0x4131   :  { %v4834_v25 = vmul.f32 0.5, %v4833_v41 }
0x4133   :  { %v4836_v13 = vmul.f32 %v4834_v25, %v8368_v0 }
0x419f   :  { %v4839_v58 = vpop.permute.xlu1 %4838 }
0x41a0   :  { %v4841_v10 = vmul.f32 %v4839_v58, %v4834_v25 }
0x41a2   :  { %4843 = vrot.lane.b32.xlu0 %v4841_v10, %s9035_s3 }
0x4214   :  { %v4844_v22 = vpop.permute.xlu0 %4843 }
0x4215   :  { %v8741_v8 = vadd.f32 %v4844_v22, %v4836_v13 }
0x4217   :  { %5968 = vtanh.f32 %v8741_v8 }
0x421d   :  { %v5969_v23 = vpop.eup %5968 }
0x421e   :  { %4849 = vrot.lane.b32.xlu1 %v5969_v23, %s9045_s0 }
0x4290   :  { %v4850_v37 = vpop.permute.xlu1 %4849 }
0x4291   :  { %v8745_v54 = vmul.f32 %v4850_v37, %v4834_v25 }
0x4293   :  { %4854 = vrot.lane.b32.xlu0 %v8745_v54, %s9035_s3 }
0x4305   :  { %v8749_v4 = vpop.permute.xlu0 %4854 }
0x4306   :  { %5650 = vmatmul.msk.f32.vlgmr.msra.gmra.mxu0 %vm234_vm3, %v8749_v4 }
0x4383   :  { %v4875_v0 = vpop.f32.mrf.mxu0 }
0x4384   :  { %v8754_v50 = vadd.f32 %v8380_v16, %v4875_v0  ;;  %v6170_v16 = vld [vmem:[%s8936_s7 + $0x20] sm:$0xff]  ;;  %s9072_s7 = smov 48  }
0x4386   :  { %4879 = vrot.lane.b32.xlu1 %v8754_v50, %s9020_s26  ;;  %5653 = vmatpush.msk.msrb.mxu2 %vm134_vm1, %v8754_v50 }
0x4387   :  { %5654 = vmatmul.msk.f32.vlgmr.msrb.gmra.mxu2 %vm130_vm2, %v8392_v2  ;;  %v4988_v2 = vpop.f32.mrf.mxu3 }
0x4388   :  { %5036 = vmatpush.msra.mxu2 %v8399_v61  ;;  %v5035_v24 = vmul.f32 %v4988_v2, %v4988_v2 }
0x438a   :  { %5037 = vmatpush.msra.mxu2 %v8405_v21 }
0x438c   :  { %5038 = vmatpush.msra.mxu2 %v8411_v33 }
0x438e   :  { %5039 = vmatpush.msra.mxu2 %v8417_v27 }
0x4390   :  { %5040 = vmatpush.msra.mxu2 %v8423_v49 }
0x4392   :  { %5041 = vmatpush.msra.mxu2 %v8429_v60 }
0x4394   :  { %5042 = vmatpush.msra.mxu2 %v8435_v34 }
0x4396   :  { %5043 = vmatpush.msra.mxu2 %v8441_v17 }
0x4398   :  { %5044 = vmatpush.msra.mxu2 %v8447_v28 }
0x439a   :  { %5045 = vmatpush.msra.mxu2 %v8453_v6 }
0x439c   :  { %5046 = vmatpush.msra.mxu2 %v8459_v7 }
0x439e   :  { %5047 = vmatpush.msra.mxu2 %v8465_v31 }
0x43a0   :  { %5048 = vmatpush.msra.mxu2 %v8471_v63 }
0x43a2   :  { %5049 = vmatpush.msra.mxu2 %v8477_v43 }
0x43a4   :  { %5050 = vmatpush.msra.mxu2 %v8483_v42 }
0x43a6   :  { %5051 = vmatpush.msra.mxu2 %v8489_v20 }
0x43a7   :  { %5052 = vmatmul.f32.vlgmr.msra.gmra.mxu2 %v5035_v24 }
0x43a8   :  { %5383 = vmatpush.msrb.mxu2 %v6170_v16 }
0x43f8   :  { %v4880_v48 = vpop.permute.xlu1 %4879 }
0x43f9   :  { %5651 = vmatpush.msk.msrb.mxu1 %vm134_vm1, %v4880_v48 }
0x43fa   :  { %5652 = vmatmul.msk.f32.vlgmr.msrb.gmra.mxu1 %vm130_vm2, %v8500_v36 }
0x43fb   :  { %5015 = vmatpush.msra.mxu1 %v8399_v61 }
0x43fd   :  { %5016 = vmatpush.msra.mxu1 %v8405_v21 }
0x43ff   :  { %5017 = vmatpush.msra.mxu1 %v8411_v33 }
0x4401   :  { %5018 = vmatpush.msra.mxu1 %v8417_v27 }
0x4403   :  { %5019 = vmatpush.msra.mxu1 %v8423_v49 }
0x4405   :  { %5020 = vmatpush.msra.mxu1 %v8429_v60 }
0x4407   :  { %5021 = vmatpush.msra.mxu1 %v8435_v34 }
0x4409   :  { %5022 = vmatpush.msra.mxu1 %v8441_v17 }
0x440a   :  { %v4922_v61 = vpop.f32.mrf.mxu2 }
0x440b   :  { %5023 = vmatpush.msra.mxu1 %v8447_v28 }
0x440d   :  { %5024 = vmatpush.msra.mxu1 %v8453_v6 }
0x440f   :  { %5025 = vmatpush.msra.mxu1 %v8459_v7 }
0x4411   :  { %5026 = vmatpush.msra.mxu1 %v8465_v31 }
0x4413   :  { %5027 = vmatpush.msra.mxu1 %v8471_v63 }
0x4415   :  { %5028 = vmatpush.msra.mxu1 %v8477_v43 }
0x4417   :  { %5029 = vmatpush.msra.mxu1 %v8483_v42 }
0x4419   :  { %5030 = vmatpush.msra.mxu1 %v8489_v20 }
0x441b   :  { %5358 = vmatpush.msrb.mxu1 %v8287_v38 }
0x442a   :  { %v5053_v58 = vpop.f32.mrf.mxu2 }
0x442b   :  { %v5060_v13 = vmax.f32 %v5053_v58, 1e-16 }
0x4477   :  { %v4900_v21 = vpop.f32.mrf.mxu1 }
0x4478   :  { %v8801_v33 = vadd.f32 %v4922_v61, %v4900_v21 }
0x447a   :  { %v4925_v27 = vadd.f32 1e-16, %v8801_v33  ;;  %v4927_v49 = vmin.f32 %v8801_v33, 20.0  ;;  %v4934_v6 = vmul.f32 0.5, %v8801_v33  ;;  %v4938_v7 = vsel %vm373_vm6, %v8801_v33, -inf }
0x447b   :  { %vm4926_vm1 = vcmp.gt.f32.partialorder %v8801_v33, 20.0 }
0x447c   :  { %5657 = vmatmul.msk.f32.vlgmr.msrb.gmra.mxu0 %vm186_vm0, %v4925_v27  ;;  %v5056_v60 = vmul.f32 %v4925_v27, %v4925_v27  ;;  %v4928_v34 = vmul.f32 1.442695, %v4927_v49 }
0x447e   :  { %v5057_v17 = vsel %vm497_vm4, %v5056_v60, 0.0  ;;  %5970 = vpow2.f32 %v4928_v34 }
0x447f   :  { %5058 = vadd.xlane.f32.xlu0 %v5057_v17 }
0x4484   :  { %v5971_v28 = vpop.eup %5970 }
0x4485   :  { %v4930_v38 = vadd.f32 1.0, %v5971_v28 }
0x4487   :  { %4939 = vmax.xlane.f32.xlu0 %v4938_v7  ;;  %5972 = vlog2.f32 %v4930_v38 }
0x4488   :  { %5974 = vtanh.f32 %v4934_v6 }
0x448d   :  { %v5973_v31 = vpop.eup %5972 }
0x448e   :  { %v5975_v63 = vpop.eup %5974  ;;  %v4932_v43 = vmul.f32 0.6931472, %v5973_v31 }
0x448f   :  { %v4936_v20 = vadd.f32 1.0, %v5975_v63 }
0x4490   :  { %v8812_v42 = vsel %vm4926_vm1, %v8801_v33, %v4932_v43 }
0x4491   :  { %5076 = vperm.xlu2 %5743, %v8812_v42   ;;  %v4937_v36 = vmul.f32 0.5, %v4936_v20 }
0x4493   :  { %v5110_v30 = vsub.f32 1.0, %v4937_v36 }
0x4499   :  { %5746 = vset.pattern.permute.xlu2 %v9062_v18 }
0x449b   :  { %5113 = vperm.xlu0 %5745, %v5110_v30  }
0x44a3   :  { %5747 = vset.pattern.permute.xlu0 %v9063_v12 }
0x44f2   :  { %v5059_v10 = vpop.xlane.xlu0 %5058 }
0x44f3   :  { %v5061_v22 = vmax.f32 %v5059_v10, 1e-16 }
0x44f5   :  { %v5062_v23 = vmul.f32 %v5061_v22, %v5060_v13 }
0x44f7   :  { %5976 = vrsqrt.f32 %v5062_v23  ;;  %vm5069_vm4 = vweird.f32 %v5062_v23 }
0x44f9   :  { %v5011_v41 = vpop.f32.mrf.mxu0 }
0x44fa   :  { %v5014_v25 = vmul.f32 %v5011_v41, %v4988_v2  ;;  %v5077_v2 = vpop.permute.xlu2 %5076  ;;  %v4940_v38 = vpop.xlane.xlu0 %4939 }
0x44fb   :  { %v4941_v7 = vsub.f32 %v8801_v33, %v4940_v38 }
0x44fc   :  { %5031 = vmatmul.f32.vlgmr.msra.gmra.mxu1 %v5014_v25 }
0x44fd   :  { %v5977_v37 = vpop.eup %5976  ;;  %v4942_v31 = vmul.f32 1.442695, %v4941_v7 }
0x44fe   :  { %v5064_v0 = vmul.f32 %v5977_v37, %v5062_v23  ;;  %vm5070_vm2 = vweird.f32 %v5977_v37  ;;  %v5284_v23 = vmul.f32 0.5, %v8754_v50 }
0x44ff   :  { %vm5071_vm6 = vmor %vm5069_vm4, %vm5070_vm2  ;;  %vm1513_vm4 = vcmask 123968  }
0x4500   :  { %v5065_v16 = vmul.f32 %v5977_v37, %v5064_v0 }
0x4502   :  { %v5066_v24 = vmul.f32 0.5, %v5065_v16 }
0x4504   :  { %v5067_v48 = vsub.f32 1.5, %v5066_v24 }
0x4506   :  { %v5068_v61 = vmul.f32 %v5977_v37, %v5067_v48 }
0x4508   :  { %v5072_v12 = vsel %vm5071_vm6, %v5977_v37, %v5068_v61  ;;  %vm2163_vm6 = vcmask 189568  }
0x450d   :  { %v5114_v0 = vpop.permute.xlu0 %5113 }
0x450e   :  { %v5116_v61 = vmul.f32 %v5114_v0, %v8551_v35 }
0x4579   :  { %v5032_v18 = vpop.f32.mrf.mxu1 }
0x457a   :  { %v5073_v21 = vmul.f32 %v5072_v12, %v5032_v18 }
0x457c   :  { %v5079_v27 = vmul.f32 %v5077_v2, %v5073_v21 }
0x457e   :  { %v5080_v49 = vsel %vm521_vm10, %v5079_v27, -inf }
0x457f   :  { %5081 = vmax.xlane.f32.xlu1 %v5080_v49  ;;  %v9073_v49 = vld [vmem:[#allocation14_spill] sm:$0xff] }
0x4598   :  { %5106 = vperm.xlu1 %5744, %v4937_v36  }
0x45f2   :  { %v5082_v60 = vpop.xlane.xlu1 %5081 }
0x45f3   :  { %v5083_v34 = vsub.f32 %v5079_v27, %v5082_v60  ;;  %v9074_v60 = vld [vmem:[#allocation13_spill] sm:$0xff] }
0x45f5   :  { %v5084_v17 = vmul.f32 1.442695, %v5083_v34  ;;  %v4106_v34 = vadd.f32 %v9074_v60, %v9073_v49 }
0x45f7   :  { %5978 = vpow2.f32 %v5084_v17  ;;  %v8833_v17 = vld [vmem:[%s8937_s8] ss:$0 sm:$0xff]  ;;  %s6270_s8 = smov 8  }
0x45f8   :  { %5980 = vpow2.f32 %v4942_v31  ;;  %v4108_v35 = vadd.f32 %v8833_v17, %v4106_v34 }
0x45fd   :  { %v5979_v28 = vpop.eup %5978 }
0x45fe   :  { %v5086_v6 = vsel %vm521_vm10, %v5979_v28, 0.0  ;;  %v5981_v63 = vpop.eup %5980 }
0x45ff   :  { %5087 = vadd.xlane.f32.xlu2 %v5086_v6 }
0x460a   :  { %v5107_v48 = vpop.permute.xlu1 %5106 }
0x4617   :  { %4945 = vrot.lane.b32.xlu2 %v5981_v63, %s9036_s23 }
0x4672   :  { %v5088_v43 = vpop.xlane.xlu2 %5087 }
0x4673   :  { %5982 = vrcp.f32 %v5088_v43  ;;  %v5100_v58 = vand.u32 2147483648, %v5088_v43  ;;  %v5098_v13 = vand.u32 2147483647, %v5088_v43  ;;  %vm5094_vm15 = vweird.f32 %v5088_v43 }
0x4674   :  { %5984 = vtanh.f32 %v5284_v23  ;;  %v9077_v23 = vld [vmem:[#allocation10_spill] sm:$0xff] }
0x4675   :  { %v5101_v33 = vor.u32 1.1754944e-38, %v5100_v58  ;;  %vm5099_vm12 = vcmp.eq.f32.partialorder %v5098_v13, 8.507059e+37  ;;  %v9075_v58 = vmov 13  }
0x4679   :  { %v5983_v20 = vpop.eup %5982 }
0x467a   :  { %v5090_v36 = vmul.f32 %v5983_v20, %v5088_v43  ;;  %v4946_v30 = vpop.permute.xlu2 %4945  ;;  %vm5095_vm14 = vweird.f32 %v5983_v20  ;;  %v5985_v21 = vpop.eup %5984 }
0x467b   :  { %v4948_v41 = vsel %vm384_vm11, %v4946_v30, 0.0  ;;  %vm5096_vm7 = vmor %vm5094_vm15, %vm5095_vm14  ;;  %v5286_v2 = vadd.f32 1.0, %v5985_v21  ;;  %vm2813_vm14 = vcmask 255168   ;;  %vm3463_vm15 = vcmask 320768  }
0x467c   :  { %v5091_v25 = vsub.f32 1.0, %v5090_v36  ;;  %4949 = vadd.xlane.f32.xlu1 %v4948_v41 }
0x467d   :  { %v5287_v27 = vmul.f32 0.5, %v5286_v2  ;;  %v9082_v2 = vld [vmem:[#allocation20_spill] sm:$0xff] }
0x467e   :  { %v5092_v10 = vmul.f32 %v5983_v20, %v5091_v25 }
0x4680   :  { %v5093_v22 = vadd.f32 %v5983_v20, %v5092_v10 }
0x4682   :  { %v5097_v37 = vsel %vm5096_vm7, %v5983_v20, %v5093_v22  ;;  %vm4113_vm7 = vcmask 386368  }
0x4683   :  { %v5102_v16 = vsel %vm5099_vm12, %v5101_v33, %v5097_v37  ;;  %v4966_v33 = vadd.f32 1.0, %v8812_v42  ;;  %vm4763_vm12 = vcmask 451968  }
0x4684   :  { %v5103_v24 = vmul.f32 %v5979_v28, %v5102_v16  ;;  %v4756_v28 = vadd.f32 %v8733_v29, %v8735_v19 }
0x4686   :  { %v5109_v18 = vmul.f32 %v5107_v48, %v5103_v24  ;;  %v4758_v6 = vadd.f32 %v8833_v17, %v4756_v28  ;;  %v9078_v24 = vld [vmem:[#allocation17_spill] sm:$0xff]  ;;  %v9079_v48 = vld [vmem:[#allocation16_spill] sm:$0xff] }
0x4688   :  { %v5117_v12 = vadd.f32 %v5116_v61, %v5109_v18  ;;  %v2156_v61 = vadd.f32 %v9079_v48, %v9078_v24  ;;  %v9081_v18 = vld [vmem:[#allocation9_spill] sm:$0xff] }
0x468a   :  { %5658 = vmatmul.msk.f32.vlgmr.msra.gmra.mxu3 %vm560_vm5, %v5117_v12  ;;  %v2158_v42 = vadd.f32 %v8833_v17, %v2156_v61 }
0x4695   :  { %5312 = vrot.lane.b32.xlu1 %v5287_v27, %s9029_s22  ;;  %s6272_s22 = smov 24   ;;  %v9083_v27 = vld [vmem:[#allocation19_spill] sm:$0xff] }
0x4696   :  { %v3456_v49 = vadd.f32 %v9083_v27, %v9082_v2 }
0x4698   :  { %v3458_v60 = vadd.f32 %v8833_v17, %v3456_v49 }
0x469d   :  { %5420 = vrot.lane.b32.xlu1 %v8745_v54, %s9072_s7 }
0x46a5   :  { %4110 = vrot.lane.b32.xlu1 %v4108_v35, %s6269_s4 }
0x46ad   :  { %4760 = vrot.lane.b32.xlu1 %v4758_v6, %s9072_s7 }
0x46ef   :  { %v4950_v54 = vpop.xlane.xlu1 %4949 }
0x46f0   :  { %5986 = vrcp.f32 %v4950_v54  ;;  %v4962_v43 = vand.u32 2147483648, %v4950_v54  ;;  %v4960_v36 = vand.u32 2147483647, %v4950_v54  ;;  %vm4956_vm13 = vweird.f32 %v4950_v54 }
0x46f2   :  { %v4963_v41 = vor.u32 1.1754944e-38, %v4962_v43  ;;  %vm4961_vm2 = vcmp.eq.f32.partialorder %v4960_v36, 8.507059e+37 }
0x46f6   :  { %v5987_v38 = vpop.eup %5986 }
0x46f7   :  { %v4952_v7 = vmul.f32 %v5987_v38, %v4950_v54  ;;  %vm4957_vm11 = vweird.f32 %v5987_v38 }
0x46f8   :  { %vm4958_vm1 = vmor %vm4956_vm13, %vm4957_vm11 }
0x46f9   :  { %v4953_v31 = vsub.f32 1.0, %v4952_v7 }
0x46fb   :  { %v4954_v20 = vmul.f32 %v5987_v38, %v4953_v31 }
0x46fd   :  { %v4955_v30 = vadd.f32 %v5987_v38, %v4954_v20 }
0x46ff   :  { %v4959_v25 = vsel %vm4958_vm1, %v5987_v38, %v4955_v30 }
0x4700   :  { %v4964_v29 = vsel %vm4961_vm2, %v4963_v41, %v4959_v25 }
0x4701   :  { %v4965_v19 = vmul.f32 %v5981_v63, %v4964_v29  ;;  %v9076_v63 = vld [vmem:[#allocation11_spill] sm:$0xff] }
0x4702   :  { %v1506_v37 = vadd.f32 %v9077_v23, %v9076_v63 }
0x4703   :  { %5158 = vperm.xlu0 %5747, %v4965_v19   ;;  %5148 = vperm.xlu2 %5746, %v4965_v19  }
0x4704   :  { %v1508_v0 = vadd.f32 %v8833_v17, %v1506_v37 }
0x4707   :  { %v8864_v54 = vpop.permute.xlu1 %5312 }
0x470b   :  { %5748 = vset.pattern.permute.xlu2 %v9046_v45  ;;  %5750 = vset.pattern.permute.xlu0 %v9075_v58 }
0x470c   :  { %5143 = vperm.xlu2 %5748, %v4965_v19  }
0x470d   :  { %v5138_v10 = vpop.f32.mrf.mxu3 }
0x470f   :  { %v8867_v7 = vpop.permute.xlu1 %5420 }
0x4714   :  { %5749 = vset.pattern.permute.xlu2 %v9075_v58 }
0x4717   :  { %v4111_v43 = vpop.permute.xlu1 %4110 }
0x471f   :  { %v4761_v19 = vpop.permute.xlu1 %4760 }
0x475d   :  { %v5149_v13 = vpop.permute.xlu2 %5148 }
0x475e   :  { %v5151_v22 = vmul.f32 %v5149_v13, %v5138_v10 }
0x4760   :  { %5153 = vrot.lane.b32.xlu2 %v5151_v22, %s9027_s27  ;;  %s6271_s27 = smov 16  }
0x4766   :  { %v5144_v34 = vpop.permute.xlu2 %5143 }
0x4767   :  { %v5146_v36 = vmul.f32 %v5144_v34, %v5138_v10 }
0x4768   :  { %5172 = vperm.xlu2 %5749, %v4966_v33  }
0x4770   :  { %5339 = vrot.lane.b32.xlu2 %v8754_v50, %s9037_s24  ;;  %v9080_v50 = vld [vmem:[#allocation12_spill] sm:$0xff] }
0x4771   :  { %v2806_v12 = vadd.f32 %v9081_v18, %v9080_v50 }
0x4773   :  { %v2808_v21 = vadd.f32 %v8833_v17, %v2806_v12 }
0x4775   :  { %v5159_v45 = vpop.permute.xlu0 %5158 }
0x4776   :  { %v5161_v16 = vmul.f32 %v5159_v45, %v5138_v10 }
0x4778   :  { %5163 = vrot.lane.b32.xlu0 %v5161_v16, %s9028_s2  ;;  %1510 = vrot.lane.b32.xlu2 %v1508_v0, %s6270_s8 }
0x4780   :  { %2160 = vrot.lane.b32.xlu2 %v2158_v42, %s6271_s27 }
0x4788   :  { %2810 = vrot.lane.b32.xlu2 %v2808_v21, %s6272_s22 }
0x4790   :  { %3460 = vrot.lane.b32.xlu2 %v3458_v60, %s9035_s3 }
0x47ba   :  { %v5154_v35 = vpop.permute.xlu2 %5153 }
0x47bb   :  { %v5156_v30 = vadd.f32 %v5154_v35, %v5146_v36 }
0x47c2   :  { %v5173_v28 = vpop.permute.xlu2 %5172 }
0x47ca   :  { %v5340_v6 = vpop.permute.xlu2 %5339 }
0x47cb   :  { %5666 = vmatmul.msk.f32.vlgmr.msrb.gmra.mxu1 %vm186_vm0, %v5340_v6 }
0x47d2   :  { %v1511_v38 = vpop.permute.xlu2 %1510 }
0x47d3   :  { %1514 = vst.msk [vmem:[#allocation2] sm:$0x3] %vm1513_vm4, %v1511_v38 }
0x47da   :  { %v2161_v31 = vpop.permute.xlu2 %2160 }
0x47db   :  { %2164 = vst.msk [vmem:[#allocation2] sm:$0x3] %vm2163_vm6, %v2161_v31 }
0x47e2   :  { %v2811_v20 = vpop.permute.xlu2 %2810 }
0x47e3   :  { %2814 = vst.msk [vmem:[#allocation2] sm:$0x3] %vm2813_vm14, %v2811_v20 }
0x47ea   :  { %v5164_v41 = vpop.permute.xlu0 %5163  ;;  %v3461_v25 = vpop.permute.xlu2 %3460 }
0x47eb   :  { %v5166_v29 = vadd.f32 %v5164_v41, %v5156_v30  ;;  %3464 = vst.msk [vmem:[#allocation2] sm:$0x3] %vm3463_vm15, %v3461_v25 }
0x47ec   :  { %4114 = vst.msk [vmem:[#allocation2] sm:$0x3] %vm4113_vm7, %v4111_v43 }
0x47ed   :  { %v5167_v58 = vmax.f32 %v5166_v29, 1e-30  ;;  %4764 = vst.msk [vmem:[#allocation2] sm:$0x3] %vm4763_vm12, %v4761_v19 }
0x47ef   :  { %5988 = vlog2.f32 %v5167_v58 }
0x47f5   :  { %v5989_v13 = vpop.eup %5988 }
0x47f6   :  { %v5169_v22 = vmul.f32 0.6931472, %v5989_v13 }
0x47f8   :  { %v5175_v33 = vmul.f32 %v5173_v28, %v5169_v22 }
0x47fa   :  { %v5176_v63 = vmul.f32 1.442695, %v5175_v33 }
0x47fc   :  { %5990 = vpow2.f32 %v5176_v63 }
0x4802   :  { %v5991_v23 = vpop.eup %5990 }
0x4803   :  { %v5178_v10 = vsel %vm521_vm10, %v5991_v23, 0.0  ;;  %vm5429_vm10 = vcmask 648576  }
0x4804   :  { %5179 = vadd.xlane.f32.xlu0 %v5178_v10 }
0x4818   :  { %5426 = vrot.lane.b32.xlu0 %v8741_v8, %s6271_s27 }
0x4877   :  { %v5180_v37 = vpop.xlane.xlu0 %5179 }
0x4878   :  { %v5181_v45 = vadd.f32 1e-16, %v5180_v37 }
0x487a   :  { %5992 = vrcp.f32 %v5181_v45  ;;  %v5193_v48 = vand.u32 2147483648, %v5181_v45  ;;  %v5191_v42 = vand.u32 2147483647, %v5181_v45  ;;  %vm5187_vm13 = vweird.f32 %v5181_v45 }
0x487c   :  { %v5194_v18 = vor.u32 1.1754944e-38, %v5193_v48  ;;  %vm5192_vm2 = vcmp.eq.f32.partialorder %v5191_v42, 8.507059e+37 }
0x4880   :  { %v5993_v0 = vpop.eup %5992 }
0x4881   :  { %v5183_v16 = vmul.f32 %v5993_v0, %v5181_v45  ;;  %vm5188_vm11 = vweird.f32 %v5993_v0 }
0x4882   :  { %vm5189_vm1 = vmor %vm5187_vm13, %vm5188_vm11 }
0x4883   :  { %v5184_v24 = vsub.f32 1.0, %v5183_v16 }
0x4885   :  { %v5185_v61 = vmul.f32 %v5993_v0, %v5184_v24 }
0x4887   :  { %v5186_v50 = vadd.f32 %v5993_v0, %v5185_v61 }
0x4889   :  { %v5190_v12 = vsel %vm5189_vm1, %v5993_v0, %v5186_v50 }
0x488a   :  { %v5195_v21 = vsel %vm5192_vm2, %v5194_v18, %v5190_v12 }
0x488b   :  { %v5196_v2 = vmul.f32 %v5991_v23, %v5195_v21 }
0x488d   :  { %5659 = vmatpush.msk.msra.mxu0 %vm644_vm8, %v5196_v2  ;;  %5661 = vmatpush.msk.msrb.mxu3 %vm644_vm8, %v5196_v2  ;;  %vm5439_vm8 = vcmask 911104  }
0x488e   :  { %5660 = vmatmul.msk.f32.vlgmr.msra.gmra.mxu0 %vm640_vm9, %v8560_v47  ;;  %5662 = vmatmul.msk.f32.vlgmr.msrb.gmra.mxu3 %vm640_vm9, %v8567_v14  ;;  %v6172_v14 = vld [vmem:[%s8939_s10] sm:$0xff]  ;;  %s6274_s10 = smov [#allocation4]  }
0x488f   :  { %5257 = vmatpush.msrb.mxu0 %v8574_v5  ;;  %5264 = vmatpush.msra.mxu3 %v8580_v32  ;;  %v9084_v32 = vld [vmem:[#allocation15_spill] sm:$0xff] }
0x4891   :  { %5258 = vmatpush.msrb.mxu0 %v8586_v52  ;;  %5265 = vmatpush.msra.mxu3 %v8592_v53  ;;  %v9086_v53 = vld [vmem:[#allocation21_spill] sm:$0xff] }
0x4893   :  { %5305 = vmatpush.msra.mxu0 %v8574_v5  ;;  %5266 = vmatpush.msra.mxu3 %v8599_v59 }
0x4895   :  { %5306 = vmatpush.msra.mxu0 %v8586_v52  ;;  %5267 = vmatpush.msra.mxu3 %v8606_v44  ;;  %v9085_v52 = vld [vmem:[#allocation18_spill] sm:$0xff] }
0x4897   :  { %5268 = vmatpush.msra.mxu3 %v8612_v56 }
0x4899   :  { %5269 = vmatpush.msra.mxu3 %v8618_v62 }
0x489b   :  { %5270 = vmatpush.msra.mxu3 %v8624_v15 }
0x489d   :  { %5271 = vmatpush.msra.mxu3 %v8630_v11 }
0x489f   :  { %5272 = vmatpush.msra.mxu3 %v8636_v26  ;;  %v5360_v26 = vpop.f32.mrf.mxu1 }
0x48a1   :  { %5273 = vmatpush.msra.mxu3 %v8642_v3 }
0x48a3   :  { %5274 = vmatpush.msra.mxu3 %v8648_v40 }
0x48a5   :  { %5275 = vmatpush.msra.mxu3 %v8654_v39 }
0x48a7   :  { %5276 = vmatpush.msra.mxu3 %v8660_v55  ;;  %v6273_v55 = vmov 0.0  }
0x48a8   :  { %5415 = vst [vmem:[#allocation4] sm:$0x3] %v6273_v55 }
0x48a9   :  { %5277 = vmatpush.msra.mxu3 %v8666_v1 }
0x48ab   :  { %5278 = vmatpush.msra.mxu3 %v8672_v51 }
0x48ad   :  { %5279 = vmatpush.msra.mxu3 %v8678_v46 }
0x490b   :  { %v5217_v47 = vpop.f32.mrf.mxu0 }
0x490c   :  { %5663 = vmatmul.msk.f32.vlgmr.msrb.gmra.mxu0 %vm560_vm5, %v5217_v47  ;;  %5431 = vrot.lane.b32.xlu2 %v5217_v47, %s6267_s20 }
0x490d   :  { %5331 = vmatpush.msrb.mxu0 %v6172_v14 }
0x4911   :  { %v5237_v5 = vpop.f32.mrf.mxu3 }
0x4914   :  { %5664 = vmatmul.msk.f32.vlgmr.msra.gmra.mxu0 %vm560_vm5, %v5237_v5  ;;  %5436 = vrot.lane.b32.xlu2 %v5237_v5, %s9028_s2  ;;  %vm5434_vm5 = vcmask 779904   ;;  %s5458_s2 = sshll.u32 %s6274_s10, 4  ;;  %s5459_s2 = int_to_ptr.vmem [resolvable:$true] %s5458_s2 }
0x4915   :  { %5400 = vmatpush.msra.mxu0 %v8687_v9  ;;  %v5427_v9 = vpop.permute.xlu0 %5426 }
0x4917   :  { %5401 = vmatpush.msra.mxu0 %v9084_v32 }
0x4919   :  { %5402 = vmatpush.msra.mxu0 %v9085_v52 }
0x491b   :  { %5403 = vmatpush.msra.mxu0 %v9086_v53 }
0x491c   :  { %5665 = vmatmul.msk.f32.vlgmr.msrb.gmra.mxu0 %vm186_vm0, %v8864_v54 }
0x4924   :  { %5668 = vmatmul.msk.f32.vlgmr.msra.gmra.mxu0 %vm234_vm3, %v8749_v4  ;;  %vm5423_vm3 = vcmask 386176  }
0x4966   :  { %v5432_v51 = vpop.permute.xlu2 %5431 }
0x4989   :  { %v5260_v59 = vpop.f32.mrf.mxu0 }
0x498a   :  { %v5263_v44 = vmul.f32 %v5260_v59, %v8721_v57 }
0x498c   :  { %5280 = vmatmul.f32.vlgmr.msra.gmra.mxu3 %v5263_v44 }
0x4991   :  { %v5308_v56 = vpop.f32.mrf.mxu0 }
0x4992   :  { %v5363_v3 = vmul.f32 %v5360_v26, %v5308_v56 }
0x4999   :  { %v5333_v62 = vpop.f32.mrf.mxu0 }
0x499a   :  { %v5336_v15 = vmul.f32 %v5333_v62, %v5308_v56 }
0x499c   :  { %v5337_v11 = vsub.f32 1.0, %v5336_v15 }
0x499e   :  { %v5338_v40 = vmul.f32 %v5337_v11, %v8721_v57  ;;  %v5437_v57 = vpop.permute.xlu2 %5436 }
0x49a0   :  { %v5364_v39 = vadd.f32 %v5363_v3, %v5338_v40 }
0x49a1   :  { %v5405_v8 = vpop.f32.mrf.mxu0 }
0x49a2   :  { %5441 = vst [vmem:[#allocation6] sm:$0x3] %v5364_v39 }
0x4a0f   :  { %v5281_v1 = vpop.f32.mrf.mxu3 }
0x4a10   :  { %5667 = vmatmul.msk.f32.vlgmr.msrb.gmra.mxu2 %vm186_vm0, %v5281_v1  ;;  %5416 = vrot.lane.b32.xlu1 %v5281_v1, %s6270_s8  ;;  %vm5413_vm0 = vcmask 517568  }
0x4a82   :  { %v5417_v46 = vpop.permute.xlu1 %5416 }
0x4a83   :  { %5419 = vst.msk [vmem:[#allocation4] sm:$0x3] %vm1513_vm4, %v5417_v46 }
0x4a84   :  { %5424 = vst.msk [vmem:[#allocation4] sm:$0x3] %vm5423_vm3, %v8867_v7 }
0x4a85   :  { %5430 = vst.msk [vmem:[#allocation4] sm:$0x3] %vm5429_vm10, %v5427_v9 }
0x4a86   :  { %5435 = vst.msk [vmem:[#allocation4] sm:$0x3] %vm5434_vm5, %v5432_v51 }
0x4a87   :  { %5440 = vst.msk [vmem:[#allocation4] sm:$0x3] %vm5439_vm8, %v5437_v57 }
0x4a88   :  { %5463 = dma.vmem_to_hbm [thread:$0]  %s5459_s2, 32, %s5461_s30, [#allocation5]  }
0x4a89   :  { %5474 = dma.vmem_to_hbm [thread:$0]  %s5470_s11, 32, %s5472_s6, [#allocation5]  }
0x4a93   :  { %v5385_v4 = vpop.f32.mrf.mxu2 }
0x4a94   :  { %v5406_v27 = vadd.f32 %v5405_v8, %v5385_v4 }
0x4a96   :  { %v5408_v49 = vadd.f32 %v8833_v17, %v5406_v27 }
0x4a98   :  { %5410 = vrot.lane.b32.xlu1 %v5408_v49, %s6276_s29 }
0x4b0a   :  { %v5411_v60 = vpop.permute.xlu1 %5410 }
0x4b0b   :  { %5414 = vst.msk [vmem:[#allocation2] sm:$0x3] %vm5413_vm0, %v5411_v60 }
0x4b0c   :  { %5452 = dma.vmem_to_hbm [thread:$0]  %s5448_s13, 32, %s5450_s14, [#allocation3]  }
0x4b0d   :  { %6245 = dma.done.wait [#allocation3], 32  }
0x4b0e   :  { %6246 = vsyncadd [#allocation3], 4294967264 }
0x4b0f   :  { %6247 = dma.done.wait [#allocation5], 64  }
0x4b10   :  { %6248 = vsyncadd [#allocation5], 4294967232 }
0x4b11   :  { %5487 = vsyncpa [#allocation3], 1 }
0x4b12   :  { %5488 = vsyncpa [#allocation5], 1 }

</bundles_post_ra>
